<compile_context>
chip_gen: v7x
topology: tpu7x:2x2x1
jax: 0.10.0
libtpu: 0.0.40
codegen_flags: <defaults>
</compile_context>

<pallas_src>
import numpy as np
import jax
import jax.numpy as jnp
from jax import lax
from jax.experimental import pallas as pl
from jax.experimental.pallas import tpu as pltpu

EPS = 1e-5


# --------------------------------- kernel -----------------------------------
def _make_kernel(H, W, Cin, Cout):
    HW = H * W
    rows = 2 * HW            # flattened upsampled rows (2H image rows x W cols)
    C4 = 4 * Cin             # slab segments: [odd_m1 | u_even | u_odd | even_p1]

    def kernel(x_ref, rhs_ref, scale_ref, shift_ref, skip_ref, o_ref, slab_ref):
        # x_ref    : (1, H*W, Cin)          flat channels-last input, one image
        # rhs_ref  : (3, 4*Cin, 2*Cout)     K/N-packed conv taps, bf16
        # scale_ref: (1, 2*Cout)            BN scale, duplicated per parity
        # shift_ref: (1, 2*Cout)            BN shift (conv bias folded in)
        # skip_ref : (1, 2H*W, 2*Cout)      skip, W-parity-packed channels-last
        # o_ref    : (1, 2H*W, 2*Cout)      output, same packed layout
        # slab_ref : ((2H+2)*W, 4*Cin) bf16 persistent zero-padded MXU LHS slab
        x = x_ref[0]                                            # (H*W, Cin) f32

        # ---------- bilinear 2x along H (align_corners=False): 2-tap lerp ----
        xp = jnp.concatenate([x[:W], x, x[HW - W:]], axis=0)    # edge-replicate
        a = xp[:HW]                      # image row y-1 (clamped at top)
        c = xp[2 * W:]                   # image row y+1 (clamped at bottom)
        r_even = 0.25 * a + 0.75 * x     # upsampled row 2y
        r_odd = 0.75 * x + 0.25 * c      # upsampled row 2y+1
        # Interleave even/odd rows (W % 16 == 0 -> whole-tile reshapes).
        uh = jnp.concatenate(
            [r_even.reshape(H, 1, W, Cin), r_odd.reshape(H, 1, W, Cin)],
            axis=1).reshape(rows, Cin)                          # (2H*W, Cin)

        # ---------- bilinear 2x along W + conv halo columns -------------------
        # (rows, 1) lane-broadcast boundary masks (no (rows, Cin) iota slab).
        col = lax.broadcasted_iota(jnp.int32, (rows, 1), 0) % W
        first_col = col == 0
        last_col = col == (W - 1)
        shl = jnp.concatenate([uh[:1], uh[:-1]], axis=0)        # uh[i-1]
        shr = jnp.concatenate([uh[1:], uh[-1:]], axis=0)        # uh[i+1]
        # Output columns 2j / 2j+1 (clamped lerps).
        u_even = 0.25 * jnp.where(first_col, uh, shl) + 0.75 * uh
        u_odd = 0.75 * uh + 0.25 * jnp.where(last_col, uh, shr)
        # Left/right conv-halo columns (zero outside the image), folded lerps
        # reusing shl/shr:  odd_m1[i] = u_odd[i-1],  even_p1[i] = u_even[i+1].
        odd_m1 = jnp.where(first_col, 0.0, 0.75 * shl + 0.25 * uh)
        even_p1 = jnp.where(last_col, 0.0, 0.25 * uh + 0.75 * shr)

        # ---------- pack sources into the zero-padded bf16 slab --------------
        # Rows: [W zero pad | 2H*W body | W zero pad]  (conv pad=1 along H).
        zpad = jnp.zeros((W, C4), jnp.bfloat16)
        slab_ref[pl.ds(0, W), :] = zpad
        slab_ref[pl.ds(W + rows, W), :] = zpad
        body = pl.ds(W, rows)
        slab_ref[body, pl.ds(0 * Cin, Cin)] = odd_m1.astype(jnp.bfloat16)
        slab_ref[body, pl.ds(1 * Cin, Cin)] = u_even.astype(jnp.bfloat16)
        slab_ref[body, pl.ds(2 * Cin, Cin)] = u_odd.astype(jnp.bfloat16)
        slab_ref[body, pl.ds(3 * Cin, Cin)] = even_p1.astype(jnp.bfloat16)

        # ---------- conv: 3 MXU matmuls (2H*W, 4*Cin) @ (4*Cin, 2*Cout) ------
        # Each LHS is a 16-aligned contiguous row slice (dy*W) of the slab;
        # chained sum of dots so the accumulation can stay in the MXU result
        # buffer on v7x.
        acc = (jnp.dot(slab_ref[pl.ds(0 * W, rows), :], rhs_ref[0],
                       preferred_element_type=jnp.float32)
               + jnp.dot(slab_ref[pl.ds(1 * W, rows), :], rhs_ref[1],
                         preferred_element_type=jnp.float32)
               + jnp.dot(slab_ref[pl.ds(2 * W, rows), :], rhs_ref[2],
                         preferred_element_type=jnp.float32))

        # ---------- BN (folded) + ReLU + skip add ----------------------------
        o = acc * scale_ref[...] + shift_ref[...]
        o = jnp.maximum(o, 0.0) + skip_ref[0]
        o_ref[0] = o.astype(o_ref.dtype)

    return kernel


# --------------------------------- wrapper ----------------------------------
def my_upsample2x(layer_input, skip_input, params):
    N, Cin, H, W = layer_input.shape
    Cout = params["w"].shape[0]
    H2, W2 = 2 * H, 2 * W
    HW = H * W
    rows = H2 * W
    # bf16 slab rows pack 16 per vreg; dy*W slice offsets must stay aligned.
    assert W % 16 == 0, "kernel assumes W is a multiple of 16"
    # (Cin/Cout multiples of 128 keep every slab segment lane-aligned; the
    #  test below uses 128/128.)

    # ---- conv taps packed host-side into the 3 K/N-packed RHS panels --------
    # Slab channel segments: [odd_m1 | u_even | u_odd | even_p1]
    # Output column blocks : [parity 0 (cols 2j) | parity 1 (cols 2j+1)]
    #   parity 0 taps: odd_m1*w[dy,0] + u_even*w[dy,1] + u_odd *w[dy,2]
    #   parity 1 taps: u_even*w[dy,0] + u_odd *w[dy,1] + even_p1*w[dy,2]
    wt = jnp.transpose(jnp.asarray(params["w"], jnp.float32),
                       (2, 3, 1, 0))                     # (3, 3, Cin, Cout)
    rhs = jnp.zeros((3, 4 * Cin, 2 * Cout), jnp.float32)
    rhs = rhs.at[:, 0 * Cin:1 * Cin, :Cout].set(wt[:, 0])
    rhs = rhs.at[:, 1 * Cin:2 * Cin, :Cout].set(wt[:, 1])
    rhs = rhs.at[:, 2 * Cin:3 * Cin, :Cout].set(wt[:, 2])
    rhs = rhs.at[:, 1 * Cin:2 * Cin, Cout:].set(wt[:, 0])
    rhs = rhs.at[:, 2 * Cin:3 * Cin, Cout:].set(wt[:, 1])
    rhs = rhs.at[:, 3 * Cin:4 * Cin, Cout:].set(wt[:, 2])
    rhs = rhs.astype(jnp.bfloat16)

    # Inference-mode BN folded to scale/shift; conv bias folded into shift.
    inv_std = params["gamma"] / jnp.sqrt(params["var"] + EPS)
    scale = jnp.asarray(inv_std, jnp.float32)
    shift = jnp.asarray(params["beta"]
                        + (params["b"] - params["mean"]) * inv_std, jnp.float32)
    scale2 = jnp.tile(scale, 2)[None, :]                 # (1, 2*Cout)
    shift2 = jnp.tile(shift, 2)[None, :]

    # ---- layout plumbing (wrapper-side only) --------------------------------
    # NCHW -> channels-last flat input slabs.
    x_flat = jnp.transpose(layer_input, (0, 2, 3, 1)).reshape(N, HW, Cin)
    # Skip: NCHW -> NHWC -> (N, 2H*W, 2*Cout) W-parity-packed channels.
    skip_pk = (jnp.transpose(skip_input, (0, 2, 3, 1))
               .reshape(N, H2, W, 2, Cout)
               .reshape(N, rows, 2 * Cout))

    kernel = _make_kernel(H, W, Cin, Cout)
    out_pk = pl.pallas_call(
        kernel,
        out_shape=jax.ShapeDtypeStruct((N, rows, 2 * Cout), jnp.float32),
        grid=(N,),
        in_specs=[
            pl.BlockSpec((1, HW, Cin), lambda b: (b, 0, 0)),
            pl.BlockSpec((3, 4 * Cin, 2 * Cout), lambda b: (0, 0, 0)),
            pl.BlockSpec((1, 2 * Cout), lambda b: (0, 0)),
            pl.BlockSpec((1, 2 * Cout), lambda b: (0, 0)),
            pl.BlockSpec((1, rows, 2 * Cout), lambda b: (b, 0, 0)),
        ],
        out_specs=pl.BlockSpec((1, rows, 2 * Cout), lambda b: (b, 0, 0)),
        scratch_shapes=[pltpu.VMEM((rows + 2 * W, 4 * Cin), jnp.bfloat16)],
        compiler_params=pltpu.CompilerParams(
            # batch iterations are independent -> megacore sharding on v7x
            dimension_semantics=("parallel",)),
    )(x_flat, rhs, scale2, shift2, skip_pk)

    # Packed parity channels -> NHWC -> NCHW (layout plumbing only).
    out = (out_pk.reshape(N, H2, W, 2, Cout)
           .reshape(N, H2, W2, Cout))
    return jnp.transpose(out, (0, 3, 1, 2))


# ---------------------------- pure-JAX reference ----------------------------
def _upsample_src(n):
    r = np.arange(2 * n)
    src = np.maximum((r + 0.5) * 0.5 - 0.5, 0.0)
    i0 = np.minimum(np.floor(src).astype(np.int64), n - 1)
    i1 = np.minimum(i0 + 1, n - 1)
    lam = (src - i0).astype(np.float32)
    return i0, i1, lam


def _upsample2x_ref(x):  # NCHW, PyTorch bilinear align_corners=False
    _, _, H, W = x.shape
    i0h, i1h, lh = _upsample_src(H)
    i0w, i1w, lw = _upsample_src(W)
    lh = jnp.asarray(lh)[None, None, :, None]
    lw = jnp.asarray(lw)[None, None, None, :]
    xh = x[:, :, i0h, :] * (1.0 - lh) + x[:, :, i1h, :] * lh
    xw = xh[:, :, :, i0w] * (1.0 - lw) + xh[:, :, :, i1w] * lw
    return xw


def ref_forward(layer_input, skip_input, params):
    u = _upsample2x_ref(layer_input)
    conv = lax.conv_general_dilated(
        u, params["w"], window_strides=(1, 1), padding=((1, 1), (1, 1)),
        dimension_numbers=("NCHW", "OIHW", "NCHW"))
    conv = conv + params["b"][None, :, None, None]
    inv_std = params["gamma"] / jnp.sqrt(params["var"] + EPS)
    bn = ((conv - params["mean"][None, :, None, None])
          * inv_std[None, :, None, None] + params["beta"][None, :, None, None])
    return jnp.maximum(bn, 0.0) + skip_input


# ------------------------------------ main -----------------------------------
if __name__ == "__main__":
    key = jax.random.PRNGKey(0)
    k1, k2, k3, k4, k5, k6, k7, k8 = jax.random.split(key, 8)
    # lane-dense channels (multiple of 128), W multiple of 16
    N, Cin, Cout, H, W = 2, 128, 128, 16, 16

    layer_input = jax.random.normal(k1, (N, Cin, H, W), jnp.float32)
    skip_input = jax.random.normal(k2, (N, Cout, 2 * H, 2 * W), jnp.float32)
    params = {
        "w": jax.random.normal(k3, (Cout, Cin, 3, 3), jnp.float32) * 0.2,
        "b": jax.random.normal(k4, (Cout,), jnp.float32) * 0.1,
        "gamma": 1.0 + 0.1 * jax.random.normal(k5, (Cout,), jnp.float32),
        "beta": 0.1 * jax.random.normal(k6, (Cout,), jnp.float32),
        "mean": 0.1 * jax.random.normal(k7, (Cout,), jnp.float32),
        "var": jnp.abs(jax.random.normal(k8, (Cout,), jnp.float32)) * 0.5 + 0.5,
    }

    out = jax.block_until_ready(my_upsample2x(layer_input, skip_input, params))
    ref = ref_forward(layer_input, skip_input, params)

    assert out.shape == (N, Cout, 2 * H, 2 * W)
    err = float(jnp.max(jnp.abs(out - ref)))
    rel = err / (float(jnp.max(jnp.abs(ref))) + 1e-6)
    # bf16 MXU operands (f32 accumulation) -> bf16-appropriate rel tolerance.
    assert rel < 2e-2, f"max abs err {err} (rel {rel})"
    print("KERNEL_OK")
</pallas_src>

<mosaic_0001>
module attributes {stable_mosaic.version = 11 : i64} {
  func.func @kernel(%arg0: i32, %arg1: memref<1x256x128xf32, #tpu.memory_space<vmem>>, %arg2: memref<3x512x256xbf16, #tpu.memory_space<vmem>>, %arg3: memref<1x256xf32, #tpu.memory_space<vmem>>, %arg4: memref<1x256xf32, #tpu.memory_space<vmem>>, %arg5: memref<1x512x256xf32, #tpu.memory_space<vmem>>, %arg6: memref<1x512x256xf32, #tpu.memory_space<vmem>>, %arg7: memref<544x512xbf16, #tpu.memory_space<vmem>>) attributes {dimension_semantics = [#tpu.dimension_semantics<parallel>], iteration_bounds = array<i64: 2>, scalar_prefetch = 0 : i64, scratch_operands = 1 : i64, tpu.core_type = #tpu.core_type<tc>, window_params = [{transform_indices = @transform_0, window_bounds = array<i64: 1, 256, 128>}, {pipeline_mode = #tpu.pipeline_mode<synchronous>, transform_indices = @transform_1, window_bounds = array<i64: 3, 512, 256>}, {pipeline_mode = #tpu.pipeline_mode<synchronous>, transform_indices = @transform_2, window_bounds = array<i64: 1, 256>}, {pipeline_mode = #tpu.pipeline_mode<synchronous>, transform_indices = @transform_3, window_bounds = array<i64: 1, 256>}, {transform_indices = @transform_4, window_bounds = array<i64: 1, 512, 256>}, {transform_indices = @transform_5, window_bounds = array<i64: 1, 512, 256>}]} {
    %c0 = arith.constant 0 : index
    %c0_0 = arith.constant 0 : index
    %c0_1 = arith.constant 0 : index
    %0 = vector.load %arg1[%c0, %c0_0, %c0_1] : memref<1x256x128xf32, #tpu.memory_space<vmem>>, vector<1x256x128xf32>
    %1 = vector.shape_cast %0 : vector<1x256x128xf32> to vector<256x128xf32>
    %2 = vector.extract_strided_slice %1 {offsets = [0, 0], sizes = [16, 128], strides = [1, 1]} : vector<256x128xf32> to vector<16x128xf32>
    %3 = vector.extract_strided_slice %1 {offsets = [240, 0], sizes = [16, 128], strides = [1, 1]} : vector<256x128xf32> to vector<16x128xf32>
    %4 = tpu.concatenate %2, %1, %3 in 0 : vector<16x128xf32>, vector<256x128xf32>, vector<16x128xf32> -> vector<288x128xf32>
    %5 = vector.extract_strided_slice %4 {offsets = [0, 0], sizes = [256, 128], strides = [1, 1]} : vector<288x128xf32> to vector<256x128xf32>
    %6 = vector.extract_strided_slice %4 {offsets = [32, 0], sizes = [256, 128], strides = [1, 1]} : vector<288x128xf32> to vector<256x128xf32>
    %cst = arith.constant 2.500000e-01 : f32
    %7 = vector.broadcast %cst : f32 to vector<256x128xf32>
    %8 = arith.mulf %7, %5 : vector<256x128xf32>
    %cst_2 = arith.constant 7.500000e-01 : f32
    %9 = vector.broadcast %cst_2 : f32 to vector<256x128xf32>
    %10 = arith.mulf %9, %1 : vector<256x128xf32>
    %11 = arith.addf %8, %10 : vector<256x128xf32>
    %cst_3 = arith.constant 7.500000e-01 : f32
    %12 = vector.broadcast %cst_3 : f32 to vector<256x128xf32>
    %13 = arith.mulf %12, %1 : vector<256x128xf32>
    %cst_4 = arith.constant 2.500000e-01 : f32
    %14 = vector.broadcast %cst_4 : f32 to vector<256x128xf32>
    %15 = arith.mulf %14, %6 : vector<256x128xf32>
    %16 = arith.addf %13, %15 : vector<256x128xf32>
    %17 = vector.shape_cast %11 : vector<256x128xf32> to vector<16x1x16x128xf32>
    %18 = vector.shape_cast %16 : vector<256x128xf32> to vector<16x1x16x128xf32>
    %19 = tpu.concatenate %17, %18 in 1 : vector<16x1x16x128xf32>, vector<16x1x16x128xf32> -> vector<16x2x16x128xf32>
    %20 = vector.shape_cast %19 : vector<16x2x16x128xf32> to vector<512x128xf32>
    %21 = tpu.iota {dimensions = array<i32: 0>} : vector<512x1xi32>
    %c16_i32 = arith.constant 16 : i32
    %c0_i32 = arith.constant 0 : i32
    %22 = arith.cmpi eq, %c16_i32, %c0_i32 : i32
    %c1_i32 = arith.constant 1 : i32
    %23 = arith.select %22, %c1_i32, %c16_i32 : i32
    %24 = vector.broadcast %23 : i32 to vector<512x1xi32>
    %25 = arith.remsi %21, %24 : vector<512x1xi32>
    %c0_i32_5 = arith.constant 0 : i32
    %26 = vector.broadcast %c0_i32_5 : i32 to vector<512x1xi32>
    %27 = arith.cmpi ne, %25, %26 : vector<512x1xi32>
    %c0_i32_6 = arith.constant 0 : i32
    %28 = vector.broadcast %c0_i32_6 : i32 to vector<512x1xi32>
    %29 = arith.cmpi slt, %25, %28 : vector<512x1xi32>
    %c0_i32_7 = arith.constant 0 : i32
    %30 = arith.cmpi slt, %23, %c0_i32_7 : i32
    %31 = vector.broadcast %30 : i1 to vector<512x1xi1>
    %32 = vector.broadcast %31 : vector<512x1xi1> to vector<512x1xi1>
    %33 = arith.xori %29, %32 : vector<512x1xi1>
    %34 = arith.andi %33, %27 : vector<512x1xi1>
    %35 = vector.broadcast %23 : i32 to vector<512x1xi32>
    %36 = arith.addi %25, %35 : vector<512x1xi32>
    %37 = arith.select %34, %36, %25 : vector<512x1xi1>, vector<512x1xi32>
    %c0_i32_8 = arith.constant 0 : i32
    %38 = vector.broadcast %c0_i32_8 : i32 to vector<512x1xi32>
    %39 = arith.cmpi eq, %37, %38 : vector<512x1xi32>
    %c15_i32 = arith.constant 15 : i32
    %40 = vector.broadcast %c15_i32 : i32 to vector<512x1xi32>
    %41 = arith.cmpi eq, %37, %40 : vector<512x1xi32>
    %42 = vector.extract_strided_slice %20 {offsets = [0, 0], sizes = [1, 128], strides = [1, 1]} : vector<512x128xf32> to vector<1x128xf32>
    %43 = vector.extract_strided_slice %20 {offsets = [0, 0], sizes = [511, 128], strides = [1, 1]} : vector<512x128xf32> to vector<511x128xf32>
    %44 = tpu.concatenate %42, %43 in 0 : vector<1x128xf32>, vector<511x128xf32> -> vector<512x128xf32>
    %45 = vector.extract_strided_slice %20 {offsets = [1, 0], sizes = [511, 128], strides = [1, 1]} : vector<512x128xf32> to vector<511x128xf32>
    %46 = vector.extract_strided_slice %20 {offsets = [511, 0], sizes = [1, 128], strides = [1, 1]} : vector<512x128xf32> to vector<1x128xf32>
    %47 = tpu.concatenate %45, %46 in 0 : vector<511x128xf32>, vector<1x128xf32> -> vector<512x128xf32>
    %48 = vector.shape_cast %39 : vector<512x1xi1> to vector<512x1xi1>
    %49 = vector.broadcast %48 : vector<512x1xi1> to vector<512x128xi1>
    %50 = arith.select %49, %20, %44 : vector<512x128xi1>, vector<512x128xf32>
    %cst_9 = arith.constant 2.500000e-01 : f32
    %51 = vector.broadcast %cst_9 : f32 to vector<512x128xf32>
    %52 = arith.mulf %51, %50 : vector<512x128xf32>
    %cst_10 = arith.constant 7.500000e-01 : f32
    %53 = vector.broadcast %cst_10 : f32 to vector<512x128xf32>
    %54 = arith.mulf %53, %20 : vector<512x128xf32>
    %55 = arith.addf %52, %54 : vector<512x128xf32>
    %cst_11 = arith.constant 7.500000e-01 : f32
    %56 = vector.broadcast %cst_11 : f32 to vector<512x128xf32>
    %57 = arith.mulf %56, %20 : vector<512x128xf32>
    %58 = vector.shape_cast %41 : vector<512x1xi1> to vector<512x1xi1>
    %59 = vector.broadcast %58 : vector<512x1xi1> to vector<512x128xi1>
    %60 = arith.select %59, %20, %47 : vector<512x128xi1>, vector<512x128xf32>
    %cst_12 = arith.constant 2.500000e-01 : f32
    %61 = vector.broadcast %cst_12 : f32 to vector<512x128xf32>
    %62 = arith.mulf %61, %60 : vector<512x128xf32>
    %63 = arith.addf %57, %62 : vector<512x128xf32>
    %cst_13 = arith.constant 7.500000e-01 : f32
    %64 = vector.broadcast %cst_13 : f32 to vector<512x128xf32>
    %65 = arith.mulf %64, %44 : vector<512x128xf32>
    %cst_14 = arith.constant 2.500000e-01 : f32
    %66 = vector.broadcast %cst_14 : f32 to vector<512x128xf32>
    %67 = arith.mulf %66, %20 : vector<512x128xf32>
    %68 = arith.addf %65, %67 : vector<512x128xf32>
    %cst_15 = arith.constant 0.000000e+00 : f32
    %69 = vector.shape_cast %39 : vector<512x1xi1> to vector<512x1xi1>
    %70 = vector.broadcast %69 : vector<512x1xi1> to vector<512x128xi1>
    %71 = vector.broadcast %cst_15 : f32 to vector<512x128xf32>
    %72 = arith.select %70, %71, %68 : vector<512x128xi1>, vector<512x128xf32>
    %cst_16 = arith.constant 2.500000e-01 : f32
    %73 = vector.broadcast %cst_16 : f32 to vector<512x128xf32>
    %74 = arith.mulf %73, %20 : vector<512x128xf32>
    %cst_17 = arith.constant 7.500000e-01 : f32
    %75 = vector.broadcast %cst_17 : f32 to vector<512x128xf32>
    %76 = arith.mulf %75, %47 : vector<512x128xf32>
    %77 = arith.addf %74, %76 : vector<512x128xf32>
    %cst_18 = arith.constant 0.000000e+00 : f32
    %78 = vector.shape_cast %41 : vector<512x1xi1> to vector<512x1xi1>
    %79 = vector.broadcast %78 : vector<512x1xi1> to vector<512x128xi1>
    %80 = vector.broadcast %cst_18 : f32 to vector<512x128xf32>
    %81 = arith.select %79, %80, %77 : vector<512x128xi1>, vector<512x128xf32>
    %cst_19 = arith.constant 0.000000e+00 : bf16
    %82 = vector.broadcast %cst_19 : bf16 to vector<16x512xbf16>
    %c0_20 = arith.constant 0 : index
    %c0_21 = arith.constant 0 : index
    %83 = vector.load %arg7[%c0_20, %c0_21] : memref<544x512xbf16, #tpu.memory_space<vmem>>, vector<16x512xbf16>
    tpu.vector_store %arg7[%c0_20, %c0_21], %82 {strides = array<i32>} : memref<544x512xbf16, #tpu.memory_space<vmem>>, vector<16x512xbf16>,
    %c528 = arith.constant 528 : index
    %c0_22 = arith.constant 0 : index
    %84 = vector.load %arg7[%c528, %c0_22] : memref<544x512xbf16, #tpu.memory_space<vmem>>, vector<16x512xbf16>
    tpu.vector_store %arg7[%c528, %c0_22], %82 {strides = array<i32>} : memref<544x512xbf16, #tpu.memory_space<vmem>>, vector<16x512xbf16>,
    %85 = arith.truncf %72 : vector<512x128xf32> to vector<512x128xbf16>
    %c16 = arith.constant 16 : index
    %c0_23 = arith.constant 0 : index
    %86 = vector.load %arg7[%c16, %c0_23] : memref<544x512xbf16, #tpu.memory_space<vmem>>, vector<512x128xbf16>
    tpu.vector_store %arg7[%c16, %c0_23], %85 {strides = array<i32>} : memref<544x512xbf16, #tpu.memory_space<vmem>>, vector<512x128xbf16>,
    %87 = arith.truncf %55 : vector<512x128xf32> to vector<512x128xbf16>
    %c16_24 = arith.constant 16 : index
    %c128 = arith.constant 128 : index
    %88 = vector.load %arg7[%c16_24, %c128] : memref<544x512xbf16, #tpu.memory_space<vmem>>, vector<512x128xbf16>
    tpu.vector_store %arg7[%c16_24, %c128], %87 {strides = array<i32>} : memref<544x512xbf16, #tpu.memory_space<vmem>>, vector<512x128xbf16>,
    %89 = arith.truncf %63 : vector<512x128xf32> to vector<512x128xbf16>
    %c16_25 = arith.constant 16 : index
    %c256 = arith.constant 256 : index
    %90 = vector.load %arg7[%c16_25, %c256] : memref<544x512xbf16, #tpu.memory_space<vmem>>, vector<512x128xbf16>
    tpu.vector_store %arg7[%c16_25, %c256], %89 {strides = array<i32>} : memref<544x512xbf16, #tpu.memory_space<vmem>>, vector<512x128xbf16>,
    %91 = arith.truncf %81 : vector<512x128xf32> to vector<512x128xbf16>
    %c16_26 = arith.constant 16 : index
    %c384 = arith.constant 384 : index
    %92 = vector.load %arg7[%c16_26, %c384] : memref<544x512xbf16, #tpu.memory_space<vmem>>, vector<512x128xbf16>
    tpu.vector_store %arg7[%c16_26, %c384], %91 {strides = array<i32>} : memref<544x512xbf16, #tpu.memory_space<vmem>>, vector<512x128xbf16>,
    %c0_27 = arith.constant 0 : index
    %c0_28 = arith.constant 0 : index
    %93 = vector.load %arg7[%c0_27, %c0_28] : memref<544x512xbf16, #tpu.memory_space<vmem>>, vector<512x512xbf16>
    %c0_29 = arith.constant 0 : index
    %c0_30 = arith.constant 0 : index
    %c0_31 = arith.constant 0 : index
    %94 = vector.load %arg2[%c0_29, %c0_30, %c0_31] : memref<3x512x256xbf16, #tpu.memory_space<vmem>>, vector<1x512x256xbf16>
    %95 = vector.shape_cast %94 : vector<1x512x256xbf16> to vector<512x256xbf16>
    %cst_32 = arith.constant dense<0.000000e+00> : vector<512x256xf32>
    %96 = tpu.matmul %93, %95, %cst_32 {dimension_numbers = #tpu.dot_dimension_numbers<[1], [0], [0], [1], [0, 0, 1, 1], [], []>} : vector<512x512xbf16>, vector<512x256xbf16>, vector<512x256xf32> -> vector<512x256xf32>
    %c16_33 = arith.constant 16 : index
    %c0_34 = arith.constant 0 : index
    %97 = vector.load %arg7[%c16_33, %c0_34] : memref<544x512xbf16, #tpu.memory_space<vmem>>, vector<512x512xbf16>
    %c1 = arith.constant 1 : index
    %c0_35 = arith.constant 0 : index
    %c0_36 = arith.constant 0 : index
    %98 = vector.load %arg2[%c1, %c0_35, %c0_36] : memref<3x512x256xbf16, #tpu.memory_space<vmem>>, vector<1x512x256xbf16>
    %99 = vector.shape_cast %98 : vector<1x512x256xbf16> to vector<512x256xbf16>
    %cst_37 = arith.constant dense<0.000000e+00> : vector<512x256xf32>
    %100 = tpu.matmul %97, %99, %cst_37 {dimension_numbers = #tpu.dot_dimension_numbers<[1], [0], [0], [1], [0, 0, 1, 1], [], []>} : vector<512x512xbf16>, vector<512x256xbf16>, vector<512x256xf32> -> vector<512x256xf32>
    %101 = arith.addf %96, %100 : vector<512x256xf32>
    %c32 = arith.constant 32 : index
    %c0_38 = arith.constant 0 : index
    %102 = vector.load %arg7[%c32, %c0_38] : memref<544x512xbf16, #tpu.memory_space<vmem>>, vector<512x512xbf16>
    %c2 = arith.constant 2 : index
    %c0_39 = arith.constant 0 : index
    %c0_40 = arith.constant 0 : index
    %103 = vector.load %arg2[%c2, %c0_39, %c0_40] : memref<3x512x256xbf16, #tpu.memory_space<vmem>>, vector<1x512x256xbf16>
    %104 = vector.shape_cast %103 : vector<1x512x256xbf16> to vector<512x256xbf16>
    %cst_41 = arith.constant dense<0.000000e+00> : vector<512x256xf32>
    %105 = tpu.matmul %102, %104, %cst_41 {dimension_numbers = #tpu.dot_dimension_numbers<[1], [0], [0], [1], [0, 0, 1, 1], [], []>} : vector<512x512xbf16>, vector<512x256xbf16>, vector<512x256xf32> -> vector<512x256xf32>
    %106 = arith.addf %101, %105 : vector<512x256xf32>
    %c0_42 = arith.constant 0 : index
    %c0_43 = arith.constant 0 : index
    %107 = vector.load %arg3[%c0_42, %c0_43] : memref<1x256xf32, #tpu.memory_space<vmem>>, vector<1x256xf32>
    %108 = vector.broadcast %107 : vector<1x256xf32> to vector<512x256xf32>
    %109 = arith.mulf %106, %108 : vector<512x256xf32>
    %c0_44 = arith.constant 0 : index
    %c0_45 = arith.constant 0 : index
    %110 = vector.load %arg4[%c0_44, %c0_45] : memref<1x256xf32, #tpu.memory_space<vmem>>, vector<1x256xf32>
    %111 = vector.broadcast %110 : vector<1x256xf32> to vector<512x256xf32>
    %112 = arith.addf %109, %111 : vector<512x256xf32>
    %cst_46 = arith.constant 0.000000e+00 : f32
    %113 = vector.broadcast %cst_46 : f32 to vector<512x256xf32>
    %114 = arith.maximumf %112, %113 : vector<512x256xf32>
    %c0_47 = arith.constant 0 : index
    %c0_48 = arith.constant 0 : index
    %c0_49 = arith.constant 0 : index
    %115 = vector.load %arg5[%c0_47, %c0_48, %c0_49] : memref<1x512x256xf32, #tpu.memory_space<vmem>>, vector<1x512x256xf32>
    %116 = vector.shape_cast %115 : vector<1x512x256xf32> to vector<512x256xf32>
    %117 = arith.addf %114, %116 : vector<512x256xf32>
    %c0_50 = arith.constant 0 : index
    %c0_51 = arith.constant 0 : index
    %c0_52 = arith.constant 0 : index
    %118 = vector.load %arg6[%c0_50, %c0_51, %c0_52] : memref<1x512x256xf32, #tpu.memory_space<vmem>>, vector<1x512x256xf32>
    %119 = vector.shape_cast %118 : vector<1x512x256xf32> to vector<512x256xf32>
    %120 = vector.shape_cast %117 : vector<512x256xf32> to vector<1x512x256xf32>
    tpu.vector_store %arg6[%c0_50, %c0_51, %c0_52], %120 {strides = array<i32>} : memref<1x512x256xf32, #tpu.memory_space<vmem>>, vector<1x512x256xf32>,
    return
  }
  func.func @transform_0(%arg0: i32) -> (i32, i32, i32) {
    %c0_i32 = arith.constant 0 : i32
    %c0_i32_0 = arith.constant 0 : i32
    %c0_i32_1 = arith.constant 0 : i32
    return %arg0, %c0_i32, %c0_i32_0 : i32, i32, i32
  }
  func.func @transform_1(%arg0: i32) -> (i32, i32, i32) {
    %c0_i32 = arith.constant 0 : i32
    %c0_i32_0 = arith.constant 0 : i32
    %c0_i32_1 = arith.constant 0 : i32
    %c0_i32_2 = arith.constant 0 : i32
    return %c0_i32, %c0_i32_0, %c0_i32_1 : i32, i32, i32
  }
  func.func @transform_2(%arg0: i32) -> (i32, i32) {
    %c0_i32 = arith.constant 0 : i32
    %c0_i32_0 = arith.constant 0 : i32
    %c0_i32_1 = arith.constant 0 : i32
    return %c0_i32, %c0_i32_0 : i32, i32
  }
  func.func @transform_3(%arg0: i32) -> (i32, i32) {
    %c0_i32 = arith.constant 0 : i32
    %c0_i32_0 = arith.constant 0 : i32
    %c0_i32_1 = arith.constant 0 : i32
    return %c0_i32, %c0_i32_0 : i32, i32
  }
  func.func @transform_4(%arg0: i32) -> (i32, i32, i32) {
    %c0_i32 = arith.constant 0 : i32
    %c0_i32_0 = arith.constant 0 : i32
    %c0_i32_1 = arith.constant 0 : i32
    return %arg0, %c0_i32, %c0_i32_0 : i32, i32, i32
  }
  func.func @transform_5(%arg0: i32) -> (i32, i32, i32) {
    %c0_i32 = arith.constant 0 : i32
    %c0_i32_0 = arith.constant 0 : i32
    %c0_i32_1 = arith.constant 0 : i32
    return %arg0, %c0_i32, %c0_i32_0 : i32, i32, i32
  }
}

</mosaic_0001>

<bundles_post_ra>
// kernel: tpu_custom_call.1
= control target key start
LH: loop header
LB: loop body
LE: loop exit
PB: predicated region body
PF: predicated region fallthrough
CT: control target
= control target key end

     0   :  { %s14267_s0 = inlined_call_operand.hbm [shape: f32[2,256,128], index: 0, kind: input, shape index: {}]   ;;  %s14268_s1 = inlined_call_operand.hbm [shape: bf16[3,512,256], index: 1, kind: input, shape index: {}]   ;;  %s14269_s2 = inlined_call_operand.vmem [shape: f32[1,256], index: 2, kind: input, shape index: {}]   ;;  %s14270_s3 = inlined_call_operand.vmem [shape: f32[1,256], index: 3, kind: input, shape index: {}]   ;;  %s14271_s4 = inlined_call_operand.hbm [shape: f32[2,512,256], index: 4, kind: input, shape index: {}]   ;;  %s14272_s5 = inlined_call_operand.hbm [shape: f32[2,512,256], index: 5, kind: output, shape index: {}]  }
   0x1   :  { %14721 = sst [smem:[#allocation177_spill]] %s14267_s0 }
   0x2   :  { %14722 = sst [smem:[#allocation178_spill]] %s14271_s4 }
   0x3   :  { %10 = vsyncpa [#allocation4], 0 }
   0x4   :  { %12 = vsyncpa [#allocation4 + $0x1], 0 }
   0x5   :  { %13 = vsyncpa [#allocation7], 0 }
   0x6   :  { %14 = vsyncpa [#allocation5], 0 }
   0x7   :  { %16 = vsyncpa [#allocation5 + $0x1], 0  ;;  %s10023_s18 = smov 0   ;;  %s10025_s19 = smov 0  }
   0x8   :  { %s10027_s20 = smov 0   ;;  %s10029_s21 = smov 0  }
   0x9 LB: > { %s10044_s22 = sadd.s32 1, %s9979_s21   ;;  %s29_s23 = sadd.s32 1, %s9975_s20  ;;  %s9979_s21 = sphi %s10029_s21, %s15693_s21   ;;  %s9975_s20 = sphi %s10027_s20, %s15692_s20   ;;  %s9971_s19 = sphi %s10025_s19, %s15691_s19   ;;  %s9967_s18 = sphi %s10023_s18, %s15690_s18  }
   0xa   : > { %s26_s24 = ssub.s32 %s9979_s21, %s10044_s22  ;;  %p36_p0 = scmp.ne.s32.totalorder %s9975_s20, %s9971_s19 }
   0xb   : > { %p27_p1 = scmp.eq.s32.totalorder %s26_s24, 0  ;;  %p37_p2 = scmp.eq.s32.totalorder %s9979_s21, 0 }
   0xc   : > { %p9485_p5 = scmp.lt.s32.totalorder %s9979_s21, 2  ;;  %s200_s26 = sand.u32 1, %s9979_s21  }
   0xd   : > { %s10053_s25 = scalar_select %p27_p1, %s9975_s20, %s29_s23  }
   0xe   : > { %p38_p3 = por %p37_p2, %p36_p0  ;;  %s202_s27 = sand.u32 1, %s9975_s20  }
   0xf   : > { %s7856_s28 = sshll.u32 %s202_s27, 8  ;;  %s8064_s29 = sshll.u32 %s9979_s21, 12 }
  0x10   : > { %s14723_s0 = sld [smem:[#allocation177_spill]]  ;;  %s204_s8 = scalar_lea.vmem [#allocation3], %s7856_s28 }
  0x11   : > { %s211_s9 = sshll.u32 %s204_s8, 4  ;;  %p10068_p6 = pnand %p9485_p5, %p38_p3  ;;  %s10072_s9 = int_to_ptr.vmem [resolvable:$true] %s211_s9 }
  0x12   : > { %s10074_s11 = sshll.u32 %s202_s27, 10  ;;  %s10076_s12 = scalar_lea.sflag [#allocation4], %s200_s26 }
  0x13   : > { %p9819_p8 = pneg %p10068_p6 }
  0x16   : > { %s10066_s7 = scalar_lea.hbm %s14723_s0, %s8064_s29  ;;  %s9822_s16 = scalar_lea.hbm %s14723_s0, 8192 }
  0x17   : > { %s9817_s13 = scalar_lea.hbm %s10066_s7, 4096  ;;  %p9823_p11 = scmp.lt.u32.totalorder %s10066_s7, %s14723_s0 }
  0x18   : > { %p9818_p7 = scmp.ne.s32.totalorder %s10066_s7, %s9817_s13  ;;  %p9824_p12 = scmp.lt.u32.totalorder %s9822_s16, %s9817_s13 }
  0x19   : > { %p9826_p1 = scmp.lt.u32.totalorder %s9817_s13, %s10066_s7 }
  0x1a   : > { %p9820_p9 = pnand %p9819_p8, %p9818_p7  ;;  %p9825_p13 = por %p9824_p12, %p9823_p11 }
  0x1c   : > { %p9821_p10 = pneg %p9820_p9  ;;  %p9827_p2 = por %p9826_p1, %p9825_p13 }
  0x1e   : > { %p9828_p3 = pnand %p9827_p2, %p9821_p10 }
  0x20   : > { %9831 = shalt.err (!%p9828_p3)
}
  0x21   : > { %s9832_s24 = scalar_lea.vmem %s10072_s9, 4096  ;;  %s9981_s26 = smov [#allocation3]  }
  0x22   : > { %p9833_p5 = scmp.ne.s32.totalorder %s10072_s9, %s9832_s24  ;;  %s9837_s27 = sshll.u32 %s9981_s26, 4  ;;  %s9838_s27 = int_to_ptr.vmem [resolvable:$false] %s9837_s27 }
  0x23   : > { %s9839_s28 = scalar_lea.vmem %s9838_s27, 8192  ;;  %p9840_p4 = scmp.lt.s32.totalorder %s10072_s9, %s9838_s27 }
  0x24   : > { %p9835_p7 = pnand %p9833_p5, %p9819_p8  ;;  %p9841_p11 = scmp.lt.s32.totalorder %s9839_s28, %s9832_s24 }
  0x26   : > { %p9836_p9 = pneg %p9835_p7  ;;  %p9842_p12 = por %p9841_p11, %p9840_p4 }
  0x28   : > { %p9843_p13 = pnand %p9842_p12, %p9836_p9 }
  0x2a   : > { %9846 = shalt.err (!%p9843_p13)
}
  0x2b   : > { %s14275_s29 = smov 128   ;;  %s14278_s30 = smov 8  }
  0x2c   : > { %9476 = dma.hbm_to_vmem [thread:$0]  (!%p10068_p6), %s10066_s7, 4096, %s10072_s9, %s10076_s12, %s14275_s29, %s14275_s29, %s14278_s30  }
  0x2d   : > { %s225_s6 = scalar_lea.vmem [#allocation8], %s10074_s11  ;;  %s10109_s13 = sadd.s32 4294967295, %s9979_s21  }
  0x2e   : > { %s232_s8 = sshll.u32 %s225_s6, 4  ;;  %s7852_s14 = sadd.s32 4294967294, %s9979_s21   ;;  %s10149_s8 = int_to_ptr.vmem [resolvable:$true] %s232_s8 }
  0x2f   : > { %p42_p4 = scmp.ne.s32.totalorder %s9971_s19, %s9967_s18  ;;  %p14273_p10 = scmp.eq.s32.totalorder %s10109_s13, 0 }
  0x30   : > { %p155_p1 = scmp.eq.s32.totalorder %s10109_s13, 1  ;;  %p161_p2 = scmp.eq.s32.totalorder %s7852_s14, 1 }
  0x31   : > { %p7853_p3 = scmp.ge.s32.totalorder %s9979_s21, 1  ;;  %p10119_p5 = por %p14273_p10, %p42_p4 }
  0x32   : > { %p10126_p7 = por %p155_p1, %p36_p0  ;;  %p10130_p9 = por %p161_p2, %p42_p4 }
  0x33   : > { %s14725_s15 = scalar_select %p10119_p5, 1, 0 }
  0x34   : > { %s14726_s7 = scalar_select %p10126_p7, 1, 0 }
  0x35   : > { %s14727_s9 = scalar_select %p10130_p9, 1, 0 }
  0x36   : > { %p168_p11 = scmp.lt.s32.totalorder %s9979_s21, 3  ;;  %s9984_s16 = smov [#allocation6]  }
  0x37   : > { %s180_s17 = sshll.u32 %s9984_s16, 4  ;;  %s8065_s23 = sshll.u32 %s9979_s21, 14  ;;  %s10139_s17 = int_to_ptr.vmem [resolvable:$true] %s180_s17 }
  0x38   : > { %p10135_p12 = pnand %p7853_p3, %p168_p11  ;;  %s14729_s4 = sld [smem:[#allocation178_spill]] }
  0x3a   : > { %s14728_s11 = scalar_select %p10135_p12, 1, 0 }
  0x3b   : > { %p9469_p0 = pneg %p10135_p12 }
  0x3d   : > { %p10153_p13 = pnand %p9469_p0, %p14273_p10 }
  0x3e   : > { %s10147_s27 = scalar_lea.hbm %s14729_s4, %s8065_s23  ;;  %s9852_s23 = scalar_lea.hbm %s14729_s4, 32768 }
  0x3f   : > { %s9847_s6 = scalar_lea.hbm %s10147_s27, 16384  ;;  %p9853_p3 = scmp.lt.u32.totalorder %s10147_s27, %s14729_s4 }
  0x40   : > { %p9848_p4 = scmp.ne.s32.totalorder %s10147_s27, %s9847_s6  ;;  %p9854_p11 = scmp.lt.u32.totalorder %s9852_s23, %s9847_s6 }
  0x41   : > { %p9856_p0 = scmp.lt.u32.totalorder %s9847_s6, %s10147_s27 }
  0x42   : > { %p9850_p1 = pnand %p9848_p4, %p9819_p8  ;;  %p9855_p9 = por %p9854_p11, %p9853_p3 }
  0x44   : > { %p9851_p2 = pneg %p9850_p1  ;;  %p9857_p10 = por %p9856_p0, %p9855_p9 }
  0x46   : > { %p9858_p7 = pnand %p9857_p10, %p9851_p2 }
  0x48   : > { %9861 = shalt.err (!%p9858_p7)
}
  0x49   : > { %s9862_s29 = scalar_lea.vmem %s10149_s8, 16384  ;;  %s9985_s14 = smov [#allocation8]  }
  0x4a   : > { %p9863_p4 = scmp.ne.s32.totalorder %s10149_s8, %s9862_s29  ;;  %s9867_s16 = sshll.u32 %s9985_s14, 4  ;;  %s9868_s16 = int_to_ptr.vmem [resolvable:$false] %s9867_s16 }
  0x4b   : > { %s9869_s24 = scalar_lea.vmem %s9868_s16, 32768  ;;  %p9870_p12 = scmp.lt.s32.totalorder %s10149_s8, %s9868_s16 }
  0x4c   : > { %p9865_p1 = pnand %p9863_p4, %p9819_p8  ;;  %p9871_p3 = scmp.lt.s32.totalorder %s9869_s24, %s9862_s29 }
  0x4e   : > { %p9866_p5 = pneg %p9865_p1  ;;  %p9872_p11 = por %p9871_p3, %p9870_p12 }
  0x50   : > { %p9873_p9 = pnand %p9872_p11, %p9866_p5 }
  0x52   : > { %9876 = shalt.err (!%p9873_p9)
}
  0x53   : > { %s9986_s6 = smov 256   ;;  %s9987_s23 = smov 16  }
  0x54   : > { %9479 = dma.hbm_to_vmem [thread:$0]  (!%p10068_p6), %s10147_s27, 16384, %s10149_s8, %s10076_s12, %s9986_s6, %s9986_s6, %s9987_s23  }
  0x55   : > { %s9877_s14 = scalar_lea.hbm %s14268_s1, 24576  ;;  %p9879_p10 = pneg %p10153_p13 }
  0x56   : > { %p9878_p8 = scmp.ne.s32.totalorder %s14268_s1, %s9877_s14  ;;  %p9884_p12 = scmp.lt.u32.totalorder %s9877_s14, %s14268_s1 }
  0x58   : > { %p9880_p5 = pnand %p9879_p10, %p9878_p8 }
  0x5a   : > { %p9881_p7 = pneg %p9880_p5 }
  0x5c   : > { %p9886_p2 = pnand %p9884_p12, %p9881_p7 }
  0x5e   : > { %9889 = shalt.err (!%p9886_p2)
}
  0x5f   : > { %s9890_s10 = scalar_lea.vmem %s10139_s17, 24576  ;;  %p9898_p1 = scmp.lt.s32.totalorder %s10139_s17, %s10139_s17 }
  0x60   : > { %p9891_p6 = scmp.ne.s32.totalorder %s10139_s17, %s9890_s10  ;;  %p9899_p3 = scmp.lt.s32.totalorder %s9890_s10, %s9890_s10 }
  0x62   : > { %p9893_p0 = pnand %p9891_p6, %p9879_p10  ;;  %p9900_p11 = por %p9899_p3, %p9898_p1 }
  0x64   : > { %p9894_p4 = pneg %p9893_p0 }
  0x66   : > { %p9901_p9 = pnand %p9900_p11, %p9894_p4 }
  0x68   : > { %9904 = shalt.err (!%p9901_p9)
}
  0x69   : > { %s14731_s0 = smov 8   ;;  %s14732_s4 = smov 128  }
  0x6a   : > { %9472 = dma.hbm_to_vmem [thread:$0]  (!%p10153_p13), %s14268_s1, 24576, %s10139_s17, [#allocation7], %s14732_s4, %s14732_s4, %s14731_s0  }
  0x6b   : > { %p14733_p8 = scmp.ne.s32.totalorder %s14728_s11, 0 }
  0x6d   : > { %244 = sbr.rel (%p14733_p8) target bundleno = 1311 (0x51f), region = 40 }
  0x74   : > { %s246_s8 = sand.u32 1, %s10109_s13   ;;  %s10209_s27 = sand.u32 1, %s9971_s19  }
  0x75   : > { %s7863_s24 = sshll.u32 %s10209_s27, 8  ;;  %s247_s28 = scalar_lea.sflag [#allocation4], %s246_s8 }
  0x76   : > { %s10212_s6 = scalar_lea.vmem [#allocation3], %s7863_s24  ;;  %p14734_p10 = scmp.ne.s32.totalorder %s14725_s15, 0 }
  0x78   : > { %9950 = dma.done.wait (%p14734_p10), %s247_s28, 4096  }
  0x79   : > { %9952 = vsyncadd (%p14734_p10), %s247_s28, 4294963200  ;;  %p14735_p13 = scmp.eq.s32.totalorder %s10109_s13, 0 }
  0x7b   : > { %9954 = dma.done.wait (%p14735_p13), [#allocation7], 24576   ;;  %p14736_p5 = pmov %p14735_p13 }
  0x7c   : > { %s7865_s11 = sshll.u32 %s10209_s27, 10 }
  0x7d   : > { %9956 = vsyncadd (%p14736_p5), [#allocation7], 4294942720  ;;  %s10225_s17 = scalar_lea.vmem [#allocation8], %s7865_s11 }
  0x7e   : > { %9958 = dma.done.wait (%p14734_p10), %s247_s28, 16384  }
  0x7f   : > { %9960 = vsyncadd (%p14734_p10), %s247_s28, 4294950912  ;;  %v14279_v0 = vmov 0   ;;  %v9529_v1 = vld [vmem:[#allocation6 + $0x204] ss:$8 sps:$4 sm:$0xff]   ;;  %v9533_v3 = vld [vmem:[#allocation6 + $0x200] ss:$8 sps:$4 sm:$0xff]   ;;  %v456_v22 = vlaneseq }
  0x80   : > { %5275 = vmatprep.mubr.bf16.mxu0 %v14279_v0  ;;  %v9531_v2 = vld [vmem:[#allocation6 + $0x104] ss:$8 sps:$4 sm:$0xff]   ;;  %3864 = vmatprep.subr.bf16.mxu1 %v9529_v1  ;;  %v9534_v4 = vld [vmem:[#allocation6 + $0x100] ss:$8 sps:$4 sm:$0xff]   ;;  %v9535_v5 = vld [vmem:[#allocation6 + $0x214] ss:$8 sps:$4 sm:$0xff]  }
  0x81   : > { %5243 = vmatprep.subr.bf16.mxu0 %v9531_v2  ;;  %3865 = vmatpush1.bf16.msra.mxu1 %v9533_v3  ;;  %v9537_v6 = vld [vmem:[#allocation6 + $0x114] ss:$8 sps:$4 sm:$0xff]   ;;  %v9539_v7 = vld [vmem:[#allocation6 + $0x210] ss:$8 sps:$4 sm:$0xff]   ;;  %v9541_v9 = vld [vmem:[#allocation6 + $0x224] ss:$8 sps:$4 sm:$0xff]  }
  0x82   : > { %5244 = vmatpush1.bf16.msra.mxu0 %v9534_v4  ;;  %3866 = vmatprep.subr.bf16.mxu1 %v9535_v5  ;;  %v9540_v8 = vld [vmem:[#allocation6 + $0x110] ss:$8 sps:$4 sm:$0xff]   ;;  %v9543_v10 = vld [vmem:[#allocation6 + $0x124] ss:$8 sps:$4 sm:$0xff]   ;;  %v9545_v11 = vld [vmem:[#allocation6 + $0x220] ss:$8 sps:$4 sm:$0xff]  }
  0x83   : > { %5245 = vmatprep.subr.bf16.mxu0 %v9537_v6  ;;  %v9546_v12 = vld [vmem:[#allocation6 + $0x120] ss:$8 sps:$4 sm:$0xff]   ;;  %v9547_v13 = vld [vmem:[#allocation6 + $0x234] ss:$8 sps:$4 sm:$0xff]   ;;  %v9551_v15 = vld [vmem:[#allocation6 + $0x230] ss:$8 sps:$4 sm:$0xff]  }
  0x84   : > { %v9549_v14 = vld [vmem:[#allocation6 + $0x134] ss:$8 sps:$4 sm:$0xff]   ;;  %v9552_v16 = vld [vmem:[#allocation6 + $0x130] ss:$8 sps:$4 sm:$0xff]   ;;  %v9553_v17 = vld [vmem:[#allocation6 + $0x244] ss:$8 sps:$4 sm:$0xff]  }
  0x85   : > { %3867 = vmatpush1.bf16.msra.mxu1 %v9539_v7  ;;  %v9555_v18 = vld [vmem:[#allocation6 + $0x144] ss:$8 sps:$4 sm:$0xff]   ;;  %v9557_v19 = vld [vmem:[#allocation6 + $0x240] ss:$8 sps:$4 sm:$0xff]   ;;  %v9559_v21 = vld [vmem:[#allocation6 + $0x254] ss:$8 sps:$4 sm:$0xff]  }
  0x86   : > { %5246 = vmatpush1.bf16.msra.mxu0 %v9540_v8  ;;  %3868 = vmatprep.subr.bf16.mxu1 %v9541_v9  ;;  %v9558_v20 = vld [vmem:[#allocation6 + $0x140] ss:$8 sps:$4 sm:$0xff]   ;;  %v9561_v23 = vld [vmem:[#allocation6 + $0x154] ss:$8 sps:$4 sm:$0xff]   ;;  %v9563_v24 = vld [vmem:[#allocation6 + $0x250] ss:$8 sps:$4 sm:$0xff]  }
  0x87   : > { %5247 = vmatprep.subr.bf16.mxu0 %v9543_v10  ;;  %v9564_v25 = vld [vmem:[#allocation6 + $0x150] ss:$8 sps:$4 sm:$0xff]   ;;  %v9565_v26 = vld [vmem:[#allocation6 + $0x264] ss:$8 sps:$4 sm:$0xff]   ;;  %v10232_v27 = vshrl.u32 %v456_v22, 7  ;;  %vm14307_vm0 = vcmask 1040384  }
  0x88   : > { %v9567_v28 = vld [vmem:[#allocation6 + $0x164] ss:$8 sps:$4 sm:$0xff]   ;;  %v9569_v30 = vld [vmem:[#allocation6 + $0x260] ss:$8 sps:$4 sm:$0xff]   ;;  %v9571_v32 = vld [vmem:[#allocation6 + $0x274] ss:$8 sps:$4 sm:$0xff]  }
  0x89   : > { %3869 = vmatpush1.bf16.msra.mxu1 %v9545_v11  ;;  %14737 = vst [vmem:[#allocation14_spill] sm:$0xff] %v10232_v27  ;;  %v10235_v29 = vadd.s32 16, %v10232_v27  ;;  %v9570_v31 = vld [vmem:[#allocation6 + $0x160] ss:$8 sps:$4 sm:$0xff]   ;;  %v525_v33 = vand.u32 15, %v10232_v27  ;;  %v10239_v34 = vadd.s32 8, %v10232_v27 }
  0x8a   : > { %5248 = vmatpush1.bf16.msra.mxu0 %v9546_v12  ;;  %3870 = vmatprep.subr.bf16.mxu1 %v9547_v13  ;;  %v9573_v35 = vld [vmem:[#allocation6 + $0x174] ss:$8 sps:$4 sm:$0xff]   ;;  %v10242_v36 = vadd.s32 32, %v10232_v27  ;;  %v10245_v37 = vadd.s32 24, %v10232_v27  ;;  %v10249_v39 = vadd.s32 48, %v10232_v27  ;;  %v10252_v40 = vadd.s32 40, %v10232_v27 }
  0x8b   : > { %5249 = vmatprep.subr.bf16.mxu0 %v9549_v14  ;;  %v539_v38 = vand.u32 15, %v10235_v29  ;;  %v10255_v41 = vadd.s32 64, %v10232_v27  ;;  %v9575_v42 = vld [vmem:[#allocation6 + $0x270] ss:$8 sps:$4 sm:$0xff]   ;;  %v10258_v43 = vadd.s32 56, %v10232_v27  ;;  %v10261_v44 = vadd.s32 80, %v10232_v27 }
  0x8c   : > { %v9576_v45 = vld [vmem:[#allocation6 + $0x170] ss:$8 sps:$4 sm:$0xff]   ;;  %v9577_v46 = vld [vmem:[#allocation6 + $0x284] ss:$8 sps:$4 sm:$0xff]   ;;  %v10264_v47 = vadd.s32 72, %v10232_v27  ;;  %v532_v49 = vand.u32 15, %v10239_v34 }
  0x8d   : > { %3871 = vmatpush1.bf16.msra.mxu1 %v9551_v15  ;;  %v9579_v48 = vld [vmem:[#allocation6 + $0x184] ss:$8 sps:$4 sm:$0xff]   ;;  %v9581_v55 = vld [vmem:[#allocation6 + $0x280] ss:$8 sps:$4 sm:$0xff]   ;;  %v10274_v58 = vadd.s32 96, %v10232_v27  ;;  %v10279_v63 = vadd.s32 88, %v10232_v27 }
  0x8e   : > { %5250 = vmatpush1.bf16.msra.mxu0 %v9552_v16  ;;  %3872 = vmatprep.subr.bf16.mxu1 %v9553_v17  ;;  %v9582_v56 = vld [vmem:[#allocation6 + $0x180] ss:$8 sps:$4 sm:$0xff]   ;;  %v9583_v59 = vld [vmem:[#allocation6 + $0x294] ss:$8 sps:$4 sm:$0xff]   ;;  %v10282_v1 = vadd.s32 112, %v10232_v27  ;;  %v10285_v2 = vadd.s32 104, %v10232_v27 }
  0x8f   : > { %5251 = vmatprep.subr.bf16.mxu0 %v9555_v18  ;;  %v9585_v62 = vld [vmem:[#allocation6 + $0x194] ss:$8 sps:$4 sm:$0xff]   ;;  %v10288_v3 = vadd.s32 128, %v10232_v27  ;;  %v10291_v4 = vadd.s32 120, %v10232_v27  ;;  %v10294_v5 = vadd.s32 144, %v10232_v27  ;;  %v10298_v8 = vadd.s32 136, %v10232_v27 }
  0x90   : > { %v9587_v6 = vld [vmem:[#allocation6 + $0x290] ss:$8 sps:$4 sm:$0xff]   ;;  %v9589_v10 = vld [vmem:[#allocation6 + $0x2a4] ss:$8 sps:$4 sm:$0xff]   ;;  %v10301_v11 = vadd.s32 160, %v10232_v27  ;;  %vm10311_vm1 = vcmp.eq.s32.totalorder %v525_v33, 0 }
  0x91   : > { %3873 = vmatpush1.bf16.msra.mxu1 %v9557_v19  ;;  %v9588_v9 = vld [vmem:[#allocation6 + $0x190] ss:$8 sps:$4 sm:$0xff]   ;;  %v9591_v12 = vld [vmem:[#allocation6 + $0x1a4] ss:$8 sps:$4 sm:$0xff]   ;;  %v9593_v19 = vld [vmem:[#allocation6 + $0x2a0] ss:$8 sps:$4 sm:$0xff]  }
  0x92   : > { %5252 = vmatpush1.bf16.msra.mxu0 %v9558_v20  ;;  %3874 = vmatprep.subr.bf16.mxu1 %v9559_v21  ;;  %v9594_v20 = vld [vmem:[#allocation6 + $0x1a0] ss:$8 sps:$4 sm:$0xff]   ;;  %v9600_v33 = vld [vmem:[#allocation6 + $0x1b0] ss:$8 sps:$4 sm:$0xff]   ;;  %vm14322_vm2 = vcmask 1046528   ;;  %vm10346_vm3 = vcmp.eq.s32.totalorder %v539_v38, 0  ;;  %vm8067_vm7 = vmneg %vm10311_vm1 }
  0x93   : > { %5253 = vmatprep.subr.bf16.mxu0 %v9561_v23  ;;  %v10317_v23 = vadd.s32 152, %v10232_v27  ;;  %v9606_v22 = vld [vmem:[#allocation6 + $0x1c0] ss:$8 sps:$4 sm:$0xff]   ;;  %v10359_v38 = vld [vmem:[%s10212_s6 + $0x10] sm:$0xff]  ;;  %vm10363_vm4 = vcmp.eq.s32.totalorder %v532_v49, 15  ;;  %v10375_v17 = vld [vmem:[%s10212_s6 + $0x18] sm:$0xff] }
  0x94   : > { %v10378_v16 = vmul.f32 0.25, %v10359_v38  ;;  %v9609_v14 = vld [vmem:[#allocation6 + $0x1d4] ss:$8 sps:$4 sm:$0xff]   ;;  %v9611_v13 = vld [vmem:[#allocation6 + $0x2d0] ss:$8 sps:$4 sm:$0xff]   ;;  %vm8195_vm8 = vmneg %vm10363_vm4  ;;  %vm14305_vm9 = vmmov 1  }
  0x95   : > { %3875 = vmatpush1.bf16.msra.mxu1 %v9563_v24  ;;  %v9595_v24 = vld [vmem:[#allocation6 + $0x2b4] ss:$8 sps:$4 sm:$0xff]   ;;  %v9613_v52 = vld [vmem:[#allocation6 + $0x2e4] ss:$8 sps:$4 sm:$0xff]   ;;  %vm10509_vm10 = vmpackc.low %vm14305_vm9, %vm8067_vm7  ;;  %s13688_s29 = scalar_lea.vmem [#allocation9], %s7865_s11  ;;  %s8066_s16 = sshll.u32 %s10109_s13, 14 }
  0x96   : > { %5254 = vmatpush1.bf16.msra.mxu0 %v9564_v25  ;;  %3876 = vmatprep.subr.bf16.mxu1 %v9565_v26  ;;  %v10321_v26 = vadd.s32 176, %v10232_v27  ;;  %vm10522_vm11 = vmpackc.low %vm8195_vm8, %vm14305_vm9  ;;  %v9735_v21 = vld [vmem:[#allocation6 + $0x24] ss:$8 sps:$4 sm:$0xff]   ;;  %s7749_s10 = sshll.u32 %s13688_s29, 4  ;;  %s14218_s12 = scalar_lea.hbm %s14272_s5, %s8066_s16  ;;  %s14220_s10 = int_to_ptr.vmem [resolvable:$true] %s7749_s10 }
  0x97   : > { %5255 = vmatprep.subr.bf16.mxu0 %v9567_v28  ;;  %v9597_v28 = vld [vmem:[#allocation6 + $0x1b4] ss:$8 sps:$4 sm:$0xff]   ;;  %vm8071_vm14 = vmneg %vm10346_vm3  ;;  %s7736_s13 = scalar_lea.sflag [#allocation5], %s10209_s27  ;;  %s9905_s30 = scalar_lea.vmem %s14220_s10, 16384 }
  0x98   : > { %p9906_p7 = scmp.ne.s32.totalorder %s14220_s10, %s9905_s30  ;;  %p15687_p12 = scmp.ne.s32.totalorder %s14726_s7, 0 }
  0x99   : > { %3877 = vmatpush1.bf16.msra.mxu1 %v9569_v30  ;;  %v10324_v30 = vadd.s32 168, %v10232_v27  ;;  %s9990_s8 = smov [#allocation9]  }
  0x9a   : > { %5256 = vmatpush1.bf16.msra.mxu0 %v9570_v31  ;;  %3878 = vmatprep.subr.bf16.mxu1 %v9571_v32  ;;  %v10327_v31 = vadd.s32 192, %v10232_v27  ;;  %v9599_v32 = vld [vmem:[#allocation6 + $0x2b0] ss:$8 sps:$4 sm:$0xff]   ;;  %p9907_p2 = pnand %p9906_p7, %p15687_p12  ;;  %s9909_s24 = sshll.u32 %s9990_s8, 4  ;;  %s9910_s24 = int_to_ptr.vmem [resolvable:$false] %s9909_s24 }
  0x9b   : > { %5257 = vmatprep.subr.bf16.mxu0 %v9573_v35  ;;  %14740 = vst [vmem:[#allocation15_spill] sm:$0xff] %v10324_v30  ;;  %v296_v35 = vld [vmem:[%s10212_s6] sm:$0xff]  ;;  %s9911_s28 = scalar_lea.vmem %s9910_s24, 32768  ;;  %p9912_p0 = scmp.lt.s32.totalorder %s14220_s10, %s9910_s24 }
  0x9c   : > { %14741 = vst [vmem:[#allocation16_spill] sm:$0xff] %v10327_v31  ;;  %v9633_v31 = vld [vmem:[#allocation6 + $0x314] ss:$8 sps:$4 sm:$0xff]   ;;  %p9908_p6 = pneg %p9907_p2  ;;  %p9913_p4 = scmp.lt.s32.totalorder %s9911_s28, %s9905_s30 }
  0x9d   : > { %3879 = vmatpush1.bf16.msra.mxu1 %v9575_v42  ;;  %v10331_v42 = vadd.s32 184, %v10232_v27 }
  0x9e   : > { %5258 = vmatpush1.bf16.msra.mxu0 %v9576_v45  ;;  %3880 = vmatprep.subr.bf16.mxu1 %v9577_v46  ;;  %v10334_v45 = vadd.s32 208, %v10232_v27  ;;  %v10337_v46 = vadd.s32 200, %v10232_v27  ;;  %p9914_p1 = por %p9913_p4, %p9912_p0 }
  0x9f   : > { %5259 = vmatprep.subr.bf16.mxu0 %v9579_v48  ;;  %14742 = vst [vmem:[#allocation17_spill] sm:$0xff] %v10331_v42  ;;  %v9601_v48 = vld [vmem:[#allocation6 + $0x2c4] ss:$8 sps:$4 sm:$0xff]  }
  0xa0   : > { %14743 = vst [vmem:[#allocation18_spill] sm:$0xff] %v10334_v45  ;;  %14744 = vst [vmem:[#allocation19_spill] sm:$0xff] %v10337_v46  ;;  %p9915_p3 = pnand %p9914_p1, %p9908_p6 }
  0xa1   : > { %3881 = vmatpush1.bf16.msra.mxu1 %v9581_v55  ;;  %v297_v55 = vld [vmem:[%s10212_s6 + $0x8] sm:$0xff] }
  0xa2   : > { %5260 = vmatpush1.bf16.msra.mxu0 %v9582_v56  ;;  %3882 = vmatprep.subr.bf16.mxu1 %v9583_v59  ;;  %v10340_v56 = vmul.f32 0.25, %v296_v35  ;;  %v358_v59 = vmul.f32 0.75, %v296_v35 }
  0xa3   : > { %5261 = vmatprep.subr.bf16.mxu0 %v9585_v62  ;;  %v9603_v62 = vld [vmem:[#allocation6 + $0x1c4] ss:$8 sps:$4 sm:$0xff]  }
  0xa4   : > { %v390_v35 = vadd.f32 %v358_v59, %v10340_v56 }
  0xa5   : > { %3883 = vmatpush1.bf16.msra.mxu1 %v9587_v6  ;;  %v10342_v6 = vmul.f32 0.25, %v297_v55 }
  0xa6   : > { %5262 = vmatpush1.bf16.msra.mxu0 %v9588_v9  ;;  %3884 = vmatprep.subr.bf16.mxu1 %v9589_v10  ;;  %v359_v9 = vmul.f32 0.75, %v297_v55  ;;  %v9605_v55 = vld [vmem:[#allocation6 + $0x2c0] ss:$8 sps:$4 sm:$0xff]   ;;  %v1482_v25 = vrot.slane %v390_v35, 7  ;;  %v10372_v18 = vmul.f32 0.25, %v390_v35  ;;  %v14776_v10 = vmov 0 }
  0xa7   : > { %5263 = vmatprep.subr.bf16.mxu0 %v9591_v12  ;;  %v10370_v12 = vmul.f32 0.75, %v390_v35 }
  0xa8   : > { %v10356_v29 = vadd.f32 %v359_v9, %v10342_v6  ;;  %v1673_v15 = vsel %vm14307_vm0, %v390_v35, %v1482_v25 }
  0xa9   : > { %3885 = vmatpush1.bf16.msra.mxu1 %v9593_v19  ;;  %v1995_v61 = vsel %vm10311_vm1, %v390_v35, %v1673_v15  ;;  %v2571_v57 = vmul.f32 0.75, %v1673_v15  ;;  %vm10596_vm1 = vmpackc.low %vm14305_vm9, %vm8071_vm14 }
  0xaa   : > { %5264 = vmatpush1.bf16.msra.mxu0 %v9594_v20  ;;  %3886 = vmatprep.subr.bf16.mxu1 %v9595_v24  ;;  %v1483_v34 = vrot.slane %v10356_v29, 7  ;;  %v10382_v49 = vmul.f32 0.75, %v10356_v29  ;;  %v10385_v19 = vmul.f32 0.25, %v10356_v29  ;;  %v10388_v20 = vmul.f32 0.25, %v10375_v17 }
  0xab   : > { %5265 = vmatprep.subr.bf16.mxu0 %v9597_v28  ;;  %v9607_v28 = vld [vmem:[#allocation6 + $0x2d4] ss:$8 sps:$4 sm:$0xff]   ;;  %v1676_v7 = vrot.slane %v10356_v29, 1  ;;  %v2059_v54 = vmul.f32 0.25, %v1995_v61  ;;  %v2699_v51 = vadd.f32 %v10372_v18, %v2571_v57  ;;  %v9615_v61 = vld [vmem:[#allocation6 + $0x1e4] ss:$8 sps:$4 sm:$0xff]  }
  0xac   : > { %v1484_v60 = vsel %vm14307_vm0, %v1482_v25, %v1483_v34 }
  0xad   : > { %3887 = vmatpush1.bf16.msra.mxu1 %v9599_v32  ;;  %v10392_v32 = vadd.f32 %v358_v59, %v10378_v16  ;;  %v2060_v0 = vmul.f32 0.25, %v1484_v60  ;;  %v2572_v53 = vmul.f32 0.75, %v1484_v60  ;;  %v2187_v60 = vadd.f32 %v10370_v12, %v2059_v54 }
  0xae   : > { %5266 = vmatpush1.bf16.msra.mxu0 %v9600_v33  ;;  %3888 = vmatprep.subr.bf16.mxu1 %v9601_v48  ;;  %v1675_v33 = vrot.slane %v390_v35, 1  ;;  %v10399_v48 = vadd.f32 %v359_v9, %v10388_v20  ;;  %v14789_v35 = vmov 0 }
  0xaf   : > { %5267 = vmatprep.subr.bf16.mxu0 %v9603_v62  ;;  %v9612_v62 = vld [vmem:[#allocation6 + $0x1d0] ss:$8 sps:$4 sm:$0xff]   ;;  %v1485_v59 = vrot.slane %v10392_v32, 7  ;;  %v10405_v50 = vmul.f32 0.75, %v10392_v32  ;;  %v2188_v9 = vadd.f32 %v10382_v49, %v2060_v0 }
  0xb0   : > { %v14284_v25 = vrot.slane %v10399_v48, 7  ;;  %v10408_v15 = vmul.f32 0.75, %v10399_v48  ;;  %v1677_v27 = vsel %vm14322_vm2, %v1675_v33, %v1676_v7  ;;  %v9618_v33 = vld [vmem:[#allocation6 + $0x1e0] ss:$8 sps:$4 sm:$0xff]  }
  0xb1   : > { %3889 = vmatpush1.bf16.msra.mxu1 %v9605_v55  ;;  %v1486_v57 = vsel %vm14307_vm0, %v1483_v34, %v1485_v59  ;;  %v10422_v46 = vpack.c.bf16 %v2188_v9, %v2187_v60  ;;  %v14751_v34 = vand.u32 15, %v10242_v36  ;;  %v14754_v60 = vrot.slane %v10392_v32, 1  ;;  %v9619_v36 = vld [vmem:[#allocation6 + $0x2f4] ss:$8 sps:$4 sm:$0xff]  }
  0xb2   : > { %5268 = vmatpush1.bf16.msra.mxu0 %v9606_v22  ;;  %3890 = vmatprep.subr.bf16.mxu1 %v9607_v28  ;;  %v2700_v22 = vadd.f32 %v10385_v19, %v2572_v53  ;;  %v1488_v55 = vsel %vm14307_vm0, %v1485_v59, %v14284_v25  ;;  %v10420_v28 = vmul.f32 0.25, %v10392_v32  ;;  %v1997_v0 = vsel %vm10346_vm3, %v10392_v32, %v1486_v57 }
  0xb3   : > { %5269 = vmatprep.subr.bf16.mxu0 %v9609_v14  ;;  %v9617_v14 = vld [vmem:[#allocation6 + $0x2e0] ss:$8 sps:$4 sm:$0xff]   ;;  %14749 = vst [vmem:[#allocation20_spill] sm:$0xff] %v10422_v46  ;;  %v2062_v53 = vmul.f32 0.25, %v1488_v55  ;;  %vm10431_vm5 = vcmp.eq.s32.totalorder %v14751_v34, 0  ;;  %v2061_v59 = vmul.f32 0.25, %v1997_v0  ;;  %3896 = vmatprep.mubr.bf16.mxu1 %v10422_v46 }
  0xb4   : > { %v10424_v54 = vpack.c.bf16 %v2700_v22, %v2699_v51  ;;  %v2574_v25 = vmul.f32 0.75, %v1488_v55  ;;  %v1679_v51 = vsel %vm14322_vm2, %v1676_v7, %v14754_v60  ;;  %v2827_v9 = vmul.f32 0.75, %v1677_v27  ;;  %v9623_v60 = vld [vmem:[#allocation6 + $0x2f0] ss:$8 sps:$4 sm:$0xff]   ;;  %vm8075_vm7 = vmneg %vm10431_vm5 }
  0xb5   : > { %3891 = vmatpush1.bf16.msra.mxu1 %v9611_v13  ;;  %v14755_v22 = vand.u32 15, %v10245_v37  ;;  %v9621_v13 = vld [vmem:[#allocation6 + $0x1f4] ss:$8 sps:$4 sm:$0xff]   ;;  %v2380_v55 = vsel %vm10363_vm4, %v10356_v29, %v1679_v51  ;;  %v2828_v7 = vmul.f32 0.75, %v1679_v51  ;;  %v2573_v0 = vmul.f32 0.75, %v1486_v57  ;;  %v10460_v57 = vld [vmem:[%s10212_s6 + $0x20] sm:$0xff]  ;;  %vm10682_vm14 = vmpackc.low %vm14305_vm9, %vm8075_vm7 }
  0xb6   : > { %14750 = vst [vmem:[#allocation21_spill] sm:$0xff] %v10424_v54  ;;  %5270 = vmatpush1.bf16.msra.mxu0 %v9612_v62  ;;  %3892 = vmatprep.subr.bf16.mxu1 %v9613_v52  ;;  %v2190_v62 = vadd.f32 %v10408_v15, %v2062_v53  ;;  %v2189_v37 = vadd.f32 %v10405_v50, %v2061_v59  ;;  %v10452_v52 = vmul.f32 0.25, %v10399_v48  ;;  %v2444_v42 = vmul.f32 0.25, %v2380_v55  ;;  %v10463_v51 = vld [vmem:[%s10212_s6 + $0x28] sm:$0xff] }
  0xb7   : > { %vm10440_vm6 = vcmp.eq.s32.totalorder %v14755_v22, 15  ;;  %5271 = vmatprep.subr.bf16.mxu0 %v9615_v61  ;;  %v2891_v34 = vadd.f32 %v2827_v9, %v10372_v18  ;;  %v2443_v61 = vmul.f32 0.25, %v1677_v27  ;;  %v2892_v22 = vadd.f32 %v2828_v7, %v10385_v19  ;;  %v9624_v18 = vld [vmem:[#allocation6 + $0x1f0] ss:$8 sps:$4 sm:$0xff]   ;;  %v9630_v55 = vld [vmem:[#allocation6 + $0x404] ss:$8 sps:$4 sm:$0xff]  }
  0xb8   : > { %v2701_v53 = vadd.f32 %v10420_v28, %v2573_v0  ;;  %v10457_v29 = vmul.f32 0.75, %v10359_v38  ;;  %v10465_v59 = vpack.c.bf16 %v2190_v62, %v2189_v37  ;;  %v2702_v27 = vadd.f32 %v10452_v52, %v2574_v25  ;;  %v9627_v38 = vld [vmem:[#allocation6 + $0x304] ss:$8 sps:$4 sm:$0xff]   ;;  %vm8199_vm15 = vmneg %vm10440_vm6 }
  0xb9   : > { %3893 = vmatpush1.bf16.msra.mxu1 %v9617_v14  ;;  %v2507_v9 = vadd.f32 %v2443_v61, %v10370_v12  ;;  %v10470_v19 = vmul.f32 0.75, %v10375_v17  ;;  %v10474_v7 = vpack.c.bf16 %v2892_v22, %v2891_v34  ;;  %v2508_v14 = vadd.f32 %v2444_v42, %v10382_v49  ;;  %v9625_v49 = vld [vmem:[#allocation6 + $0x300] ss:$8 sps:$4 sm:$0xff]   ;;  %vm10610_vm3 = vmpackc.low %vm8199_vm15, %vm14305_vm9 }
  0xba   : > { %5272 = vmatpush1.bf16.msra.mxu0 %v9618_v33  ;;  %3894 = vmatprep.subr.bf16.mxu1 %v9619_v36  ;;  %v10479_v33 = vadd.f32 %v10457_v29, %v10340_v56  ;;  %v1680_v12 = vrot.slane %v10399_v48, 1  ;;  %v10484_v17 = vpack.c.bf16 %v2702_v27, %v2701_v53  ;;  %v10491_v36 = vmul.f32 0.25, %v10460_v57  ;;  %v9628_v34 = vld [vmem:[#allocation6 + $0x400] ss:$8 sps:$4 sm:$0xff]  }
  0xbb   : > { %5273 = vmatprep.subr.bf16.mxu0 %v9621_v13  ;;  %v10488_v25 = vadd.f32 %v10470_v19, %v10342_v6  ;;  %v10494_v42 = vmul.f32 0.25, %v10463_v51  ;;  %v10496_v56 = vpack.c.bf16 %v2508_v14, %v2507_v9  ;;  %v14758_v0 = vrot.slane %v10392_v32, 1 }
  0xbc   : > { %v1489_v13 = vrot.slane %v10479_v33, 7  ;;  %v10500_v62 = vmul.f32 0.75, %v10479_v33  ;;  %v14759_v6 = vmov 0  ;;  %v1682_v32 = vrot.slane %v10479_v33, 1 }
  0xbd   : > { %v1681_v37 = vsel %vm14322_vm2, %v14758_v0, %v1680_v12  ;;  %3895 = vmatpush1.bf16.msra.mxu1 %v9623_v60  ;;  %v14760_v6 = vsel %vm10509_vm10, 4294967295, %v14759_v6  ;;  %v14289_v61 = vrot.slane %v10488_v25, 7  ;;  %v10515_v22 = vmul.f32 0.75, %v10488_v25 }
  0xbe   : > { %5274 = vmatpush1.bf16.msra.mxu0 %v9624_v18  ;;  %14761 = vst [vmem:[#allocation22_spill] sm:$0xff] %v14760_v6  ;;  %v2829_v53 = vmul.f32 0.75, %v1681_v37  ;;  %4217 = vmatprep.subr.bf16.mxu1 %v9627_v38  ;;  %v14764_v60 = vrot.slane %v10399_v48, 7  ;;  %v10530_v27 = vmul.f32 0.25, %v10479_v33  ;;  %v10533_v9 = vmul.f32 0.25, %v10488_v25 }
  0xbf   : > { %6109 = vmatprep.subr.bf16.mxu0 %v9630_v55  ;;  %v2445_v38 = vmul.f32 0.25, %v1681_v37  ;;  %v14765_v55 = vand.u32 15, %v10249_v39  ;;  %v1492_v14 = vsel %vm14307_vm0, %v1489_v13, %v14289_v61  ;;  %v9636_v37 = vld [vmem:[#allocation6 + $0x414] ss:$8 sps:$4 sm:$0xff]   ;;  %v14768_v39 = vand.u32 15, %v10252_v40 }
  0xc0   : > { %v1490_v18 = vsel %vm14307_vm0, %v14764_v60, %v1489_v13  ;;  %v1683_v60 = vsel %vm14322_vm2, %v1680_v12, %v1682_v32  ;;  %v2893_v46 = vadd.f32 %v2829_v53, %v10420_v28  ;;  %8070 = vmatmul.mubr.msk.bf16.vlgmr.msra.gmra.mrb[0].mxu1 %vm10509_vm10, %v10424_v54  ;;  %v14771_v13 = vmov 0   ;;  %v9631_v12 = vld [vmem:[#allocation6 + $0x310] ss:$8 sps:$4 sm:$0xff]  }
  0xc1   : > { %vm10537_vm12 = vcmp.eq.s32.totalorder %v14765_v55, 0  ;;  %v1999_v0 = vsel %vm10431_vm5, %v10479_v33, %v1490_v18  ;;  %vm10551_vm13 = vcmp.eq.s32.totalorder %v14768_v39, 15  ;;  %5276 = vmatmul.mubr.bf16.vlgmr.msra.gmra.mrb[0].mxu0 %v14771_v13  ;;  %v2064_v33 = vmul.f32 0.25, %v1492_v14  ;;  %4218 = vmatpush1.bf16.msra.mxu1 %v9625_v49  ;;  %v9634_v54 = vld [vmem:[#allocation6 + $0x410] ss:$8 sps:$4 sm:$0xff]  }
  0xc2   : > { %v2063_v61 = vmul.f32 0.25, %v1999_v0  ;;  %v2576_v30 = vmul.f32 0.75, %v1492_v14  ;;  %v2382_v28 = vsel %vm10440_vm6, %v10399_v48, %v1683_v60  ;;  %6110 = vmatpush1.bf16.msra.mxu0 %v9628_v34  ;;  %v2830_v40 = vmul.f32 0.75, %v1683_v60  ;;  %3906 = vmatprep.mubr.bf16.mxu1 %v10465_v59  ;;  %v9639_v0 = vld [vmem:[#allocation6 + $0x324] ss:$8 sps:$4 sm:$0xff]   ;;  %vm8203_vm8 = vmneg %vm10551_vm13 }
  0xc3   : > { %v2575_v53 = vmul.f32 0.75, %v1490_v18  ;;  %v2446_v39 = vmul.f32 0.25, %v2382_v28  ;;  %v2509_v6 = vadd.f32 %v2445_v38, %v10405_v50  ;;  %8450 = vmatprep.mubr.msk.bf16.mxu0 %vm10522_vm11, %v10474_v7  ;;  %v2192_v49 = vadd.f32 %v10515_v22, %v2064_v33  ;;  %v9642_v18 = vld [vmem:[#allocation6 + $0x424] ss:$8 sps:$4 sm:$0xff]   ;;  %4219 = vmatprep.subr.bf16.mxu1 %v9633_v31  ;;  %vm10697_vm5 = vmpackc.low %vm8203_vm8, %vm14305_vm9 }
  0xc4   : > { %v2191_v48 = vadd.f32 %v10500_v62, %v2063_v61  ;;  %v2704_v34 = vadd.f32 %v10533_v9, %v2576_v30  ;;  %v1684_v14 = vrot.slane %v10488_v25, 1  ;;  %v2894_v60 = vadd.f32 %v2830_v40, %v10452_v52  ;;  %6111 = vmatprep.subr.bf16.mxu0 %v9636_v37  ;;  %v9637_v40 = vld [vmem:[#allocation6 + $0x320] ss:$8 sps:$4 sm:$0xff]   ;;  %vm8079_vm15 = vmneg %vm10537_vm12 }
  0xc5   : > { %v2703_v50 = vadd.f32 %v10530_v27, %v2575_v53  ;;  %v2510_v38 = vadd.f32 %v2446_v39, %v10408_v15  ;;  %v10579_v61 = vmul.f32 0.75, %v10460_v57  ;;  %v10585_v30 = vadd.f32 %v10457_v29, %v10491_v36  ;;  %4220 = vmatpush1.bf16.msra.mxu1 %v9631_v12  ;;  %v9640_v37 = vld [vmem:[#allocation6 + $0x420] ss:$8 sps:$4 sm:$0xff]  }
  0xc6   : > { %v10581_v33 = vpack.c.bf16 %v2192_v49, %v2191_v48  ;;  %v10589_v52 = vadd.f32 %v10470_v19, %v10494_v42  ;;  %v1685_v28 = vsel %vm14322_vm2, %v1682_v32, %v1684_v14  ;;  %v10600_v15 = vpack.c.bf16 %v2894_v60, %v2893_v46  ;;  %6112 = vmatpush1.bf16.msra.mxu0 %v9634_v54  ;;  %v9645_v32 = vld [vmem:[#allocation6 + $0x334] ss:$8 sps:$4 sm:$0xff]  }
  0xc7   : > { %v10602_v57 = vpack.c.bf16 %v2704_v34, %v2703_v50  ;;  %v10604_v29 = vpack.c.bf16 %v2510_v38, %v2509_v6  ;;  %v2831_v19 = vmul.f32 0.75, %v1685_v28  ;;  %v14777_v10 = vsel %vm10610_vm3, 4294967295, %v14776_v10  ;;  %4221 = vmatprep.subr.bf16.mxu1 %v9639_v0  ;;  %6113 = vmatprep.subr.bf16.mxu0 %v9642_v18  ;;  %v9648_v60 = vld [vmem:[#allocation6 + $0x434] ss:$8 sps:$4 sm:$0xff]  }
  0xc8   : > { %14772 = vst [vmem:[#allocation23_spill] sm:$0xff] %v10581_v33  ;;  %14778 = vst [vmem:[#allocation25_spill] sm:$0xff] %v14777_v10  ;;  %v1493_v46 = vrot.slane %v10585_v30, 7  ;;  %v14293_v53 = vrot.slane %v10589_v52, 7  ;;  %v10617_v6 = vmul.f32 0.75, %v10585_v30  ;;  %v10620_v54 = vmul.f32 0.75, %v10589_v52  ;;  %8074 = vmatmul.mubr.msk.bf16.gmra.mrb[4].mxu1 %vm10596_vm1, %v10484_v17 }
  0xc9   : > { %14775 = vst [vmem:[#allocation24_spill] sm:$0xff] %v10602_v57  ;;  %v14779_v12 = vand.u32 15, %v10255_v41  ;;  %v14298_v45 = vrot.slane %v10585_v30, 1  ;;  %v2895_v48 = vadd.f32 %v2831_v19, %v10530_v27  ;;  %v10631_v49 = vmul.f32 0.25, %v10585_v30  ;;  %5286 = vmatmul.mubr.bf16.gmra.mrb[4].mxu0 %v10496_v56  ;;  %3916 = vmatprep.mubr.bf16.mxu1 %v10581_v33  ;;  %v10673_v33 = vld [vmem:[%s10212_s6 + $0x30] sm:$0xff] }
  0xca   : > { %v10634_v34 = vmul.f32 0.25, %v10589_v52  ;;  %v14782_v41 = vrot.slane %v10488_v25, 7  ;;  %v1496_v27 = vsel %vm14307_vm0, %v1493_v46, %v14293_v53  ;;  %v2447_v18 = vmul.f32 0.25, %v1685_v28  ;;  %8454 = vmatprep.mubr.msk.bf16.mxu0 %vm10610_vm3, %v10600_v15  ;;  %4222 = vmatpush1.bf16.msra.mxu1 %v9637_v40 }
  0xcb   : > { %vm10624_vm4 = vcmp.eq.s32.totalorder %v14779_v12, 0  ;;  %v10647_v50 = vmul.f32 0.75, %v10463_v51  ;;  %v14783_v38 = vand.u32 15, %v10258_v43  ;;  %v2066_v28 = vmul.f32 0.25, %v1496_v27  ;;  %v9643_v12 = vld [vmem:[#allocation6 + $0x330] ss:$8 sps:$4 sm:$0xff]   ;;  %6114 = vmatpush1.bf16.msra.mxu0 %v9640_v37  ;;  %4223 = vmatprep.subr.bf16.mxu1 %v9645_v32 }
  0xcc   : > { %v1494_v0 = vsel %vm14307_vm0, %v14782_v41, %v1493_v46  ;;  %v2578_v43 = vmul.f32 0.75, %v1496_v27  ;;  %v1687_v46 = vsel %vm14322_vm2, %v1684_v14, %v14298_v45  ;;  %v9646_v27 = vld [vmem:[#allocation6 + $0x430] ss:$8 sps:$4 sm:$0xff]   ;;  %6115 = vmatprep.subr.bf16.mxu0 %v9648_v60  ;;  %v14786_v40 = vmov 0  ;;  %vm8083_vm9 = vmneg %vm10624_vm4 }
  0xcd   : > { %vm10651_vm6 = vcmp.eq.s32.totalorder %v14783_v38, 15  ;;  %v2001_v51 = vsel %vm10537_vm12, %v10585_v30, %v1494_v0  ;;  %v2384_v38 = vsel %vm10551_vm13, %v10488_v25, %v1687_v46  ;;  %v2832_v53 = vmul.f32 0.75, %v1687_v46  ;;  %v9651_v25 = vld [vmem:[#allocation6 + $0x344] ss:$8 sps:$4 sm:$0xff]  }
  0xce   : > { %v2065_v41 = vmul.f32 0.25, %v2001_v51  ;;  %v2577_v13 = vmul.f32 0.75, %v1494_v0  ;;  %v2194_v10 = vadd.f32 %v10620_v54, %v2066_v28  ;;  %v2706_v14 = vadd.f32 %v10634_v34, %v2578_v43  ;;  %v9654_v46 = vld [vmem:[#allocation6 + $0x444] ss:$8 sps:$4 sm:$0xff]   ;;  %4224 = vmatpush1.bf16.msra.mxu1 %v9643_v12  ;;  %v9660_v12 = vld [vmem:[#allocation6 + $0x454] ss:$8 sps:$4 sm:$0xff]   ;;  %vm8207_vm8 = vmneg %vm10651_vm6 }
  0xcf   : > { %v2448_v45 = vmul.f32 0.25, %v2384_v38  ;;  %v2511_v51 = vadd.f32 %v2447_v18, %v10500_v62  ;;  %v14787_v40 = vsel %vm10682_vm14, 4294967295, %v14786_v40  ;;  %v2896_v0 = vadd.f32 %v2832_v53, %v10533_v9  ;;  %6116 = vmatpush1.bf16.msra.mxu0 %v9646_v27  ;;  %4225 = vmatprep.subr.bf16.mxu1 %v9651_v25 }
  0xd0   : > { %14788 = vst [vmem:[#allocation26_spill] sm:$0xff] %v14787_v40  ;;  %v2193_v37 = vadd.f32 %v10617_v6, %v2065_v41  ;;  %v2705_v28 = vadd.f32 %v10631_v49, %v2577_v13  ;;  %v10691_v62 = vadd.f32 %v10579_v61, %v10378_v16  ;;  %v14790_v35 = vsel %vm10697_vm5, 4294967295, %v14789_v35  ;;  %v9649_v16 = vld [vmem:[#allocation6 + $0x340] ss:$8 sps:$4 sm:$0xff]   ;;  %6117 = vmatprep.subr.bf16.mxu0 %v9654_v46 }
  0xd1   : > { %14791 = vst [vmem:[#allocation27_spill] sm:$0xff] %v14790_v35  ;;  %v2512_v32 = vadd.f32 %v2448_v45, %v10515_v22  ;;  %v10704_v60 = vadd.f32 %v10647_v50, %v10388_v20  ;;  %v1688_v9 = vrot.slane %v10589_v52, 1  ;;  %v10708_v13 = vmul.f32 0.25, %v10673_v33  ;;  %v9652_v22 = vld [vmem:[#allocation6 + $0x440] ss:$8 sps:$4 sm:$0xff]   ;;  %8078 = vmatmul.mubr.msk.bf16.gmra.mrb[8].mxu1 %vm10682_vm14, %v10602_v57  ;;  %5296 = vmatmul.mubr.bf16.gmra.mrb[8].mxu0 %v10604_v29 }
  0xd2   : > { %v10710_v53 = vpack.c.bf16 %v2194_v10, %v2193_v37  ;;  %v10712_v55 = vpack.c.bf16 %v2896_v0, %v2895_v48  ;;  %v10714_v18 = vpack.c.bf16 %v2706_v14, %v2705_v28  ;;  %v1497_v43 = vrot.slane %v10691_v62, 7  ;;  %v9657_v45 = vld [vmem:[#allocation6 + $0x354] ss:$8 sps:$4 sm:$0xff]   ;;  %4226 = vmatpush1.bf16.msra.mxu1 %v9649_v16  ;;  %v9663_v16 = vld [vmem:[#allocation6 + $0x364] ss:$8 sps:$4 sm:$0xff]  }
  0xd3   : > { %v10717_v20 = vpack.c.bf16 %v2512_v32, %v2511_v51  ;;  %v14309_v41 = vrot.slane %v10704_v60, 7  ;;  %v10721_v38 = vmul.f32 0.75, %v10691_v62  ;;  %v10724_v10 = vmul.f32 0.75, %v10704_v60  ;;  %v10749_v0 = vld [vmem:[%s10212_s6 + $0x38] sm:$0xff]  ;;  %6118 = vmatpush1.bf16.msra.mxu0 %v9652_v22  ;;  %4227 = vmatprep.subr.bf16.mxu1 %v9657_v45 }
  0xd4   : > { %14792 = vst [vmem:[#allocation28_spill] sm:$0xff] %v10710_v53  ;;  %14793 = vst [vmem:[#allocation29_spill] sm:$0xff] %v10712_v55  ;;  %v14795_v48 = vand.u32 15, %v10264_v47  ;;  %v14798_v27 = vrot.slane %v10589_v52, 7  ;;  %v14799_v51 = vrot.slane %v10585_v30, 1  ;;  %v1690_v25 = vrot.slane %v10691_v62, 1  ;;  %3926 = vmatprep.mubr.bf16.mxu1 %v10710_v53  ;;  %8458 = vmatprep.mubr.msk.bf16.mxu0 %vm10697_vm5, %v10712_v55 }
  0xd5   : > { %14794 = vst [vmem:[#allocation30_spill] sm:$0xff] %v10714_v18  ;;  %v10746_v46 = vmul.f32 0.25, %v10691_v62  ;;  %v14800_v28 = vand.u32 15, %v10261_v44  ;;  %v1500_v30 = vsel %vm14307_vm0, %v1497_v43, %v14309_v41  ;;  %6119 = vmatprep.subr.bf16.mxu0 %v9660_v12  ;;  %v14807_v41 = vmov 0  ;;  %v9661_v12 = vld [vmem:[#allocation6 + $0x360] ss:$8 sps:$4 sm:$0xff]  }
  0xd6   : > { %vm10728_vm13 = vcmp.eq.s32.totalorder %v14795_v48, 15  ;;  %v1498_v47 = vsel %vm14307_vm0, %v14798_v27, %v1497_v43  ;;  %v1689_v37 = vsel %vm14322_vm2, %v14799_v51, %v1688_v9  ;;  %v9655_v51 = vld [vmem:[#allocation6 + $0x350] ss:$8 sps:$4 sm:$0xff]   ;;  %v2068_v53 = vmul.f32 0.25, %v1500_v30 }
  0xd7   : > { %vm10753_vm7 = vcmp.eq.s32.totalorder %v14800_v28, 0  ;;  %v2003_v48 = vsel %vm10624_vm4, %v10691_v62, %v1498_v47  ;;  %v2833_v27 = vmul.f32 0.75, %v1689_v37  ;;  %v2579_v44 = vmul.f32 0.75, %v1498_v47  ;;  %v9658_v43 = vld [vmem:[#allocation6 + $0x450] ss:$8 sps:$4 sm:$0xff]   ;;  %4228 = vmatpush1.bf16.msra.mxu1 %v9655_v51 }
  0xd8   : > { %v2067_v28 = vmul.f32 0.25, %v2003_v48  ;;  %v2580_v40 = vmul.f32 0.75, %v1500_v30  ;;  %v1691_v35 = vsel %vm14322_vm2, %v1688_v9, %v1690_v25  ;;  %vm14803_vm0 = vmmov 1   ;;  %6120 = vmatpush1.bf16.msra.mxu0 %v9658_v43  ;;  %4229 = vmatprep.subr.bf16.mxu1 %v9663_v16  ;;  %v9672_v51 = vld [vmem:[#allocation6 + $0x474] ss:$8 sps:$4 sm:$0xff]  }
  0xd9   : > { %vm10776_vm10 = vmpackc.low %vm14803_vm0, %vm8079_vm15  ;;  %v14804_v62 = vmov 0  ;;  %v2386_v47 = vsel %vm10651_vm6, %v10589_v52, %v1691_v35  ;;  %v2834_v30 = vmul.f32 0.75, %v1691_v35  ;;  %v2897_v9 = vadd.f32 %v2833_v27, %v10631_v49  ;;  %5306 = vmatmul.mubr.bf16.gmra.mrb[12].mxu0 %v10717_v20 }
  0xda   : > { %v14805_v62 = vsel %vm10776_vm10, 4294967295, %v14804_v62  ;;  %v10785_v48 = vmul.f32 0.25, %v10704_v60  ;;  %v2195_v24 = vadd.f32 %v10721_v38, %v2067_v28  ;;  %v2196_v22 = vadd.f32 %v10724_v10, %v2068_v53  ;;  %vm10793_vm12 = vmpackc.low %vm8207_vm8, %vm14803_vm0  ;;  %v9666_v28 = vld [vmem:[#allocation6 + $0x464] ss:$8 sps:$4 sm:$0xff]   ;;  %8082 = vmatmul.mubr.msk.bf16.gmra.mrb[12].mxu1 %vm10776_vm10, %v10714_v18 }
  0xdb   : > { %14806 = vst [vmem:[#allocation31_spill] sm:$0xff] %v14805_v62  ;;  %v14808_v41 = vsel %vm10793_vm12, 4294967295, %v14807_v41  ;;  %v2707_v52 = vadd.f32 %v10746_v46, %v2579_v44  ;;  %v2449_v49 = vmul.f32 0.25, %v1689_v37  ;;  %v14810_v35 = vand.u32 15, %v10279_v63  ;;  %vm10810_vm6 = vmpackc.low %vm14803_vm0, %vm8083_vm9  ;;  %v9664_v44 = vld [vmem:[#allocation6 + $0x460] ss:$8 sps:$4 sm:$0xff]   ;;  %6121 = vmatprep.subr.bf16.mxu0 %v9666_v28  ;;  %4230 = vmatpush1.bf16.msra.mxu1 %v9661_v12 }
  0xdc   : > { %14809 = vst [vmem:[#allocation32_spill] sm:$0xff] %v14808_v41  ;;  %v2898_v53 = vadd.f32 %v2834_v30, %v10634_v34  ;;  %v2708_v27 = vadd.f32 %v10785_v48, %v2580_v40  ;;  %v14813_v19 = vmov 0  ;;  %v2450_v37 = vmul.f32 0.25, %v2386_v47  ;;  %v9669_v30 = vld [vmem:[#allocation6 + $0x374] ss:$8 sps:$4 sm:$0xff]   ;;  %6122 = vmatpush1.bf16.msra.mxu0 %v9664_v44 }
  0xdd   : > { %vm10800_vm15 = vcmp.eq.s32.totalorder %v14810_v35, 15  ;;  %v14814_v19 = vsel %vm10810_vm6, 4294967295, %v14813_v19  ;;  %v10815_v63 = vmul.f32 0.25, %v10749_v0  ;;  %v10817_v35 = vpack.c.bf16 %v2196_v22, %v2195_v24  ;;  %4231 = vmatprep.subr.bf16.mxu1 %v9669_v30  ;;  %6123 = vmatprep.subr.bf16.mxu0 %v9672_v51 }
  0xde   : > { %14815 = vst [vmem:[#allocation33_spill] sm:$0xff] %v14814_v19  ;;  %v2513_v34 = vadd.f32 %v2449_v49, %v10617_v6  ;;  %v10822_v40 = vadd.f32 %v10579_v61, %v10708_v13  ;;  %v1692_v39 = vrot.slane %v10704_v60, 1  ;;  %v10825_v55 = vpack.c.bf16 %v2898_v53, %v2897_v9  ;;  %v9667_v9 = vld [vmem:[#allocation6 + $0x370] ss:$8 sps:$4 sm:$0xff]  }
  0xdf   : > { %14816 = vst [vmem:[#allocation34_spill] sm:$0xff] %v10817_v35  ;;  %v10827_v47 = vpack.c.bf16 %v2708_v27, %v2707_v52  ;;  %v2514_v57 = vadd.f32 %v2450_v37, %v10620_v54  ;;  %v10832_v24 = vadd.f32 %v10647_v50, %v10815_v63  ;;  %v14819_v6 = vand.u32 15, %v10274_v58  ;;  %3936 = vmatprep.mubr.bf16.mxu1 %v10817_v35  ;;  %v9675_v35 = vld [vmem:[#allocation6 + $0x384] ss:$8 sps:$4 sm:$0xff]  }
  0xe0   : > { %14817 = vst [vmem:[#allocation35_spill] sm:$0xff] %v10825_v55  ;;  %v1501_v54 = vrot.slane %v10822_v40, 7  ;;  %v10846_v43 = vmul.f32 0.75, %v10822_v40  ;;  %v1693_v50 = vsel %vm14322_vm2, %v1690_v25, %v1692_v39  ;;  %v14314_v58 = vrot.slane %v10822_v40, 1  ;;  %8462 = vmatprep.mubr.msk.bf16.mxu0 %vm10793_vm12, %v10825_v55  ;;  %4232 = vmatpush1.bf16.msra.mxu1 %v9667_v9 }
  0xe1   : > { %14818 = vst [vmem:[#allocation36_spill] sm:$0xff] %v10827_v47  ;;  %vm10836_vm9 = vcmp.eq.s32.totalorder %v14819_v6, 0  ;;  %v10856_v16 = vpack.c.bf16 %v2514_v57, %v2513_v34  ;;  %v14321_v22 = vrot.slane %v10832_v24, 7  ;;  %v10860_v52 = vmul.f32 0.75, %v10832_v24  ;;  %v9670_v34 = vld [vmem:[#allocation6 + $0x470] ss:$8 sps:$4 sm:$0xff]   ;;  %4233 = vmatprep.subr.bf16.mxu1 %v9675_v35 }
  0xe2   : > { %v2835_v25 = vmul.f32 0.75, %v1693_v50  ;;  %v14822_v49 = vrot.slane %v10704_v60, 7  ;;  %vm14823_vm4 = vcmask 1040384   ;;  %v1695_v27 = vsel %vm14322_vm2, %v1692_v39, %v14314_v58  ;;  %vm14829_vm2 = vmneg %vm10753_vm7  ;;  %6124 = vmatpush1.bf16.msra.mxu0 %v9670_v34  ;;  %8086 = vmatmul.mubr.msk.bf16.gmra.mrb[16].mxu1 %vm10810_vm6, %v10827_v47  ;;  %v15508_v31 = vld [vmem:[#allocation31_spill] sm:$0xff] }
  0xe3   : > { %v10871_v57 = vmul.f32 0.25, %v10822_v40  ;;  %v10874_v37 = vmul.f32 0.25, %v10832_v24  ;;  %vm14824_vm8 = vmmov %vm14823_vm4  ;;  %v2388_v39 = vsel %vm10728_vm13, %v10704_v60, %v1695_v27  ;;  %v2836_v58 = vmul.f32 0.75, %v1695_v27  ;;  %v10898_v60 = vld [vmem:[%s10212_s6 + $0x48] sm:$0xff]  ;;  %5316 = vmatmul.mubr.bf16.gmra.mrb[16].mxu0 %v10856_v16 }
  0xe4   : > { %v1502_v53 = vsel %vm14823_vm4, %v14822_v49, %v1501_v54  ;;  %v1504_v6 = vsel %vm14824_vm8, %v1501_v54, %v14321_v22  ;;  %v2899_v55 = vadd.f32 %v2835_v25, %v10746_v46  ;;  %vm14825_vm4 = vmneg %vm10728_vm13  ;;  %v14826_v54 = vmov 0  ;;  %v10895_v22 = vld [vmem:[%s10212_s6 + $0x40] sm:$0xff] }
  0xe5   : > { %v2005_v49 = vsel %vm10753_vm7, %v10822_v40, %v1502_v53  ;;  %v2070_v41 = vmul.f32 0.25, %v1504_v6  ;;  %v2582_v12 = vmul.f32 0.75, %v1504_v6  ;;  %vm10890_vm8 = vmpackc.low %vm14825_vm4, %vm14803_vm0  ;;  %v2900_v44 = vadd.f32 %v2836_v58, %v10785_v48 }
  0xe6   : > { %v2069_v28 = vmul.f32 0.25, %v2005_v49  ;;  %v14827_v54 = vsel %vm10890_vm8, 4294967295, %v14826_v54  ;;  %v2581_v30 = vmul.f32 0.75, %v1502_v53  ;;  %vm10905_vm12 = vmpackc.low %vm14803_vm0, %vm14829_vm2  ;;  %v14830_v46 = vmov 0 }
  0xe7   : > { %14828 = vst [vmem:[#allocation37_spill] sm:$0xff] %v14827_v54  ;;  %v14831_v46 = vsel %vm10905_vm12, 4294967295, %v14830_v46  ;;  %v2451_v14 = vmul.f32 0.25, %v1693_v50  ;;  %v2452_v25 = vmul.f32 0.25, %v2388_v39  ;;  %vm8215_vm13 = vmneg %vm10800_vm15  ;;  %v14833_v27 = vand.u32 15, %v10285_v2 }
  0xe8   : > { %14832 = vst [vmem:[#allocation38_spill] sm:$0xff] %v14831_v46  ;;  %v2197_v48 = vadd.f32 %v10846_v43, %v2069_v28  ;;  %v2198_v32 = vadd.f32 %v10860_v52, %v2070_v41  ;;  %v2710_v58 = vadd.f32 %v10874_v37, %v2582_v12  ;;  %v10921_v53 = vmul.f32 0.75, %v10673_v33  ;;  %v9678_v2 = vld [vmem:[#allocation6 + $0x484] ss:$8 sps:$4 sm:$0xff]   ;;  %v9673_v12 = vld [vmem:[#allocation6 + $0x380] ss:$8 sps:$4 sm:$0xff]  }
  0xe9   : > { %vm10913_vm4 = vcmp.eq.s32.totalorder %v14833_v27, 15  ;;  %v14836_v50 = vand.u32 15, %v10282_v1  ;;  %v10929_v49 = vpack.c.bf16 %v2900_v44, %v2899_v55  ;;  %v2709_v39 = vadd.f32 %v10871_v57, %v2581_v30  ;;  %v9676_v33 = vld [vmem:[#allocation6 + $0x480] ss:$8 sps:$4 sm:$0xff]   ;;  %6125 = vmatprep.subr.bf16.mxu0 %v9678_v2  ;;  %4234 = vmatpush1.bf16.msra.mxu1 %v9673_v12 }
  0xea   : > { %v2515_v28 = vadd.f32 %v2451_v14, %v10721_v38  ;;  %v2516_v41 = vadd.f32 %v2452_v25, %v10724_v10  ;;  %v10938_v1 = vpack.c.bf16 %v2198_v32, %v2197_v48  ;;  %v365_v55 = vmul.f32 0.75, %v10749_v0  ;;  %6126 = vmatpush1.bf16.msra.mxu0 %v9676_v33 }
  0xeb   : > { %vm10925_vm2 = vcmp.eq.s32.totalorder %v14836_v50, 0  ;;  %14839 = vst [vmem:[#allocation39_spill] sm:$0xff] %v10929_v49  ;;  %v396_v9 = vadd.f32 %v10921_v53, %v10491_v36  ;;  %v1696_v38 = vrot.slane %v10832_v24, 1  ;;  %8466 = vmatprep.mubr.msk.bf16.mxu0 %vm10890_vm8, %v10929_v49  ;;  %v10949_v10 = vpack.c.bf16 %v2710_v58, %v2709_v39  ;;  %vm10972_vm8 = vmpackc.low %vm8215_vm13, %vm14803_vm0 }
  0xec   : > { %14840 = vst [vmem:[#allocation40_spill] sm:$0xff] %v10938_v1  ;;  %v10951_v34 = vpack.c.bf16 %v2516_v41, %v2515_v28  ;;  %v10954_v44 = vmul.f32 0.25, %v10895_v22  ;;  %v10957_v0 = vmul.f32 0.25, %v10898_v60  ;;  %3946 = vmatprep.mubr.bf16.mxu1 %v10938_v1  ;;  %v10961_v36 = vadd.f32 %v365_v55, %v10494_v42 }
  0xed   : > { %14841 = vst [vmem:[#allocation41_spill] sm:$0xff] %v10949_v10  ;;  %v1505_v30 = vrot.slane %v396_v9, 7  ;;  %v10963_v14 = vmul.f32 0.75, %v396_v9  ;;  %v14842_v25 = vrot.slane %v10822_v40, 1  ;;  %vm14843_vm7 = vcmask 1046528   ;;  %8090 = vmatmul.mubr.msk.bf16.gmra.mrb[20].mxu1 %vm10905_vm12, %v10949_v10 }
  0xee   : > { %v1698_v48 = vrot.slane %v396_v9, 1  ;;  %v14844_v35 = vmov 0  ;;  %v10976_v42 = vmul.f32 0.25, %v396_v9  ;;  %v14846_v40 = vrot.slane %v10832_v24, 7  ;;  %vm14848_vm13 = vmmov %vm14843_vm7  ;;  %5326 = vmatmul.mubr.bf16.gmra.mrb[20].mxu0 %v10951_v34 }
  0xef   : > { %v1697_v27 = vsel %vm14843_vm7, %v14842_v25, %v1696_v38  ;;  %v14845_v35 = vsel %vm10972_vm8, 4294967295, %v14844_v35  ;;  %vm14847_vm6 = vcmask 1040384   ;;  %v1507_v2 = vrot.slane %v10961_v36, 7  ;;  %vm14849_vm7 = vmneg %vm10836_vm9 }
  0xf0   : > { %v2837_v32 = vmul.f32 0.75, %v1697_v27  ;;  %v2453_v58 = vmul.f32 0.25, %v1697_v27  ;;  %v1506_v50 = vsel %vm14847_vm6, %v14846_v40, %v1505_v30  ;;  %v10983_v39 = vmul.f32 0.75, %v10961_v36  ;;  %vm10996_vm6 = vmpackc.low %vm14803_vm0, %vm14849_vm7 }
  0xf1   : > { %v10986_v28 = vmul.f32 0.25, %v10961_v36  ;;  %v2007_v41 = vsel %vm10836_vm9, %v396_v9, %v1506_v50  ;;  %v1699_v25 = vsel %vm14848_vm13, %v1696_v38, %v1698_v48  ;;  %v2583_v33 = vmul.f32 0.75, %v1506_v50  ;;  %vm8219_vm13 = vmneg %vm10913_vm4  ;;  %v9681_v38 = vld [vmem:[#allocation6 + $0x394] ss:$8 sps:$4 sm:$0xff]  }
  0xf2   : > { %v2901_v12 = vadd.f32 %v2837_v32, %v10871_v57  ;;  %v14850_v27 = vmov 0  ;;  %vm14853_vm10 = vcmask 1040384   ;;  %v2071_v1 = vmul.f32 0.25, %v2007_v41  ;;  %v9679_v57 = vld [vmem:[#allocation6 + $0x390] ss:$8 sps:$4 sm:$0xff]   ;;  %4235 = vmatprep.subr.bf16.mxu1 %v9681_v38 }
  0xf3   : > { %v14851_v27 = vsel %vm10996_vm6, 4294967295, %v14850_v27  ;;  %v1508_v40 = vsel %vm14853_vm10, %v1505_v30, %v1507_v2  ;;  %v2390_v9 = vsel %vm10800_vm15, %v10832_v24, %v1699_v25  ;;  %v2838_v54 = vmul.f32 0.75, %v1699_v25  ;;  %v9682_v30 = vld [vmem:[#allocation6 + $0x490] ss:$8 sps:$4 sm:$0xff]   ;;  %4236 = vmatpush1.bf16.msra.mxu1 %v9679_v57  ;;  %vm11050_vm15 = vmpackc.low %vm8219_vm13, %vm14803_vm0 }
  0xf4   : > { %14852 = vst [vmem:[#allocation42_spill] sm:$0xff] %v14851_v27  ;;  %v2072_v61 = vmul.f32 0.25, %v1508_v40  ;;  %v2584_v32 = vmul.f32 0.75, %v1508_v40  ;;  %v2711_v50 = vadd.f32 %v10976_v42, %v2583_v33  ;;  %v2454_v49 = vmul.f32 0.25, %v2390_v9  ;;  %v9684_v33 = vld [vmem:[#allocation6 + $0x494] ss:$8 sps:$4 sm:$0xff]   ;;  %vm14866_vm13 = vmneg %vm10925_vm2 }
  0xf5   : > { %v2199_v45 = vadd.f32 %v10963_v14, %v2071_v1  ;;  %v2902_v24 = vadd.f32 %v2838_v54, %v10874_v37  ;;  %v2517_v41 = vadd.f32 %v2453_v58, %v10846_v43  ;;  %v1700_v25 = vrot.slane %v10961_v36, 1  ;;  %6127 = vmatprep.subr.bf16.mxu0 %v9684_v33 }
  0xf6   : > { %v2200_v40 = vadd.f32 %v10983_v39, %v2072_v61  ;;  %v2712_v9 = vadd.f32 %v10986_v28, %v2584_v32  ;;  %v2518_v19 = vadd.f32 %v2454_v49, %v10860_v52  ;;  %v430_v46 = vadd.f32 %v10921_v53, %v10954_v44  ;;  %6128 = vmatpush1.bf16.msra.mxu0 %v9682_v30 }
  0xf7   : > { %v11022_v10 = vpack.c.bf16 %v2902_v24, %v2901_v12  ;;  %v11025_v1 = vadd.f32 %v365_v55, %v10957_v0  ;;  %vm14854_vm10 = vcmask 1046528   ;;  %v11029_v37 = vmul.f32 0.75, %v10895_v22 }
  0xf8   : > { %v1701_v43 = vsel %vm14854_vm10, %v1698_v48, %v1700_v25  ;;  %v11031_v54 = vpack.c.bf16 %v2200_v40, %v2199_v45  ;;  %v11033_v58 = vpack.c.bf16 %v2712_v9, %v2711_v50  ;;  %v11035_v52 = vpack.c.bf16 %v2518_v19, %v2517_v41 }
  0xf9   : > { %v1509_v53 = vrot.slane %v430_v46, 7  ;;  %8470 = vmatprep.mubr.msk.bf16.mxu0 %vm10972_vm8, %v11022_v10  ;;  %v1511_v49 = vrot.slane %v11025_v1, 7  ;;  %v11041_v55 = vmul.f32 0.75, %v430_v46  ;;  %v11044_v22 = vmul.f32 0.75, %v11025_v1  ;;  %vm11075_vm8 = vmpackc.low %vm14803_vm0, %vm14866_vm13 }
  0xfa   : > { %14855 = vst [vmem:[#allocation43_spill] sm:$0xff] %v11031_v54  ;;  %14856 = vst [vmem:[#allocation44_spill] sm:$0xff] %v11033_v58  ;;  %v1702_v48 = vrot.slane %v430_v46, 1  ;;  %v14857_v19 = vmov 0  ;;  %v14859_v12 = vand.u32 15, %v10288_v3  ;;  %v14862_v38 = vand.u32 15, %v10291_v4  ;;  %3956 = vmatprep.mubr.bf16.mxu1 %v11031_v54  ;;  %5336 = vmatmul.mubr.bf16.gmra.mrb[24].mxu0 %v11035_v52 }
  0xfb   : > { %v14858_v19 = vsel %vm11050_vm15, 4294967295, %v14857_v19  ;;  %vm14865_vm9 = vcmask 1040384   ;;  %v2839_v50 = vmul.f32 0.75, %v1701_v43  ;;  %v2649_v30 = vmul.f32 0.25, %v430_v46  ;;  %8094 = vmatmul.mubr.msk.bf16.gmra.mrb[24].mxu1 %vm10996_vm6, %v11033_v58 }
  0xfc   : > { %vm11056_vm7 = vcmp.eq.s32.totalorder %v14859_v12, 0  ;;  %vm11062_vm10 = vcmp.eq.s32.totalorder %v14862_v38, 15  ;;  %v1510_v32 = vsel %vm14865_vm9, %v1507_v2, %v1509_v53  ;;  %v11069_v45 = vmul.f32 0.25, %v11025_v1  ;;  %vm14870_vm12 = vmmov %vm14865_vm9 }
  0xfd   : > { %v14867_v3 = vmov 0  ;;  %v1512_v4 = vsel %vm14870_vm12, %v1509_v53, %v1511_v49  ;;  %v2009_v24 = vsel %vm10925_vm2, %v430_v46, %v1510_v32  ;;  %vm14871_vm5 = vcmask 1046528   ;;  %vm8223_vm12 = vmneg %vm11062_vm10 }
  0xfe   : > { %v14868_v3 = vsel %vm11075_vm8, 4294967295, %v14867_v3  ;;  %v1703_v2 = vsel %vm14871_vm5, %v1700_v25, %v1702_v48  ;;  %v2585_v41 = vmul.f32 0.75, %v1510_v32  ;;  %v2073_v33 = vmul.f32 0.25, %v2009_v24  ;;  %vm8099_vm2 = vmneg %vm11056_vm7 }
  0xff   : > { %14869 = vst [vmem:[#allocation45_spill] sm:$0xff] %v14868_v3  ;;  %v2074_v40 = vmul.f32 0.25, %v1512_v4  ;;  %v2586_v9 = vmul.f32 0.75, %v1512_v4  ;;  %v2392_v12 = vsel %vm10913_vm4, %v10961_v36, %v1703_v2  ;;  %v2840_v53 = vmul.f32 0.75, %v1703_v2  ;;  %vm14875_vm4 = vmmov %vm14865_vm9 }
 0x100   : > { %v2903_v6 = vadd.f32 %v2839_v50, %v10976_v42  ;;  %v2713_v46 = vadd.f32 %v2649_v30, %v2585_v41  ;;  %v2455_v38 = vmul.f32 0.25, %v1701_v43  ;;  %v2201_v25 = vadd.f32 %v11041_v55, %v2073_v33  ;;  %vm14876_vm9 = vmmov %vm14871_vm5 }
 0x101   : > { %v2202_v32 = vadd.f32 %v11044_v22, %v2074_v40  ;;  %v2714_v4 = vadd.f32 %v11069_v45, %v2586_v9  ;;  %v2456_v24 = vmul.f32 0.25, %v2392_v12  ;;  %v2904_v51 = vadd.f32 %v2840_v53, %v10986_v28 }
 0x102   : > { %v2519_v36 = vadd.f32 %v2455_v38, %v10963_v14  ;;  %v367_v27 = vmul.f32 0.75, %v10898_v60  ;;  %v11099_v2 = vadd.f32 %v11029_v37, %v10708_v13  ;;  %v1704_v41 = vrot.slane %v11025_v1, 1 }
 0x103   : > { %v11101_v42 = vpack.c.bf16 %v2202_v32, %v2201_v25  ;;  %v11103_v43 = vpack.c.bf16 %v2714_v4, %v2713_v46  ;;  %v2520_v50 = vadd.f32 %v2456_v24, %v10983_v39  ;;  %v11107_v33 = vpack.c.bf16 %v2904_v51, %v2903_v6  ;;  %v306_v6 = vld [vmem:[%s10212_s6 + $0x50] sm:$0xff]  ;;  %v307_v46 = vld [vmem:[%s10212_s6 + $0x58] sm:$0xff] }
 0x104   : > { %v11110_v28 = vadd.f32 %v367_v27, %v10815_v63  ;;  %v1513_v60 = vrot.slane %v11099_v2, 7  ;;  %v11114_v13 = vmul.f32 0.75, %v11099_v2  ;;  %v1705_v39 = vsel %vm14871_vm5, %v1702_v48, %v1704_v41  ;;  %vm14880_vm5 = vmmov %vm14875_vm4 }
 0x105   : > { %14872 = vst [vmem:[#allocation46_spill] sm:$0xff] %v11101_v42  ;;  %14873 = vst [vmem:[#allocation47_spill] sm:$0xff] %v11103_v43  ;;  %3966 = vmatprep.mubr.bf16.mxu1 %v11101_v42  ;;  %v11117_v14 = vpack.c.bf16 %v2520_v50, %v2519_v36  ;;  %v1706_v40 = vrot.slane %v11099_v2, 1  ;;  %v11124_v63 = vmul.f32 0.25, %v11099_v2  ;;  %8474 = vmatprep.mubr.msk.bf16.mxu0 %vm11050_vm15, %v11107_v33  ;;  %v2841_v48 = vmul.f32 0.75, %v1705_v39 }
 0x106   : > { %v1514_v9 = vsel %vm14875_vm4, %v1511_v49, %v1513_v60  ;;  %v14357_v12 = vrot.slane %v11110_v28, 7  ;;  %v11132_v53 = vmul.f32 0.75, %v11110_v28  ;;  %v11143_v49 = vmul.f32 0.25, %v11110_v28  ;;  %8098 = vmatmul.mubr.msk.bf16.gmra.mrb[28].mxu1 %vm11075_vm8, %v11103_v43 }
 0x107   : > { %14874 = vst [vmem:[#allocation48_spill] sm:$0xff] %v11117_v14  ;;  %v2011_v38 = vsel %vm11056_vm7, %v11099_v2, %v1514_v9  ;;  %v1707_v25 = vsel %vm14876_vm9, %v1704_v41, %v1706_v40  ;;  %v2587_v32 = vmul.f32 0.75, %v1514_v9  ;;  %v14877_v4 = vand.u32 15, %v10294_v5  ;;  %5346 = vmatmul.mubr.bf16.gmra.mrb[28].mxu0 %v11117_v14  ;;  %vm11175_vm9 = vmpackc.low %vm8223_vm12, %vm14803_vm0 }
 0x108   : > { %v1516_v51 = vsel %vm14880_vm5, %v1513_v60, %v14357_v12  ;;  %v2075_v36 = vmul.f32 0.25, %v2011_v38  ;;  %v2394_v2 = vsel %vm11062_vm10, %v11025_v1, %v1707_v25  ;;  %v2842_v5 = vmul.f32 0.75, %v1707_v25  ;;  %vm11190_vm5 = vmpackc.low %vm14803_vm0, %vm8099_vm2 }
 0x109   : > { %vm11147_vm13 = vcmp.eq.s32.totalorder %v14877_v4, 0  ;;  %v14881_v50 = vand.u32 15, %v10298_v8  ;;  %v2076_v9 = vmul.f32 0.25, %v1516_v51  ;;  %v2588_v4 = vmul.f32 0.75, %v1516_v51 }
 0x10a   : > { %v2905_v3 = vadd.f32 %v2841_v48, %v2649_v30  ;;  %v2715_v43 = vadd.f32 %v11124_v63, %v2587_v32  ;;  %v2203_v14 = vadd.f32 %v11114_v13, %v2075_v36  ;;  %v2906_v60 = vadd.f32 %v2842_v5, %v11069_v45  ;;  %v9687_v36 = vld [vmem:[#allocation6 + $0x3a4] ss:$8 sps:$4 sm:$0xff]  }
 0x10b   : > { %vm11163_vm4 = vcmp.eq.s32.totalorder %v14881_v50, 15  ;;  %v2457_v38 = vmul.f32 0.25, %v1705_v39  ;;  %v2458_v12 = vmul.f32 0.25, %v2394_v2  ;;  %v2204_v1 = vadd.f32 %v11132_v53, %v2076_v9  ;;  %v9685_v50 = vld [vmem:[#allocation6 + $0x3a0] ss:$8 sps:$4 sm:$0xff]   ;;  %4237 = vmatprep.subr.bf16.mxu1 %v9687_v36 }
 0x10c   : > { %v14884_v8 = vmov 0  ;;  %v2716_v30 = vadd.f32 %v11143_v49, %v2588_v4  ;;  %v11180_v48 = vmul.f32 0.25, %v306_v6  ;;  %v11182_v25 = vmul.f32 0.25, %v307_v46  ;;  %v9688_v9 = vld [vmem:[#allocation6 + $0x4a0] ss:$8 sps:$4 sm:$0xff]   ;;  %4238 = vmatpush1.bf16.msra.mxu1 %v9685_v50 }
 0x10d   : > { %v14885_v8 = vsel %vm11175_vm9, 4294967295, %v14884_v8  ;;  %v11184_v32 = vpack.c.bf16 %v2906_v60, %v2905_v3  ;;  %v14888_v45 = vmov 0  ;;  %v2521_v61 = vadd.f32 %v2457_v38, %v11041_v55  ;;  %v9690_v4 = vld [vmem:[#allocation6 + $0x4a4] ss:$8 sps:$4 sm:$0xff]  }
 0x10e   : > { %14886 = vst [vmem:[#allocation49_spill] sm:$0xff] %v14885_v8  ;;  %v14889_v45 = vsel %vm11190_vm5, 4294967295, %v14888_v45  ;;  %v2522_v39 = vadd.f32 %v2458_v12, %v11044_v22  ;;  %v1708_v51 = vrot.slane %v11110_v28, 1  ;;  %v11197_v2 = vpack.c.bf16 %v2204_v1, %v2203_v14  ;;  %6129 = vmatprep.subr.bf16.mxu0 %v9690_v4 }
 0x10f   : > { %14887 = vst [vmem:[#allocation50_spill] sm:$0xff] %v11184_v32  ;;  %14890 = vst [vmem:[#allocation51_spill] sm:$0xff] %v14889_v45  ;;  %v11199_v5 = vpack.c.bf16 %v2716_v30, %v2715_v43  ;;  %v11203_v57 = vadd.f32 %v11029_v37, %v11180_v48  ;;  %v11206_v3 = vadd.f32 %v367_v27, %v11182_v25  ;;  %8478 = vmatprep.mubr.msk.bf16.mxu0 %vm11175_vm9, %v11184_v32  ;;  %vm14894_vm7 = vcmask 1046528  }
 0x110   : > { %14891 = vst [vmem:[#allocation52_spill] sm:$0xff] %v11197_v2  ;;  %v11211_v55 = vpack.c.bf16 %v2522_v39, %v2521_v61  ;;  %v1709_v22 = vsel %vm14894_vm7, %v1706_v40, %v1708_v51  ;;  %v11214_v43 = vmul.f32 0.75, %v306_v6  ;;  %v11216_v14 = vmul.f32 0.75, %v307_v46  ;;  %3976 = vmatprep.mubr.bf16.mxu1 %v11197_v2  ;;  %6130 = vmatpush1.bf16.msra.mxu0 %v9688_v9  ;;  %v9696_v2 = vld [vmem:[#allocation6 + $0x4b4] ss:$8 sps:$4 sm:$0xff]  }
 0x111   : > { %14892 = vst [vmem:[#allocation53_spill] sm:$0xff] %v11199_v5  ;;  %v14895_v37 = vand.u32 15, %v10301_v11  ;;  %v1517_v12 = vrot.slane %v11203_v57, 7  ;;  %v1519_v60 = vrot.slane %v11206_v3, 7  ;;  %v11228_v38 = vmul.f32 0.75, %v11203_v57  ;;  %8102 = vmatmul.mubr.msk.bf16.gmra.mrb[32].mxu1 %vm11190_vm5, %v11199_v5  ;;  %vm8103_vm5 = vmneg %vm11147_vm13  ;;  %6131 = vmatprep.subr.bf16.mxu0 %v9696_v2 }
 0x112   : > { %14893 = vst [vmem:[#allocation54_spill] sm:$0xff] %v11211_v55  ;;  %v11231_v40 = vmul.f32 0.75, %v11206_v3  ;;  %5356 = vmatmul.mubr.bf16.gmra.mrb[32].mxu0 %v11211_v55  ;;  %v1710_v11 = vrot.slane %v11203_v57, 1  ;;  %v2843_v6 = vmul.f32 0.75, %v1709_v22  ;;  %v11239_v46 = vmul.f32 0.25, %v11203_v57 }
 0x113   : > { %vm11220_vm10 = vcmp.eq.s32.totalorder %v14895_v37, 0  ;;  %v11242_v1 = vmul.f32 0.25, %v11206_v3  ;;  %v14898_v30 = vrot.slane %v11110_v28, 7  ;;  %vm14899_vm12 = vcmask 1040384  }
 0x114   : > { %vm14900_vm2 = vmmov %vm14899_vm12  ;;  %v2459_v36 = vmul.f32 0.25, %v1709_v22  ;;  %v11250_v4 = vadd.f32 %v11214_v43, %v10954_v44  ;;  %v14901_v37 = vand.u32 15, %v10317_v23  ;;  %v14905_v41 = vmov 0 }
 0x115   : > { %v1518_v61 = vsel %vm14899_vm12, %v14898_v30, %v1517_v12  ;;  %v1520_v39 = vsel %vm14900_vm2, %v1517_v12, %v1519_v60  ;;  %vm14904_vm12 = vcmask 1046528   ;;  %vm8227_vm2 = vmneg %vm11163_vm4  ;;  %v14948_v2 = vmov 0 }
 0x116   : > { %vm11254_vm7 = vcmp.eq.s32.totalorder %v14901_v37, 15  ;;  %v2013_v5 = vsel %vm11147_vm13, %v11203_v57, %v1518_v61  ;;  %v2078_v30 = vmul.f32 0.25, %v1520_v39  ;;  %v2590_v55 = vmul.f32 0.75, %v1520_v39  ;;  %vm11295_vm13 = vmpackc.low %vm14803_vm0, %vm8103_vm5 }
 0x117   : > { %v1711_v22 = vsel %vm14904_vm12, %v1708_v51, %v1710_v11  ;;  %v2077_v12 = vmul.f32 0.25, %v2013_v5  ;;  %v2907_v37 = vadd.f32 %v2843_v6, %v11124_v63  ;;  %v2589_v9 = vmul.f32 0.75, %v1518_v61 }
 0x118   : > { %v2396_v44 = vsel %vm11163_vm4, %v11110_v28, %v1711_v22  ;;  %v2844_v23 = vmul.f32 0.75, %v1711_v22  ;;  %v2206_v50 = vadd.f32 %v11231_v40, %v2078_v30  ;;  %v2718_v57 = vadd.f32 %v11242_v1, %v2590_v55  ;;  %vm11280_vm4 = vmpackc.low %vm8227_vm2, %vm14803_vm0 }
 0x119   : > { %v2460_v51 = vmul.f32 0.25, %v2396_v44  ;;  %v2205_v5 = vadd.f32 %v11228_v38, %v2077_v12  ;;  %v2523_v28 = vadd.f32 %v2459_v36, %v11114_v13  ;;  %v11277_v63 = vadd.f32 %v11216_v14, %v10957_v0 }
 0x11a   : > { %v2908_v39 = vadd.f32 %v2844_v23, %v11143_v49  ;;  %v14906_v41 = vsel %vm11280_vm4, 4294967295, %v14905_v41  ;;  %v2717_v55 = vadd.f32 %v11239_v46, %v2589_v9  ;;  %v1521_v6 = vrot.slane %v11250_v4, 7 }
 0x11b   : > { %14907 = vst [vmem:[#allocation55_spill] sm:$0xff] %v14906_v41  ;;  %v2524_v24 = vadd.f32 %v2460_v51, %v11132_v53  ;;  %v11288_v61 = vmul.f32 0.75, %v11250_v4  ;;  %v11290_v49 = vpack.c.bf16 %v2206_v50, %v2205_v5  ;;  %v14910_v0 = vmov 0 }
 0x11c   : > { %v11292_v13 = vpack.c.bf16 %v2908_v39, %v2907_v37  ;;  %v14911_v0 = vsel %vm11295_vm13, 4294967295, %v14910_v0  ;;  %v14370_v36 = vrot.slane %v11277_v63, 7  ;;  %v11301_v30 = vmul.f32 0.75, %v11277_v63 }
 0x11d   : > { %14908 = vst [vmem:[#allocation56_spill] sm:$0xff] %v11290_v49  ;;  %14912 = vst [vmem:[#allocation58_spill] sm:$0xff] %v14911_v0  ;;  %v11303_v53 = vpack.c.bf16 %v2718_v57, %v2717_v55  ;;  %v11305_v22 = vpack.c.bf16 %v2524_v24, %v2523_v28  ;;  %vm14915_vm12 = vcmask 1040384   ;;  %v1712_v44 = vrot.slane %v11206_v3, 1  ;;  %3986 = vmatprep.mubr.bf16.mxu1 %v11290_v49  ;;  %v14921_v55 = vld [vmem:[#allocation15_spill] sm:$0xff] }
 0x11e   : > { %14909 = vst [vmem:[#allocation57_spill] sm:$0xff] %v11292_v13  ;;  %v1522_v12 = vsel %vm14915_vm12, %v1519_v60, %v1521_v6  ;;  %8482 = vmatprep.mubr.msk.bf16.mxu0 %vm11280_vm4, %v11292_v13  ;;  %vm14916_vm5 = vmmov %vm14915_vm12  ;;  %v1714_v50 = vrot.slane %v11250_v4, 1  ;;  %vm14917_vm2 = vcmask 1046528   ;;  %v14918_v39 = vand.u32 15, %v10321_v26  ;;  %v9694_v13 = vld [vmem:[#allocation6 + $0x4b0] ss:$8 sps:$4 sm:$0xff]  }
 0x11f   : > { %14913 = vst [vmem:[#allocation59_spill] sm:$0xff] %v11303_v53  ;;  %14914 = vst [vmem:[#allocation60_spill] sm:$0xff] %v11305_v22  ;;  %v1524_v23 = vsel %vm14916_vm5, %v1521_v6, %v14370_v36  ;;  %v2015_v37 = vsel %vm11220_vm10, %v11250_v4, %v1522_v12  ;;  %v2591_v60 = vmul.f32 0.75, %v1522_v12  ;;  %8106 = vmatmul.mubr.msk.bf16.gmra.mrb[36].mxu1 %vm11295_vm13, %v11303_v53  ;;  %5366 = vmatmul.mubr.bf16.gmra.mrb[36].mxu0 %v11305_v22  ;;  %v309_v36 = vld [vmem:[%s10212_s6 + $0x68] sm:$0xff]  ;;  %v14967_v41 = vmov 0 }
 0x120   : > { %v2079_v9 = vmul.f32 0.25, %v2015_v37  ;;  %v2080_v57 = vmul.f32 0.25, %v1524_v23  ;;  %v2592_v51 = vmul.f32 0.75, %v1524_v23  ;;  %v1713_v5 = vsel %vm14917_vm2, %v1710_v11, %v1712_v44  ;;  %vm14925_vm13 = vmmov %vm14917_vm2  ;;  %v308_v23 = vld [vmem:[%s10212_s6 + $0x60] sm:$0xff]  ;;  %6132 = vmatpush1.bf16.msra.mxu0 %v9694_v13 }
 0x121   : > { %vm11327_vm12 = vcmp.eq.s32.totalorder %v14918_v39, 0  ;;  %v14922_v24 = vand.u32 15, %v14921_v55  ;;  %v1715_v12 = vsel %vm14925_vm13, %v1712_v44, %v1714_v50  ;;  %v2845_v37 = vmul.f32 0.75, %v1713_v5  ;;  %vm8231_vm4 = vmneg %vm11254_vm7 }
 0x122   : > { %v11341_v11 = vmul.f32 0.25, %v11250_v4  ;;  %v11344_v26 = vmul.f32 0.25, %v11277_v63  ;;  %v2207_v39 = vadd.f32 %v11288_v61, %v2079_v9  ;;  %v2208_v55 = vadd.f32 %v11301_v30, %v2080_v57  ;;  %vm8107_vm13 = vmneg %vm11220_vm10 }
 0x123   : > { %vm11333_vm5 = vcmp.eq.s32.totalorder %v14922_v24, 15  ;;  %v2398_v44 = vsel %vm11254_vm7, %v11206_v3, %v1715_v12  ;;  %v2846_v24 = vmul.f32 0.75, %v1715_v12  ;;  %v2909_v4 = vadd.f32 %v2845_v37, %v11239_v46  ;;  %vm11365_vm2 = vmpackc.low %vm8231_vm4, %vm14803_vm0  ;;  %v11372_v46 = vld [vmem:[%s10212_s6 + $0x70] sm:$0xff] }
 0x124   : > { %v2719_v0 = vadd.f32 %v11341_v11, %v2591_v60  ;;  %v2720_v53 = vadd.f32 %v11344_v26, %v2592_v51  ;;  %v2461_v22 = vmul.f32 0.25, %v1713_v5  ;;  %v11358_v49 = vpack.c.bf16 %v2208_v55, %v2207_v39  ;;  %vm11375_vm10 = vmpackc.low %vm14803_vm0, %vm8107_vm13 }
 0x125   : > { %v2910_v9 = vadd.f32 %v2846_v24, %v11242_v1  ;;  %v14927_v3 = vmov 0  ;;  %v2462_v27 = vmul.f32 0.25, %v2398_v44  ;;  %v11369_v57 = vmul.f32 0.25, %v308_v23  ;;  %v9691_v24 = vld [vmem:[#allocation6 + $0x3b0] ss:$8 sps:$4 sm:$0xff]  }
 0x126   : > { %14926 = vst [vmem:[#allocation15_spill] sm:$0xff] %v11358_v49  ;;  %v14928_v3 = vsel %vm11365_vm2, 4294967295, %v14927_v3  ;;  %v14930_v60 = vmov 0  ;;  %v11379_v51 = vpack.c.bf16 %v2720_v53, %v2719_v0  ;;  %v2525_v1 = vadd.f32 %v2461_v22, %v11228_v38  ;;  %3996 = vmatprep.mubr.bf16.mxu1 %v11358_v49 }
 0x127   : > { %14929 = vst [vmem:[#allocation61_spill] sm:$0xff] %v14928_v3  ;;  %v14931_v60 = vsel %vm11375_vm10, 4294967295, %v14930_v60  ;;  %v11382_v45 = vmul.f32 0.25, %v309_v36  ;;  %v1716_v5 = vrot.slane %v11277_v63, 1  ;;  %v11386_v12 = vpack.c.bf16 %v2910_v9, %v2909_v4  ;;  %v14943_v3 = vld [vmem:[#allocation17_spill] sm:$0xff] }
 0x128   : > { %14932 = vst [vmem:[#allocation62_spill] sm:$0xff] %v14931_v60  ;;  %14933 = vst [vmem:[#allocation63_spill] sm:$0xff] %v11379_v51  ;;  %v2526_v37 = vadd.f32 %v2462_v27, %v11231_v40  ;;  %v11391_v39 = vadd.f32 %v11214_v43, %v11369_v57  ;;  %v11393_v55 = vmul.f32 0.75, %v308_v23  ;;  %vm14935_vm7 = vcmask 1046528   ;;  %8110 = vmatmul.mubr.msk.bf16.gmra.mrb[40].mxu1 %vm11375_vm10, %v11379_v51 }
 0x129   : > { %14934 = vst [vmem:[#allocation64_spill] sm:$0xff] %v11386_v12  ;;  %v11397_v0 = vadd.f32 %v11216_v14, %v11382_v45  ;;  %v1717_v38 = vsel %vm14935_vm7, %v1714_v50, %v1716_v5  ;;  %v11400_v53 = vmul.f32 0.75, %v309_v36  ;;  %v11403_v22 = vmul.f32 0.25, %v11372_v46  ;;  %8486 = vmatprep.mubr.msk.bf16.mxu0 %vm11365_vm2, %v11386_v12  ;;  %v14937_v50 = vld [vmem:[#allocation16_spill] sm:$0xff] }
 0x12a   : > { %v11411_v43 = vpack.c.bf16 %v2526_v37, %v2525_v1  ;;  %v1525_v14 = vrot.slane %v11391_v39, 7  ;;  %v11415_v40 = vmul.f32 0.75, %v11391_v39  ;;  %v1718_v36 = vrot.slane %v11391_v39, 1  ;;  %v9693_v37 = vld [vmem:[#allocation6 + $0x3b4] ss:$8 sps:$4 sm:$0xff]  }
 0x12b   : > { %v14938_v23 = vand.u32 15, %v14937_v50  ;;  %v1527_v4 = vrot.slane %v11397_v0, 7  ;;  %v11426_v9 = vmul.f32 0.75, %v11397_v0  ;;  %v2847_v27 = vmul.f32 0.75, %v1717_v38  ;;  %4239 = vmatprep.subr.bf16.mxu1 %v9693_v37 }
 0x12c   : > { %14936 = vst [vmem:[#allocation65_spill] sm:$0xff] %v11411_v43  ;;  %v11429_v1 = vmul.f32 0.25, %v11391_v39  ;;  %5376 = vmatmul.mubr.bf16.gmra.mrb[40].mxu0 %v11411_v43  ;;  %v14941_v60 = vrot.slane %v11277_v63, 7  ;;  %vm14942_vm13 = vcmask 1040384   ;;  %v11437_v51 = vmul.f32 0.25, %v11397_v0  ;;  %4240 = vmatpush1.bf16.msra.mxu1 %v9691_v24 }
 0x12d   : > { %vm11420_vm4 = vcmp.eq.s32.totalorder %v14938_v23, 0  ;;  %v1719_v23 = vsel %vm14935_vm7, %v1716_v5, %v1718_v36  ;;  %v2463_v49 = vmul.f32 0.25, %v1717_v38  ;;  %v14944_v12 = vand.u32 15, %v14943_v3  ;;  %vm14947_vm2 = vmmov %vm14942_vm13 }
 0x12e   : > { %v1526_v50 = vsel %vm14942_vm13, %v14941_v60, %v1525_v14  ;;  %v1528_v43 = vsel %vm14947_vm2, %v1525_v14, %v1527_v4  ;;  %v2400_v5 = vsel %vm11333_vm5, %v11277_v63, %v1719_v23  ;;  %v2848_v8 = vmul.f32 0.75, %v1719_v23  ;;  %vm8235_vm13 = vmneg %vm11333_vm5 }
 0x12f   : > { %vm11441_vm10 = vcmp.eq.s32.totalorder %v14944_v12, 15  ;;  %v2017_v60 = vsel %vm11327_vm12, %v11391_v39, %v1526_v50  ;;  %v2082_v12 = vmul.f32 0.25, %v1528_v43  ;;  %v2594_v38 = vmul.f32 0.75, %v1528_v43  ;;  %vm8111_vm2 = vmneg %vm11327_vm12 }
 0x130   : > { %v2081_v3 = vmul.f32 0.25, %v2017_v60  ;;  %v2911_v32 = vadd.f32 %v2847_v27, %v11341_v11  ;;  %v2912_v14 = vadd.f32 %v2848_v8, %v11344_v26  ;;  %v2593_v42 = vmul.f32 0.75, %v1526_v50  ;;  %vm11465_vm7 = vmpackc.low %vm8235_vm13, %vm14803_vm0 }
 0x131   : > { %v2464_v39 = vmul.f32 0.25, %v2400_v5  ;;  %v2527_v63 = vadd.f32 %v2463_v49, %v11288_v61  ;;  %v2210_v37 = vadd.f32 %v11426_v9, %v2082_v12  ;;  %v14949_v2 = vsel %vm11465_vm7, 4294967295, %v14948_v2  ;;  %vm11483_vm12 = vmpackc.low %vm14803_vm0, %vm8111_vm2 }
 0x132   : > { %v2209_v23 = vadd.f32 %v11415_v40, %v2081_v3  ;;  %14950 = vst [vmem:[#allocation16_spill] sm:$0xff] %v14949_v2  ;;  %v2722_v8 = vadd.f32 %v11437_v51, %v2594_v38  ;;  %v402_v28 = vadd.f32 %v11393_v55, %v11180_v48  ;;  %v11472_v11 = vpack.c.bf16 %v2912_v14, %v2911_v32  ;;  %v14959_v3 = vld [vmem:[#allocation18_spill] sm:$0xff]  ;;  %v14963_v14 = vld [vmem:[#allocation19_spill] sm:$0xff]  ;;  %vm8239_vm9 = vmneg %vm11441_vm10 }
 0x133   : > { %v2721_v61 = vadd.f32 %v11429_v1, %v2593_v42  ;;  %v2528_v49 = vadd.f32 %v2464_v39, %v11301_v30  ;;  %v11478_v13 = vadd.f32 %v11400_v53, %v11182_v25  ;;  %v14952_v26 = vmov 0 }
 0x134   : > { %v11480_v6 = vpack.c.bf16 %v2210_v37, %v2209_v23  ;;  %v14953_v26 = vsel %vm11483_vm12, 4294967295, %v14952_v26  ;;  %v1529_v43 = vrot.slane %v402_v28, 7  ;;  %v11487_v24 = vmul.f32 0.75, %v402_v28  ;;  %8490 = vmatprep.mubr.msk.bf16.mxu0 %vm11465_vm7, %v11472_v11 }
 0x135   : > { %14954 = vst [vmem:[#allocation66_spill] sm:$0xff] %v14953_v26  ;;  %v1720_v48 = vrot.slane %v11397_v0, 1  ;;  %v11493_v42 = vpack.c.bf16 %v2722_v8, %v2721_v61  ;;  %v11495_v25 = vpack.c.bf16 %v2528_v49, %v2527_v63  ;;  %v1531_v32 = vrot.slane %v11478_v13, 7 }
 0x136   : > { %14951 = vst [vmem:[#allocation17_spill] sm:$0xff] %v11480_v6  ;;  %v11499_v30 = vmul.f32 0.75, %v11478_v13  ;;  %4006 = vmatprep.mubr.bf16.mxu1 %v11480_v6  ;;  %vm14957_vm5 = vcmask 1040384   ;;  %vm14958_vm13 = vcmask 1046528   ;;  %v1722_v60 = vrot.slane %v402_v28, 1 }
 0x137   : > { %14955 = vst [vmem:[#allocation67_spill] sm:$0xff] %v11493_v42  ;;  %14956 = vst [vmem:[#allocation68_spill] sm:$0xff] %v11495_v25  ;;  %v1530_v27 = vsel %vm14957_vm5, %v1527_v4, %v1529_v43  ;;  %v1721_v50 = vsel %vm14958_vm13, %v1718_v36, %v1720_v48  ;;  %v2659_v5 = vmul.f32 0.25, %v402_v28  ;;  %v14960_v12 = vand.u32 15, %v14959_v3  ;;  %8114 = vmatmul.mubr.msk.bf16.gmra.mrb[44].mxu1 %vm11483_vm12, %v11493_v42 }
 0x138   : > { %v14964_v39 = vand.u32 15, %v14963_v14  ;;  %5386 = vmatmul.mubr.bf16.gmra.mrb[44].mxu0 %v11495_v25  ;;  %v1532_v36 = vsel %vm14957_vm5, %v1529_v43, %v1531_v32  ;;  %v2019_v4 = vsel %vm11420_vm4, %v402_v28, %v1530_v27  ;;  %v2849_v23 = vmul.f32 0.75, %v1721_v50  ;;  %vm8115_vm5 = vmneg %vm11420_vm4 }
 0x139   : > { %vm11506_vm2 = vcmp.eq.s32.totalorder %v14960_v12, 0  ;;  %v2595_v37 = vmul.f32 0.75, %v1530_v27  ;;  %v2083_v8 = vmul.f32 0.25, %v2019_v4  ;;  %v2084_v61 = vmul.f32 0.25, %v1532_v36  ;;  %v11527_v12 = vld [vmem:[%s10212_s6 + $0x78] sm:$0xff] }
 0x13a   : > { %vm11512_vm7 = vcmp.eq.s32.totalorder %v14964_v39, 15  ;;  %v2596_v49 = vmul.f32 0.75, %v1532_v36  ;;  %v1723_v3 = vsel %vm14958_vm13, %v1720_v48, %v1722_v60  ;;  %v2913_v39 = vadd.f32 %v2849_v23, %v11429_v1  ;;  %vm11540_vm13 = vmpackc.low %vm8239_vm9, %vm14803_vm0 }
 0x13b   : > { %v2402_v14 = vsel %vm11441_vm10, %v11397_v0, %v1723_v3  ;;  %v2850_v43 = vmul.f32 0.75, %v1723_v3  ;;  %v2660_v28 = vmul.f32 0.25, %v11478_v13  ;;  %v2211_v27 = vadd.f32 %v11487_v24, %v2083_v8  ;;  %vm11550_vm10 = vmpackc.low %vm14803_vm0, %vm8115_vm5 }
 0x13c   : > { %v2212_v48 = vadd.f32 %v11499_v30, %v2084_v61  ;;  %v2723_v36 = vadd.f32 %v2659_v5, %v2595_v37  ;;  %v2465_v4 = vmul.f32 0.25, %v1721_v50  ;;  %v14968_v41 = vsel %vm11540_vm13, 4294967295, %v14967_v41 }
 0x13d   : > { %v2914_v26 = vadd.f32 %v2850_v43, %v11437_v51  ;;  %14969 = vst [vmem:[#allocation18_spill] sm:$0xff] %v14968_v41  ;;  %v2724_v0 = vadd.f32 %v2660_v28, %v2596_v49  ;;  %v2466_v1 = vmul.f32 0.25, %v2402_v14  ;;  %v11545_v23 = vmul.f32 0.25, %v11527_v12 }
 0x13e   : > { %v11547_v44 = vpack.c.bf16 %v2212_v48, %v2211_v27  ;;  %v14971_v8 = vmov 0  ;;  %v2529_v50 = vadd.f32 %v2465_v4, %v11415_v40  ;;  %v11557_v51 = vadd.f32 %v11393_v55, %v11403_v22 }
 0x13f   : > { %v14972_v8 = vsel %vm11550_vm10, 4294967295, %v14971_v8  ;;  %v1724_v37 = vrot.slane %v11478_v13, 1  ;;  %v11560_v61 = vpack.c.bf16 %v2914_v26, %v2913_v39  ;;  %v11562_v49 = vpack.c.bf16 %v2724_v0, %v2723_v36 }
 0x140   : > { %14970 = vst [vmem:[#allocation19_spill] sm:$0xff] %v11547_v44  ;;  %14973 = vst [vmem:[#allocation69_spill] sm:$0xff] %v14972_v8  ;;  %v2530_v3 = vadd.f32 %v2466_v1, %v11426_v9  ;;  %v11567_v14 = vadd.f32 %v11400_v53, %v11545_v23  ;;  %4016 = vmatprep.mubr.bf16.mxu1 %v11547_v44  ;;  %v1533_v40 = vrot.slane %v11557_v51, 7  ;;  %v11572_v43 = vmul.f32 0.75, %v11557_v51  ;;  %v9697_v44 = vld [vmem:[#allocation6 + $0x3c0] ss:$8 sps:$4 sm:$0xff]  }
 0x141   : > { %14974 = vst [vmem:[#allocation70_spill] sm:$0xff] %v11560_v61  ;;  %14975 = vst [vmem:[#allocation71_spill] sm:$0xff] %v11562_v49  ;;  %vm14976_vm9 = vcmask 1046528   ;;  %v1726_v26 = vrot.slane %v11557_v51, 1  ;;  %8494 = vmatprep.mubr.msk.bf16.mxu0 %vm11540_vm13, %v11560_v61  ;;  %8118 = vmatmul.mubr.msk.bf16.gmra.mrb[48].mxu1 %vm11550_vm10, %v11562_v49  ;;  %vm14978_vm4 = vcmask 1040384   ;;  %v11591_v36 = vmul.f32 0.25, %v11557_v51 }
 0x142   : > { %v1725_v55 = vsel %vm14976_vm9, %v1722_v60, %v1724_v37  ;;  %v11582_v53 = vpack.c.bf16 %v2530_v3, %v2529_v50  ;;  %v1535_v9 = vrot.slane %v11567_v14, 7  ;;  %v11586_v39 = vmul.f32 0.75, %v11567_v14  ;;  %vm14979_vm5 = vmmov %vm14976_vm9  ;;  %v9699_v61 = vld [vmem:[#allocation6 + $0x3c4] ss:$8 sps:$4 sm:$0xff]  }
 0x143   : > { %v2851_v27 = vmul.f32 0.75, %v1725_v55  ;;  %v1534_v60 = vsel %vm14978_vm4, %v1531_v32, %v1533_v40  ;;  %v1727_v48 = vsel %vm14979_vm5, %v1724_v37, %v1726_v26  ;;  %v11594_v4 = vmul.f32 0.25, %v11567_v14  ;;  %vm14980_vm9 = vmmov %vm14978_vm4  ;;  %4241 = vmatprep.subr.bf16.mxu1 %v9699_v61 }
 0x144   : > { %14977 = vst [vmem:[#allocation72_spill] sm:$0xff] %v11582_v53  ;;  %5396 = vmatmul.mubr.bf16.gmra.mrb[48].mxu0 %v11582_v53  ;;  %v1536_v0 = vsel %vm14980_vm9, %v1533_v40, %v1535_v9  ;;  %v2021_v1 = vsel %vm11506_vm2, %v11557_v51, %v1534_v60  ;;  %v2404_v32 = vsel %vm11512_vm7, %v11478_v13, %v1727_v48  ;;  %v2852_v50 = vmul.f32 0.75, %v1727_v48  ;;  %vm8243_vm4 = vmneg %vm11512_vm7 }
 0x145   : > { %v2085_v37 = vmul.f32 0.25, %v2021_v1  ;;  %v2086_v3 = vmul.f32 0.25, %v1536_v0  ;;  %v2598_v8 = vmul.f32 0.75, %v1536_v0  ;;  %v2915_v49 = vadd.f32 %v2851_v27, %v2659_v5  ;;  %vm8119_vm5 = vmneg %vm11506_vm2  ;;  %v9700_v27 = vld [vmem:[#allocation6 + $0x4c0] ss:$8 sps:$4 sm:$0xff]   ;;  %4242 = vmatpush1.bf16.msra.mxu1 %v9697_v44 }
 0x146   : > { %v2916_v53 = vadd.f32 %v2852_v50, %v2660_v28  ;;  %v2597_v41 = vmul.f32 0.75, %v1534_v60  ;;  %v2467_v40 = vmul.f32 0.25, %v1725_v55  ;;  %v2468_v51 = vmul.f32 0.25, %v2404_v32  ;;  %vm11611_vm9 = vmpackc.low %vm8243_vm4, %vm14803_vm0  ;;  %v9702_v60 = vld [vmem:[#allocation6 + $0x4c4] ss:$8 sps:$4 sm:$0xff]  }
 0x147   : > { %v2213_v42 = vadd.f32 %v11572_v43, %v2085_v37  ;;  %v2214_v13 = vadd.f32 %v11586_v39, %v2086_v3  ;;  %v14981_v63 = vmov 0  ;;  %v2726_v5 = vadd.f32 %v11594_v4, %v2598_v8  ;;  %vm11630_vm7 = vmpackc.low %vm14803_vm0, %vm8119_vm5  ;;  %6133 = vmatprep.subr.bf16.mxu0 %v9702_v60 }
 0x148   : > { %v14982_v63 = vsel %vm11611_vm9, 4294967295, %v14981_v63  ;;  %v11617_v28 = vmul.f32 0.75, %v11372_v46  ;;  %v11619_v48 = vpack.c.bf16 %v2916_v53, %v2915_v49  ;;  %v2725_v55 = vadd.f32 %v11591_v36, %v2597_v41  ;;  %6134 = vmatpush1.bf16.msra.mxu0 %v9700_v27 }
 0x149   : > { %14983 = vst [vmem:[#allocation73_spill] sm:$0xff] %v14982_v63  ;;  %v2531_v0 = vadd.f32 %v2467_v40, %v11487_v24  ;;  %v2532_v1 = vadd.f32 %v2468_v51, %v11499_v30  ;;  %v11624_v32 = vpack.c.bf16 %v2214_v13, %v2213_v42  ;;  %v14986_v46 = vmov 0  ;;  %v14989_v24 = vld [vmem:[#allocation14_spill] sm:$0xff] }
 0x14a   : > { %14984 = vst [vmem:[#allocation74_spill] sm:$0xff] %v11619_v48  ;;  %v14987_v46 = vsel %vm11630_vm7, 4294967295, %v14986_v46  ;;  %v373_v8 = vmul.f32 0.75, %v11527_v12  ;;  %v11637_v41 = vadd.f32 %v11617_v28, %v11369_v57  ;;  %v485_v49 = vadd.s32 224, %v14989_v24  ;;  %8498 = vmatprep.mubr.msk.bf16.mxu0 %vm11611_vm9, %v11619_v48 }
 0x14b   : > { %14985 = vst [vmem:[#allocation75_spill] sm:$0xff] %v11624_v32  ;;  %14988 = vst [vmem:[#allocation76_spill] sm:$0xff] %v14987_v46  ;;  %v11643_v42 = vpack.c.bf16 %v2726_v5, %v2725_v55  ;;  %v11645_v30 = vpack.c.bf16 %v2532_v1, %v2531_v0  ;;  %v484_v38 = vadd.s32 216, %v14989_v24  ;;  %v1728_v12 = vrot.slane %v11567_v14, 1  ;;  %4026 = vmatprep.mubr.bf16.mxu1 %v11624_v32 }
 0x14c   : > { %v11651_v57 = vadd.f32 %v373_v8, %v11382_v45  ;;  %v721_v61 = vand.u32 15, %v485_v49  ;;  %v1537_v44 = vrot.slane %v11637_v41, 7  ;;  %v11655_v53 = vmul.f32 0.75, %v11637_v41 }
 0x14d   : > { %14990 = vst [vmem:[#allocation14_spill] sm:$0xff] %v11643_v42  ;;  %14991 = vst [vmem:[#allocation77_spill] sm:$0xff] %v11645_v30  ;;  %8122 = vmatmul.mubr.msk.bf16.gmra.mrb[52].mxu1 %vm11630_vm7, %v11643_v42  ;;  %5406 = vmatmul.mubr.bf16.gmra.mrb[52].mxu0 %v11645_v30  ;;  %v714_v50 = vand.u32 15, %v484_v38  ;;  %vm14992_vm2 = vcmask 1046528   ;;  %v1730_v3 = vrot.slane %v11637_v41, 1  ;;  %v11664_v45 = vmul.f32 0.25, %v11637_v41 }
 0x14e   : > { %v1729_v37 = vsel %vm14992_vm2, %v1726_v26, %v1728_v12  ;;  %vm11666_vm4 = vcmp.eq.s32.totalorder %v721_v61, 0  ;;  %vm14995_vm5 = vcmask 1040384   ;;  %v1539_v13 = vrot.slane %v11651_v57, 7  ;;  %v11690_v38 = vld [vmem:[%s10212_s6 + $0x80] sm:$0xff]  ;;  %v9705_v30 = vld [vmem:[#allocation6 + $0x3d4] ss:$8 sps:$4 sm:$0xff]  }
 0x14f   : > { %v1538_v51 = vsel %vm14995_vm5, %v1535_v9, %v1537_v44  ;;  %v11673_v5 = vmul.f32 0.75, %v11651_v57  ;;  %vm11678_vm2 = vcmp.eq.s32.totalorder %v714_v50, 15  ;;  %vm14998_vm7 = vcmask 1046528   ;;  %vm14999_vm9 = vmmov %vm14995_vm5  ;;  %4243 = vmatprep.subr.bf16.mxu1 %v9705_v30 }
 0x150   : > { %v2023_v26 = vsel %vm11666_vm4, %v11637_v41, %v1538_v51  ;;  %v1731_v60 = vsel %vm14998_vm7, %v1728_v12, %v1730_v3  ;;  %v2853_v55 = vmul.f32 0.75, %v1729_v37  ;;  %v1540_v0 = vsel %vm14999_vm9, %v1537_v44, %v1539_v13  ;;  %vm8247_vm5 = vmneg %vm11678_vm2  ;;  %v11694_v12 = vld [vmem:[%s10212_s6 + $0x88] sm:$0xff] }
 0x151   : > { %v2087_v9 = vmul.f32 0.25, %v2023_v26  ;;  %v2406_v1 = vsel %vm11678_vm2, %v11567_v14, %v1731_v60  ;;  %v2854_v49 = vmul.f32 0.75, %v1731_v60  ;;  %v2088_v41 = vmul.f32 0.25, %v1540_v0  ;;  %vm8123_vm9 = vmneg %vm11666_vm4 }
 0x152   : > { %v2600_v61 = vmul.f32 0.75, %v1540_v0  ;;  %v2917_v50 = vadd.f32 %v2853_v55, %v11591_v36  ;;  %v2599_v46 = vmul.f32 0.75, %v1538_v51  ;;  %v2664_v42 = vmul.f32 0.25, %v11651_v57  ;;  %vm11703_vm7 = vmpackc.low %vm8247_vm5, %vm14803_vm0 }
 0x153   : > { %v2215_v44 = vadd.f32 %v11655_v53, %v2087_v9  ;;  %v2918_v26 = vadd.f32 %v2854_v49, %v11594_v4  ;;  %v2469_v14 = vmul.f32 0.25, %v1729_v37  ;;  %v2216_v27 = vadd.f32 %v11673_v5, %v2088_v41  ;;  %vm11720_vm4 = vmpackc.low %vm14803_vm0, %vm8123_vm9 }
 0x154   : > { %v15000_v60 = vmov 0  ;;  %v2727_v36 = vadd.f32 %v11664_v45, %v2599_v46  ;;  %v2470_v51 = vmul.f32 0.25, %v2406_v1  ;;  %v11709_v55 = vmul.f32 0.25, %v11690_v38 }
 0x155   : > { %v15001_v60 = vsel %vm11703_vm7, 4294967295, %v15000_v60  ;;  %v11711_v4 = vpack.c.bf16 %v2918_v26, %v2917_v50  ;;  %v2728_v0 = vadd.f32 %v2664_v42, %v2600_v61  ;;  %v2533_v40 = vadd.f32 %v2469_v14, %v11572_v43 }
 0x156   : > { %15002 = vst [vmem:[#allocation78_spill] sm:$0xff] %v15001_v60  ;;  %v11715_v37 = vmul.f32 0.25, %v11694_v12  ;;  %v11717_v9 = vpack.c.bf16 %v2216_v27, %v2215_v44  ;;  %v15005_v49 = vmov 0  ;;  %v2534_v46 = vadd.f32 %v2470_v51, %v11586_v39 }
 0x157   : > { %15003 = vst [vmem:[#allocation79_spill] sm:$0xff] %v11711_v4  ;;  %v15006_v49 = vsel %vm11720_vm4, 4294967295, %v15005_v49  ;;  %v11727_v1 = vadd.f32 %v11617_v28, %v11709_v55  ;;  %v487_v41 = vadd.s32 240, %v14989_v24  ;;  %8502 = vmatprep.mubr.msk.bf16.mxu0 %vm11703_vm7, %v11711_v4  ;;  %v11733_v43 = vpack.c.bf16 %v2728_v0, %v2727_v36 }
 0x158   : > { %15004 = vst [vmem:[#allocation80_spill] sm:$0xff] %v11717_v9  ;;  %15007 = vst [vmem:[#allocation81_spill] sm:$0xff] %v15006_v49  ;;  %v11736_v61 = vadd.f32 %v373_v8, %v11715_v37  ;;  %v486_v50 = vadd.s32 232, %v14989_v24  ;;  %v1732_v44 = vrot.slane %v11651_v57, 1  ;;  %4036 = vmatprep.mubr.bf16.mxu1 %v11717_v9  ;;  %v11741_v39 = vpack.c.bf16 %v2534_v46, %v2533_v40 }
 0x159   : > { %15008 = vst [vmem:[#allocation82_spill] sm:$0xff] %v11733_v43  ;;  %v735_v28 = vand.u32 15, %v487_v41  ;;  %v1541_v26 = vrot.slane %v11727_v1, 7  ;;  %v11745_v14 = vmul.f32 0.75, %v11727_v1  ;;  %8126 = vmatmul.mubr.msk.bf16.gmra.mrb[56].mxu1 %vm11720_vm4, %v11733_v43  ;;  %vm15010_vm2 = vcmask 1046528  }
 0x15a   : > { %15009 = vst [vmem:[#allocation83_spill] sm:$0xff] %v11741_v39  ;;  %v14449_v8 = vrot.slane %v11736_v61, 7  ;;  %v11752_v27 = vmul.f32 0.75, %v11736_v61  ;;  %v728_v36 = vand.u32 15, %v486_v50  ;;  %v1733_v51 = vsel %vm15010_vm2, %v1730_v3, %v1732_v44  ;;  %5416 = vmatmul.mubr.bf16.gmra.mrb[56].mxu0 %v11741_v39 }
 0x15b   : > { %vm11756_vm5 = vcmp.eq.s32.totalorder %v735_v28, 0  ;;  %vm15013_vm9 = vcmask 1040384   ;;  %v1734_v46 = vrot.slane %v11727_v1, 1  ;;  %v2855_v41 = vmul.f32 0.75, %v1733_v51 }
 0x15c   : > { %v1542_v40 = vsel %vm15013_vm9, %v1539_v13, %v1541_v26  ;;  %vm15014_vm4 = vmmov %vm15013_vm9  ;;  %vm11768_vm2 = vcmp.eq.s32.totalorder %v728_v36, 15  ;;  %vm15017_vm9 = vcmask 1046528   ;;  %v2665_v36 = vmul.f32 0.25, %v11727_v1 }
 0x15d   : > { %v1544_v49 = vsel %vm15014_vm4, %v1541_v26, %v14449_v8  ;;  %v2025_v50 = vsel %vm11756_vm5, %v11727_v1, %v1542_v40  ;;  %v2601_v28 = vmul.f32 0.75, %v1542_v40  ;;  %v1735_v13 = vsel %vm15017_vm9, %v1732_v44, %v1734_v46  ;;  %vm8251_vm4 = vmneg %vm11768_vm2  ;;  %v9703_v8 = vld [vmem:[#allocation6 + $0x3d0] ss:$8 sps:$4 sm:$0xff]  }
 0x15e   : > { %v2089_v43 = vmul.f32 0.25, %v2025_v50  ;;  %v2090_v39 = vmul.f32 0.25, %v1544_v49  ;;  %v2602_v9 = vmul.f32 0.75, %v1544_v49  ;;  %v2408_v60 = vsel %vm11768_vm2, %v11651_v57, %v1735_v13  ;;  %vm8127_vm9 = vmneg %vm11756_vm5  ;;  %v9706_v50 = vld [vmem:[#allocation6 + $0x4d0] ss:$8 sps:$4 sm:$0xff]   ;;  %4244 = vmatpush1.bf16.msra.mxu1 %v9703_v8 }
 0x15f   : > { %v2856_v4 = vmul.f32 0.75, %v1735_v13  ;;  %v2919_v26 = vadd.f32 %v2855_v41, %v11664_v45  ;;  %v11783_v44 = vmul.f32 0.25, %v11736_v61  ;;  %v2471_v57 = vmul.f32 0.25, %v1733_v51  ;;  %v9708_v45 = vld [vmem:[#allocation6 + $0x4d4] ss:$8 sps:$4 sm:$0xff]   ;;  %vm11796_vm7 = vmpackc.low %vm8251_vm4, %vm14803_vm0 }
 0x160   : > { %v2217_v40 = vadd.f32 %v11745_v14, %v2089_v43  ;;  %v2218_v49 = vadd.f32 %v11752_v27, %v2090_v39  ;;  %v2729_v13 = vadd.f32 %v2665_v36, %v2601_v28  ;;  %v2472_v32 = vmul.f32 0.25, %v2408_v60  ;;  %6135 = vmatprep.subr.bf16.mxu0 %v9708_v45  ;;  %vm11811_vm2 = vmpackc.low %vm14803_vm0, %vm8127_vm9 }
 0x161   : > { %v2920_v41 = vadd.f32 %v2856_v4, %v2664_v42  ;;  %v11788_v1 = vmul.f32 0.75, %v11690_v38  ;;  %v15019_v43 = vmov 0  ;;  %v2730_v39 = vadd.f32 %v11783_v44, %v2602_v9  ;;  %6136 = vmatpush1.bf16.msra.mxu0 %v9706_v50 }
 0x162   : > { %v11790_v63 = vpack.c.bf16 %v2218_v49, %v2217_v40  ;;  %v15020_v43 = vsel %vm11796_vm7, 4294967295, %v15019_v43  ;;  %v2535_v42 = vadd.f32 %v2471_v57, %v11655_v53  ;;  %v11803_v60 = vmul.f32 0.75, %v11694_v12 }
 0x163   : > { %15021 = vst [vmem:[#allocation85_spill] sm:$0xff] %v15020_v43  ;;  %v11805_v30 = vpack.c.bf16 %v2920_v41, %v2919_v26  ;;  %v15023_v38 = vmov 0  ;;  %v2536_v4 = vadd.f32 %v2472_v32, %v11673_v5  ;;  %v11818_v53 = vadd.f32 %v11788_v1, %v11403_v22 }
 0x164   : > { %15018 = vst [vmem:[#allocation84_spill] sm:$0xff] %v11790_v63  ;;  %v15024_v38 = vsel %vm11811_vm2, 4294967295, %v15023_v38  ;;  %v489_v12 = vadd.s32 256, %v14989_v24  ;;  %4046 = vmatprep.mubr.bf16.mxu1 %v11790_v63  ;;  %v11822_v9 = vpack.c.bf16 %v2730_v39, %v2729_v13  ;;  %v11826_v8 = vadd.f32 %v11803_v60, %v11545_v23  ;;  %v9711_v63 = vld [vmem:[#allocation6 + $0x3e4] ss:$8 sps:$4 sm:$0xff]  }
 0x165   : > { %15022 = vst [vmem:[#allocation86_spill] sm:$0xff] %v11805_v30  ;;  %15025 = vst [vmem:[#allocation87_spill] sm:$0xff] %v15024_v38  ;;  %v488_v51 = vadd.s32 248, %v14989_v24  ;;  %v1736_v0 = vrot.slane %v11736_v61, 1  ;;  %8506 = vmatprep.mubr.msk.bf16.mxu0 %vm11796_vm7, %v11805_v30  ;;  %v11833_v22 = vpack.c.bf16 %v2536_v4, %v2535_v42  ;;  %v1545_v5 = vrot.slane %v11818_v53, 7  ;;  %4245 = vmatprep.subr.bf16.mxu1 %v9711_v63 }
 0x166   : > { %15026 = vst [vmem:[#allocation88_spill] sm:$0xff] %v11822_v9  ;;  %v749_v32 = vand.u32 15, %v489_v12  ;;  %v11837_v3 = vmul.f32 0.75, %v11818_v53  ;;  %8130 = vmatmul.mubr.msk.bf16.gmra.mrb[60].mxu1 %vm11811_vm2, %v11822_v9  ;;  %v1547_v23 = vrot.slane %v11826_v8, 7  ;;  %v11844_v28 = vmul.f32 0.75, %v11826_v8 }
 0x167   : > { %15027 = vst [vmem:[#allocation89_spill] sm:$0xff] %v11833_v22  ;;  %v742_v26 = vand.u32 15, %v488_v51  ;;  %vm15028_vm5 = vcmask 1046528   ;;  %5426 = vmatmul.mubr.bf16.gmra.mrb[60].mxu0 %v11833_v22  ;;  %v15031_v57 = vrot.slane %v11736_v61, 7  ;;  %vm15032_vm9 = vcmask 1040384   ;;  %v11875_v22 = vld [vmem:[%s10212_s6 + $0x98] sm:$0xff] }
 0x168   : > { %v1737_v40 = vsel %vm15028_vm5, %v1734_v46, %v1736_v0  ;;  %vm11848_vm4 = vcmp.eq.s32.totalorder %v749_v32, 0  ;;  %v1738_v45 = vrot.slane %v11818_v53, 1  ;;  %vm15033_vm2 = vmmov %vm15032_vm9  ;;  %vm15036_vm7 = vcmask 1046528  }
 0x169   : > { %v1546_v50 = vsel %vm15032_vm9, %v15031_v57, %v1545_v5  ;;  %v2857_v41 = vmul.f32 0.75, %v1737_v40  ;;  %v1548_v13 = vsel %vm15033_vm2, %v1545_v5, %v1547_v23  ;;  %vm11860_vm5 = vcmp.eq.s32.totalorder %v742_v26, 15  ;;  %v11866_v57 = vld [vmem:[%s10212_s6 + $0x90] sm:$0xff] }
 0x16a   : > { %v2027_v46 = vsel %vm11848_vm4, %v11818_v53, %v1546_v50  ;;  %v2603_v42 = vmul.f32 0.75, %v1546_v50  ;;  %v2092_v12 = vmul.f32 0.25, %v1548_v13  ;;  %v2604_v51 = vmul.f32 0.75, %v1548_v13  ;;  %vm8255_vm2 = vmneg %vm11860_vm5 }
 0x16b   : > { %v2091_v4 = vmul.f32 0.25, %v2027_v46  ;;  %v1739_v32 = vsel %vm15036_vm7, %v1736_v0, %v1738_v45  ;;  %v2921_v9 = vadd.f32 %v2857_v41, %v2665_v36  ;;  %v2667_v26 = vmul.f32 0.25, %v11818_v53  ;;  %vm8131_vm7 = vmneg %vm11848_vm4 }
 0x16c   : > { %v2410_v5 = vsel %vm11860_vm5, %v11736_v61, %v1739_v32  ;;  %v2858_v38 = vmul.f32 0.75, %v1739_v32  ;;  %v2220_v13 = vadd.f32 %v11844_v28, %v2092_v12  ;;  %v2668_v0 = vmul.f32 0.25, %v11826_v8  ;;  %vm11889_vm9 = vmpackc.low %vm8255_vm2, %vm14803_vm0 }
 0x16d   : > { %v2219_v50 = vadd.f32 %v11837_v3, %v2091_v4  ;;  %v2473_v46 = vmul.f32 0.25, %v1737_v40  ;;  %v2731_v36 = vadd.f32 %v2667_v26, %v2603_v42  ;;  %v2474_v41 = vmul.f32 0.25, %v2410_v5  ;;  %vm11900_vm4 = vmpackc.low %vm14803_vm0, %vm8131_vm7 }
 0x16e   : > { %v2922_v61 = vadd.f32 %v2858_v38, %v11783_v44  ;;  %v11884_v39 = vmul.f32 0.25, %v11866_v57  ;;  %v15038_v4 = vmov 0  ;;  %v2732_v12 = vadd.f32 %v2668_v0, %v2604_v51 }
 0x16f   : > { %v11886_v53 = vpack.c.bf16 %v2220_v13, %v2219_v50  ;;  %v15039_v4 = vsel %vm11889_vm9, 4294967295, %v15038_v4  ;;  %v2537_v32 = vadd.f32 %v2473_v46, %v11745_v14  ;;  %v11895_v49 = vmul.f32 0.25, %v11875_v22 }
 0x170   : > { %15040 = vst [vmem:[#allocation91_spill] sm:$0xff] %v15039_v4  ;;  %v11897_v40 = vpack.c.bf16 %v2922_v61, %v2921_v9  ;;  %v15042_v44 = vmov 0  ;;  %v2538_v38 = vadd.f32 %v2474_v41, %v11752_v27  ;;  %v11907_v42 = vadd.f32 %v11788_v1, %v11884_v39 }
 0x171   : > { %15037 = vst [vmem:[#allocation90_spill] sm:$0xff] %v11886_v53  ;;  %v15043_v44 = vsel %vm11900_vm4, 4294967295, %v15042_v44  ;;  %v491_v51 = vadd.s32 272, %v14989_v24  ;;  %4056 = vmatprep.mubr.bf16.mxu1 %v11886_v53  ;;  %v11911_v14 = vpack.c.bf16 %v2732_v12, %v2731_v36  ;;  %v11915_v9 = vadd.f32 %v11803_v60, %v11895_v49 }
 0x172   : > { %15041 = vst [vmem:[#allocation92_spill] sm:$0xff] %v11897_v40  ;;  %15044 = vst [vmem:[#allocation93_spill] sm:$0xff] %v15043_v44  ;;  %v490_v5 = vadd.s32 264, %v14989_v24  ;;  %v1740_v50 = vrot.slane %v11826_v8, 1  ;;  %8510 = vmatprep.mubr.msk.bf16.mxu0 %vm11889_vm9, %v11897_v40  ;;  %v11922_v27 = vpack.c.bf16 %v2538_v38, %v2537_v32  ;;  %v1549_v13 = vrot.slane %v11907_v42, 7 }
 0x173   : > { %15045 = vst [vmem:[#allocation94_spill] sm:$0xff] %v11911_v14  ;;  %v763_v1 = vand.u32 15, %v491_v51  ;;  %v11926_v46 = vmul.f32 0.75, %v11907_v42  ;;  %8134 = vmatmul.mubr.msk.bf16.gmra.mrb[64].mxu1 %vm11900_vm4, %v11911_v14  ;;  %v14482_v60 = vrot.slane %v11915_v9, 7  ;;  %v11933_v61 = vmul.f32 0.75, %v11915_v9 }
 0x174   : > { %15046 = vst [vmem:[#allocation95_spill] sm:$0xff] %v11922_v27  ;;  %v756_v36 = vand.u32 15, %v490_v5  ;;  %vm15047_vm5 = vcmask 1046528   ;;  %5436 = vmatmul.mubr.bf16.gmra.mrb[64].mxu0 %v11922_v27  ;;  %vm15050_vm7 = vcmask 1040384   ;;  %v1742_v38 = vrot.slane %v11907_v42, 1 }
 0x175   : > { %v1741_v41 = vsel %vm15047_vm5, %v1738_v45, %v1740_v50  ;;  %vm11937_vm2 = vcmp.eq.s32.totalorder %v763_v1, 0  ;;  %v1550_v32 = vsel %vm15050_vm7, %v1547_v23, %v1549_v13  ;;  %vm15051_vm4 = vmmov %vm15050_vm7  ;;  %vm15054_vm7 = vcmask 1046528  }
 0x176   : > { %v2859_v51 = vmul.f32 0.75, %v1741_v41  ;;  %v1552_v44 = vsel %vm15051_vm4, %v1549_v13, %v14482_v60  ;;  %v2029_v5 = vsel %vm11937_vm2, %v11907_v42, %v1550_v32  ;;  %vm11949_vm5 = vcmp.eq.s32.totalorder %v756_v36, 15  ;;  %v9709_v60 = vld [vmem:[#allocation6 + $0x3e0] ss:$8 sps:$4 sm:$0xff]  }
 0x177   : > { %v2605_v1 = vmul.f32 0.75, %v1550_v32  ;;  %v2093_v14 = vmul.f32 0.25, %v2029_v5  ;;  %v2094_v27 = vmul.f32 0.25, %v1552_v44  ;;  %v2606_v53 = vmul.f32 0.75, %v1552_v44  ;;  %vm8259_vm4 = vmneg %vm11949_vm5  ;;  %4246 = vmatpush1.bf16.msra.mxu1 %v9709_v60 }
 0x178   : > { %v1743_v23 = vsel %vm15054_vm7, %v1740_v50, %v1742_v38  ;;  %v2923_v13 = vadd.f32 %v2859_v51, %v2667_v26  ;;  %v2669_v36 = vmul.f32 0.25, %v11907_v42  ;;  %v11963_v44 = vmul.f32 0.25, %v11915_v9  ;;  %vm8135_vm7 = vmneg %vm11937_vm2  ;;  %v9712_v50 = vld [vmem:[#allocation6 + $0x4e0] ss:$8 sps:$4 sm:$0xff]   ;;  %v9714_v26 = vld [vmem:[#allocation6 + $0x4e4] ss:$8 sps:$4 sm:$0xff]  }
 0x179   : > { %v2412_v4 = vsel %vm11949_vm5, %v11826_v8, %v1743_v23  ;;  %v2860_v40 = vmul.f32 0.75, %v1743_v23  ;;  %v2221_v32 = vadd.f32 %v11926_v46, %v2093_v14  ;;  %v2222_v5 = vadd.f32 %v11933_v61, %v2094_v27  ;;  %vm11976_vm9 = vmpackc.low %vm8259_vm4, %vm14803_vm0  ;;  %6137 = vmatprep.subr.bf16.mxu0 %v9714_v26 }
 0x17a   : > { %v2475_v8 = vmul.f32 0.25, %v1741_v41  ;;  %v2733_v23 = vadd.f32 %v2669_v36, %v2605_v1  ;;  %v2476_v43 = vmul.f32 0.25, %v2412_v4  ;;  %v11968_v42 = vmul.f32 0.75, %v11866_v57  ;;  %vm11991_vm5 = vmpackc.low %vm14803_vm0, %vm8135_vm7  ;;  %6138 = vmatpush1.bf16.msra.mxu0 %v9712_v50 }
 0x17b   : > { %v2924_v51 = vadd.f32 %v2860_v40, %v2668_v0  ;;  %v11970_v30 = vpack.c.bf16 %v2222_v5, %v2221_v32  ;;  %v15056_v14 = vmov 0  ;;  %v2734_v27 = vadd.f32 %v11963_v44, %v2606_v53 }
 0x17c   : > { %v15057_v14 = vsel %vm11976_vm9, 4294967295, %v15056_v14  ;;  %v2539_v0 = vadd.f32 %v2475_v8, %v11837_v3  ;;  %v11983_v4 = vmul.f32 0.75, %v11875_v22  ;;  %v15060_v57 = vmov 0 }
 0x17d   : > { %15055 = vst [vmem:[#allocation96_spill] sm:$0xff] %v11970_v30  ;;  %15058 = vst [vmem:[#allocation97_spill] sm:$0xff] %v15057_v14  ;;  %v11985_v63 = vpack.c.bf16 %v2924_v51, %v2923_v13  ;;  %v15061_v57 = vsel %vm11991_vm5, 4294967295, %v15060_v57  ;;  %v2540_v40 = vadd.f32 %v2476_v43, %v11844_v28  ;;  %v11998_v3 = vadd.f32 %v11968_v42, %v11709_v55 }
 0x17e   : > { %15062 = vst [vmem:[#allocation99_spill] sm:$0xff] %v15061_v57  ;;  %v493_v22 = vadd.s32 288, %v14989_v24  ;;  %4066 = vmatprep.mubr.bf16.mxu1 %v11970_v30  ;;  %v12002_v53 = vpack.c.bf16 %v2734_v27, %v2733_v23  ;;  %v12006_v60 = vadd.f32 %v11983_v4, %v11715_v37  ;;  %v492_v41 = vadd.s32 280, %v14989_v24  ;;  %v9717_v30 = vld [vmem:[#allocation6 + $0x3f4] ss:$8 sps:$4 sm:$0xff]  }
 0x17f   : > { %15059 = vst [vmem:[#allocation98_spill] sm:$0xff] %v11985_v63  ;;  %v1744_v12 = vrot.slane %v11915_v9, 1  ;;  %8514 = vmatprep.mubr.msk.bf16.mxu0 %vm11976_vm9, %v11985_v63  ;;  %v12013_v55 = vpack.c.bf16 %v2540_v40, %v2539_v0  ;;  %v1553_v28 = vrot.slane %v11998_v3, 7  ;;  %v12017_v45 = vmul.f32 0.75, %v11998_v3  ;;  %4247 = vmatprep.subr.bf16.mxu1 %v9717_v30 }
 0x180   : > { %15063 = vst [vmem:[#allocation100_spill] sm:$0xff] %v12002_v53  ;;  %v777_v43 = vand.u32 15, %v493_v22  ;;  %8138 = vmatmul.mubr.msk.bf16.gmra.mrb[68].mxu1 %vm11991_vm5, %v12002_v53  ;;  %v1555_v37 = vrot.slane %v12006_v60, 7  ;;  %v12024_v1 = vmul.f32 0.75, %v12006_v60  ;;  %v770_v13 = vand.u32 15, %v492_v41 }
 0x181   : > { %15064 = vst [vmem:[#allocation101_spill] sm:$0xff] %v12013_v55  ;;  %vm15065_vm2 = vcmask 1046528   ;;  %5446 = vmatmul.mubr.bf16.gmra.mrb[68].mxu0 %v12013_v55  ;;  %v15068_v8 = vrot.slane %v11915_v9, 7  ;;  %vm15069_vm7 = vcmask 1040384   ;;  %v1746_v26 = vrot.slane %v11998_v3, 1  ;;  %v12055_v55 = vld [vmem:[%s10212_s6 + $0xa8] sm:$0xff] }
 0x182   : > { %v1745_v32 = vsel %vm15065_vm2, %v1742_v38, %v1744_v12  ;;  %vm12028_vm4 = vcmp.eq.s32.totalorder %v777_v43, 0  ;;  %vm15070_vm5 = vmmov %vm15069_vm7  ;;  %vm12040_vm2 = vcmp.eq.s32.totalorder %v770_v13, 15  ;;  %vm15073_vm9 = vcmask 1046528  }
 0x183   : > { %v1554_v50 = vsel %vm15069_vm7, %v15068_v8, %v1553_v28  ;;  %v2861_v51 = vmul.f32 0.75, %v1745_v32  ;;  %v1556_v23 = vsel %vm15070_vm5, %v1553_v28, %v1555_v37  ;;  %v1747_v43 = vsel %vm15073_vm9, %v1744_v12, %v1746_v26  ;;  %v12046_v8 = vld [vmem:[%s10212_s6 + $0xa0] sm:$0xff]  ;;  %vm8263_vm5 = vmneg %vm12040_vm2 }
 0x184   : > { %v2031_v38 = vsel %vm12028_vm4, %v11998_v3, %v1554_v50  ;;  %v2607_v0 = vmul.f32 0.75, %v1554_v50  ;;  %v2096_v22 = vmul.f32 0.25, %v1556_v23  ;;  %v2608_v41 = vmul.f32 0.75, %v1556_v23  ;;  %vm8139_vm9 = vmneg %vm12028_vm4 }
 0x185   : > { %v2095_v40 = vmul.f32 0.25, %v2031_v38  ;;  %v2414_v28 = vsel %vm12040_vm2, %v11915_v9, %v1747_v43  ;;  %v2862_v57 = vmul.f32 0.75, %v1747_v43  ;;  %v2925_v53 = vadd.f32 %v2861_v51, %v2669_v36  ;;  %vm12069_vm7 = vmpackc.low %vm8263_vm5, %vm14803_vm0 }
 0x186   : > { %v2671_v13 = vmul.f32 0.25, %v11998_v3  ;;  %v2224_v23 = vadd.f32 %v12024_v1, %v2096_v22  ;;  %v2672_v12 = vmul.f32 0.25, %v12006_v60  ;;  %v2477_v38 = vmul.f32 0.25, %v1745_v32  ;;  %vm12080_vm4 = vmpackc.low %vm14803_vm0, %vm8139_vm9 }
 0x187   : > { %v2223_v50 = vadd.f32 %v12017_v45, %v2095_v40  ;;  %v2926_v9 = vadd.f32 %v2862_v57, %v11963_v44  ;;  %v2478_v51 = vmul.f32 0.25, %v2414_v28  ;;  %v12064_v27 = vmul.f32 0.25, %v12046_v8 }
 0x188   : > { %v2735_v36 = vadd.f32 %v2671_v13, %v2607_v0  ;;  %v15075_v40 = vmov 0  ;;  %v2736_v22 = vadd.f32 %v2672_v12, %v2608_v41  ;;  %v2541_v43 = vadd.f32 %v2477_v38, %v11926_v46 }
 0x189   : > { %v12066_v3 = vpack.c.bf16 %v2224_v23, %v2223_v50  ;;  %v15076_v40 = vsel %vm12069_vm7, 4294967295, %v15075_v40  ;;  %v12075_v5 = vmul.f32 0.25, %v12055_v55  ;;  %v12077_v32 = vpack.c.bf16 %v2926_v9, %v2925_v53 }
 0x18a   : > { %15077 = vst [vmem:[#allocation103_spill] sm:$0xff] %v15076_v40  ;;  %v15079_v44 = vmov 0  ;;  %v2542_v57 = vadd.f32 %v2478_v51, %v11933_v61  ;;  %v12087_v0 = vadd.f32 %v11968_v42, %v12064_v27  ;;  %v495_v41 = vadd.s32 304, %v14989_v24 }
 0x18b   : > { %15074 = vst [vmem:[#allocation102_spill] sm:$0xff] %v12066_v3  ;;  %15078 = vst [vmem:[#allocation104_spill] sm:$0xff] %v12077_v32  ;;  %v15080_v44 = vsel %vm12080_vm4, 4294967295, %v15079_v44  ;;  %4076 = vmatprep.mubr.bf16.mxu1 %v12066_v3  ;;  %v12091_v46 = vpack.c.bf16 %v2736_v22, %v2735_v36  ;;  %v12095_v53 = vadd.f32 %v11983_v4, %v12075_v5  ;;  %v494_v28 = vadd.s32 296, %v14989_v24 }
 0x18c   : > { %15081 = vst [vmem:[#allocation105_spill] sm:$0xff] %v15080_v44  ;;  %v1748_v50 = vrot.slane %v12006_v60, 1  ;;  %8518 = vmatprep.mubr.msk.bf16.mxu0 %vm12069_vm7, %v12077_v32  ;;  %v12102_v61 = vpack.c.bf16 %v2542_v57, %v2541_v43  ;;  %v791_v42 = vand.u32 15, %v495_v41  ;;  %v1557_v23 = vrot.slane %v12087_v0, 7 }
 0x18d   : > { %15082 = vst [vmem:[#allocation106_spill] sm:$0xff] %v12091_v46  ;;  %v12106_v38 = vmul.f32 0.75, %v12087_v0  ;;  %8142 = vmatmul.mubr.msk.bf16.gmra.mrb[72].mxu1 %vm12080_vm4, %v12091_v46  ;;  %v14515_v4 = vrot.slane %v12095_v53, 7  ;;  %v12113_v9 = vmul.f32 0.75, %v12095_v53  ;;  %v784_v36 = vand.u32 15, %v494_v28 }
 0x18e   : > { %15083 = vst [vmem:[#allocation107_spill] sm:$0xff] %v12102_v61  ;;  %vm15084_vm2 = vcmask 1046528   ;;  %5456 = vmatmul.mubr.bf16.gmra.mrb[72].mxu0 %v12102_v61  ;;  %vm12117_vm5 = vcmp.eq.s32.totalorder %v791_v42, 0  ;;  %vm15087_vm9 = vcmask 1040384   ;;  %v1750_v57 = vrot.slane %v12087_v0, 1 }
 0x18f   : > { %v1749_v51 = vsel %vm15084_vm2, %v1746_v26, %v1748_v50  ;;  %v1558_v43 = vsel %vm15087_vm9, %v1555_v37, %v1557_v23  ;;  %vm15088_vm4 = vmmov %vm15087_vm9  ;;  %vm12129_vm2 = vcmp.eq.s32.totalorder %v784_v36, 15  ;;  %vm15091_vm9 = vcmask 1046528  }
 0x190   : > { %v2863_v41 = vmul.f32 0.75, %v1749_v51  ;;  %v1560_v44 = vsel %vm15088_vm4, %v1557_v23, %v14515_v4  ;;  %v2033_v28 = vsel %vm12117_vm5, %v12087_v0, %v1558_v43  ;;  %v2609_v42 = vmul.f32 0.75, %v1558_v43  ;;  %vm8267_vm4 = vmneg %vm12129_vm2  ;;  %v9715_v4 = vld [vmem:[#allocation6 + $0x3f0] ss:$8 sps:$4 sm:$0xff]  }
 0x191   : > { %v2097_v46 = vmul.f32 0.25, %v2033_v28  ;;  %v2098_v61 = vmul.f32 0.25, %v1560_v44  ;;  %v2610_v3 = vmul.f32 0.75, %v1560_v44  ;;  %v1751_v37 = vsel %vm15091_vm9, %v1748_v50, %v1750_v57  ;;  %vm8143_vm9 = vmneg %vm12117_vm5  ;;  %v9718_v50 = vld [vmem:[#allocation6 + $0x4f0] ss:$8 sps:$4 sm:$0xff]   ;;  %4248 = vmatpush1.bf16.msra.mxu1 %v9715_v4 }
 0x192   : > { %v2416_v40 = vsel %vm12129_vm2, %v12006_v60, %v1751_v37  ;;  %v2864_v32 = vmul.f32 0.75, %v1751_v37  ;;  %v2927_v23 = vadd.f32 %v2863_v41, %v2671_v13  ;;  %v2673_v36 = vmul.f32 0.25, %v12087_v0  ;;  %v9720_v13 = vld [vmem:[#allocation6 + $0x4f4] ss:$8 sps:$4 sm:$0xff]   ;;  %vm12156_vm7 = vmpackc.low %vm8267_vm4, %vm14803_vm0 }
 0x193   : > { %v2225_v43 = vadd.f32 %v12106_v38, %v2097_v46  ;;  %v2226_v28 = vadd.f32 %v12113_v9, %v2098_v61  ;;  %v12143_v44 = vmul.f32 0.25, %v12095_v53  ;;  %v2479_v60 = vmul.f32 0.25, %v1749_v51  ;;  %6139 = vmatprep.subr.bf16.mxu0 %v9720_v13  ;;  %vm12171_vm2 = vmpackc.low %vm14803_vm0, %vm8143_vm9 }
 0x194   : > { %v2928_v41 = vadd.f32 %v2864_v32, %v2672_v12  ;;  %v2737_v37 = vadd.f32 %v2673_v36, %v2609_v42  ;;  %v2480_v14 = vmul.f32 0.25, %v2416_v40  ;;  %v12148_v0 = vmul.f32 0.75, %v12046_v8  ;;  %6140 = vmatpush1.bf16.msra.mxu0 %v9718_v50 }
 0x195   : > { %v12150_v63 = vpack.c.bf16 %v2226_v28, %v2225_v43  ;;  %v15093_v46 = vmov 0  ;;  %v2738_v61 = vadd.f32 %v12143_v44, %v2610_v3  ;;  %v2543_v12 = vadd.f32 %v2479_v60, %v12017_v45 }
 0x196   : > { %v15094_v46 = vsel %vm12156_vm7, 4294967295, %v15093_v46  ;;  %v12163_v40 = vmul.f32 0.75, %v12055_v55  ;;  %v12165_v30 = vpack.c.bf16 %v2928_v41, %v2927_v23  ;;  %v15097_v8 = vmov 0 }
 0x197   : > { %15092 = vst [vmem:[#allocation108_spill] sm:$0xff] %v12150_v63  ;;  %15095 = vst [vmem:[#allocation109_spill] sm:$0xff] %v15094_v46  ;;  %v15098_v8 = vsel %vm12171_vm2, 4294967295, %v15097_v8  ;;  %v2544_v32 = vadd.f32 %v2480_v14, %v12024_v1  ;;  %v12178_v45 = vadd.f32 %v12148_v0, %v11884_v39  ;;  %v497_v55 = vadd.s32 320, %v14989_v24  ;;  %4086 = vmatprep.mubr.bf16.mxu1 %v12150_v63 }
 0x198   : > { %15096 = vst [vmem:[#allocation110_spill] sm:$0xff] %v12165_v30  ;;  %15099 = vst [vmem:[#allocation111_spill] sm:$0xff] %v15098_v8  ;;  %v12182_v3 = vpack.c.bf16 %v2738_v61, %v2737_v37  ;;  %v12186_v4 = vadd.f32 %v12163_v40, %v11895_v49  ;;  %v496_v51 = vadd.s32 312, %v14989_v24  ;;  %v1752_v22 = vrot.slane %v12095_v53, 1  ;;  %8522 = vmatprep.mubr.msk.bf16.mxu0 %vm12156_vm7, %v12165_v30 }
 0x199   : > { %v12193_v39 = vpack.c.bf16 %v2544_v32, %v2543_v12  ;;  %v805_v14 = vand.u32 15, %v497_v55  ;;  %v1561_v1 = vrot.slane %v12178_v45, 7  ;;  %v12197_v26 = vmul.f32 0.75, %v12178_v45 }
 0x19a   : > { %15100 = vst [vmem:[#allocation112_spill] sm:$0xff] %v12182_v3  ;;  %8146 = vmatmul.mubr.msk.bf16.gmra.mrb[76].mxu1 %vm12171_vm2, %v12182_v3  ;;  %v1563_v49 = vrot.slane %v12186_v4, 7  ;;  %v12204_v42 = vmul.f32 0.75, %v12186_v4  ;;  %v798_v23 = vand.u32 15, %v496_v51  ;;  %vm15102_vm5 = vcmask 1046528  }
 0x19b   : > { %15101 = vst [vmem:[#allocation113_spill] sm:$0xff] %v12193_v39  ;;  %v1753_v43 = vsel %vm15102_vm5, %v1750_v57, %v1752_v22  ;;  %5466 = vmatmul.mubr.bf16.gmra.mrb[76].mxu0 %v12193_v39  ;;  %vm12208_vm4 = vcmp.eq.s32.totalorder %v805_v14, 0  ;;  %v15105_v60 = vrot.slane %v12095_v53, 7  ;;  %vm15106_vm9 = vcmask 1040384   ;;  %v12235_v39 = vld [vmem:[%s10212_s6 + $0xb8] sm:$0xff] }
 0x19c   : > { %v1754_v13 = vrot.slane %v12178_v45, 1  ;;  %v2865_v41 = vmul.f32 0.75, %v1753_v43  ;;  %vm15107_vm2 = vmmov %vm15106_vm9  ;;  %vm12220_vm5 = vcmp.eq.s32.totalorder %v798_v23, 15  ;;  %vm15110_vm7 = vcmask 1046528  }
 0x19d   : > { %v1562_v50 = vsel %vm15106_vm9, %v15105_v60, %v1561_v1  ;;  %v1564_v37 = vsel %vm15107_vm2, %v1561_v1, %v1563_v49  ;;  %v12226_v60 = vld [vmem:[%s10212_s6 + $0xb0] sm:$0xff]  ;;  %vm8271_vm2 = vmneg %vm12220_vm5  ;;  %v2675_v23 = vmul.f32 0.25, %v12178_v45  ;;  %v12255_v28 = vmul.f32 0.25, %v12235_v39 }
 0x19e   : > { %v2035_v57 = vsel %vm12208_vm4, %v12178_v45, %v1562_v50  ;;  %v2611_v12 = vmul.f32 0.75, %v1562_v50  ;;  %v2100_v55 = vmul.f32 0.25, %v1564_v37  ;;  %v2612_v51 = vmul.f32 0.75, %v1564_v37  ;;  %vm12249_vm9 = vmpackc.low %vm8271_vm2, %vm14803_vm0 }
 0x19f   : > { %v2099_v32 = vmul.f32 0.25, %v2035_v57  ;;  %v1755_v14 = vsel %vm15110_vm7, %v1752_v22, %v1754_v13  ;;  %v2929_v3 = vadd.f32 %v2865_v41, %v2673_v36  ;;  %v2676_v22 = vmul.f32 0.25, %v12186_v4  ;;  %vm8147_vm7 = vmneg %vm12208_vm4 }
 0x1a0   : > { %v2418_v1 = vsel %vm12220_vm5, %v12095_v53, %v1755_v14  ;;  %v2866_v8 = vmul.f32 0.75, %v1755_v14  ;;  %v2228_v37 = vadd.f32 %v12204_v42, %v2100_v55  ;;  %v2481_v57 = vmul.f32 0.25, %v1753_v43  ;;  %vm12260_vm4 = vmpackc.low %vm14803_vm0, %vm8147_vm7 }
 0x1a1   : > { %v2227_v50 = vadd.f32 %v12197_v26, %v2099_v32  ;;  %v2739_v36 = vadd.f32 %v2675_v23, %v2611_v12  ;;  %v2482_v41 = vmul.f32 0.25, %v2418_v1  ;;  %v12244_v61 = vmul.f32 0.25, %v12226_v60 }
 0x1a2   : > { %v2930_v53 = vadd.f32 %v2866_v8, %v12143_v44  ;;  %v15112_v32 = vmov 0  ;;  %v2740_v55 = vadd.f32 %v2676_v22, %v2612_v51  ;;  %v2545_v14 = vadd.f32 %v2481_v57, %v12106_v38 }
 0x1a3   : > { %v12246_v45 = vpack.c.bf16 %v2228_v37, %v2227_v50  ;;  %v15113_v32 = vsel %vm12249_vm9, 4294967295, %v15112_v32  ;;  %v15116_v44 = vmov 0  ;;  %v2546_v8 = vadd.f32 %v2482_v41, %v12113_v9 }
 0x1a4   : > { %15114 = vst [vmem:[#allocation115_spill] sm:$0xff] %v15113_v32  ;;  %v12257_v43 = vpack.c.bf16 %v2930_v53, %v2929_v3  ;;  %v15117_v44 = vsel %vm12260_vm4, 4294967295, %v15116_v44  ;;  %v12267_v12 = vadd.f32 %v12148_v0, %v12244_v61  ;;  %v499_v51 = vadd.s32 336, %v14989_v24 }
 0x1a5   : > { %15111 = vst [vmem:[#allocation114_spill] sm:$0xff] %v12246_v45  ;;  %15118 = vst [vmem:[#allocation117_spill] sm:$0xff] %v15117_v44  ;;  %4096 = vmatprep.mubr.bf16.mxu1 %v12246_v45  ;;  %v12271_v38 = vpack.c.bf16 %v2740_v55, %v2739_v36  ;;  %v12275_v3 = vadd.f32 %v12163_v40, %v12255_v28  ;;  %v498_v1 = vadd.s32 328, %v14989_v24  ;;  %v1756_v50 = vrot.slane %v12186_v4, 1  ;;  %v9723_v44 = vld [vmem:[#allocation6 + $0x4] ss:$8 sps:$4 sm:$0xff]  }
 0x1a6   : > { %15115 = vst [vmem:[#allocation116_spill] sm:$0xff] %v12257_v43  ;;  %8526 = vmatprep.mubr.msk.bf16.mxu0 %vm12249_vm9, %v12257_v43  ;;  %v12282_v9 = vpack.c.bf16 %v2546_v8, %v2545_v14  ;;  %v819_v0 = vand.u32 15, %v499_v51  ;;  %v1565_v37 = vrot.slane %v12267_v12, 7  ;;  %v12286_v57 = vmul.f32 0.75, %v12267_v12  ;;  %4890 = vmatprep.subr.bf16.mxu1 %v9723_v44 }
 0x1a7   : > { %15119 = vst [vmem:[#allocation118_spill] sm:$0xff] %v12271_v38  ;;  %8150 = vmatmul.mubr.msk.bf16.gmra.mrb[80].mxu1 %vm12260_vm4, %v12271_v38  ;;  %v14548_v40 = vrot.slane %v12275_v3, 7  ;;  %v12293_v53 = vmul.f32 0.75, %v12275_v3  ;;  %v812_v36 = vand.u32 15, %v498_v1  ;;  %vm15121_vm5 = vcmask 1046528  }
 0x1a8   : > { %15120 = vst [vmem:[#allocation119_spill] sm:$0xff] %v12282_v9  ;;  %v1757_v41 = vsel %vm15121_vm5, %v1754_v13, %v1756_v50  ;;  %5476 = vmatmul.mubr.bf16.gmra.mrb[80].mxu0 %v12282_v9  ;;  %vm12297_vm2 = vcmp.eq.s32.totalorder %v819_v0, 0  ;;  %vm15124_vm7 = vcmask 1040384   ;;  %v1758_v8 = vrot.slane %v12267_v12, 1  ;;  %v9726_v9 = vld [vmem:[#allocation6 + $0x504] ss:$8 sps:$4 sm:$0xff]  }
 0x1a9   : > { %v1566_v14 = vsel %vm15124_vm7, %v1563_v49, %v1565_v37  ;;  %v2867_v51 = vmul.f32 0.75, %v1757_v41  ;;  %vm15125_vm4 = vmmov %vm15124_vm7  ;;  %vm12309_vm5 = vcmp.eq.s32.totalorder %v812_v36, 15  ;;  %vm15128_vm7 = vcmask 1046528   ;;  %6462 = vmatprep.subr.bf16.mxu0 %v9726_v9 }
 0x1aa   : > { %v1568_v38 = vsel %vm15125_vm4, %v1565_v37, %v14548_v40  ;;  %v2037_v13 = vsel %vm12297_vm2, %v12267_v12, %v1566_v14  ;;  %v2613_v0 = vmul.f32 0.75, %v1566_v14  ;;  %v1759_v43 = vsel %vm15128_vm7, %v1756_v50, %v1758_v8  ;;  %vm8275_vm4 = vmneg %vm12309_vm5 }
 0x1ab   : > { %v2101_v45 = vmul.f32 0.25, %v2037_v13  ;;  %v2102_v49 = vmul.f32 0.25, %v1568_v38  ;;  %v2614_v32 = vmul.f32 0.75, %v1568_v38  ;;  %v2420_v37 = vsel %vm12309_vm5, %v12186_v4, %v1759_v43  ;;  %vm8151_vm7 = vmneg %vm12297_vm2 }
 0x1ac   : > { %v2868_v40 = vmul.f32 0.75, %v1759_v43  ;;  %v2931_v63 = vadd.f32 %v2867_v51, %v2675_v23  ;;  %v2677_v36 = vmul.f32 0.25, %v12267_v12  ;;  %v2678_v38 = vmul.f32 0.25, %v12275_v3  ;;  %vm12331_vm5 = vmpackc.low %vm8275_vm4, %vm14803_vm0 }
 0x1ad   : > { %v2229_v14 = vadd.f32 %v12286_v57, %v2101_v45  ;;  %v2230_v13 = vadd.f32 %v12293_v53, %v2102_v49  ;;  %v2483_v44 = vmul.f32 0.25, %v1757_v41  ;;  %v2484_v43 = vmul.f32 0.25, %v2420_v37  ;;  %vm12340_vm2 = vmpackc.low %vm14803_vm0, %vm8151_vm7 }
 0x1ae   : > { %v2932_v50 = vadd.f32 %v2868_v40, %v2676_v22  ;;  %v2741_v4 = vadd.f32 %v2677_v36, %v2613_v0  ;;  %v12326_v23 = vmul.f32 0.75, %v12226_v60  ;;  %v15130_v12 = vmov 0 }
 0x1af   : > { %v12328_v51 = vpack.c.bf16 %v2230_v13, %v2229_v14  ;;  %v15131_v12 = vsel %vm12331_vm5, 4294967295, %v15130_v12  ;;  %v2742_v45 = vadd.f32 %v2678_v38, %v2614_v32  ;;  %v2547_v9 = vadd.f32 %v2483_v44, %v12197_v26 }
 0x1b0   : > { %15132 = vst [vmem:[#allocation121_spill] sm:$0xff] %v15131_v12  ;;  %v381_v55 = vmul.f32 0.75, %v12235_v39  ;;  %v12337_v1 = vpack.c.bf16 %v2932_v50, %v2931_v63  ;;  %v15134_v22 = vmov 0  ;;  %v2548_v60 = vadd.f32 %v2484_v43, %v12204_v42  ;;  %v12403_v12 = vld [vmem:[%s10212_s6 + $0xc8] sm:$0xff] }
 0x1b1   : > { %15129 = vst [vmem:[#allocation120_spill] sm:$0xff] %v12328_v51  ;;  %v15135_v22 = vsel %vm12340_vm2, 4294967295, %v15134_v22  ;;  %v12347_v40 = vadd.f32 %v12326_v23, %v12064_v27  ;;  %v501_v41 = vadd.s32 352, %v14989_v24  ;;  %4106 = vmatprep.mubr.bf16.mxu1 %v12328_v51  ;;  %v12351_v26 = vpack.c.bf16 %v2742_v45, %v2741_v4 }
 0x1b2   : > { %15133 = vst [vmem:[#allocation122_spill] sm:$0xff] %v12337_v1  ;;  %15136 = vst [vmem:[#allocation123_spill] sm:$0xff] %v15135_v22  ;;  %v12354_v63 = vadd.f32 %v381_v55, %v12075_v5  ;;  %v500_v39 = vadd.s32 344, %v14989_v24  ;;  %v1760_v32 = vrot.slane %v12275_v3, 1  ;;  %8530 = vmatprep.mubr.msk.bf16.mxu0 %vm12331_vm5, %v12337_v1  ;;  %v12361_v42 = vpack.c.bf16 %v2548_v60, %v2547_v9 }
 0x1b3   : > { %15137 = vst [vmem:[#allocation124_spill] sm:$0xff] %v12351_v26  ;;  %v833_v27 = vand.u32 15, %v501_v41  ;;  %v1569_v0 = vrot.slane %v12347_v40, 7  ;;  %v12365_v49 = vmul.f32 0.75, %v12347_v40  ;;  %8154 = vmatmul.mubr.msk.bf16.gmra.mrb[84].mxu1 %vm12340_vm2, %v12351_v26  ;;  %vm15139_vm4 = vcmask 1046528   ;;  %v12394_v26 = vld [vmem:[%s10212_s6 + $0xc0] sm:$0xff] }
 0x1b4   : > { %15138 = vst [vmem:[#allocation125_spill] sm:$0xff] %v12361_v42  ;;  %v1571_v5 = vrot.slane %v12354_v63, 7  ;;  %v12372_v37 = vmul.f32 0.75, %v12354_v63  ;;  %v826_v14 = vand.u32 15, %v500_v39  ;;  %v1761_v13 = vsel %vm15139_vm4, %v1758_v8, %v1760_v32  ;;  %5486 = vmatmul.mubr.bf16.gmra.mrb[84].mxu0 %v12361_v42 }
 0x1b5   : > { %vm12376_vm7 = vcmp.eq.s32.totalorder %v833_v27, 0  ;;  %v15142_v50 = vrot.slane %v12275_v3, 7  ;;  %vm15143_vm5 = vcmask 1040384   ;;  %v1762_v43 = vrot.slane %v12347_v40, 1 }
 0x1b6   : > { %v2869_v45 = vmul.f32 0.75, %v1761_v13  ;;  %vm15144_vm2 = vmmov %vm15143_vm5  ;;  %vm12388_vm4 = vcmp.eq.s32.totalorder %v826_v14, 15  ;;  %vm15147_vm9 = vcmask 1046528   ;;  %v2679_v14 = vmul.f32 0.25, %v12347_v40 }
 0x1b7   : > { %v1570_v4 = vsel %vm15143_vm5, %v15142_v50, %v1569_v0  ;;  %v1572_v9 = vsel %vm15144_vm2, %v1569_v0, %v1571_v5  ;;  %v1763_v50 = vsel %vm15147_vm9, %v1760_v32, %v1762_v43  ;;  %vm8279_vm5 = vmneg %vm12388_vm4  ;;  %v2680_v32 = vmul.f32 0.25, %v12354_v63 }
 0x1b8   : > { %v2039_v8 = vsel %vm12376_vm7, %v12347_v40, %v1570_v4  ;;  %v2615_v41 = vmul.f32 0.75, %v1570_v4  ;;  %v2104_v27 = vmul.f32 0.25, %v1572_v9  ;;  %v2616_v22 = vmul.f32 0.75, %v1572_v9  ;;  %vm8155_vm9 = vmneg %vm12376_vm7 }
 0x1b9   : > { %v2103_v39 = vmul.f32 0.25, %v2039_v8  ;;  %v2422_v0 = vsel %vm12388_vm4, %v12275_v3, %v1763_v50  ;;  %v2870_v42 = vmul.f32 0.75, %v1763_v50  ;;  %v2933_v51 = vadd.f32 %v2869_v45, %v2677_v36  ;;  %vm12416_vm2 = vmpackc.low %vm8279_vm5, %vm14803_vm0 }
 0x1ba   : > { %v2232_v9 = vadd.f32 %v12372_v37, %v2104_v27  ;;  %v2485_v8 = vmul.f32 0.25, %v1761_v13  ;;  %v2743_v50 = vadd.f32 %v2679_v14, %v2615_v41  ;;  %v2486_v36 = vmul.f32 0.25, %v2422_v0  ;;  %vm12427_vm7 = vmpackc.low %vm14803_vm0, %vm8155_vm9 }
 0x1bb   : > { %v2231_v4 = vadd.f32 %v12365_v49, %v2103_v39  ;;  %v2934_v3 = vadd.f32 %v2870_v42, %v2678_v38  ;;  %v12411_v45 = vmul.f32 0.25, %v12394_v26  ;;  %v15149_v40 = vmov 0 }
 0x1bc   : > { %v15150_v40 = vsel %vm12416_vm2, 4294967295, %v15149_v40  ;;  %v2744_v39 = vadd.f32 %v2680_v32, %v2616_v22  ;;  %v2549_v27 = vadd.f32 %v2485_v8, %v12286_v57  ;;  %v12422_v44 = vmul.f32 0.25, %v12403_v12 }
 0x1bd   : > { %v12413_v60 = vpack.c.bf16 %v2232_v9, %v2231_v4  ;;  %15151 = vst [vmem:[#allocation127_spill] sm:$0xff] %v15150_v40  ;;  %v12424_v13 = vpack.c.bf16 %v2934_v3, %v2933_v51  ;;  %v15153_v38 = vmov 0  ;;  %v2550_v42 = vadd.f32 %v2486_v36, %v12293_v53 }
 0x1be   : > { %v15154_v38 = vsel %vm12427_vm7, 4294967295, %v15153_v38  ;;  %v12434_v41 = vadd.f32 %v12326_v23, %v12411_v45  ;;  %v503_v22 = vadd.s32 368, %v14989_v24  ;;  %v12438_v57 = vpack.c.bf16 %v2744_v39, %v2743_v50 }
 0x1bf   : > { %15148 = vst [vmem:[#allocation126_spill] sm:$0xff] %v12413_v60  ;;  %15152 = vst [vmem:[#allocation128_spill] sm:$0xff] %v12424_v13  ;;  %4116 = vmatprep.mubr.bf16.mxu1 %v12413_v60  ;;  %v12441_v51 = vadd.f32 %v381_v55, %v12422_v44  ;;  %v502_v0 = vadd.s32 360, %v14989_v24  ;;  %v1764_v4 = vrot.slane %v12354_v63, 1  ;;  %8534 = vmatprep.mubr.msk.bf16.mxu0 %vm12416_vm2, %v12424_v13  ;;  %vm15158_vm4 = vcmask 1046528  }
 0x1c0   : > { %15155 = vst [vmem:[#allocation129_spill] sm:$0xff] %v15154_v38  ;;  %15156 = vst [vmem:[#allocation130_spill] sm:$0xff] %v12438_v57  ;;  %v12448_v53 = vpack.c.bf16 %v2550_v42, %v2549_v27  ;;  %v847_v23 = vand.u32 15, %v503_v22  ;;  %v1573_v9 = vrot.slane %v12434_v41, 7  ;;  %v12452_v8 = vmul.f32 0.75, %v12434_v41  ;;  %8158 = vmatmul.mubr.msk.bf16.gmra.mrb[88].mxu1 %vm12427_vm7, %v12438_v57 }
 0x1c1   : > { %v1575_v55 = vrot.slane %v12441_v51, 7  ;;  %v12459_v3 = vmul.f32 0.75, %v12441_v51  ;;  %v840_v50 = vand.u32 15, %v502_v0  ;;  %v1765_v36 = vsel %vm15158_vm4, %v1762_v43, %v1764_v4 }
 0x1c2   : > { %15157 = vst [vmem:[#allocation131_spill] sm:$0xff] %v12448_v53  ;;  %5496 = vmatmul.mubr.bf16.gmra.mrb[88].mxu0 %v12448_v53  ;;  %vm12463_vm5 = vcmp.eq.s32.totalorder %v847_v23, 0  ;;  %vm15161_vm9 = vcmask 1040384   ;;  %v1766_v42 = vrot.slane %v12434_v41, 1  ;;  %v2871_v22 = vmul.f32 0.75, %v1765_v36 }
 0x1c3   : > { %v1574_v27 = vsel %vm15161_vm9, %v1571_v5, %v1573_v9  ;;  %vm15162_vm7 = vmmov %vm15161_vm9  ;;  %vm12473_vm2 = vcmp.eq.s32.totalorder %v840_v50, 15  ;;  %v2681_v50 = vmul.f32 0.25, %v12434_v41  ;;  %v383_v39 = vmul.f32 0.75, %v12403_v12 }
 0x1c4   : > { %v1576_v38 = vsel %vm15162_vm7, %v1573_v9, %v1575_v55  ;;  %v2041_v57 = vsel %vm12463_vm5, %v12434_v41, %v1574_v27  ;;  %v2617_v43 = vmul.f32 0.75, %v1574_v27  ;;  %v1767_v40 = vsel %vm15158_vm4, %v1764_v4, %v1766_v42  ;;  %vm8283_vm7 = vmneg %vm12473_vm2 }
 0x1c5   : > { %v2105_v23 = vmul.f32 0.25, %v2041_v57  ;;  %v2106_v53 = vmul.f32 0.25, %v1576_v38  ;;  %v2618_v60 = vmul.f32 0.75, %v1576_v38  ;;  %v2424_v5 = vsel %vm12473_vm2, %v12354_v63, %v1767_v40  ;;  %vm8159_vm9 = vmneg %vm12463_vm5 }
 0x1c6   : > { %v2872_v13 = vmul.f32 0.75, %v1767_v40  ;;  %v2935_v9 = vadd.f32 %v2871_v22, %v2679_v14  ;;  %v2682_v57 = vmul.f32 0.25, %v12441_v51  ;;  %v2487_v38 = vmul.f32 0.25, %v1765_v36  ;;  %vm12495_vm2 = vmpackc.low %vm8283_vm7, %vm14803_vm0 }
 0x1c7   : > { %v2233_v1 = vadd.f32 %v12452_v8, %v2105_v23  ;;  %v2234_v27 = vadd.f32 %v12459_v3, %v2106_v53  ;;  %v2745_v46 = vadd.f32 %v2681_v50, %v2617_v43  ;;  %v2488_v63 = vmul.f32 0.25, %v2424_v5  ;;  %vm12504_vm5 = vmpackc.low %vm14803_vm0, %vm8159_vm9 }
 0x1c8   : > { %v2936_v4 = vadd.f32 %v2872_v13, %v2680_v32  ;;  %v12490_v14 = vmul.f32 0.75, %v12394_v26  ;;  %v15166_v41 = vmov 0  ;;  %v2746_v53 = vadd.f32 %v2682_v57, %v2618_v60 }
 0x1c9   : > { %v12492_v40 = vpack.c.bf16 %v2234_v27, %v2233_v1  ;;  %v15167_v41 = vsel %vm12495_vm2, 4294967295, %v15166_v41  ;;  %v2551_v22 = vadd.f32 %v2487_v38, %v12365_v49  ;;  %v15170_v32 = vmov 0 }
 0x1ca   : > { %15168 = vst [vmem:[#allocation133_spill] sm:$0xff] %v15167_v41  ;;  %v12501_v0 = vpack.c.bf16 %v2936_v4, %v2935_v9  ;;  %v15171_v32 = vsel %vm12504_vm5, 4294967295, %v15170_v32  ;;  %v2552_v1 = vadd.f32 %v2488_v63, %v12372_v37  ;;  %v12511_v26 = vadd.f32 %v12490_v14, %v12244_v61 }
 0x1cb   : > { %15165 = vst [vmem:[#allocation132_spill] sm:$0xff] %v12492_v40  ;;  %15172 = vst [vmem:[#allocation135_spill] sm:$0xff] %v15171_v32  ;;  %v505_v13 = vadd.s32 384, %v14989_v24  ;;  %4126 = vmatprep.mubr.bf16.mxu1 %v12492_v40  ;;  %v12515_v49 = vpack.c.bf16 %v2746_v53, %v2745_v46  ;;  %v12518_v12 = vadd.f32 %v383_v39, %v12255_v28  ;;  %v504_v60 = vadd.s32 376, %v14989_v24  ;;  %v12556_v32 = vld [vmem:[%s10212_s6 + $0xd0] sm:$0xff]  ;;  %v12565_v40 = vld [vmem:[%s10212_s6 + $0xd8] sm:$0xff] }
 0x1cc   : > { %15169 = vst [vmem:[#allocation134_spill] sm:$0xff] %v12501_v0  ;;  %v1768_v36 = vrot.slane %v12441_v51, 1  ;;  %8538 = vmatprep.mubr.msk.bf16.mxu0 %vm12495_vm2, %v12501_v0  ;;  %v12525_v37 = vpack.c.bf16 %v2552_v1, %v2551_v22  ;;  %v1577_v43 = vrot.slane %v12511_v26, 7  ;;  %v12529_v23 = vmul.f32 0.75, %v12511_v26 }
 0x1cd   : > { %15173 = vst [vmem:[#allocation136_spill] sm:$0xff] %v12515_v49  ;;  %v861_v61 = vand.u32 15, %v505_v13  ;;  %8162 = vmatmul.mubr.msk.bf16.gmra.mrb[92].mxu1 %vm12504_vm5, %v12515_v49  ;;  %v1579_v46 = vrot.slane %v12518_v12, 7  ;;  %v12536_v28 = vmul.f32 0.75, %v12518_v12  ;;  %v854_v5 = vand.u32 15, %v504_v60 }
 0x1ce   : > { %15174 = vst [vmem:[#allocation137_spill] sm:$0xff] %v12525_v37  ;;  %v1769_v9 = vsel %vm15158_vm4, %v1766_v42, %v1768_v36  ;;  %5506 = vmatmul.mubr.bf16.gmra.mrb[92].mxu0 %v12525_v37  ;;  %vm15177_vm9 = vcmask 1040384   ;;  %v1770_v4 = vrot.slane %v12511_v26, 1  ;;  %v12584_v27 = vmul.f32 0.25, %v12565_v40 }
 0x1cf   : > { %vm12540_vm7 = vcmp.eq.s32.totalorder %v861_v61, 0  ;;  %v1578_v38 = vsel %vm15177_vm9, %v1575_v55, %v1577_v43  ;;  %v2873_v63 = vmul.f32 0.75, %v1769_v9  ;;  %vm15178_vm5 = vmmov %vm15177_vm9  ;;  %vm12550_vm2 = vcmp.eq.s32.totalorder %v854_v5, 15 }
 0x1d0   : > { %v1580_v53 = vsel %vm15178_vm5, %v1577_v43, %v1579_v46  ;;  %v2043_v22 = vsel %vm12540_vm7, %v12511_v26, %v1578_v38  ;;  %v2619_v1 = vmul.f32 0.75, %v1578_v38  ;;  %v1771_v55 = vsel %vm15158_vm4, %v1768_v36, %v1770_v4  ;;  %vm8287_vm5 = vmneg %vm12550_vm2 }
 0x1d1   : > { %v2107_v13 = vmul.f32 0.25, %v2043_v22  ;;  %v2108_v60 = vmul.f32 0.25, %v1580_v53  ;;  %v2620_v61 = vmul.f32 0.75, %v1580_v53  ;;  %v2426_v43 = vsel %vm12550_vm2, %v12441_v51, %v1771_v55  ;;  %vm8163_vm9 = vmneg %vm12540_vm7 }
 0x1d2   : > { %v2874_v49 = vmul.f32 0.75, %v1771_v55  ;;  %v2937_v37 = vadd.f32 %v2873_v63, %v2681_v50  ;;  %v2683_v5 = vmul.f32 0.25, %v12511_v26  ;;  %v2684_v36 = vmul.f32 0.25, %v12518_v12  ;;  %vm12578_vm2 = vmpackc.low %vm8287_vm5, %vm14803_vm0 }
 0x1d3   : > { %v2235_v38 = vadd.f32 %v12529_v23, %v2107_v13  ;;  %v2236_v53 = vadd.f32 %v12536_v28, %v2108_v60  ;;  %v2489_v22 = vmul.f32 0.25, %v1769_v9  ;;  %v2490_v50 = vmul.f32 0.25, %v2426_v43  ;;  %vm12589_vm7 = vmpackc.low %vm14803_vm0, %vm8163_vm9 }
 0x1d4   : > { %v2938_v51 = vadd.f32 %v2874_v49, %v2682_v57  ;;  %v2747_v55 = vadd.f32 %v2683_v5, %v2619_v1  ;;  %v12573_v63 = vmul.f32 0.25, %v12556_v32  ;;  %v15182_v26 = vmov 0 }
 0x1d5   : > { %v12575_v42 = vpack.c.bf16 %v2236_v53, %v2235_v38  ;;  %v15183_v26 = vsel %vm12578_vm2, 4294967295, %v15182_v26  ;;  %v2748_v13 = vadd.f32 %v2684_v36, %v2620_v61  ;;  %v2553_v60 = vadd.f32 %v2489_v22, %v12452_v8 }
 0x1d6   : > { %15184 = vst [vmem:[#allocation139_spill] sm:$0xff] %v15183_v26  ;;  %v12586_v9 = vpack.c.bf16 %v2938_v51, %v2937_v37  ;;  %v15186_v57 = vmov 0  ;;  %v2554_v49 = vadd.f32 %v2490_v50, %v12459_v3  ;;  %v12596_v1 = vadd.f32 %v12490_v14, %v12573_v63 }
 0x1d7   : > { %15181 = vst [vmem:[#allocation138_spill] sm:$0xff] %v12575_v42  ;;  %v15187_v57 = vsel %vm12589_vm7, 4294967295, %v15186_v57  ;;  %v507_v61 = vadd.s32 400, %v14989_v24  ;;  %4136 = vmatprep.mubr.bf16.mxu1 %v12575_v42  ;;  %v12600_v8 = vpack.c.bf16 %v2748_v13, %v2747_v55  ;;  %v12603_v37 = vadd.f32 %v383_v39, %v12584_v27 }
 0x1d8   : > { %15185 = vst [vmem:[#allocation140_spill] sm:$0xff] %v12586_v9  ;;  %15188 = vst [vmem:[#allocation141_spill] sm:$0xff] %v15187_v57  ;;  %v506_v43 = vadd.s32 392, %v14989_v24  ;;  %v1772_v38 = vrot.slane %v12518_v12, 1  ;;  %8542 = vmatprep.mubr.msk.bf16.mxu0 %vm12578_vm2, %v12586_v9  ;;  %v12610_v3 = vpack.c.bf16 %v2554_v49, %v2553_v60  ;;  %v1581_v53 = vrot.slane %v12596_v1, 7 }
 0x1d9   : > { %15189 = vst [vmem:[#allocation142_spill] sm:$0xff] %v12600_v8  ;;  %v875_v14 = vand.u32 15, %v507_v61  ;;  %v12614_v22 = vmul.f32 0.75, %v12596_v1  ;;  %8166 = vmatmul.mubr.msk.bf16.gmra.mrb[96].mxu1 %vm12589_vm7, %v12600_v8  ;;  %v1583_v39 = vrot.slane %v12603_v37, 7  ;;  %v12621_v51 = vmul.f32 0.75, %v12603_v37 }
 0x1da   : > { %15190 = vst [vmem:[#allocation143_spill] sm:$0xff] %v12610_v3  ;;  %v868_v55 = vand.u32 15, %v506_v43  ;;  %v1773_v50 = vsel %vm15158_vm4, %v1770_v4, %v1772_v38  ;;  %5516 = vmatmul.mubr.bf16.gmra.mrb[96].mxu0 %v12610_v3  ;;  %vm15193_vm9 = vcmask 1040384   ;;  %v1774_v49 = vrot.slane %v12596_v1, 1 }
 0x1db   : > { %vm12625_vm5 = vcmp.eq.s32.totalorder %v875_v14, 0  ;;  %v1582_v60 = vsel %vm15193_vm9, %v1579_v46, %v1581_v53  ;;  %v2875_v61 = vmul.f32 0.75, %v1773_v50  ;;  %vm15194_vm7 = vmmov %vm15193_vm9  ;;  %v385_v13 = vmul.f32 0.75, %v12565_v40 }
 0x1dc   : > { %v1584_v57 = vsel %vm15194_vm7, %v1581_v53, %v1583_v39  ;;  %v2045_v8 = vsel %vm12625_vm5, %v12596_v1, %v1582_v60  ;;  %vm12635_vm2 = vcmp.eq.s32.totalorder %v868_v55, 15  ;;  %v2621_v4 = vmul.f32 0.75, %v1582_v60  ;;  %vm8167_vm9 = vmneg %vm12625_vm5 }
 0x1dd   : > { %v2109_v14 = vmul.f32 0.25, %v2045_v8  ;;  %v2110_v3 = vmul.f32 0.25, %v1584_v57  ;;  %v2622_v42 = vmul.f32 0.75, %v1584_v57  ;;  %v1775_v26 = vsel %vm15158_vm4, %v1772_v38, %v1774_v49  ;;  %vm8291_vm7 = vmneg %vm12635_vm2 }
 0x1de   : > { %v2428_v46 = vsel %vm12635_vm2, %v12518_v12, %v1775_v26  ;;  %v2876_v9 = vmul.f32 0.75, %v1775_v26  ;;  %v2939_v53 = vadd.f32 %v2875_v61, %v2683_v5  ;;  %v2685_v55 = vmul.f32 0.25, %v12596_v1  ;;  %vm12657_vm2 = vmpackc.low %vm8291_vm7, %vm14803_vm0 }
 0x1df   : > { %v2237_v41 = vadd.f32 %v12614_v22, %v2109_v14  ;;  %v2238_v60 = vadd.f32 %v12621_v51, %v2110_v3  ;;  %v2686_v8 = vmul.f32 0.25, %v12603_v37  ;;  %v2491_v57 = vmul.f32 0.25, %v1773_v50  ;;  %vm12666_vm5 = vmpackc.low %vm14803_vm0, %vm8167_vm9 }
 0x1e0   : > { %v2940_v38 = vadd.f32 %v2876_v9, %v2684_v36  ;;  %v2749_v0 = vadd.f32 %v2685_v55, %v2621_v4  ;;  %v2492_v12 = vmul.f32 0.25, %v2428_v46  ;;  %v12652_v5 = vmul.f32 0.75, %v12556_v32 }
 0x1e1   : > { %v12654_v26 = vpack.c.bf16 %v2238_v60, %v2237_v41  ;;  %v15198_v1 = vmov 0  ;;  %v2750_v3 = vadd.f32 %v2686_v8, %v2622_v42  ;;  %v2555_v61 = vadd.f32 %v2491_v57, %v12529_v23 }
 0x1e2   : > { %v15199_v1 = vsel %vm12657_vm2, 4294967295, %v15198_v1  ;;  %v12663_v43 = vpack.c.bf16 %v2940_v38, %v2939_v53  ;;  %v15202_v36 = vmov 0  ;;  %v2556_v41 = vadd.f32 %v2492_v12, %v12536_v28 }
 0x1e3   : > { %15197 = vst [vmem:[#allocation144_spill] sm:$0xff] %v12654_v26  ;;  %15200 = vst [vmem:[#allocation145_spill] sm:$0xff] %v15199_v1  ;;  %v15203_v36 = vsel %vm12666_vm5, 4294967295, %v15202_v36  ;;  %v12673_v32 = vadd.f32 %v12652_v5, %v12411_v45  ;;  %v509_v9 = vadd.s32 416, %v14989_v24  ;;  %4146 = vmatprep.mubr.bf16.mxu1 %v12654_v26  ;;  %v12677_v23 = vpack.c.bf16 %v2750_v3, %v2749_v0  ;;  %v12727_v26 = vld [vmem:[%s10212_s6 + $0xe8] sm:$0xff] }
 0x1e4   : > { %15201 = vst [vmem:[#allocation146_spill] sm:$0xff] %v12663_v43  ;;  %15204 = vst [vmem:[#allocation147_spill] sm:$0xff] %v15203_v36  ;;  %v12680_v40 = vadd.f32 %v385_v13, %v12422_v44  ;;  %v508_v42 = vadd.s32 408, %v14989_v24  ;;  %v1776_v50 = vrot.slane %v12603_v37, 1  ;;  %8546 = vmatprep.mubr.msk.bf16.mxu0 %vm12657_vm2, %v12663_v43  ;;  %v12687_v28 = vpack.c.bf16 %v2556_v41, %v2555_v61  ;;  %v12718_v36 = vld [vmem:[%s10212_s6 + $0xe0] sm:$0xff] }
 0x1e5   : > { %15205 = vst [vmem:[#allocation148_spill] sm:$0xff] %v12677_v23  ;;  %v889_v45 = vand.u32 15, %v509_v9  ;;  %v1585_v4 = vrot.slane %v12673_v32, 7  ;;  %v12691_v14 = vmul.f32 0.75, %v12673_v32  ;;  %8170 = vmatmul.mubr.msk.bf16.gmra.mrb[100].mxu1 %vm12666_vm5, %v12677_v23  ;;  %vm15209_vm9 = vcmask 1040384  }
 0x1e6   : > { %15206 = vst [vmem:[#allocation149_spill] sm:$0xff] %v12687_v28  ;;  %v1587_v44 = vrot.slane %v12680_v40, 7  ;;  %v12698_v0 = vmul.f32 0.75, %v12680_v40  ;;  %v882_v46 = vand.u32 15, %v508_v42  ;;  %v1777_v53 = vsel %vm15158_vm4, %v1774_v49, %v1776_v50  ;;  %5526 = vmatmul.mubr.bf16.gmra.mrb[100].mxu0 %v12687_v28  ;;  %vm15210_vm5 = vmmov %vm15209_vm9 }
 0x1e7   : > { %vm12702_vm7 = vcmp.eq.s32.totalorder %v889_v45, 0  ;;  %v1586_v57 = vsel %vm15209_vm9, %v1583_v39, %v1585_v4  ;;  %v1778_v38 = vrot.slane %v12673_v32, 1  ;;  %v2877_v12 = vmul.f32 0.75, %v1777_v53 }
 0x1e8   : > { %v1588_v3 = vsel %vm15210_vm5, %v1585_v4, %v1587_v44  ;;  %v2047_v61 = vsel %vm12702_vm7, %v12673_v32, %v1586_v57  ;;  %vm12712_vm2 = vcmp.eq.s32.totalorder %v882_v46, 15  ;;  %v2623_v41 = vmul.f32 0.75, %v1586_v57  ;;  %vm8171_vm9 = vmneg %vm12702_vm7 }
 0x1e9   : > { %v2111_v9 = vmul.f32 0.25, %v2047_v61  ;;  %v2112_v42 = vmul.f32 0.25, %v1588_v3  ;;  %v2624_v45 = vmul.f32 0.75, %v1588_v3  ;;  %v1779_v39 = vsel %vm15158_vm4, %v1776_v50, %v1778_v38  ;;  %vm8295_vm5 = vmneg %vm12712_vm2 }
 0x1ea   : > { %v2430_v4 = vsel %vm12712_vm2, %v12603_v37, %v1779_v39  ;;  %v2878_v23 = vmul.f32 0.75, %v1779_v39  ;;  %v2941_v28 = vadd.f32 %v2877_v12, %v2685_v55  ;;  %v2687_v46 = vmul.f32 0.25, %v12673_v32  ;;  %vm12740_vm2 = vmpackc.low %vm8295_vm5, %vm14803_vm0 }
 0x1eb   : > { %v2239_v57 = vadd.f32 %v12691_v14, %v2111_v9  ;;  %v2240_v3 = vadd.f32 %v12698_v0, %v2112_v42  ;;  %v2688_v50 = vmul.f32 0.25, %v12680_v40  ;;  %v2493_v61 = vmul.f32 0.25, %v1777_v53  ;;  %vm12751_vm7 = vmpackc.low %vm14803_vm0, %vm8171_vm9 }
 0x1ec   : > { %v2942_v37 = vadd.f32 %v2878_v23, %v2686_v8  ;;  %v2751_v39 = vadd.f32 %v2687_v46, %v2623_v41  ;;  %v2494_v55 = vmul.f32 0.25, %v2430_v4  ;;  %v12735_v12 = vmul.f32 0.25, %v12718_v36 }
 0x1ed   : > { %v12737_v49 = vpack.c.bf16 %v2240_v3, %v2239_v57  ;;  %v15214_v32 = vmov 0  ;;  %v2752_v9 = vadd.f32 %v2688_v50, %v2624_v45  ;;  %v2557_v42 = vadd.f32 %v2493_v61, %v12614_v22 }
 0x1ee   : > { %v15215_v32 = vsel %vm12740_vm2, 4294967295, %v15214_v32  ;;  %v12746_v60 = vmul.f32 0.25, %v12727_v26  ;;  %v12748_v53 = vpack.c.bf16 %v2942_v37, %v2941_v28  ;;  %v15218_v8 = vmov 0 }
 0x1ef   : > { %15213 = vst [vmem:[#allocation150_spill] sm:$0xff] %v12737_v49  ;;  %15216 = vst [vmem:[#allocation151_spill] sm:$0xff] %v15215_v32  ;;  %v15219_v8 = vsel %vm12751_vm7, 4294967295, %v15218_v8  ;;  %v2558_v23 = vadd.f32 %v2494_v55, %v12621_v51  ;;  %v12758_v41 = vadd.f32 %v12652_v5, %v12735_v12  ;;  %v511_v45 = vadd.s32 432, %v14989_v24  ;;  %4156 = vmatprep.mubr.bf16.mxu1 %v12737_v49 }
 0x1f0   : > { %15217 = vst [vmem:[#allocation152_spill] sm:$0xff] %v12748_v53  ;;  %15220 = vst [vmem:[#allocation153_spill] sm:$0xff] %v15219_v8  ;;  %v12762_v22 = vpack.c.bf16 %v2752_v9, %v2751_v39  ;;  %v12765_v28 = vadd.f32 %v385_v13, %v12746_v60  ;;  %v510_v4 = vadd.s32 424, %v14989_v24  ;;  %v1780_v57 = vrot.slane %v12680_v40, 1  ;;  %8550 = vmatprep.mubr.msk.bf16.mxu0 %vm12740_vm2, %v12748_v53 }
 0x1f1   : > { %v12772_v51 = vpack.c.bf16 %v2558_v23, %v2557_v42  ;;  %v903_v5 = vand.u32 15, %v511_v45  ;;  %v1589_v3 = vrot.slane %v12758_v41, 7  ;;  %v12776_v61 = vmul.f32 0.75, %v12758_v41 }
 0x1f2   : > { %15221 = vst [vmem:[#allocation154_spill] sm:$0xff] %v12762_v22  ;;  %8174 = vmatmul.mubr.msk.bf16.gmra.mrb[104].mxu1 %vm12751_vm7, %v12762_v22  ;;  %v1591_v13 = vrot.slane %v12765_v28, 7  ;;  %v12783_v37 = vmul.f32 0.75, %v12765_v28  ;;  %v896_v39 = vand.u32 15, %v510_v4  ;;  %v1781_v55 = vsel %vm15158_vm4, %v1778_v38, %v1780_v57 }
 0x1f3   : > { %15222 = vst [vmem:[#allocation155_spill] sm:$0xff] %v12772_v51  ;;  %5536 = vmatmul.mubr.bf16.gmra.mrb[104].mxu0 %v12772_v51  ;;  %vm12787_vm5 = vcmp.eq.s32.totalorder %v903_v5, 0  ;;  %vm15225_vm9 = vcmask 1040384   ;;  %v1782_v23 = vrot.slane %v12758_v41, 1  ;;  %v2879_v45 = vmul.f32 0.75, %v1781_v55 }
 0x1f4   : > { %v1590_v42 = vsel %vm15225_vm9, %v1587_v44, %v1589_v3  ;;  %vm15226_vm7 = vmmov %vm15225_vm9  ;;  %vm12797_vm2 = vcmp.eq.s32.totalorder %v896_v39, 15  ;;  %v2689_v39 = vmul.f32 0.25, %v12758_v41  ;;  %v387_v9 = vmul.f32 0.75, %v12727_v26 }
 0x1f5   : > { %v1592_v8 = vsel %vm15226_vm7, %v1589_v3, %v1591_v13  ;;  %v2049_v22 = vsel %vm12787_vm5, %v12758_v41, %v1590_v42  ;;  %v2625_v38 = vmul.f32 0.75, %v1590_v42  ;;  %v1783_v32 = vsel %vm15158_vm4, %v1780_v57, %v1782_v23  ;;  %vm8299_vm7 = vmneg %vm12797_vm2 }
 0x1f6   : > { %v2113_v5 = vmul.f32 0.25, %v2049_v22  ;;  %v2114_v51 = vmul.f32 0.25, %v1592_v8  ;;  %v2626_v49 = vmul.f32 0.75, %v1592_v8  ;;  %v2432_v44 = vsel %vm12797_vm2, %v12680_v40, %v1783_v32  ;;  %vm8175_vm9 = vmneg %vm12787_vm5 }
 0x1f7   : > { %v2880_v53 = vmul.f32 0.75, %v1783_v32  ;;  %v2943_v3 = vadd.f32 %v2879_v45, %v2687_v46  ;;  %v2690_v22 = vmul.f32 0.25, %v12765_v28  ;;  %v2495_v8 = vmul.f32 0.25, %v1781_v55  ;;  %vm12819_vm2 = vmpackc.low %vm8299_vm7, %vm14803_vm0 }
 0x1f8   : > { %v2241_v1 = vadd.f32 %v12776_v61, %v2113_v5  ;;  %v2242_v42 = vadd.f32 %v12783_v37, %v2114_v51  ;;  %v2753_v43 = vadd.f32 %v2689_v39, %v2625_v38  ;;  %v2496_v40 = vmul.f32 0.25, %v2432_v44  ;;  %vm12828_vm5 = vmpackc.low %vm14803_vm0, %vm8175_vm9 }
 0x1f9   : > { %v2944_v57 = vadd.f32 %v2880_v53, %v2688_v50  ;;  %v12814_v46 = vmul.f32 0.75, %v12718_v36  ;;  %v15230_v41 = vmov 0  ;;  %v2754_v51 = vadd.f32 %v2690_v22, %v2626_v49 }
 0x1fa   : > { %v12816_v32 = vpack.c.bf16 %v2242_v42, %v2241_v1  ;;  %v15231_v41 = vsel %vm12819_vm2, 4294967295, %v15230_v41  ;;  %v2559_v45 = vadd.f32 %v2495_v8, %v12691_v14  ;;  %v15234_v50 = vmov 0 }
 0x1fb   : > { %15232 = vst [vmem:[#allocation157_spill] sm:$0xff] %v15231_v41  ;;  %v12825_v4 = vpack.c.bf16 %v2944_v57, %v2943_v3  ;;  %v15235_v50 = vsel %vm12828_vm5, 4294967295, %v15234_v50  ;;  %v2560_v1 = vadd.f32 %v2496_v40, %v12698_v0  ;;  %v12835_v36 = vadd.f32 %v12814_v46, %v12573_v63 }
 0x1fc   : > { %15229 = vst [vmem:[#allocation156_spill] sm:$0xff] %v12816_v32  ;;  %15236 = vst [vmem:[#allocation159_spill] sm:$0xff] %v15235_v50  ;;  %v513_v53 = vadd.s32 448, %v14989_v24  ;;  %4166 = vmatprep.mubr.bf16.mxu1 %v12816_v32  ;;  %v12839_v14 = vpack.c.bf16 %v2754_v51, %v2753_v43  ;;  %v12842_v26 = vadd.f32 %v387_v9, %v12584_v27  ;;  %v512_v49 = vadd.s32 440, %v14989_v24  ;;  %v12880_v50 = vld [vmem:[%s10212_s6 + $0xf0] sm:$0xff]  ;;  %v12889_v32 = vld [vmem:[%s10212_s6 + $0xf8] sm:$0xff] }
 0x1fd   : > { %15233 = vst [vmem:[#allocation158_spill] sm:$0xff] %v12825_v4  ;;  %v1784_v55 = vrot.slane %v12765_v28, 1  ;;  %8554 = vmatprep.mubr.msk.bf16.mxu0 %vm12819_vm2, %v12825_v4  ;;  %v12849_v0 = vpack.c.bf16 %v2560_v1, %v2559_v45  ;;  %v1593_v38 = vrot.slane %v12835_v36, 7  ;;  %v12853_v5 = vmul.f32 0.75, %v12835_v36 }
 0x1fe   : > { %15237 = vst [vmem:[#allocation160_spill] sm:$0xff] %v12839_v14  ;;  %v917_v63 = vand.u32 15, %v513_v53  ;;  %8178 = vmatmul.mubr.msk.bf16.gmra.mrb[108].mxu1 %vm12828_vm5, %v12839_v14  ;;  %v1595_v27 = vrot.slane %v12842_v26, 7  ;;  %v12860_v43 = vmul.f32 0.75, %v12842_v26  ;;  %v910_v44 = vand.u32 15, %v512_v49 }
 0x1ff   : > { %15238 = vst [vmem:[#allocation161_spill] sm:$0xff] %v12849_v0  ;;  %v1785_v3 = vsel %vm15158_vm4, %v1782_v23, %v1784_v55  ;;  %5546 = vmatmul.mubr.bf16.gmra.mrb[108].mxu0 %v12849_v0  ;;  %vm15241_vm9 = vcmask 1040384   ;;  %v1786_v57 = vrot.slane %v12835_v36, 1  ;;  %v423_v42 = vmul.f32 0.25, %v12889_v32 }
 0x200   : > { %vm12864_vm7 = vcmp.eq.s32.totalorder %v917_v63, 0  ;;  %v1594_v8 = vsel %vm15241_vm9, %v1591_v13, %v1593_v38  ;;  %v2881_v40 = vmul.f32 0.75, %v1785_v3  ;;  %vm15242_vm5 = vmmov %vm15241_vm9  ;;  %vm12874_vm2 = vcmp.eq.s32.totalorder %v910_v44, 15 }
 0x201   : > { %v1596_v51 = vsel %vm15242_vm5, %v1593_v38, %v1595_v27  ;;  %v2051_v45 = vsel %vm12864_vm7, %v12835_v36, %v1594_v8  ;;  %v2627_v1 = vmul.f32 0.75, %v1594_v8  ;;  %v1787_v13 = vsel %vm15158_vm4, %v1784_v55, %v1786_v57  ;;  %vm8303_vm5 = vmneg %vm12874_vm2 }
 0x202   : > { %v2115_v53 = vmul.f32 0.25, %v2051_v45  ;;  %v2116_v49 = vmul.f32 0.25, %v1596_v51  ;;  %v2628_v63 = vmul.f32 0.75, %v1596_v51  ;;  %v2434_v38 = vsel %vm12874_vm2, %v12765_v28, %v1787_v13  ;;  %vm8179_vm9 = vmneg %vm12864_vm7 }
 0x203   : > { %v2882_v14 = vmul.f32 0.75, %v1787_v13  ;;  %v2945_v0 = vadd.f32 %v2881_v40, %v2689_v39  ;;  %v2691_v44 = vmul.f32 0.25, %v12835_v36  ;;  %v2692_v55 = vmul.f32 0.25, %v12842_v26  ;;  %vm12902_vm2 = vmpackc.low %vm8303_vm5, %vm14803_vm0 }
 0x204   : > { %v2243_v8 = vadd.f32 %v12853_v5, %v2115_v53  ;;  %v2244_v51 = vadd.f32 %v12860_v43, %v2116_v49  ;;  %v2497_v45 = vmul.f32 0.25, %v1785_v3  ;;  %v2498_v39 = vmul.f32 0.25, %v2434_v38  ;;  %vm12911_vm7 = vmpackc.low %vm14803_vm0, %vm8179_vm9 }
 0x205   : > { %v2946_v28 = vadd.f32 %v2882_v14, %v2690_v22  ;;  %v2755_v13 = vadd.f32 %v2691_v44, %v2627_v1  ;;  %v12897_v40 = vmul.f32 0.25, %v12880_v50  ;;  %v15246_v36 = vmov 0 }
 0x206   : > { %v12899_v23 = vpack.c.bf16 %v2244_v51, %v2243_v8  ;;  %v15247_v36 = vsel %vm12902_vm2, 4294967295, %v15246_v36  ;;  %v2756_v53 = vadd.f32 %v2692_v55, %v2628_v63  ;;  %v2561_v49 = vadd.f32 %v2497_v45, %v12776_v61 }
 0x207   : > { %15248 = vst [vmem:[#allocation163_spill] sm:$0xff] %v15247_v36  ;;  %v12908_v41 = vpack.c.bf16 %v2946_v28, %v2945_v0  ;;  %v15250_v22 = vmov 0  ;;  %v2562_v14 = vadd.f32 %v2498_v39, %v12783_v37  ;;  %v12918_v3 = vadd.f32 %v12897_v40, %v12814_v46 }
 0x208   : > { %15245 = vst [vmem:[#allocation162_spill] sm:$0xff] %v12899_v23  ;;  %v15251_v22 = vsel %vm12911_vm7, 4294967295, %v15250_v22  ;;  %v515_v1 = vadd.s32 464, %v14989_v24  ;;  %4176 = vmatprep.mubr.bf16.mxu1 %v12899_v23  ;;  %v12922_v61 = vpack.c.bf16 %v2756_v53, %v2755_v13  ;;  %v12924_v63 = vadd.f32 %v423_v42, %v387_v9 }
 0x209   : > { %15249 = vst [vmem:[#allocation164_spill] sm:$0xff] %v12908_v41  ;;  %15252 = vst [vmem:[#allocation165_spill] sm:$0xff] %v15251_v22  ;;  %v514_v0 = vadd.s32 456, %v14989_v24  ;;  %v1788_v38 = vrot.slane %v12842_v26, 1  ;;  %8558 = vmatprep.mubr.msk.bf16.mxu0 %vm12902_vm2, %v12908_v41  ;;  %v12931_v37 = vpack.c.bf16 %v2562_v14, %v2561_v49  ;;  %v1597_v8 = vrot.slane %v12918_v3, 7 }
 0x20a   : > { %15253 = vst [vmem:[#allocation166_spill] sm:$0xff] %v12922_v61  ;;  %v931_v46 = vand.u32 15, %v515_v1  ;;  %v12935_v51 = vmul.f32 0.75, %v12918_v3  ;;  %8182 = vmatmul.mubr.msk.bf16.gmra.mrb[112].mxu1 %vm12911_vm7, %v12922_v61  ;;  %v1599_v9 = vrot.slane %v12924_v63, 7  ;;  %v12942_v45 = vmul.f32 0.75, %v12924_v63 }
 0x20b   : > { %15254 = vst [vmem:[#allocation167_spill] sm:$0xff] %v12931_v37  ;;  %v924_v28 = vand.u32 15, %v514_v0  ;;  %v1789_v13 = vsel %vm15158_vm4, %v1786_v57, %v1788_v38  ;;  %5556 = vmatmul.mubr.bf16.gmra.mrb[112].mxu0 %v12931_v37  ;;  %vm15257_vm9 = vcmask 1040384   ;;  %v1790_v49 = vrot.slane %v12918_v3, 1 }
 0x20c   : > { %vm12946_vm5 = vcmp.eq.s32.totalorder %v931_v46, 0  ;;  %v1598_v53 = vsel %vm15257_vm9, %v1595_v27, %v1597_v8  ;;  %v2883_v14 = vmul.f32 0.75, %v1789_v13  ;;  %vm15258_vm7 = vmmov %vm15257_vm9  ;;  %v389_v0 = vmul.f32 0.75, %v12889_v32 }
 0x20d   : > { %v1600_v1 = vsel %vm15258_vm7, %v1597_v8, %v1599_v9  ;;  %v2053_v22 = vsel %vm12946_vm5, %v12918_v3, %v1598_v53  ;;  %vm12956_vm2 = vcmp.eq.s32.totalorder %v924_v28, 15  ;;  %v2629_v57 = vmul.f32 0.75, %v1598_v53  ;;  %vm8183_vm9 = vmneg %vm12946_vm5 }
 0x20e   : > { %v2117_v46 = vmul.f32 0.25, %v2053_v22  ;;  %v2118_v61 = vmul.f32 0.25, %v1600_v1  ;;  %v2630_v37 = vmul.f32 0.75, %v1600_v1  ;;  %v1791_v23 = vsel %vm15158_vm4, %v1788_v38, %v1790_v49  ;;  %vm8307_vm7 = vmneg %vm12956_vm2 }
 0x20f   : > { %v2436_v27 = vsel %vm12956_vm2, %v12842_v26, %v1791_v23  ;;  %v2884_v36 = vmul.f32 0.75, %v1791_v23  ;;  %v2947_v8 = vadd.f32 %v2883_v14, %v2691_v44  ;;  %v2693_v28 = vmul.f32 0.25, %v12918_v3  ;;  %vm12976_vm2 = vmpackc.low %vm8307_vm7, %vm14803_vm0 }
 0x210   : > { %v2245_v41 = vadd.f32 %v12935_v51, %v2117_v46  ;;  %v2246_v53 = vadd.f32 %v12942_v45, %v2118_v61  ;;  %v2694_v22 = vmul.f32 0.25, %v12924_v63  ;;  %v2499_v38 = vmul.f32 0.25, %v1789_v13  ;;  %vm12985_vm5 = vmpackc.low %vm14803_vm0, %vm8183_vm9 }
 0x211   : > { %v2948_v1 = vadd.f32 %v2884_v36, %v2692_v55  ;;  %v2757_v4 = vadd.f32 %v2693_v28, %v2629_v57  ;;  %v2500_v26 = vmul.f32 0.25, %v2436_v27  ;;  %v388_v44 = vmul.f32 0.75, %v12880_v50 }
 0x212   : > { %v12973_v23 = vpack.c.bf16 %v2246_v53, %v2245_v41  ;;  %v15262_v3 = vmov 0  ;;  %v2758_v14 = vadd.f32 %v2694_v22, %v2630_v37  ;;  %v2563_v61 = vadd.f32 %v2499_v38, %v12853_v5 }
 0x213   : > { %v15263_v3 = vsel %vm12976_vm2, 4294967295, %v15262_v3  ;;  %v12982_v39 = vpack.c.bf16 %v2948_v1, %v2947_v8  ;;  %v15266_v55 = vmov 0  ;;  %v2564_v41 = vadd.f32 %v2500_v26, %v12860_v43 }
 0x214   : > { %15261 = vst [vmem:[#allocation168_spill] sm:$0xff] %v12973_v23  ;;  %15264 = vst [vmem:[#allocation169_spill] sm:$0xff] %v15263_v3  ;;  %v15267_v55 = vsel %vm12985_vm5, 4294967295, %v15266_v55  ;;  %v12991_v50 = vadd.f32 %v388_v44, %v12735_v12  ;;  %v517_v36 = vadd.s32 480, %v14989_v24  ;;  %4186 = vmatprep.mubr.bf16.mxu1 %v12973_v23  ;;  %v12995_v37 = vpack.c.bf16 %v2758_v14, %v2757_v4 }
 0x215   : > { %15265 = vst [vmem:[#allocation170_spill] sm:$0xff] %v12982_v39  ;;  %15268 = vst [vmem:[#allocation171_spill] sm:$0xff] %v15267_v55  ;;  %v12998_v32 = vadd.f32 %v389_v0, %v12746_v60  ;;  %v13000_v5 = vadd.f32 %v423_v42, %v389_v0  ;;  %v516_v13 = vadd.s32 472, %v14989_v24  ;;  %8562 = vmatprep.mubr.msk.bf16.mxu0 %vm12976_vm2, %v12982_v39  ;;  %v1792_v27 = vrot.slane %v12924_v63, 1 }
 0x216   : > { %15269 = vst [vmem:[#allocation172_spill] sm:$0xff] %v12995_v37  ;;  %v13006_v43 = vpack.c.bf16 %v2564_v41, %v2563_v61  ;;  %v945_v12 = vand.u32 15, %v517_v36  ;;  %v1601_v57 = vrot.slane %v12991_v50, 7  ;;  %v13010_v46 = vmul.f32 0.75, %v12991_v50  ;;  %8186 = vmatmul.mubr.msk.bf16.gmra.mrb[116].mxu1 %vm12985_vm5, %v12995_v37 }
 0x217   : > { %v1603_v60 = vrot.slane %v12998_v32, 7  ;;  %v13017_v4 = vmul.f32 0.75, %v12998_v32  ;;  %v938_v42 = vand.u32 15, %v516_v13  ;;  %vm15273_vm7 = vcmask 1040384  }
 0x218   : > { %15270 = vst [vmem:[#allocation173_spill] sm:$0xff] %v13006_v43  ;;  %5566 = vmatmul.mubr.bf16.gmra.mrb[116].mxu0 %v13006_v43  ;;  %vm13021_vm4 = vcmp.eq.s32.totalorder %v945_v12, 0  ;;  %v1602_v53 = vsel %vm15273_vm7, %v1599_v9, %v1601_v57  ;;  %v1794_v38 = vrot.slane %v12991_v50, 1  ;;  %v13028_v1 = vmul.f32 0.25, %v12991_v50  ;;  %vm15274_vm9 = vmmov %vm15273_vm7 }
 0x219   : > { %v1604_v26 = vsel %vm15274_vm9, %v1601_v57, %v1603_v60  ;;  %v2055_v14 = vsel %vm13021_vm4, %v12991_v50, %v1602_v53  ;;  %vm13034_vm5 = vcmp.eq.s32.totalorder %v938_v42, 15  ;;  %vm15277_vm2 = vcmask 1046528  }
 0x21a   : > { %v1793_v0 = vsel %vm15277_vm2, %v1790_v49, %v1792_v27  ;;  %v2119_v41 = vmul.f32 0.25, %v2055_v14  ;;  %v2120_v36 = vmul.f32 0.25, %v1604_v26  ;;  %v2632_v9 = vmul.f32 0.75, %v1604_v26  ;;  %vm15278_vm7 = vmmov %vm15277_vm2 }
 0x21b   : > { %v1795_v13 = vsel %vm15278_vm7, %v1792_v27, %v1794_v38  ;;  %v2885_v57 = vmul.f32 0.75, %v1793_v0  ;;  %vm8311_vm9 = vmneg %vm13034_vm5  ;;  %v2631_v50 = vmul.f32 0.75, %v1602_v53  ;;  %v2696_v49 = vmul.f32 0.25, %v12998_v32 }
 0x21c   : > { %v2438_v12 = vsel %vm13034_vm5, %v12924_v63, %v1795_v13  ;;  %v2886_v55 = vmul.f32 0.75, %v1795_v13  ;;  %v2247_v42 = vadd.f32 %v13010_v46, %v2119_v41  ;;  %v2248_v37 = vadd.f32 %v13017_v4, %v2120_v36  ;;  %vm8187_vm2 = vmneg %vm13021_vm4 }
 0x21d   : > { %v2501_v27 = vmul.f32 0.25, %v1793_v0  ;;  %v2949_v26 = vadd.f32 %v2885_v57, %v2693_v28  ;;  %v2759_v63 = vadd.f32 %v13028_v1, %v2631_v50  ;;  %v2502_v43 = vmul.f32 0.25, %v2438_v12  ;;  %vm13054_vm5 = vmpackc.low %vm8311_vm9, %vm14803_vm0 }
 0x21e   : > { %v2950_v14 = vadd.f32 %v2886_v55, %v2694_v22  ;;  %v13051_v13 = vpack.c.bf16 %v2248_v37, %v2247_v42  ;;  %v15280_v53 = vmov 0  ;;  %v2760_v61 = vadd.f32 %v2696_v49, %v2632_v9  ;;  %vm13065_vm4 = vmpackc.low %vm14803_vm0, %vm8187_vm2 }
 0x21f   : > { %v15281_v53 = vsel %vm13054_vm5, 4294967295, %v15280_v53  ;;  %v2565_v41 = vadd.f32 %v2501_v27, %v12935_v51  ;;  %v13060_v36 = vadd.f32 %v12897_v40, %v388_v44  ;;  %v15282_v28 = vmov 0 }
 0x220   : > { %15279 = vst [vmem:[#allocation174_spill] sm:$0xff] %v13051_v13  ;;  %v13062_v8 = vpack.c.bf16 %v2950_v14, %v2949_v26  ;;  %v15283_v28 = vsel %vm13065_vm4, 4294967295, %v15282_v28  ;;  %v2566_v22 = vadd.f32 %v2502_v43, %v12942_v45  ;;  %v519_v55 = vadd.s32 496, %v14989_v24  ;;  %4196 = vmatprep.mubr.bf16.mxu1 %v13051_v13 }
 0x221   : > { %15284 = vst [vmem:[#allocation175_spill] sm:$0xff] %v15283_v28  ;;  %v1607_v37 = vrot.slane %v13000_v5, 7  ;;  %v13073_v0 = vpack.c.bf16 %v2760_v61, %v2759_v63  ;;  %v1605_v40 = vrot.slane %v13060_v36, 7  ;;  %v13077_v51 = vmul.f32 0.75, %v13060_v36 }
 0x222   : > { %v13080_v44 = vmul.f32 0.75, %v13000_v5  ;;  %8566 = vmatprep.mubr.msk.bf16.mxu0 %vm13054_vm5, %v13062_v8  ;;  %v13085_v45 = vpack.c.bf16 %v2566_v22, %v2565_v41  ;;  %v959_v43 = vand.u32 15, %v519_v55  ;;  %v518_v9 = vadd.s32 488, %v14989_v24 }
 0x223   : > { %v1796_v12 = vrot.slane %v12998_v32, 1  ;;  %8190 = vmatmul.mubr.msk.bf16.gmra.mrb[120].mxu1 %vm13065_vm4, %v13073_v0  ;;  %vm15286_vm7 = vcmask 1040384   ;;  %v14697_v42 = vrot.slane %v13060_v36, 1  ;;  %v13096_v27 = vmul.f32 0.25, %v13060_v36 }
 0x224   : > { %15285 = vst [vmem:[#allocation176_spill] sm:$0xff] %v13080_v44  ;;  %v1606_v57 = vsel %vm15286_vm7, %v1603_v60, %v1605_v40  ;;  %vm15287_vm9 = vmmov %vm15286_vm7  ;;  %5576 = vmatmul.mubr.bf16.gmra.mrb[120].mxu0 %v13085_v45  ;;  %vm13099_vm2 = vcmp.eq.s32.totalorder %v959_v43, 0  ;;  %v952_v61 = vand.u32 15, %v518_v9  ;;  %vm15290_vm7 = vcmask 1046528  }
 0x225   : > { %v1608_v50 = vsel %vm15287_vm9, %v1605_v40, %v1607_v37  ;;  %v2057_v60 = vsel %vm13099_vm2, %v13060_v36, %v1606_v57  ;;  %v1797_v41 = vsel %vm15290_vm7, %v1794_v38, %v1796_v12  ;;  %vm15291_vm9 = vmmov %vm15290_vm7  ;;  %v2633_v55 = vmul.f32 0.75, %v1606_v57 }
 0x226   : > { %v2122_v14 = vmul.f32 0.25, %v1608_v50  ;;  %v2634_v63 = vmul.f32 0.75, %v1608_v50  ;;  %v1799_v22 = vsel %vm15291_vm9, %v1796_v12, %v14697_v42  ;;  %v2121_v37 = vmul.f32 0.25, %v2057_v60  ;;  %vm8191_vm5 = vmneg %vm13099_vm2 }
 0x227   : > { %vm13111_vm4 = vcmp.eq.s32.totalorder %v952_v61, 15  ;;  %v2887_v50 = vmul.f32 0.75, %v1797_v41  ;;  %v2888_v9 = vmul.f32 0.75, %v1799_v22  ;;  %v13123_v12 = vmul.f32 0.25, %v13000_v5  ;;  %vm13130_vm2 = vmpackc.low %vm14803_vm0, %vm8191_vm5 }
 0x228   : > { %v2250_v40 = vadd.f32 %v13080_v44, %v2122_v14  ;;  %v2440_v38 = vsel %vm13111_vm4, %v12998_v32, %v1799_v22  ;;  %vm8315_vm7 = vmneg %vm13111_vm4  ;;  %v2761_v57 = vadd.f32 %v13096_v27, %v2633_v55  ;;  %v2249_v14 = vadd.f32 %v13077_v51, %v2121_v37  ;;  %v9727_v37 = vld [vmem:[#allocation6 + $0x10] ss:$8 sps:$4 sm:$0xff]   ;;  %v15501_v32 = vld [vmem:[#allocation22_spill] sm:$0xff] }
 0x229   : > { %v2951_v61 = vadd.f32 %v2887_v50, %v13028_v1  ;;  %v2503_v60 = vmul.f32 0.25, %v1797_v41  ;;  %v2504_v26 = vmul.f32 0.25, %v2440_v38  ;;  %v2952_v42 = vadd.f32 %v2888_v9, %v2696_v49  ;;  %vm13137_vm4 = vmpackc.low %vm8315_vm7, %vm14803_vm0  ;;  %v15299_v50 = vld [vmem:[#allocation23_spill] sm:$0xff] }
 0x22a   : > { %v2762_v44 = vadd.f32 %v13123_v12, %v2634_v63  ;;  %v13134_v22 = vpack.c.bf16 %v2250_v40, %v2249_v14  ;;  %v9738_v38 = vld [vmem:[#allocation6 + $0x524] ss:$8 sps:$4 sm:$0xff]   ;;  %v9736_v9 = vld [vmem:[#allocation6 + $0x520] ss:$8 sps:$4 sm:$0xff]   ;;  %v9744_v14 = vld [vmem:[#allocation6 + $0x534] ss:$8 sps:$4 sm:$0xff]   ;;  %vm15306_vm5 = vnez %v14805_v62 }
 0x22b   : > { %v2567_v55 = vadd.f32 %v2503_v60, %v13010_v46  ;;  %v2568_v1 = vadd.f32 %v2504_v26, %v13017_v4  ;;  %v13143_v41 = vpack.c.bf16 %v2952_v42, %v2951_v61  ;;  %v9721_v46 = vld [vmem:[#allocation6] ss:$8 sps:$4 sm:$0xff]   ;;  %v9732_v42 = vld [vmem:[#allocation6 + $0x514] ss:$8 sps:$4 sm:$0xff]  }
 0x22c   : > { %v13145_v49 = vpack.c.bf16 %v2762_v44, %v2761_v57  ;;  %4206 = vmatprep.mubr.bf16.mxu1 %v13134_v22  ;;  %v9724_v4 = vld [vmem:[#allocation6 + $0x500] ss:$8 sps:$4 sm:$0xff]   ;;  %v9729_v44 = vld [vmem:[#allocation6 + $0x14] ss:$8 sps:$4 sm:$0xff]  }
 0x22d   : > { %v13148_v63 = vpack.c.bf16 %v2568_v1, %v2567_v55  ;;  %8570 = vmatprep.mubr.msk.bf16.mxu0 %vm13137_vm4, %v13143_v41  ;;  %v9741_v57 = vld [vmem:[#allocation6 + $0x34] ss:$8 sps:$4 sm:$0xff]   ;;  %v15303_v55 = vld [vmem:[#allocation27_spill] sm:$0xff]  ;;  %v15524_v40 = vld [vmem:[#allocation42_spill] sm:$0xff] }
 0x22e   : > { %8194 = vmatmul.mubr.msk.bf16.gmra.mrb[124].mxu1 %vm13130_vm2, %v13145_v49  ;;  %v15300_v61 = vld [vmem:[#allocation24_spill] sm:$0xff]  ;;  %v15302_v26 = vld [vmem:[#allocation29_spill] sm:$0xff]  ;;  %v9760_v62 = vld [vmem:[#allocation6 + $0x560] ss:$8 sps:$4 sm:$0xff]  }
 0x22f   : > { %5586 = vmatmul.mubr.bf16.gmra.mrb[124].mxu0 %v13148_v63  ;;  %8198 = vmatprep.mubr.msk.bf16.mxu1 %vm10522_vm11, %v10474_v7  ;;  %v9730_v7 = vld [vmem:[#allocation6 + $0x510] ss:$8 sps:$4 sm:$0xff]   ;;  %vm15304_vm11 = vnez %v15303_v55  ;;  %v9780_v60 = vld [vmem:[#allocation6 + $0x594] ss:$8 sps:$4 sm:$0xff]   ;;  %v15528_v55 = vld [vmem:[#allocation47_spill] sm:$0xff] }
 0x230   : > { %6141 = vmatprep.mubr.bf16.mxu0 %v10465_v59  ;;  %v15305_v1 = vld [vmem:[#allocation28_spill] sm:$0xff] }
 0x236   : > { %4250 = vmatmul.mubr.bf16.vlgmr.msra.gmra.mrb[0].mxu1 %v10496_v56  ;;  %v9733_v56 = vld [vmem:[#allocation6 + $0x20] ss:$8 sps:$4 sm:$0xff]  }
 0x237   : > { %8574 = vmatmul.mubr.msk.bf16.vlgmr.msra.gmra.mrb[0].mxu0 %vm10596_vm1, %v10484_v17  ;;  %4891 = vmatpush1.bf16.msra.mxu1 %v9721_v46  ;;  %v9739_v46 = vld [vmem:[#allocation6 + $0x30] ss:$8 sps:$4 sm:$0xff]  }
 0x238   : > { %6463 = vmatpush1.bf16.msra.mxu0 %v9724_v4  ;;  %8202 = vmatprep.mubr.msk.bf16.mxu1 %vm10610_vm3, %v10600_v15  ;;  %v9742_v4 = vld [vmem:[#allocation6 + $0x530] ss:$8 sps:$4 sm:$0xff]  }
 0x239   : > { %6151 = vmatprep.mubr.bf16.mxu0 %v15299_v50  ;;  %4892 = vmatprep.subr.bf16.mxu1 %v9729_v44  ;;  %v9747_v44 = vld [vmem:[#allocation6 + $0x44] ss:$8 sps:$4 sm:$0xff]  }
 0x23a   : > { %6464 = vmatprep.subr.bf16.mxu0 %v9732_v42  ;;  %v9750_v42 = vld [vmem:[#allocation6 + $0x544] ss:$8 sps:$4 sm:$0xff]  }
 0x23b   : > { %4893 = vmatpush1.bf16.msra.mxu1 %v9727_v37  ;;  %v9745_v37 = vld [vmem:[#allocation6 + $0x40] ss:$8 sps:$4 sm:$0xff]  }
 0x23c   : > { %6465 = vmatpush1.bf16.msra.mxu0 %v9730_v7  ;;  %4894 = vmatprep.subr.bf16.mxu1 %v9735_v21  ;;  %v9748_v7 = vld [vmem:[#allocation6 + $0x540] ss:$8 sps:$4 sm:$0xff]   ;;  %v9753_v21 = vld [vmem:[#allocation6 + $0x54] ss:$8 sps:$4 sm:$0xff]  }
 0x23d   : > { %6466 = vmatprep.subr.bf16.mxu0 %v9738_v38  ;;  %v9756_v38 = vld [vmem:[#allocation6 + $0x554] ss:$8 sps:$4 sm:$0xff]  }
 0x23e   : > { %4260 = vmatmul.mubr.bf16.gmra.mrb[4].mxu1 %v10604_v29 }
 0x23f   : > { %8578 = vmatmul.mubr.msk.bf16.gmra.mrb[4].mxu0 %vm10682_vm14, %v15300_v61  ;;  %8206 = vmatprep.mubr.msk.bf16.mxu1 %vm15304_vm11, %v15302_v26  ;;  %v15317_v61 = vld [vmem:[#allocation41_spill] sm:$0xff]  ;;  %vm15320_vm14 = vnez %v14845_v35  ;;  %v15515_v35 = vld [vmem:[#allocation40_spill] sm:$0xff] }
 0x240   : > { %6161 = vmatprep.mubr.bf16.mxu0 %v15305_v1  ;;  %4895 = vmatpush1.bf16.msra.mxu1 %v9733_v56  ;;  %v15307_v56 = vld [vmem:[#allocation35_spill] sm:$0xff]  ;;  %v9768_v1 = vld [vmem:[#allocation6 + $0x574] ss:$8 sps:$4 sm:$0xff]  }
 0x241   : > { %6467 = vmatpush1.bf16.msra.mxu0 %v9736_v9  ;;  %4896 = vmatprep.subr.bf16.mxu1 %v9741_v57  ;;  %v15308_v9 = vld [vmem:[#allocation32_spill] sm:$0xff]  ;;  %v15310_v57 = vld [vmem:[#allocation34_spill] sm:$0xff] }
 0x242   : > { %6468 = vmatprep.subr.bf16.mxu0 %v9744_v14  ;;  %vm15309_vm9 = vnez %v15308_v9  ;;  %v9751_v14 = vld [vmem:[#allocation6 + $0x50] ss:$8 sps:$4 sm:$0xff]  }
 0x243   : > { %v15531_v9 = vld [vmem:[#allocation52_spill] sm:$0xff] }
 0x244   : > { %4897 = vmatpush1.bf16.msra.mxu1 %v9739_v46  ;;  %v9754_v46 = vld [vmem:[#allocation6 + $0x550] ss:$8 sps:$4 sm:$0xff]  }
 0x245   : > { %6469 = vmatpush1.bf16.msra.mxu0 %v9742_v4  ;;  %4898 = vmatprep.subr.bf16.mxu1 %v9747_v44  ;;  %v9759_v4 = vld [vmem:[#allocation6 + $0x64] ss:$8 sps:$4 sm:$0xff]  }
 0x246   : > { %4270 = vmatmul.mubr.bf16.gmra.mrb[8].mxu1 %v10717_v20  ;;  %6470 = vmatprep.subr.bf16.mxu0 %v9750_v42  ;;  %v9762_v44 = vld [vmem:[#allocation6 + $0x564] ss:$8 sps:$4 sm:$0xff]   ;;  %v9757_v42 = vld [vmem:[#allocation6 + $0x60] ss:$8 sps:$4 sm:$0xff]  }
 0x247   : > { %8582 = vmatmul.mubr.msk.bf16.gmra.mrb[8].mxu0 %vm15306_vm5, %v10714_v18  ;;  %8210 = vmatprep.mubr.msk.bf16.mxu1 %vm15309_vm9, %v15307_v56  ;;  %v9765_v18 = vld [vmem:[#allocation6 + $0x74] ss:$8 sps:$4 sm:$0xff]  }
 0x248   : > { %6171 = vmatprep.mubr.bf16.mxu0 %v15310_v57  ;;  %4899 = vmatpush1.bf16.msra.mxu1 %v9745_v37  ;;  %v15311_v57 = vld [vmem:[#allocation33_spill] sm:$0xff]  ;;  %v15313_v37 = vld [vmem:[#allocation39_spill] sm:$0xff] }
 0x249   : > { %6471 = vmatpush1.bf16.msra.mxu0 %v9748_v7  ;;  %4900 = vmatprep.subr.bf16.mxu1 %v9753_v21  ;;  %vm15312_vm7 = vnez %v15311_v57  ;;  %v15314_v7 = vld [vmem:[#allocation37_spill] sm:$0xff]  ;;  %v15316_v21 = vld [vmem:[#allocation40_spill] sm:$0xff]  ;;  %v9772_v57 = vld [vmem:[#allocation6 + $0x580] ss:$8 sps:$4 sm:$0xff]  }
 0x24a   : > { %6472 = vmatprep.subr.bf16.mxu0 %v9756_v38  ;;  %vm15315_vm5 = vnez %v15314_v7  ;;  %v9763_v38 = vld [vmem:[#allocation6 + $0x70] ss:$8 sps:$4 sm:$0xff]  }
 0x24b   : > { %v15534_v7 = vld [vmem:[#allocation53_spill] sm:$0xff] }
 0x24c   : > { %4901 = vmatpush1.bf16.msra.mxu1 %v9751_v14  ;;  %v9766_v14 = vld [vmem:[#allocation6 + $0x570] ss:$8 sps:$4 sm:$0xff]  }
 0x24d   : > { %6473 = vmatpush1.bf16.msra.mxu0 %v9754_v46  ;;  %4902 = vmatprep.subr.bf16.mxu1 %v9759_v4  ;;  %v9771_v46 = vld [vmem:[#allocation6 + $0x84] ss:$8 sps:$4 sm:$0xff]  }
 0x24e   : > { %4280 = vmatmul.mubr.bf16.gmra.mrb[12].mxu1 %v10856_v16  ;;  %6474 = vmatprep.subr.bf16.mxu0 %v9762_v44  ;;  %v9774_v4 = vld [vmem:[#allocation6 + $0x584] ss:$8 sps:$4 sm:$0xff]   ;;  %v9769_v44 = vld [vmem:[#allocation6 + $0x80] ss:$8 sps:$4 sm:$0xff]  }
 0x24f   : > { %8586 = vmatmul.mubr.msk.bf16.gmra.mrb[12].mxu0 %vm15312_vm7, %v10827_v47  ;;  %8214 = vmatprep.mubr.msk.bf16.mxu1 %vm15315_vm5, %v15313_v37  ;;  %v9777_v47 = vld [vmem:[#allocation6 + $0x94] ss:$8 sps:$4 sm:$0xff]  }
 0x250   : > { %6181 = vmatprep.mubr.bf16.mxu0 %v15316_v21  ;;  %4903 = vmatpush1.bf16.msra.mxu1 %v9757_v42  ;;  %v15318_v21 = vld [vmem:[#allocation38_spill] sm:$0xff] }
 0x251   : > { %6475 = vmatpush1.bf16.msra.mxu0 %v9760_v62  ;;  %4904 = vmatprep.subr.bf16.mxu1 %v9765_v18  ;;  %vm15319_vm7 = vnez %v15318_v21  ;;  %v9775_v18 = vld [vmem:[#allocation6 + $0x90] ss:$8 sps:$4 sm:$0xff]   ;;  %v9786_v42 = vld [vmem:[#allocation6 + $0x5a4] ss:$8 sps:$4 sm:$0xff]  }
 0x252   : > { %6476 = vmatprep.subr.bf16.mxu0 %v9768_v1  ;;  %v9778_v62 = vld [vmem:[#allocation6 + $0x590] ss:$8 sps:$4 sm:$0xff]   ;;  %v9783_v1 = vld [vmem:[#allocation6 + $0xa4] ss:$8 sps:$4 sm:$0xff]  }
 0x253   : > { %v15338_v21 = vld [vmem:[#allocation60_spill] sm:$0xff] }
 0x254   : > { %4905 = vmatpush1.bf16.msra.mxu1 %v9763_v38  ;;  %v9781_v38 = vld [vmem:[#allocation6 + $0xa0] ss:$8 sps:$4 sm:$0xff]  }
 0x255   : > { %6477 = vmatpush1.bf16.msra.mxu0 %v9766_v14  ;;  %4906 = vmatprep.subr.bf16.mxu1 %v9771_v46  ;;  %v9784_v14 = vld [vmem:[#allocation6 + $0x5a0] ss:$8 sps:$4 sm:$0xff]   ;;  %v9792_v46 = vld [vmem:[#allocation6 + $0x5b4] ss:$8 sps:$4 sm:$0xff]  }
 0x256   : > { %4290 = vmatmul.mubr.bf16.gmra.mrb[16].mxu1 %v10951_v34  ;;  %6478 = vmatprep.subr.bf16.mxu0 %v9774_v4  ;;  %v9789_v4 = vld [vmem:[#allocation6 + $0xb4] ss:$8 sps:$4 sm:$0xff]  }
 0x257   : > { %8590 = vmatmul.mubr.msk.bf16.gmra.mrb[16].mxu0 %vm15319_vm7, %v15317_v61  ;;  %8218 = vmatprep.mubr.msk.bf16.mxu1 %vm15320_vm14, %v11022_v10  ;;  %v9793_v61 = vld [vmem:[#allocation6 + $0xc0] ss:$8 sps:$4 sm:$0xff]  }
 0x258   : > { %6191 = vmatprep.mubr.bf16.mxu0 %v11031_v54  ;;  %4907 = vmatpush1.bf16.msra.mxu1 %v9769_v44  ;;  %v15324_v44 = vld [vmem:[#allocation47_spill] sm:$0xff]  ;;  %v15337_v54 = vld [vmem:[#allocation56_spill] sm:$0xff] }
 0x259   : > { %6479 = vmatpush1.bf16.msra.mxu0 %v9772_v57  ;;  %4908 = vmatprep.subr.bf16.mxu1 %v9777_v47  ;;  %v15322_v47 = vld [vmem:[#allocation46_spill] sm:$0xff]  ;;  %v9787_v57 = vld [vmem:[#allocation6 + $0xb0] ss:$8 sps:$4 sm:$0xff]  }
 0x25a   : > { %6480 = vmatprep.subr.bf16.mxu0 %v9780_v60  ;;  %v15323_v60 = vld [vmem:[#allocation48_spill] sm:$0xff] }
 0x25c   : > { %4909 = vmatpush1.bf16.msra.mxu1 %v9775_v18  ;;  %v15334_v18 = vld [vmem:[#allocation57_spill] sm:$0xff] }
 0x25d   : > { %6481 = vmatpush1.bf16.msra.mxu0 %v9778_v62  ;;  %4910 = vmatprep.subr.bf16.mxu1 %v9783_v1  ;;  %v15326_v62 = vld [vmem:[#allocation50_spill] sm:$0xff]  ;;  %v15327_v1 = vld [vmem:[#allocation49_spill] sm:$0xff] }
 0x25e   : > { %4300 = vmatmul.mubr.bf16.gmra.mrb[20].mxu1 %v11035_v52  ;;  %6482 = vmatprep.subr.bf16.mxu0 %v9786_v42  ;;  %vm15328_vm7 = vnez %v15327_v1  ;;  %v9790_v42 = vld [vmem:[#allocation6 + $0x5b0] ss:$8 sps:$4 sm:$0xff]  }
 0x25f   : > { %8594 = vmatmul.mubr.msk.bf16.gmra.mrb[20].mxu0 %vm10996_vm6, %v11033_v58  ;;  %8222 = vmatprep.mubr.msk.bf16.mxu1 %vm11050_vm15, %v11107_v33  ;;  %v15329_v58 = vld [vmem:[#allocation52_spill] sm:$0xff] }
 0x260   : > { %6201 = vmatprep.mubr.bf16.mxu0 %v15322_v47  ;;  %4911 = vmatpush1.bf16.msra.mxu1 %v9781_v38  ;;  %v15330_v38 = vld [vmem:[#allocation54_spill] sm:$0xff]  ;;  %v15332_v47 = vld [vmem:[#allocation51_spill] sm:$0xff] }
 0x261   : > { %6483 = vmatpush1.bf16.msra.mxu0 %v9784_v14  ;;  %4912 = vmatprep.subr.bf16.mxu1 %v9789_v4  ;;  %v15331_v14 = vld [vmem:[#allocation53_spill] sm:$0xff]  ;;  %vm15333_vm6 = vnez %v15332_v47  ;;  %v15339_v4 = vld [vmem:[#allocation59_spill] sm:$0xff] }
 0x262   : > { %6484 = vmatprep.subr.bf16.mxu0 %v9792_v46  ;;  %v15340_v46 = vld [vmem:[#allocation58_spill] sm:$0xff] }
 0x263   : > { %v9796_v47 = vld [vmem:[#allocation6 + $0x5c0] ss:$8 sps:$4 sm:$0xff]  }
 0x264   : > { %4913 = vmatpush1.bf16.msra.mxu1 %v9787_v57  ;;  %v15342_v57 = vld [vmem:[#allocation64_spill] sm:$0xff] }
 0x265   : > { %6485 = vmatpush1.bf16.msra.mxu0 %v9790_v42  ;;  %v15343_v42 = vld [vmem:[#allocation61_spill] sm:$0xff] }
 0x266   : > { %4310 = vmatmul.mubr.bf16.gmra.mrb[24].mxu1 %v15323_v60  ;;  %vm15344_vm15 = vnez %v15343_v42  ;;  %v15542_v42 = vld [vmem:[#allocation59_spill] sm:$0xff] }
 0x267   : > { %8598 = vmatmul.mubr.msk.bf16.gmra.mrb[24].mxu0 %vm11075_vm8, %v15324_v44  ;;  %8226 = vmatprep.mubr.msk.bf16.mxu1 %vm15328_vm7, %v15326_v62  ;;  %v15335_v44 = vld [vmem:[#allocation55_spill] sm:$0xff]  ;;  %vm15341_vm7 = vnez %v15340_v46  ;;  %v9799_v46 = vld [vmem:[#allocation6 + $0xd0] ss:$8 sps:$4 sm:$0xff]  }
 0x268   : > { %6211 = vmatprep.mubr.bf16.mxu0 %v15329_v58  ;;  %vm15336_vm8 = vnez %v15335_v44  ;;  %v9795_v58 = vld [vmem:[#allocation6 + $0xc4] ss:$8 sps:$4 sm:$0xff]  }
 0x269   : > { %4914 = vmatprep.subr.bf16.mxu1 %v9795_v58  ;;  %v15348_v44 = vld [vmem:[#allocation62_spill] sm:$0xff]  ;;  %v15351_v58 = vld [vmem:[#allocation67_spill] sm:$0xff] }
 0x26a   : > { %4915 = vmatpush1.bf16.msra.mxu1 %v9793_v61  ;;  %v15353_v61 = vld [vmem:[#allocation70_spill] sm:$0xff] }
 0x26e   : > { %4320 = vmatmul.mubr.bf16.gmra.mrb[28].mxu1 %v15330_v38  ;;  %v15345_v38 = vld [vmem:[#allocation15_spill] sm:$0xff] }
 0x26f   : > { %8602 = vmatmul.mubr.msk.bf16.gmra.mrb[28].mxu0 %vm15333_vm6, %v15331_v14  ;;  %8230 = vmatprep.mubr.msk.bf16.mxu1 %vm15336_vm8, %v15334_v18  ;;  %v9798_v14 = vld [vmem:[#allocation6 + $0x5c4] ss:$8 sps:$4 sm:$0xff]   ;;  %vm15349_vm6 = vnez %v15348_v44  ;;  %v9802_v44 = vld [vmem:[#allocation6 + $0x5d0] ss:$8 sps:$4 sm:$0xff]  }
 0x270   : > { %6221 = vmatprep.mubr.bf16.mxu0 %v15337_v54  ;;  %6486 = vmatprep.subr.bf16.mxu0 %v9798_v14  ;;  %v15346_v54 = vld [vmem:[#allocation65_spill] sm:$0xff] }
 0x271   : > { %6487 = vmatpush1.bf16.msra.mxu0 %v9796_v47  ;;  %v15359_v14 = vld [vmem:[#allocation73_spill] sm:$0xff] }
 0x272   : > { %v15362_v47 = vld [vmem:[#allocation77_spill] sm:$0xff] }
 0x276   : > { %4330 = vmatmul.mubr.bf16.gmra.mrb[32].mxu1 %v15338_v21  ;;  %v15347_v21 = vld [vmem:[#allocation63_spill] sm:$0xff] }
 0x277   : > { %8606 = vmatmul.mubr.msk.bf16.gmra.mrb[32].mxu0 %vm15341_vm7, %v15339_v4  ;;  %8234 = vmatprep.mubr.msk.bf16.mxu1 %vm15344_vm15, %v15342_v57  ;;  %vm15350_vm7 = vnez %v14949_v2  ;;  %v15355_v4 = vld [vmem:[#allocation19_spill] sm:$0xff] }
 0x278   : > { %6231 = vmatprep.mubr.bf16.mxu0 %v15345_v38  ;;  %v9801_v38 = vld [vmem:[#allocation6 + $0xd4] ss:$8 sps:$4 sm:$0xff]   ;;  %v9808_v2 = vld [vmem:[#allocation6 + $0x5e0] ss:$8 sps:$4 sm:$0xff]  }
 0x279   : > { %4916 = vmatprep.subr.bf16.mxu1 %v9801_v38  ;;  %v15363_v38 = vld [vmem:[#allocation14_spill] sm:$0xff] }
 0x27a   : > { %4917 = vmatpush1.bf16.msra.mxu1 %v9799_v46  ;;  %v15367_v46 = vld [vmem:[#allocation78_spill] sm:$0xff] }
 0x27e   : > { %4340 = vmatmul.mubr.bf16.gmra.mrb[36].mxu1 %v15346_v54 }
 0x27f   : > { %8610 = vmatmul.mubr.msk.bf16.gmra.mrb[36].mxu0 %vm15349_vm6, %v15347_v21  ;;  %8238 = vmatprep.mubr.msk.bf16.mxu1 %vm15350_vm7, %v11472_v11  ;;  %v9804_v21 = vld [vmem:[#allocation6 + $0x5d4] ss:$8 sps:$4 sm:$0xff]  }
 0x280   : > { %6241 = vmatprep.mubr.bf16.mxu0 %v11480_v6  ;;  %6488 = vmatprep.subr.bf16.mxu0 %v9804_v21  ;;  %v15356_v6 = vld [vmem:[#allocation72_spill] sm:$0xff] }
 0x281   : > { %6489 = vmatpush1.bf16.msra.mxu0 %v9802_v44  ;;  %v15364_v21 = vld [vmem:[#allocation76_spill] sm:$0xff]  ;;  %v15366_v44 = vld [vmem:[#allocation79_spill] sm:$0xff] }
 0x282   : > { %vm15365_vm6 = vnez %v15364_v21  ;;  %v15374_v21 = vld [vmem:[#allocation86_spill] sm:$0xff] }
 0x286   : > { %4350 = vmatmul.mubr.bf16.gmra.mrb[40].mxu1 %v11495_v25  ;;  %v15357_v25 = vld [vmem:[#allocation71_spill] sm:$0xff] }
 0x287   : > { %8614 = vmatmul.mubr.msk.bf16.gmra.mrb[40].mxu0 %vm11483_vm12, %v15351_v58  ;;  %8242 = vmatprep.mubr.msk.bf16.mxu1 %vm11540_vm13, %v15353_v61  ;;  %vm15360_vm12 = vnez %v15359_v14  ;;  %v15361_v58 = vld [vmem:[#allocation75_spill] sm:$0xff]  ;;  %vm15368_vm13 = vnez %v15367_v46  ;;  %v15372_v14 = vld [vmem:[#allocation81_spill] sm:$0xff]  ;;  %v15377_v46 = vld [vmem:[#allocation84_spill] sm:$0xff] }
 0x288   : > { %6251 = vmatprep.mubr.bf16.mxu0 %v15355_v4  ;;  %v9805_v61 = vld [vmem:[#allocation6 + $0xe0] ss:$8 sps:$4 sm:$0xff]   ;;  %v9807_v4 = vld [vmem:[#allocation6 + $0xe4] ss:$8 sps:$4 sm:$0xff]  }
 0x289   : > { %4918 = vmatprep.subr.bf16.mxu1 %v9807_v4  ;;  %v15379_v4 = vld [vmem:[#allocation88_spill] sm:$0xff] }
 0x28a   : > { %4919 = vmatpush1.bf16.msra.mxu1 %v9805_v61  ;;  %v15383_v61 = vld [vmem:[#allocation91_spill] sm:$0xff] }
 0x28e   : > { %4360 = vmatmul.mubr.bf16.gmra.mrb[44].mxu1 %v15356_v6  ;;  %v15369_v6 = vld [vmem:[#allocation80_spill] sm:$0xff] }
 0x28f   : > { %8618 = vmatmul.mubr.msk.bf16.gmra.mrb[44].mxu0 %vm11550_vm10, %v15357_v25  ;;  %8246 = vmatprep.mubr.msk.bf16.mxu1 %vm15360_vm12, %v11619_v48  ;;  %v9810_v25 = vld [vmem:[#allocation6 + $0x5e4] ss:$8 sps:$4 sm:$0xff]   ;;  %vm15373_vm10 = vnez %v15372_v14  ;;  %v9811_v48 = vld [vmem:[#allocation6 + $0xf0] ss:$8 sps:$4 sm:$0xff]   ;;  %vm15384_vm12 = vnez %v15383_v61 }
 0x290   : > { %6261 = vmatprep.mubr.bf16.mxu0 %v15361_v58  ;;  %6490 = vmatprep.subr.bf16.mxu0 %v9810_v25  ;;  %v15370_v58 = vld [vmem:[#allocation83_spill] sm:$0xff]  ;;  %v9814_v14 = vld [vmem:[#allocation6 + $0x5f0] ss:$8 sps:$4 sm:$0xff]  }
 0x291   : > { %6491 = vmatpush1.bf16.msra.mxu0 %v9808_v2  ;;  %v15380_v25 = vld [vmem:[#allocation87_spill] sm:$0xff]  ;;  %v15382_v2 = vld [vmem:[#allocation92_spill] sm:$0xff] }
 0x292   : > { %v15393_v61 = vld [vmem:[#allocation96_spill] sm:$0xff] }
 0x296   : > { %4370 = vmatmul.mubr.bf16.gmra.mrb[48].mxu1 %v15362_v47  ;;  %v15371_v47 = vld [vmem:[#allocation82_spill] sm:$0xff] }
 0x297   : > { %8622 = vmatmul.mubr.msk.bf16.gmra.mrb[48].mxu0 %vm15365_vm6, %v15363_v38  ;;  %8250 = vmatprep.mubr.msk.bf16.mxu1 %vm15368_vm13, %v15366_v44  ;;  %v15375_v38 = vld [vmem:[#allocation85_spill] sm:$0xff]  ;;  %vm15381_vm13 = vnez %v15380_v25  ;;  %v15390_v25 = vld [vmem:[#allocation98_spill] sm:$0xff] }
 0x298   : > { %6271 = vmatprep.mubr.bf16.mxu0 %v15369_v6  ;;  %vm15376_vm6 = vnez %v15375_v38  ;;  %v15378_v44 = vld [vmem:[#allocation89_spill] sm:$0xff] }
 0x299   : > { %v9813_v6 = vld [vmem:[#allocation6 + $0xf4] ss:$8 sps:$4 sm:$0xff]  }
 0x29a   : > { %4920 = vmatprep.subr.bf16.mxu1 %v9813_v6  ;;  %v15388_v38 = vld [vmem:[#allocation93_spill] sm:$0xff]  ;;  %v15398_v6 = vld [vmem:[#allocation104_spill] sm:$0xff] }
 0x29b   : > { %4921 = vmatpush1.bf16.msra.mxu1 %v9811_v48  ;;  %v15399_v48 = vld [vmem:[#allocation103_spill] sm:$0xff] }
 0x29e   : > { %4380 = vmatmul.mubr.bf16.gmra.mrb[52].mxu1 %v15370_v58  ;;  %v15385_v58 = vld [vmem:[#allocation90_spill] sm:$0xff] }
 0x29f   : > { %8626 = vmatmul.mubr.msk.bf16.gmra.mrb[52].mxu0 %vm15373_vm10, %v15371_v47  ;;  %8254 = vmatprep.mubr.msk.bf16.mxu1 %vm15376_vm6, %v15374_v21  ;;  %v9816_v47 = vld [vmem:[#allocation6 + $0x5f4] ss:$8 sps:$4 sm:$0xff]   ;;  %vm15389_vm10 = vnez %v15388_v38  ;;  %vm15400_vm6 = vnez %v15399_v48  ;;  %v15403_v38 = vld [vmem:[#allocation106_spill] sm:$0xff] }
 0x2a0   : > { %6281 = vmatprep.mubr.bf16.mxu0 %v15377_v46  ;;  %6492 = vmatprep.subr.bf16.mxu0 %v9816_v47  ;;  %v15386_v46 = vld [vmem:[#allocation95_spill] sm:$0xff]  ;;  %v15395_v21 = vld [vmem:[#allocation100_spill] sm:$0xff] }
 0x2a1   : > { %6493 = vmatpush1.bf16.msra.mxu0 %v9814_v14  ;;  %v15401_v14 = vld [vmem:[#allocation102_spill] sm:$0xff]  ;;  %v15402_v47 = vld [vmem:[#allocation107_spill] sm:$0xff]  ;;  %v15413_v48 = vld [vmem:[#allocation116_spill] sm:$0xff] }
 0x2a6   : > { %4390 = vmatmul.mubr.bf16.gmra.mrb[56].mxu1 %v15378_v44  ;;  %v15387_v44 = vld [vmem:[#allocation94_spill] sm:$0xff] }
 0x2a7   : > { %8630 = vmatmul.mubr.msk.bf16.gmra.mrb[56].mxu0 %vm15381_vm13, %v15379_v4  ;;  %8258 = vmatprep.mubr.msk.bf16.mxu1 %vm15384_vm12, %v15382_v2  ;;  %v15391_v4 = vld [vmem:[#allocation97_spill] sm:$0xff] }
 0x2a8   : > { %6291 = vmatprep.mubr.bf16.mxu0 %v15385_v58  ;;  %vm15392_vm13 = vnez %v15391_v4  ;;  %v15394_v2 = vld [vmem:[#allocation101_spill] sm:$0xff]  ;;  %v15396_v58 = vld [vmem:[#allocation99_spill] sm:$0xff] }
 0x2a9   : > { %vm15397_vm12 = vnez %v15396_v58  ;;  %v15409_v58 = vld [vmem:[#allocation113_spill] sm:$0xff]  ;;  %v15411_v4 = vld [vmem:[#allocation111_spill] sm:$0xff] }
 0x2ae   : > { %4400 = vmatmul.mubr.bf16.gmra.mrb[60].mxu1 %v15386_v46 }
 0x2af   : > { %8634 = vmatmul.mubr.msk.bf16.gmra.mrb[60].mxu0 %vm15389_vm10, %v15387_v44  ;;  %8262 = vmatprep.mubr.msk.bf16.mxu1 %vm15392_vm13, %v15390_v25  ;;  %v15404_v44 = vld [vmem:[#allocation105_spill] sm:$0xff] }
 0x2b0   : > { %6301 = vmatprep.mubr.bf16.mxu0 %v15393_v61  ;;  %vm15405_vm10 = vnez %v15404_v44  ;;  %v15406_v61 = vld [vmem:[#allocation109_spill] sm:$0xff]  ;;  %v15417_v44 = vld [vmem:[#allocation119_spill] sm:$0xff] }
 0x2b1   : > { %vm15407_vm13 = vnez %v15406_v61  ;;  %v15421_v61 = vld [vmem:[#allocation122_spill] sm:$0xff] }
 0x2b6   : > { %4410 = vmatmul.mubr.bf16.gmra.mrb[64].mxu1 %v15394_v2  ;;  %v15408_v2 = vld [vmem:[#allocation108_spill] sm:$0xff] }
 0x2b7   : > { %8638 = vmatmul.mubr.msk.bf16.gmra.mrb[64].mxu0 %vm15397_vm12, %v15395_v21  ;;  %8266 = vmatprep.mubr.msk.bf16.mxu1 %vm15400_vm6, %v15398_v6  ;;  %v15410_v21 = vld [vmem:[#allocation112_spill] sm:$0xff]  ;;  %vm15412_vm12 = vnez %v15411_v4  ;;  %v15419_v6 = vld [vmem:[#allocation117_spill] sm:$0xff] }
 0x2b8   : > { %6311 = vmatprep.mubr.bf16.mxu0 %v15401_v14  ;;  %v15414_v14 = vld [vmem:[#allocation115_spill] sm:$0xff]  ;;  %v15425_v4 = vld [vmem:[#allocation125_spill] sm:$0xff] }
 0x2b9   : > { %vm15415_vm6 = vnez %v15414_v14  ;;  %v15429_v14 = vld [vmem:[#allocation128_spill] sm:$0xff] }
 0x2be   : > { %4420 = vmatmul.mubr.bf16.gmra.mrb[68].mxu1 %v15402_v47  ;;  %v15416_v47 = vld [vmem:[#allocation114_spill] sm:$0xff] }
 0x2bf   : > { %8642 = vmatmul.mubr.msk.bf16.gmra.mrb[68].mxu0 %vm15405_vm10, %v15403_v38  ;;  %8270 = vmatprep.mubr.msk.bf16.mxu1 %vm15407_vm13, %v12165_v30  ;;  %v15418_v38 = vld [vmem:[#allocation118_spill] sm:$0xff]  ;;  %vm15420_vm10 = vnez %v15419_v6  ;;  %v15427_v30 = vld [vmem:[#allocation123_spill] sm:$0xff] }
 0x2c0   : > { %6321 = vmatprep.mubr.bf16.mxu0 %v15408_v2  ;;  %v15422_v2 = vld [vmem:[#allocation121_spill] sm:$0xff]  ;;  %v15433_v6 = vld [vmem:[#allocation131_spill] sm:$0xff] }
 0x2c1   : > { %vm15423_vm13 = vnez %v15422_v2  ;;  %v15437_v2 = vld [vmem:[#allocation134_spill] sm:$0xff] }
 0x2c6   : > { %4430 = vmatmul.mubr.bf16.gmra.mrb[72].mxu1 %v15409_v58  ;;  %v15424_v58 = vld [vmem:[#allocation120_spill] sm:$0xff] }
 0x2c7   : > { %8646 = vmatmul.mubr.msk.bf16.gmra.mrb[72].mxu0 %vm15412_vm12, %v15410_v21  ;;  %8274 = vmatprep.mubr.msk.bf16.mxu1 %vm15415_vm6, %v15413_v48  ;;  %v15426_v21 = vld [vmem:[#allocation124_spill] sm:$0xff]  ;;  %vm15428_vm12 = vnez %v15427_v30  ;;  %v15435_v48 = vld [vmem:[#allocation129_spill] sm:$0xff] }
 0x2c8   : > { %6331 = vmatprep.mubr.bf16.mxu0 %v15416_v47  ;;  %v15430_v47 = vld [vmem:[#allocation127_spill] sm:$0xff]  ;;  %v15441_v30 = vld [vmem:[#allocation137_spill] sm:$0xff] }
 0x2c9   : > { %vm15431_vm6 = vnez %v15430_v47  ;;  %v15445_v47 = vld [vmem:[#allocation140_spill] sm:$0xff] }
 0x2ce   : > { %4440 = vmatmul.mubr.bf16.gmra.mrb[76].mxu1 %v15417_v44  ;;  %v15432_v44 = vld [vmem:[#allocation126_spill] sm:$0xff] }
 0x2cf   : > { %8650 = vmatmul.mubr.msk.bf16.gmra.mrb[76].mxu0 %vm15420_vm10, %v15418_v38  ;;  %8278 = vmatprep.mubr.msk.bf16.mxu1 %vm15423_vm13, %v15421_v61  ;;  %v15434_v38 = vld [vmem:[#allocation130_spill] sm:$0xff]  ;;  %vm15436_vm10 = vnez %v15435_v48  ;;  %v15443_v61 = vld [vmem:[#allocation135_spill] sm:$0xff] }
 0x2d0   : > { %6341 = vmatprep.mubr.bf16.mxu0 %v15424_v58  ;;  %v15438_v58 = vld [vmem:[#allocation133_spill] sm:$0xff]  ;;  %v15449_v48 = vld [vmem:[#allocation143_spill] sm:$0xff] }
 0x2d1   : > { %vm15439_vm13 = vnez %v15438_v58  ;;  %v15453_v58 = vld [vmem:[#allocation146_spill] sm:$0xff] }
 0x2d6   : > { %4450 = vmatmul.mubr.bf16.gmra.mrb[80].mxu1 %v15425_v4  ;;  %v15440_v4 = vld [vmem:[#allocation132_spill] sm:$0xff] }
 0x2d7   : > { %8654 = vmatmul.mubr.msk.bf16.gmra.mrb[80].mxu0 %vm15428_vm12, %v15426_v21  ;;  %8282 = vmatprep.mubr.msk.bf16.mxu1 %vm15431_vm6, %v15429_v14  ;;  %v15442_v21 = vld [vmem:[#allocation136_spill] sm:$0xff]  ;;  %vm15444_vm12 = vnez %v15443_v61  ;;  %v15451_v14 = vld [vmem:[#allocation141_spill] sm:$0xff] }
 0x2d8   : > { %6351 = vmatprep.mubr.bf16.mxu0 %v15432_v44  ;;  %v15446_v44 = vld [vmem:[#allocation139_spill] sm:$0xff]  ;;  %v15457_v61 = vld [vmem:[#allocation149_spill] sm:$0xff] }
 0x2d9   : > { %vm15447_vm6 = vnez %v15446_v44  ;;  %v15461_v44 = vld [vmem:[#allocation152_spill] sm:$0xff] }
 0x2de   : > { %4460 = vmatmul.mubr.bf16.gmra.mrb[84].mxu1 %v15433_v6  ;;  %v15448_v6 = vld [vmem:[#allocation138_spill] sm:$0xff] }
 0x2df   : > { %8658 = vmatmul.mubr.msk.bf16.gmra.mrb[84].mxu0 %vm15436_vm10, %v15434_v38  ;;  %8286 = vmatprep.mubr.msk.bf16.mxu1 %vm15439_vm13, %v15437_v2  ;;  %v15450_v38 = vld [vmem:[#allocation142_spill] sm:$0xff]  ;;  %vm15452_vm10 = vnez %v15451_v14  ;;  %v15459_v2 = vld [vmem:[#allocation147_spill] sm:$0xff] }
 0x2e0   : > { %6361 = vmatprep.mubr.bf16.mxu0 %v15440_v4  ;;  %v15454_v4 = vld [vmem:[#allocation145_spill] sm:$0xff]  ;;  %v15465_v14 = vld [vmem:[#allocation155_spill] sm:$0xff] }
 0x2e1   : > { %vm15455_vm13 = vnez %v15454_v4  ;;  %v15469_v4 = vld [vmem:[#allocation158_spill] sm:$0xff] }
 0x2e6   : > { %4470 = vmatmul.mubr.bf16.gmra.mrb[88].mxu1 %v15441_v30  ;;  %v15456_v30 = vld [vmem:[#allocation144_spill] sm:$0xff] }
 0x2e7   : > { %8662 = vmatmul.mubr.msk.bf16.gmra.mrb[88].mxu0 %vm15444_vm12, %v15442_v21  ;;  %8290 = vmatprep.mubr.msk.bf16.mxu1 %vm15447_vm6, %v15445_v47  ;;  %v15458_v21 = vld [vmem:[#allocation148_spill] sm:$0xff]  ;;  %vm15460_vm12 = vnez %v15459_v2  ;;  %v15467_v47 = vld [vmem:[#allocation153_spill] sm:$0xff] }
 0x2e8   : > { %6371 = vmatprep.mubr.bf16.mxu0 %v15448_v6  ;;  %v15462_v6 = vld [vmem:[#allocation151_spill] sm:$0xff]  ;;  %v15473_v2 = vld [vmem:[#allocation161_spill] sm:$0xff] }
 0x2e9   : > { %vm15463_vm6 = vnez %v15462_v6  ;;  %v15477_v6 = vld [vmem:[#allocation164_spill] sm:$0xff] }
 0x2ee   : > { %4480 = vmatmul.mubr.bf16.gmra.mrb[92].mxu1 %v15449_v48  ;;  %v15464_v48 = vld [vmem:[#allocation150_spill] sm:$0xff] }
 0x2ef   : > { %8666 = vmatmul.mubr.msk.bf16.gmra.mrb[92].mxu0 %vm15452_vm10, %v15450_v38  ;;  %8294 = vmatprep.mubr.msk.bf16.mxu1 %vm15455_vm13, %v15453_v58  ;;  %v15466_v38 = vld [vmem:[#allocation154_spill] sm:$0xff]  ;;  %vm15468_vm10 = vnez %v15467_v47  ;;  %v15475_v58 = vld [vmem:[#allocation159_spill] sm:$0xff] }
 0x2f0   : > { %6381 = vmatprep.mubr.bf16.mxu0 %v15456_v30  ;;  %v15470_v30 = vld [vmem:[#allocation157_spill] sm:$0xff]  ;;  %v15481_v47 = vld [vmem:[#allocation167_spill] sm:$0xff] }
 0x2f1   : > { %vm15471_vm13 = vnez %v15470_v30 }
 0x2f6   : > { %4490 = vmatmul.mubr.bf16.gmra.mrb[96].mxu1 %v15457_v61  ;;  %v15472_v61 = vld [vmem:[#allocation156_spill] sm:$0xff] }
 0x2f7   : > { %8670 = vmatmul.mubr.msk.bf16.gmra.mrb[96].mxu0 %vm15460_vm12, %v15458_v21  ;;  %8298 = vmatprep.mubr.msk.bf16.mxu1 %vm15463_vm6, %v15461_v44  ;;  %v15474_v21 = vld [vmem:[#allocation160_spill] sm:$0xff]  ;;  %vm15476_vm12 = vnez %v15475_v58  ;;  %v15483_v44 = vld [vmem:[#allocation165_spill] sm:$0xff]  ;;  %v520_v58 = vadd.s32 504, %v14989_v24 }
 0x2f8   : > { %6391 = vmatprep.mubr.bf16.mxu0 %v15464_v48  ;;  %v15478_v48 = vld [vmem:[#allocation163_spill] sm:$0xff] }
 0x2f9   : > { %vm15479_vm6 = vnez %v15478_v48  ;;  %v15487_v48 = vld [vmem:[#allocation172_spill] sm:$0xff] }
 0x2fe   : > { %4500 = vmatmul.mubr.bf16.gmra.mrb[100].mxu1 %v15465_v14  ;;  %v15480_v14 = vld [vmem:[#allocation162_spill] sm:$0xff] }
 0x2ff   : > { %8674 = vmatmul.mubr.msk.bf16.gmra.mrb[100].mxu0 %vm15468_vm10, %v15466_v38  ;;  %8302 = vmatprep.mubr.msk.bf16.mxu1 %vm15471_vm13, %v15469_v4  ;;  %v15482_v38 = vld [vmem:[#allocation166_spill] sm:$0xff]  ;;  %vm15484_vm10 = vnez %v15483_v44  ;;  %vm15485_vm13 = vnez %v15263_v3  ;;  %v966_v44 = vand.u32 15, %v520_v58 }
 0x300   : > { %6401 = vmatprep.mubr.bf16.mxu0 %v15472_v61  ;;  %v15486_v61 = vld [vmem:[#allocation173_spill] sm:$0xff] }
 0x301   : > { %vm1416_vm7 = vcmp.eq.s32.totalorder %v966_v44, 15 }
 0x306   : > { %4510 = vmatmul.mubr.bf16.gmra.mrb[104].mxu1 %v15473_v2 }
 0x307   : > { %8678 = vmatmul.mubr.msk.bf16.gmra.mrb[104].mxu0 %vm15476_vm12, %v15474_v21  ;;  %8306 = vmatprep.mubr.msk.bf16.mxu1 %vm15479_vm6, %v15477_v6  ;;  %v1800_v21 = vrot.slane %v13000_v5, 1  ;;  %vm15490_vm6 = vnez %v15281_v53 }
 0x308   : > { %6411 = vmatprep.mubr.bf16.mxu0 %v15480_v14  ;;  %v15488_v14 = vld [vmem:[#allocation171_spill] sm:$0xff] }
 0x309   : > { %vm15489_vm12 = vnez %v15488_v14 }
 0x30e   : > { %4520 = vmatmul.mubr.bf16.gmra.mrb[108].mxu1 %v15481_v47 }
 0x30f   : > { %8682 = vmatmul.mubr.msk.bf16.gmra.mrb[108].mxu0 %vm15484_vm10, %v15482_v38  ;;  %8310 = vmatprep.mubr.msk.bf16.mxu1 %vm15485_vm13, %v12982_v39  ;;  %v15491_v38 = vrot.slane %v13060_v36, 1  ;;  %vm15492_vm10 = vcmask 1046528  }
 0x310   : > { %6421 = vmatprep.mubr.bf16.mxu0 %v12973_v23  ;;  %vm15493_vm13 = vmmov %vm15492_vm10 }
 0x311   : > { %v1801_v23 = vsel %vm15492_vm10, %v15491_v38, %v1800_v21  ;;  %v1866_v3 = vsel %vm15493_vm13, %v1800_v21, %v13000_v5  ;;  %vm8319_vm13 = vmneg %vm1416_vm7 }
 0x312   : > { %v2889_v39 = vmul.f32 0.75, %v1801_v23  ;;  %v2442_v36 = vsel %vm1416_vm7, %v13000_v5, %v1866_v3  ;;  %v2505_v21 = vmul.f32 0.25, %v1801_v23  ;;  %vm13414_vm10 = vmpackc.low %vm8319_vm13, %vm14803_vm0  ;;  %v15497_v5 = vld [vmem:[#allocation176_spill] sm:$0xff]  ;;  %v15498_v23 = vmov 0  }
 0x313   : > { %v2506_v44 = vmul.f32 0.25, %v2442_v36  ;;  %vm15502_vm0 = vnez %v15501_v32  ;;  %v15546_v36 = vld [vmem:[#allocation15_spill] sm:$0xff] }
 0x314   : > { %v2953_v58 = vadd.f32 %v2889_v39, %v13096_v27  ;;  %v15561_v32 = vld [vmem:[#allocation83_spill] sm:$0xff] }
 0x315   : > { %v2570_v39 = vadd.f32 %v2506_v44, %v15497_v5  ;;  %v15553_v44 = vld [vmem:[#allocation77_spill] sm:$0xff]  ;;  %v15555_v5 = vld [vmem:[#allocation79_spill] sm:$0xff] }
 0x316   : > { %4530 = vmatmul.mubr.bf16.gmra.mrb[112].mxu1 %v15486_v61  ;;  %v2890_v61 = vmul.f32 0.75, %v1866_v3  ;;  %v2569_v3 = vadd.f32 %v2505_v21, %v13077_v51  ;;  %v15499_v51 = vld [vmem:[#allocation20_spill] sm:$0xff]  ;;  %v15551_v21 = vld [vmem:[#allocation62_spill] sm:$0xff] }
 0x317   : > { %8686 = vmatmul.mubr.msk.bf16.gmra.mrb[112].mxu0 %vm15489_vm12, %v15487_v48  ;;  %8314 = vmatprep.mubr.msk.bf16.mxu1 %vm15490_vm6, %v13062_v8  ;;  %vm15494_vm12 = vnez %v15283_v28 }
 0x318   : > { %6431 = vmatprep.mubr.bf16.mxu0 %v13051_v13  ;;  %v2954_v38 = vadd.f32 %v2890_v61, %v13123_v12  ;;  %v13428_v27 = vpack.c.bf16 %v2570_v39, %v2569_v3  ;;  %v15500_v12 = vld [vmem:[#allocation21_spill] sm:$0xff]  ;;  %v15545_v61 = vld [vmem:[#allocation72_spill] sm:$0xff]  ;;  %v15556_v39 = vld [vmem:[#allocation78_spill] sm:$0xff] }
 0x319   : > { %v15554_v3 = vld [vmem:[#allocation17_spill] sm:$0xff] }
 0x31a   : > { %v13411_v13 = vpack.c.bf16 %v2954_v38, %v2953_v58  ;;  %v15548_v58 = vld [vmem:[#allocation73_spill] sm:$0xff]  ;;  %v15550_v38 = vld [vmem:[#allocation63_spill] sm:$0xff] }
 0x31e   : > { %4540 = vmatmul.mubr.bf16.gmra.mrb[116].mxu1 %v13085_v45 }
 0x31f   : > { %8690 = vmatmul.mubr.msk.bf16.gmra.mrb[116].mxu0 %vm15494_vm12, %v13073_v0  ;;  %8318 = vmatprep.mubr.msk.bf16.mxu1 %vm13137_vm4, %v13143_v41 }
 0x320   : > { %6441 = vmatprep.mubr.bf16.mxu0 %v13134_v22  ;;  %v15520_v22 = vld [vmem:[#allocation54_spill] sm:$0xff] }
 0x326   : > { %4550 = vmatmul.mubr.bf16.gmra.mrb[120].mxu1 %v13148_v63 }
 0x327   : > { %8694 = vmatmul.mubr.msk.bf16.gmra.mrb[120].mxu0 %vm13130_vm2, %v13145_v49  ;;  %8322 = vmatprep.mubr.msk.bf16.mxu1 %vm13414_vm10, %v13411_v13  ;;  %vm15511_vm2 = vnez %v14858_v19  ;;  %v15521_v19 = vld [vmem:[#allocation43_spill] sm:$0xff]  ;;  %v15523_v49 = vld [vmem:[#allocation44_spill] sm:$0xff] }
 0x328   : > { %6451 = vmatprep.mubr.bf16.mxu0 %v15498_v23 }
 0x32e   : > { %4560 = vmatmul.mubr.bf16.gmra.mrb[124].mxu1 %v13428_v27 }
 0x32f   : > { %6452 = vmatmul.mubr.bf16.gmra.mrb[124].mxu0 %v15498_v23  ;;  %4922 = vmatprep.mubr.bf16.mxu1 %v15498_v23 }
 0x330   : > { %8698 = vmatprep.mubr.msk.bf16.mxu0 %vm10610_vm3, %v10600_v15  ;;  %v15503_v15 = vld [vmem:[#allocation24_spill] sm:$0xff] }
 0x336   : > { %4923 = vmatmul.mubr.bf16.vlgmr.msra.gmra.mrb[0].mxu1 %v15498_v23 }
 0x337   : > { %6495 = vmatmul.mubr.bf16.vlgmr.msra.gmra.mrb[0].mxu0 %v10604_v29  ;;  %4932 = vmatprep.mubr.bf16.mxu1 %v15499_v51  ;;  %v15504_v29 = vld [vmem:[#allocation26_spill] sm:$0xff]  ;;  %v15558_v51 = vld [vmem:[#allocation67_spill] sm:$0xff] }
 0x338   : > { %8702 = vmatprep.mubr.msk.bf16.mxu0 %vm15304_vm11, %v15302_v26  ;;  %vm15505_vm3 = vnez %v15504_v29  ;;  %v15527_v26 = vld [vmem:[#allocation46_spill] sm:$0xff] }
 0x339   : > { %v15563_v29 = vld [vmem:[#allocation86_spill] sm:$0xff] }
 0x33e   : > { %8326 = vmatmul.mubr.msk.bf16.gmra.mrb[4].mxu1 %vm15502_vm0, %v15500_v12  ;;  %v15559_v12 = vld [vmem:[#allocation66_spill] sm:$0xff] }
 0x33f   : > { %6505 = vmatmul.mubr.bf16.gmra.mrb[4].mxu0 %v10717_v20  ;;  %4942 = vmatprep.mubr.bf16.mxu1 %v10465_v59  ;;  %v15506_v59 = vld [vmem:[#allocation28_spill] sm:$0xff]  ;;  %v15510_v20 = vld [vmem:[#allocation34_spill] sm:$0xff] }
 0x340   : > { %8706 = vmatprep.mubr.msk.bf16.mxu0 %vm15309_vm9, %v15307_v56  ;;  %vm15525_vm9 = vnez %v15524_v40  ;;  %v15529_v56 = vld [vmem:[#allocation45_spill] sm:$0xff] }
 0x341   : > { %vm15530_vm7 = vnez %v15529_v56  ;;  %v15583_v40 = vld [vmem:[#allocation101_spill] sm:$0xff]  ;;  %v15588_v56 = vld [vmem:[#allocation88_spill] sm:$0xff] }
 0x346   : > { %8330 = vmatmul.mubr.msk.bf16.gmra.mrb[8].mxu1 %vm10596_vm1, %v10484_v17  ;;  %v15507_v17 = vld [vmem:[#allocation30_spill] sm:$0xff]  ;;  %vm15509_vm1 = vnez %v15508_v31  ;;  %v15567_v31 = vld [vmem:[#allocation69_spill] sm:$0xff] }
 0x347   : > { %6515 = vmatmul.mubr.bf16.gmra.mrb[8].mxu0 %v10856_v16  ;;  %4952 = vmatprep.mubr.bf16.mxu1 %v15299_v50  ;;  %v15512_v16 = vld [vmem:[#allocation36_spill] sm:$0xff] }
 0x348   : > { %8710 = vmatprep.mubr.msk.bf16.mxu0 %vm15315_vm5, %v15313_v37  ;;  %v15526_v50 = vld [vmem:[#allocation60_spill] sm:$0xff] }
 0x349   : > { %v15532_v37 = vld [vmem:[#allocation16_spill] sm:$0xff] }
 0x34e   : > { %8334 = vmatmul.mubr.msk.bf16.gmra.mrb[12].mxu1 %vm15505_vm3, %v15503_v15  ;;  %vm15549_vm3 = vnez %v15548_v58  ;;  %v15562_v15 = vld [vmem:[#allocation19_spill] sm:$0xff]  ;;  %v15609_v58 = vld [vmem:[#allocation122_spill] sm:$0xff] }
 0x34f   : > { %6525 = vmatmul.mubr.bf16.gmra.mrb[12].mxu0 %v10951_v34  ;;  %4962 = vmatprep.mubr.bf16.mxu1 %v15506_v59  ;;  %v15513_v34 = vld [vmem:[#allocation33_spill] sm:$0xff] }
 0x350   : > { %8714 = vmatprep.mubr.msk.bf16.mxu0 %vm15320_vm14, %v11022_v10  ;;  %vm15514_vm11 = vnez %v15513_v34  ;;  %vm15516_vm14 = vnez %v15327_v1  ;;  %v15517_v10 = vld [vmem:[#allocation41_spill] sm:$0xff]  ;;  %v15539_v1 = vld [vmem:[#allocation70_spill] sm:$0xff]  ;;  %v15571_v34 = vld [vmem:[#allocation92_spill] sm:$0xff] }
 0x351   : > { %v15564_v59 = vld [vmem:[#allocation85_spill] sm:$0xff] }
 0x356   : > { %8338 = vmatmul.mubr.msk.bf16.gmra.mrb[16].mxu1 %vm15509_vm1, %v15507_v17  ;;  %vm15552_vm1 = vnez %v15551_v21  ;;  %v15566_v17 = vld [vmem:[#allocation71_spill] sm:$0xff]  ;;  %v15612_v21 = vld [vmem:[#allocation106_spill] sm:$0xff] }
 0x357   : > { %6535 = vmatmul.mubr.bf16.gmra.mrb[16].mxu0 %v11035_v52  ;;  %4972 = vmatprep.mubr.bf16.mxu1 %v15510_v20  ;;  %v15518_v52 = vld [vmem:[#allocation38_spill] sm:$0xff]  ;;  %v15569_v20 = vld [vmem:[#allocation89_spill] sm:$0xff] }
 0x358   : > { %8718 = vmatprep.mubr.msk.bf16.mxu0 %vm15511_vm2, %v11107_v33  ;;  %vm15519_vm5 = vnez %v15518_v52  ;;  %vm15557_vm2 = vnez %v15556_v39  ;;  %v15575_v52 = vld [vmem:[#allocation76_spill] sm:$0xff]  ;;  %v15580_v33 = vld [vmem:[#allocation82_spill] sm:$0xff] }
 0x359   : > { %v15617_v39 = vld [vmem:[#allocation128_spill] sm:$0xff] }
 0x35e   : > { %8342 = vmatmul.mubr.msk.bf16.gmra.mrb[20].mxu1 %vm15514_vm11, %v15512_v16  ;;  %vm15560_vm11 = vnez %v15559_v12  ;;  %v15570_v16 = vld [vmem:[#allocation75_spill] sm:$0xff]  ;;  %v15620_v12 = vld [vmem:[#allocation112_spill] sm:$0xff] }
 0x35f   : > { %6545 = vmatmul.mubr.bf16.gmra.mrb[20].mxu0 %v15323_v60  ;;  %4982 = vmatprep.mubr.bf16.mxu1 %v15515_v35  ;;  %v15535_v60 = vld [vmem:[#allocation51_spill] sm:$0xff] }
 0x360   : > { %8722 = vmatprep.mubr.msk.bf16.mxu0 %vm15516_vm14, %v15326_v62  ;;  %vm15536_vm13 = vnez %v15535_v60  ;;  %v15538_v62 = vld [vmem:[#allocation56_spill] sm:$0xff]  ;;  %vm15565_vm14 = vnez %v15564_v59  ;;  %v15572_v35 = vld [vmem:[#allocation91_spill] sm:$0xff]  ;;  %v15596_v60 = vld [vmem:[#allocation94_spill] sm:$0xff] }
 0x361   : > { %v15625_v59 = vld [vmem:[#allocation134_spill] sm:$0xff] }
 0x366   : > { %8346 = vmatmul.mubr.msk.bf16.gmra.mrb[24].mxu1 %vm15519_vm5, %v15517_v10  ;;  %vm15568_vm5 = vnez %v15567_v31  ;;  %v15574_v10 = vld [vmem:[#allocation14_spill] sm:$0xff] }
 0x367   : > { %6555 = vmatmul.mubr.bf16.gmra.mrb[24].mxu0 %v15520_v22  ;;  %4992 = vmatprep.mubr.bf16.mxu1 %v15521_v19  ;;  %v15577_v22 = vld [vmem:[#allocation80_spill] sm:$0xff]  ;;  %v15578_v19 = vld [vmem:[#allocation97_spill] sm:$0xff]  ;;  %v15628_v31 = vld [vmem:[#allocation118_spill] sm:$0xff] }
 0x368   : > { %8726 = vmatprep.mubr.msk.bf16.mxu0 %vm15336_vm8, %v15334_v18  ;;  %vm15533_vm8 = vnez %v15532_v37  ;;  %v15537_v18 = vld [vmem:[#allocation68_spill] sm:$0xff]  ;;  %v15592_v37 = vld [vmem:[#allocation90_spill] sm:$0xff] }
 0x36e   : > { %8350 = vmatmul.mubr.msk.bf16.gmra.mrb[28].mxu1 %vm15525_vm9, %v15523_v49  ;;  %vm15573_vm9 = vnez %v15572_v35  ;;  %v15581_v49 = vld [vmem:[#allocation81_spill] sm:$0xff]  ;;  %v15633_v35 = vld [vmem:[#allocation140_spill] sm:$0xff] }
 0x36f   : > { %6565 = vmatmul.mubr.bf16.gmra.mrb[28].mxu0 %v15526_v50  ;;  %5002 = vmatprep.mubr.bf16.mxu1 %v15527_v26  ;;  %v15584_v50 = vld [vmem:[#allocation84_spill] sm:$0xff] }
 0x370   : > { %8730 = vmatprep.mubr.msk.bf16.mxu0 %vm15344_vm15, %v15342_v57  ;;  %v15540_v57 = vld [vmem:[#allocation18_spill] sm:$0xff]  ;;  %v15585_v26 = vld [vmem:[#allocation104_spill] sm:$0xff] }
 0x371   : > { %vm15541_vm15 = vnez %v15540_v57  ;;  %v15601_v57 = vld [vmem:[#allocation116_spill] sm:$0xff] }
 0x376   : > { %8354 = vmatmul.mubr.msk.bf16.gmra.mrb[32].mxu1 %vm15530_vm7, %v15528_v55  ;;  %vm15576_vm7 = vnez %v15575_v52  ;;  %v15586_v55 = vld [vmem:[#allocation103_spill] sm:$0xff]  ;;  %v15636_v52 = vld [vmem:[#allocation124_spill] sm:$0xff] }
 0x377   : > { %6575 = vmatmul.mubr.bf16.gmra.mrb[32].mxu0 %v15346_v54  ;;  %5012 = vmatprep.mubr.bf16.mxu1 %v15531_v9  ;;  %v15543_v54 = vld [vmem:[#allocation58_spill] sm:$0xff]  ;;  %v15591_v9 = vld [vmem:[#allocation107_spill] sm:$0xff] }
 0x378   : > { %8734 = vmatprep.mubr.msk.bf16.mxu0 %vm15533_vm8, %v11472_v11  ;;  %vm15544_vm0 = vnez %v15543_v54  ;;  %v15547_v11 = vld [vmem:[#allocation74_spill] sm:$0xff]  ;;  %vm15579_vm8 = vnez %v15578_v19  ;;  %v15604_v54 = vld [vmem:[#allocation100_spill] sm:$0xff]  ;;  %v15639_v19 = vld [vmem:[#allocation143_spill] sm:$0xff] }
 0x37e   : > { %8358 = vmatmul.mubr.msk.bf16.gmra.mrb[36].mxu1 %vm15536_vm13, %v15534_v7  ;;  %vm15582_vm13 = vnez %v15581_v49  ;;  %v15594_v7 = vld [vmem:[#allocation109_spill] sm:$0xff]  ;;  %v15641_v49 = vld [vmem:[#allocation146_spill] sm:$0xff] }
 0x37f   : > { %6585 = vmatmul.mubr.bf16.gmra.mrb[36].mxu0 %v15537_v18  ;;  %5022 = vmatprep.mubr.bf16.mxu1 %v15538_v62  ;;  %v15597_v18 = vld [vmem:[#allocation93_spill] sm:$0xff] }
 0x380   : > { %8738 = vmatprep.mubr.msk.bf16.mxu0 %vm15541_vm15, %v15539_v1  ;;  %vm15587_vm15 = vnez %v15586_v55  ;;  %v15599_v62 = vld [vmem:[#allocation113_spill] sm:$0xff]  ;;  %v15600_v1 = vld [vmem:[#allocation96_spill] sm:$0xff] }
 0x381   : > { %v15647_v55 = vld [vmem:[#allocation149_spill] sm:$0xff] }
 0x386   : > { %8362 = vmatmul.mubr.msk.bf16.gmra.mrb[40].mxu1 %vm15544_vm0, %v15542_v42  ;;  %v15602_v42 = vld [vmem:[#allocation115_spill] sm:$0xff] }
 0x387   : > { %6595 = vmatmul.mubr.bf16.gmra.mrb[40].mxu0 %v15545_v61  ;;  %5032 = vmatprep.mubr.bf16.mxu1 %v15546_v36  ;;  %v15605_v61 = vld [vmem:[#allocation99_spill] sm:$0xff] }
 0x388   : > { %8742 = vmatprep.mubr.msk.bf16.mxu0 %vm15549_vm3, %v15547_v11  ;;  %vm15595_vm3 = vnez %v15594_v7  ;;  %v15607_v36 = vld [vmem:[#allocation119_spill] sm:$0xff]  ;;  %v15608_v11 = vld [vmem:[#allocation102_spill] sm:$0xff] }
 0x389   : > { %v15655_v7 = vld [vmem:[#allocation155_spill] sm:$0xff] }
 0x38e   : > { %8366 = vmatmul.mubr.msk.bf16.gmra.mrb[44].mxu1 %vm15552_vm1, %v15550_v38  ;;  %vm15598_vm1 = vnez %v15597_v18  ;;  %v15610_v38 = vld [vmem:[#allocation121_spill] sm:$0xff]  ;;  %v15658_v18 = vld [vmem:[#allocation142_spill] sm:$0xff] }
 0x38f   : > { %6605 = vmatmul.mubr.bf16.gmra.mrb[44].mxu0 %v15553_v44  ;;  %5042 = vmatprep.mubr.bf16.mxu1 %v15554_v3  ;;  %v15613_v44 = vld [vmem:[#allocation105_spill] sm:$0xff] }
 0x390   : > { %8746 = vmatprep.mubr.msk.bf16.mxu0 %vm15557_vm2, %v15555_v5  ;;  %vm15603_vm2 = vnez %v15602_v42  ;;  %v15615_v3 = vld [vmem:[#allocation125_spill] sm:$0xff]  ;;  %v15616_v5 = vld [vmem:[#allocation108_spill] sm:$0xff]  ;;  %v6947_v42 = vsub.s32 0, %v14989_v24 }
 0x396   : > { %8370 = vmatmul.mubr.msk.bf16.gmra.mrb[48].mxu1 %vm15560_vm11, %v15558_v51  ;;  %vm15606_vm11 = vnez %v15605_v61  ;;  %v15618_v51 = vld [vmem:[#allocation127_spill] sm:$0xff] }
 0x397   : > { %6615 = vmatmul.mubr.bf16.gmra.mrb[48].mxu0 %v15561_v32  ;;  %5052 = vmatprep.mubr.bf16.mxu1 %v15562_v15  ;;  %v15621_v32 = vld [vmem:[#allocation111_spill] sm:$0xff] }
 0x398   : > { %8750 = vmatprep.mubr.msk.bf16.mxu0 %vm15565_vm14, %v15563_v29  ;;  %vm15611_vm14 = vnez %v15610_v38  ;;  %v15623_v15 = vld [vmem:[#allocation131_spill] sm:$0xff]  ;;  %v15624_v29 = vld [vmem:[#allocation114_spill] sm:$0xff] }
 0x399   : > { %v15665_v61 = vld [vmem:[#allocation147_spill] sm:$0xff] }
 0x39e   : > { %8374 = vmatmul.mubr.msk.bf16.gmra.mrb[52].mxu1 %vm15568_vm5, %v15566_v17  ;;  %vm15614_vm5 = vnez %v15613_v44  ;;  %v15626_v17 = vld [vmem:[#allocation133_spill] sm:$0xff] }
 0x39f   : > { %6625 = vmatmul.mubr.bf16.gmra.mrb[52].mxu0 %v15569_v20  ;;  %5062 = vmatprep.mubr.bf16.mxu1 %v15570_v16  ;;  %v15629_v20 = vld [vmem:[#allocation117_spill] sm:$0xff] }
 0x3a0   : > { %8754 = vmatprep.mubr.msk.bf16.mxu0 %vm15573_vm9, %v15571_v34  ;;  %vm15619_vm9 = vnez %v15618_v51  ;;  %v15631_v16 = vld [vmem:[#allocation137_spill] sm:$0xff]  ;;  %v15632_v34 = vld [vmem:[#allocation120_spill] sm:$0xff] }
 0x3a6   : > { %8378 = vmatmul.mubr.msk.bf16.gmra.mrb[56].mxu1 %vm15576_vm7, %v15574_v10  ;;  %vm15622_vm7 = vnez %v15621_v32  ;;  %v15634_v10 = vld [vmem:[#allocation139_spill] sm:$0xff] }
 0x3a7   : > { %6635 = vmatmul.mubr.bf16.gmra.mrb[56].mxu0 %v15386_v46  ;;  %5072 = vmatprep.mubr.bf16.mxu1 %v15577_v22  ;;  %v15589_v46 = vld [vmem:[#allocation87_spill] sm:$0xff] }
 0x3a8   : > { %8758 = vmatprep.mubr.msk.bf16.mxu0 %vm15579_vm8, %v15390_v25  ;;  %vm15590_vm0 = vnez %v15589_v46  ;;  %v15593_v25 = vld [vmem:[#allocation110_spill] sm:$0xff]  ;;  %vm15627_vm8 = vnez %v15626_v17  ;;  %v15637_v22 = vld [vmem:[#allocation123_spill] sm:$0xff]  ;;  %v15649_v46 = vld [vmem:[#allocation152_spill] sm:$0xff] }
 0x3ae   : > { %8382 = vmatmul.mubr.msk.bf16.gmra.mrb[60].mxu1 %vm15582_vm13, %v15580_v33  ;;  %vm15630_vm13 = vnez %v15629_v20  ;;  %v15640_v33 = vld [vmem:[#allocation126_spill] sm:$0xff] }
 0x3af   : > { %6645 = vmatmul.mubr.bf16.gmra.mrb[60].mxu0 %v15583_v40  ;;  %5082 = vmatprep.mubr.bf16.mxu1 %v15584_v50  ;;  %v15642_v40 = vld [vmem:[#allocation145_spill] sm:$0xff]  ;;  %v15644_v50 = vld [vmem:[#allocation130_spill] sm:$0xff] }
 0x3b0   : > { %8762 = vmatprep.mubr.msk.bf16.mxu0 %vm15587_vm15, %v15585_v26  ;;  %vm15635_vm15 = vnez %v15634_v10  ;;  %v15645_v26 = vld [vmem:[#allocation129_spill] sm:$0xff] }
 0x3b6   : > { %8386 = vmatmul.mubr.msk.bf16.gmra.mrb[64].mxu1 %vm15590_vm0, %v15588_v56  ;;  %vm15638_vm0 = vnez %v15637_v22  ;;  %v15648_v56 = vld [vmem:[#allocation132_spill] sm:$0xff] }
 0x3b7   : > { %6655 = vmatmul.mubr.bf16.gmra.mrb[64].mxu0 %v15591_v9  ;;  %5092 = vmatprep.mubr.bf16.mxu1 %v15592_v37  ;;  %v15650_v9 = vld [vmem:[#allocation151_spill] sm:$0xff]  ;;  %v15652_v37 = vld [vmem:[#allocation136_spill] sm:$0xff] }
 0x3b8   : > { %8766 = vmatprep.mubr.msk.bf16.mxu0 %vm15595_vm3, %v15593_v25  ;;  %vm15643_vm3 = vnez %v15642_v40  ;;  %v15653_v25 = vld [vmem:[#allocation135_spill] sm:$0xff]  ;;  %v15675_v22 = vld [vmem:[#allocation156_spill] sm:$0xff] }
 0x3be   : > { %8390 = vmatmul.mubr.msk.bf16.gmra.mrb[68].mxu1 %vm15598_vm1, %v15596_v60  ;;  %vm15646_vm1 = vnez %v15645_v26  ;;  %v15656_v60 = vld [vmem:[#allocation138_spill] sm:$0xff] }
 0x3bf   : > { %6665 = vmatmul.mubr.bf16.gmra.mrb[68].mxu0 %v15599_v62  ;;  %5102 = vmatprep.mubr.bf16.mxu1 %v15600_v1  ;;  %v15659_v62 = vld [vmem:[#allocation141_spill] sm:$0xff]  ;;  %v15661_v1 = vld [vmem:[#allocation144_spill] sm:$0xff] }
 0x3c0   : > { %8770 = vmatprep.mubr.msk.bf16.mxu0 %vm15603_vm2, %v15601_v57  ;;  %vm15651_vm2 = vnez %v15650_v9  ;;  %v15662_v57 = vld [vmem:[#allocation163_spill] sm:$0xff] }
 0x3c6   : > { %8394 = vmatmul.mubr.msk.bf16.gmra.mrb[72].mxu1 %vm15606_vm11, %v15604_v54  ;;  %vm15654_vm11 = vnez %v15653_v25  ;;  %v15664_v54 = vld [vmem:[#allocation148_spill] sm:$0xff] }
 0x3c7   : > { %6675 = vmatmul.mubr.bf16.gmra.mrb[72].mxu0 %v15607_v36  ;;  %5112 = vmatprep.mubr.bf16.mxu1 %v15608_v11  ;;  %v15668_v36 = vld [vmem:[#allocation170_spill] sm:$0xff]  ;;  %v15669_v11 = vld [vmem:[#allocation169_spill] sm:$0xff] }
 0x3c8   : > { %8774 = vmatprep.mubr.msk.bf16.mxu0 %vm15611_vm14, %v15609_v58  ;;  %vm15657_vm14 = vnez %v15470_v30  ;;  %v6943_v30 = vld [vmem:[%s14269_s2] sm:$0x3] }
 0x3c9   : > { %v13658_v38 = vrot.slane %v6943_v30, %v6947_v42 }
 0x3ce   : > { %8398 = vmatmul.mubr.msk.bf16.gmra.mrb[76].mxu1 %vm15614_vm5, %v15612_v21  ;;  %vm15660_vm5 = vnez %v15659_v62 }
 0x3cf   : > { %6685 = vmatmul.mubr.bf16.gmra.mrb[76].mxu0 %v15615_v3  ;;  %5122 = vmatprep.mubr.bf16.mxu1 %v15616_v5 }
 0x3d0   : > { %8778 = vmatprep.mubr.msk.bf16.mxu0 %vm15619_vm9, %v15617_v39  ;;  %vm15663_vm9 = vnez %v15662_v57 }
 0x3d6   : > { %8402 = vmatmul.mubr.msk.bf16.gmra.mrb[80].mxu1 %vm15622_vm7, %v15620_v12  ;;  %vm15666_vm7 = vnez %v15665_v61 }
 0x3d7   : > { %6695 = vmatmul.mubr.bf16.gmra.mrb[80].mxu0 %v15623_v15  ;;  %5132 = vmatprep.mubr.bf16.mxu1 %v15624_v29 }
 0x3d8   : > { %8782 = vmatprep.mubr.msk.bf16.mxu0 %vm15627_vm8, %v15625_v59  ;;  %vm15670_vm8 = vnez %v15669_v11 }
 0x3de   : > { %8406 = vmatmul.mubr.msk.bf16.gmra.mrb[84].mxu1 %vm15630_vm13, %v15628_v31 }
 0x3df   : > { %6705 = vmatmul.mubr.bf16.gmra.mrb[84].mxu0 %v15631_v16  ;;  %5142 = vmatprep.mubr.bf16.mxu1 %v15632_v34  ;;  %v15671_v16 = vld [vmem:[#allocation154_spill] sm:$0xff]  ;;  %v15672_v34 = vld [vmem:[#allocation153_spill] sm:$0xff] }
 0x3e0   : > { %8786 = vmatprep.mubr.msk.bf16.mxu0 %vm15635_vm15, %v15633_v35  ;;  %vm15673_vm13 = vnez %v15672_v34 }
 0x3e6   : > { %8410 = vmatmul.mubr.msk.bf16.gmra.mrb[88].mxu1 %vm15638_vm0, %v15636_v52  ;;  %v15674_v52 = vld [vmem:[#allocation173_spill] sm:$0xff] }
 0x3e7   : > { %6715 = vmatmul.mubr.bf16.gmra.mrb[88].mxu0 %v15639_v19  ;;  %5152 = vmatprep.mubr.bf16.mxu1 %v15640_v33  ;;  %v7351_v19 = vld [vmem:[%s10225_s17] sm:$0xff] }
 0x3e8   : > { %8790 = vmatprep.mubr.msk.bf16.mxu0 %vm15643_vm3, %v15641_v49 }
 0x3ee   : > { %8414 = vmatmul.mubr.msk.bf16.gmra.mrb[92].mxu1 %vm15646_vm1, %v15644_v50  ;;  %v7352_v50 = vld [vmem:[%s10225_s17 + $0x8] sm:$0xff] }
 0x3ef   : > { %6725 = vmatmul.mubr.bf16.gmra.mrb[92].mxu0 %v15647_v55  ;;  %5162 = vmatprep.mubr.bf16.mxu1 %v15648_v56 }
 0x3f0   : > { %8794 = vmatprep.mubr.msk.bf16.mxu0 %vm15651_vm2, %v15649_v46  ;;  %v7353_v46 = vld [vmem:[%s10225_s17 + $0x10] sm:$0xff] }
 0x3f6   : > { %8418 = vmatmul.mubr.msk.bf16.gmra.mrb[96].mxu1 %vm15654_vm11, %v15652_v37 }
 0x3f7   : > { %6735 = vmatmul.mubr.bf16.gmra.mrb[96].mxu0 %v15655_v7  ;;  %5172 = vmatprep.mubr.bf16.mxu1 %v15656_v60 }
 0x3f8   : > { %8798 = vmatprep.mubr.msk.bf16.mxu0 %vm15657_vm14, %v15469_v4  ;;  %v6951_v4 = vsub.s32 1, %v14989_v24 }
 0x3fa   : > { %v13660_v3 = vrot.slane %v6943_v30, %v6951_v4 }
 0x3fe   : > { %8422 = vmatmul.mubr.msk.bf16.gmra.mrb[100].mxu1 %vm15660_vm5, %v15658_v18  ;;  %v7354_v18 = vld [vmem:[%s10225_s17 + $0x18] sm:$0xff] }
 0x3ff   : > { %6745 = vmatmul.mubr.bf16.gmra.mrb[100].mxu0 %v15473_v2  ;;  %5182 = vmatprep.mubr.bf16.mxu1 %v15661_v1  ;;  %v15667_v2 = vld [vmem:[#allocation150_spill] sm:$0xff] }
 0x400   : > { %8802 = vmatprep.mubr.msk.bf16.mxu0 %vm15663_vm9, %v15477_v6  ;;  %v7083_v6 = vld [vmem:[%s14270_s3] sm:$0x3] }
 0x401   : > { %v13662_v5 = vrot.slane %v7083_v6, %v6947_v42  ;;  %v13664_v12 = vrot.slane %v7083_v6, %v6951_v4 }
 0x406   : > { %8426 = vmatmul.mubr.msk.bf16.gmra.mrb[104].mxu1 %vm15666_vm7, %v15664_v54 }
 0x407   : > { %6755 = vmatmul.mubr.bf16.gmra.mrb[104].mxu0 %v15481_v47  ;;  %5192 = vmatprep.mubr.bf16.mxu1 %v15667_v2 }
 0x408   : > { %8806 = vmatprep.mubr.msk.bf16.mxu0 %vm15670_vm8, %v15668_v36 }
 0x409   : > { %v4924_v58 = vpop.f32.mrb[0].mxu1 }
 0x40a   : > { %v6496_v21 = vpop.f32.mrb[0].mxu0  ;;  %v4926_v44 = vpop.f32.mrb[1].mxu1 }
 0x40b   : > { %v8819_v24 = vadd.f32 %v6496_v21, %v4924_v58  ;;  %v6498_v47 = vpop.f32.mrb[1].mxu0  ;;  %v4928_v39 = vpop.f32.mrb[2].mxu1  ;;  %v15676_v21 = vld [vmem:[#allocation160_spill] sm:$0xff] }
 0x40c   : > { %v8820_v51 = vadd.f32 %v6498_v47, %v4926_v44  ;;  %v6500_v32 = vpop.f32.mrb[2].mxu0  ;;  %v4930_v15 = vpop.f32.mrb[3].mxu1  ;;  %v15677_v44 = vld [vmem:[#allocation159_spill] sm:$0xff] }
 0x40d   : > { %v6955_v29 = vmul.f32 %v8819_v24, %v13658_v38  ;;  %v8821_v59 = vadd.f32 %v6500_v32, %v4928_v39  ;;  %v6502_v17 = vpop.f32.mrb[3].mxu0  ;;  %v15679_v39 = vld [vmem:[#allocation162_spill] sm:$0xff] }
 0x40e   : > { %v6956_v31 = vmul.f32 %v8820_v51, %v13660_v3  ;;  %v8822_v20 = vadd.f32 %v6502_v17, %v4930_v15  ;;  %8430 = vmatmul.mubr.msk.bf16.gmra.mrb[108].mxu1 %vm15673_vm13, %v15671_v16  ;;  %v7355_v51 = vld [vmem:[%s10225_s17 + $0x20] sm:$0xff] }
 0x40f   : > { %v7095_v35 = vadd.f32 %v13662_v5, %v6955_v29  ;;  %v6957_v10 = vmul.f32 %v8821_v59, %v13658_v38  ;;  %6765 = vmatmul.mubr.bf16.gmra.mrb[108].mxu0 %v15674_v52  ;;  %5202 = vmatprep.mubr.bf16.mxu1 %v15675_v22  ;;  %v7356_v59 = vld [vmem:[%s10225_s17 + $0x28] sm:$0xff]  ;;  %v7358_v22 = vld [vmem:[%s10225_s17 + $0x38] sm:$0xff] }
 0x410   : > { %v7096_v33 = vadd.f32 %v13664_v12, %v6956_v31  ;;  %v6958_v49 = vmul.f32 %v8822_v20, %v13660_v3  ;;  %8810 = vmatprep.mubr.msk.bf16.mxu0 %vm15490_vm6, %v13062_v8  ;;  %vm15678_vm6 = vnez %v15677_v44  ;;  %v7362_v44 = vld [vmem:[%s10225_s17 + $0x58] sm:$0xff] }
 0x411   : > { %v7223_v40 = vmax.f32 %v7095_v35, 0.0  ;;  %v7097_v26 = vadd.f32 %v13662_v5, %v6957_v10  ;;  %v4934_v55 = vpop.f32.mrb[4].mxu1 }
 0x412   : > { %v7224_v56 = vmax.f32 %v7096_v33, 0.0  ;;  %v7098_v9 = vadd.f32 %v13664_v12, %v6958_v49  ;;  %v6506_v37 = vpop.f32.mrb[4].mxu0  ;;  %v4936_v25 = vpop.f32.mrb[5].mxu1 }
 0x413   : > { %v7479_v7 = vadd.f32 %v7351_v19, %v7223_v40  ;;  %v7225_v60 = vmax.f32 %v7097_v26, 0.0  ;;  %v8823_v62 = vadd.f32 %v6506_v37, %v4934_v55  ;;  %v6508_v1 = vpop.f32.mrb[5].mxu0  ;;  %v4938_v57 = vpop.f32.mrb[6].mxu1 }
 0x414   : > { %v7480_v53 = vadd.f32 %v7352_v50, %v7224_v56  ;;  %v7226_v8 = vmax.f32 %v7098_v9, 0.0  ;;  %v8824_v42 = vadd.f32 %v6508_v1, %v4936_v25  ;;  %v6510_v54 = vpop.f32.mrb[6].mxu0  ;;  %v4940_v61 = vpop.f32.mrb[7].mxu1 }
 0x415   : > { %7607 = vst [vmem:[%s13688_s29] sm:$0xff] %v7479_v7  ;;  %v7481_v30 = vadd.f32 %v7353_v46, %v7225_v60  ;;  %v6959_v4 = vmul.f32 %v8823_v62, %v13658_v38  ;;  %v8825_v2 = vadd.f32 %v6510_v54, %v4938_v57  ;;  %v6512_v6 = vpop.f32.mrb[7].mxu0  ;;  %v15680_v60 = vld [vmem:[#allocation166_spill] sm:$0xff]  ;;  %v15683_v57 = vld [vmem:[#allocation168_spill] sm:$0xff] }
 0x416   : > { %7608 = vst [vmem:[%s13688_s29 + $0x8] sm:$0xff] %v7480_v53  ;;  %v7482_v36 = vadd.f32 %v7354_v18, %v7226_v8  ;;  %v6960_v11 = vmul.f32 %v8824_v42, %v13660_v3  ;;  %v8826_v58 = vadd.f32 %v6512_v6, %v4940_v61  ;;  %8434 = vmatmul.mubr.msk.bf16.gmra.mrb[112].mxu1 %vm15678_vm6, %v15676_v21  ;;  %v15681_v18 = vld [vmem:[#allocation165_spill] sm:$0xff]  ;;  %v7359_v53 = vld [vmem:[%s10225_s17 + $0x40] sm:$0xff]  ;;  %v7360_v61 = vld [vmem:[%s10225_s17 + $0x48] sm:$0xff] }
 0x417   : > { %7609 = vst [vmem:[%s13688_s29 + $0x10] sm:$0xff] %v7481_v30  ;;  %v7099_v24 = vadd.f32 %v13662_v5, %v6959_v4  ;;  %v6961_v47 = vmul.f32 %v8825_v2, %v13658_v38  ;;  %6775 = vmatmul.mubr.bf16.gmra.mrb[112].mxu0 %v13085_v45  ;;  %5212 = vmatprep.mubr.bf16.mxu1 %v15679_v39  ;;  %v7357_v45 = vld [vmem:[%s10225_s17 + $0x30] sm:$0xff] }
 0x418   : > { %7610 = vst [vmem:[%s13688_s29 + $0x18] sm:$0xff] %v7482_v36  ;;  %v7100_v32 = vadd.f32 %v13664_v12, %v6960_v11  ;;  %v6962_v15 = vmul.f32 %v8826_v58, %v13660_v3  ;;  %8814 = vmatprep.mubr.msk.bf16.mxu0 %vm13137_vm4, %v13143_v41  ;;  %vm15682_vm4 = vnez %v15681_v18 }
 0x419   : > { %v7227_v29 = vmax.f32 %v7099_v24, 0.0  ;;  %v7101_v17 = vadd.f32 %v13662_v5, %v6961_v47  ;;  %v4944_v31 = vpop.f32.mrb[8].mxu1 }
 0x41a   : > { %v7228_v20 = vmax.f32 %v7100_v32, 0.0  ;;  %v7102_v16 = vadd.f32 %v13664_v12, %v6962_v15  ;;  %v6516_v34 = vpop.f32.mrb[8].mxu0  ;;  %v4946_v35 = vpop.f32.mrb[9].mxu1 }
 0x41b   : > { %v7483_v10 = vadd.f32 %v7355_v51, %v7227_v29  ;;  %v7229_v52 = vmax.f32 %v7101_v17, 0.0  ;;  %v8827_v19 = vadd.f32 %v6516_v34, %v4944_v31  ;;  %v6518_v33 = vpop.f32.mrb[9].mxu0  ;;  %v4948_v43 = vpop.f32.mrb[10].mxu1 }
 0x41c   : > { %v7484_v41 = vadd.f32 %v7356_v59, %v7228_v20  ;;  %v7230_v49 = vmax.f32 %v7102_v16, 0.0  ;;  %v8828_v40 = vadd.f32 %v6518_v33, %v4946_v35  ;;  %v6520_v50 = vpop.f32.mrb[10].mxu0  ;;  %v4950_v26 = vpop.f32.mrb[11].mxu1 }
 0x41d   : > { %7611 = vst [vmem:[%s13688_s29 + $0x20] sm:$0xff] %v7483_v10  ;;  %v7485_v55 = vadd.f32 %v7357_v45, %v7229_v52  ;;  %v6963_v56 = vmul.f32 %v8827_v19, %v13658_v38  ;;  %v8829_v46 = vadd.f32 %v6520_v50, %v4948_v43  ;;  %v6522_v9 = vpop.f32.mrb[11].mxu0  ;;  %v15685_v10 = vld [vmem:[#allocation174_spill] sm:$0xff] }
 0x41e   : > { %7612 = vst [vmem:[%s13688_s29 + $0x28] sm:$0xff] %v7484_v41  ;;  %v7486_v37 = vadd.f32 %v7358_v22, %v7230_v49  ;;  %v6964_v25 = vmul.f32 %v8828_v40, %v13660_v3  ;;  %v8830_v7 = vadd.f32 %v6522_v9, %v4950_v26  ;;  %8438 = vmatmul.mubr.msk.bf16.gmra.mrb[116].mxu1 %vm15682_vm4, %v15680_v60  ;;  %v7363_v52 = vld [vmem:[%s10225_s17 + $0x60] sm:$0xff]  ;;  %v7365_v49 = vld [vmem:[%s10225_s17 + $0x70] sm:$0xff] }
 0x41f   : > { %7613 = vst [vmem:[%s13688_s29 + $0x30] sm:$0xff] %v7485_v55  ;;  %v7103_v62 = vadd.f32 %v13662_v5, %v6963_v56  ;;  %v6965_v1 = vmul.f32 %v8829_v46, %v13658_v38  ;;  %6785 = vmatmul.mubr.bf16.gmra.mrb[116].mxu0 %v13148_v63  ;;  %5222 = vmatprep.mubr.bf16.mxu1 %v15683_v57  ;;  %v7361_v63 = vld [vmem:[%s10225_s17 + $0x50] sm:$0xff]  ;;  %v7366_v56 = vld [vmem:[%s10225_s17 + $0x78] sm:$0xff] }
 0x420   : > { %7614 = vst [vmem:[%s13688_s29 + $0x38] sm:$0xff] %v7486_v37  ;;  %v7104_v8 = vadd.f32 %v13664_v12, %v6964_v25  ;;  %v6966_v42 = vmul.f32 %v8830_v7, %v13660_v3  ;;  %8818 = vmatprep.mubr.msk.bf16.mxu0 %vm13414_vm10, %v13411_v13  ;;  %vm15684_vm10 = vnez %v15488_v14  ;;  %v7364_v14 = vld [vmem:[%s10225_s17 + $0x68] sm:$0xff] }
 0x421   : > { %v7231_v54 = vmax.f32 %v7103_v62, 0.0  ;;  %v7105_v30 = vadd.f32 %v13662_v5, %v6965_v1  ;;  %v4954_v4 = vpop.f32.mrb[12].mxu1 }
 0x422   : > { %v7232_v2 = vmax.f32 %v7104_v8, 0.0  ;;  %v7106_v6 = vadd.f32 %v13664_v12, %v6966_v42  ;;  %v6526_v36 = vpop.f32.mrb[12].mxu0  ;;  %v4956_v11 = vpop.f32.mrb[13].mxu1 }
 0x423   : > { %v7487_v58 = vadd.f32 %v7359_v53, %v7231_v54  ;;  %v7233_v21 = vmax.f32 %v7105_v30, 0.0  ;;  %v8831_v24 = vadd.f32 %v6526_v36, %v4954_v4  ;;  %v6528_v47 = vpop.f32.mrb[13].mxu0  ;;  %v4958_v28 = vpop.f32.mrb[14].mxu1 }
 0x424   : > { %v7488_v13 = vadd.f32 %v7360_v61, %v7232_v2  ;;  %v7234_v39 = vmax.f32 %v7106_v6, 0.0  ;;  %v8832_v51 = vadd.f32 %v6528_v47, %v4956_v11  ;;  %v6530_v32 = vpop.f32.mrb[14].mxu0  ;;  %v4960_v15 = vpop.f32.mrb[15].mxu1 }
 0x425   : > { %7615 = vst [vmem:[%s13688_s29 + $0x40] sm:$0xff] %v7487_v58  ;;  %v7489_v29 = vadd.f32 %v7361_v63, %v7233_v21  ;;  %v6967_v59 = vmul.f32 %v8831_v24, %v13658_v38  ;;  %v8833_v17 = vadd.f32 %v6530_v32, %v4958_v28  ;;  %v6532_v31 = vpop.f32.mrb[15].mxu0  ;;  %v7367_v63 = vld [vmem:[%s10225_s17 + $0x80] sm:$0xff]  ;;  %v7368_v58 = vld [vmem:[%s10225_s17 + $0x88] sm:$0xff]  ;;  %v7369_v24 = vld [vmem:[%s10225_s17 + $0x90] sm:$0xff] }
 0x426   : > { %7616 = vst [vmem:[%s13688_s29 + $0x48] sm:$0xff] %v7488_v13  ;;  %v7490_v20 = vadd.f32 %v7362_v44, %v7234_v39  ;;  %v6968_v45 = vmul.f32 %v8832_v51, %v13660_v3  ;;  %v8834_v16 = vadd.f32 %v6532_v31, %v4960_v15  ;;  %8442 = vmatmul.mubr.msk.bf16.gmra.mrb[120].mxu1 %vm15684_vm10, %v15487_v48  ;;  %v7370_v51 = vld [vmem:[%s10225_s17 + $0x98] sm:$0xff] }
 0x427   : > { %7617 = vst [vmem:[%s13688_s29 + $0x50] sm:$0xff] %v7489_v29  ;;  %v7107_v34 = vadd.f32 %v13662_v5, %v6967_v59  ;;  %v6969_v35 = vmul.f32 %v8833_v17, %v13658_v38  ;;  %6795 = vmatmul.mubr.bf16.gmra.mrb[120].mxu0 %v13428_v27  ;;  %5232 = vmatprep.mubr.bf16.mxu1 %v15685_v10 }
 0x428   : > { %7618 = vst [vmem:[%s13688_s29 + $0x58] sm:$0xff] %v7490_v20  ;;  %v7108_v22 = vadd.f32 %v13664_v12, %v6968_v45  ;;  %v6970_v19 = vmul.f32 %v8834_v16, %v13660_v3  ;;  %6804 = vmatprep.mubr.bf16.mxu0 %v15498_v23 }
 0x429   : > { %v7235_v48 = vmax.f32 %v7107_v34, 0.0  ;;  %v7109_v33 = vadd.f32 %v13662_v5, %v6969_v35  ;;  %v4964_v43 = vpop.f32.mrb[16].mxu1 }
 0x42a   : > { %v7236_v41 = vmax.f32 %v7108_v22, 0.0  ;;  %v7110_v27 = vadd.f32 %v13664_v12, %v6970_v19  ;;  %v6536_v40 = vpop.f32.mrb[16].mxu0  ;;  %v4966_v50 = vpop.f32.mrb[17].mxu1 }
 0x42b   : > { %v7491_v26 = vadd.f32 %v7363_v52, %v7235_v48  ;;  %v7237_v55 = vmax.f32 %v7109_v33, 0.0  ;;  %v8835_v46 = vadd.f32 %v6536_v40, %v4964_v43  ;;  %v6538_v9 = vpop.f32.mrb[17].mxu0  ;;  %v4968_v37 = vpop.f32.mrb[18].mxu1  ;;  %v7371_v33 = vld [vmem:[%s10225_s17 + $0xa0] sm:$0xff] }
 0x42c   : > { %v7492_v25 = vadd.f32 %v7364_v14, %v7236_v41  ;;  %v7238_v7 = vmax.f32 %v7110_v27, 0.0  ;;  %v8836_v60 = vadd.f32 %v6538_v9, %v4966_v50  ;;  %v6540_v18 = vpop.f32.mrb[18].mxu0  ;;  %v4970_v62 = vpop.f32.mrb[19].mxu1  ;;  %v7372_v27 = vld [vmem:[%s10225_s17 + $0xa8] sm:$0xff] }
 0x42d   : > { %7619 = vst [vmem:[%s13688_s29 + $0x60] sm:$0xff] %v7491_v26  ;;  %v7493_v1 = vadd.f32 %v7365_v49, %v7237_v55  ;;  %v6971_v57 = vmul.f32 %v8835_v46, %v13658_v38  ;;  %v8837_v53 = vadd.f32 %v6540_v18, %v4968_v37  ;;  %v6542_v8 = vpop.f32.mrb[19].mxu0  ;;  %v7373_v55 = vld [vmem:[%s10225_s17 + $0xb0] sm:$0xff] }
 0x42e   : > { %7620 = vst [vmem:[%s13688_s29 + $0x68] sm:$0xff] %v7492_v25  ;;  %v7494_v42 = vadd.f32 %v7366_v56, %v7238_v7  ;;  %v6972_v54 = vmul.f32 %v8836_v60, %v13660_v3  ;;  %v8838_v61 = vadd.f32 %v6542_v8, %v4970_v62  ;;  %8446 = vmatmul.mubr.msk.bf16.gmra.mrb[124].mxu1 %vm15494_vm12, %v13073_v0  ;;  %v7374_v7 = vld [vmem:[%s10225_s17 + $0xb8] sm:$0xff] }
 0x42f   : > { %7621 = vst [vmem:[%s13688_s29 + $0x70] sm:$0xff] %v7493_v1  ;;  %v7111_v4 = vadd.f32 %v13662_v5, %v6971_v57  ;;  %v6973_v2 = vmul.f32 %v8837_v53, %v13658_v38  ;;  %6805 = vmatmul.mubr.bf16.gmra.mrb[124].mxu0 %v15498_v23 }
 0x430   : > { %7622 = vst [vmem:[%s13688_s29 + $0x78] sm:$0xff] %v7494_v42  ;;  %v7112_v6 = vadd.f32 %v13664_v12, %v6972_v54  ;;  %v6974_v36 = vmul.f32 %v8838_v61, %v13660_v3 }
 0x431   : > { %v7239_v11 = vmax.f32 %v7111_v4, 0.0  ;;  %v7113_v21 = vadd.f32 %v13662_v5, %v6973_v2  ;;  %v4974_v44 = vpop.f32.mrb[20].mxu1 }
 0x432   : > { %v7240_v0 = vmax.f32 %v7112_v6, 0.0  ;;  %v7114_v47 = vadd.f32 %v13664_v12, %v6974_v36  ;;  %v6546_v28 = vpop.f32.mrb[20].mxu0  ;;  %v4976_v13 = vpop.f32.mrb[21].mxu1 }
 0x433   : > { %v7495_v23 = vadd.f32 %v7367_v63, %v7239_v11  ;;  %v7241_v39 = vmax.f32 %v7113_v21, 0.0  ;;  %v8839_v32 = vadd.f32 %v6546_v28, %v4974_v44  ;;  %v6548_v15 = vpop.f32.mrb[21].mxu0  ;;  %v4978_v29 = vpop.f32.mrb[22].mxu1 }
 0x434   : > { %v7496_v59 = vadd.f32 %v7368_v58, %v7240_v0  ;;  %v7242_v17 = vmax.f32 %v7114_v47, 0.0  ;;  %v8840_v31 = vadd.f32 %v6548_v15, %v4976_v13  ;;  %v6550_v20 = vpop.f32.mrb[22].mxu0  ;;  %v4980_v45 = vpop.f32.mrb[23].mxu1  ;;  %v7375_v58 = vld [vmem:[%s10225_s17 + $0xc0] sm:$0xff] }
 0x435   : > { %7623 = vst [vmem:[%s13688_s29 + $0x80] sm:$0xff] %v7495_v23  ;;  %v7497_v16 = vadd.f32 %v7369_v24, %v7241_v39  ;;  %v6975_v34 = vmul.f32 %v8839_v32, %v13658_v38  ;;  %v8841_v35 = vadd.f32 %v6550_v20, %v4978_v29  ;;  %v6552_v10 = vpop.f32.mrb[23].mxu0  ;;  %v7376_v24 = vld [vmem:[%s10225_s17 + $0xc8] sm:$0xff]  ;;  %v7377_v23 = vld [vmem:[%s10225_s17 + $0xd0] sm:$0xff] }
 0x436   : > { %7624 = vst [vmem:[%s13688_s29 + $0x88] sm:$0xff] %v7496_v59  ;;  %v7498_v52 = vadd.f32 %v7370_v51, %v7242_v17  ;;  %v6976_v22 = vmul.f32 %v8840_v31, %v13660_v3  ;;  %v8842_v19 = vadd.f32 %v6552_v10, %v4980_v45  ;;  %v7378_v59 = vld [vmem:[%s10225_s17 + $0xd8] sm:$0xff] }
 0x437   : > { %7625 = vst [vmem:[%s13688_s29 + $0x90] sm:$0xff] %v7497_v16  ;;  %v7115_v48 = vadd.f32 %v13662_v5, %v6975_v34  ;;  %v6977_v14 = vmul.f32 %v8841_v35, %v13658_v38 }
 0x438   : > { %7626 = vst [vmem:[%s13688_s29 + $0x98] sm:$0xff] %v7498_v52  ;;  %v7116_v43 = vadd.f32 %v13664_v12, %v6976_v22  ;;  %v6978_v41 = vmul.f32 %v8842_v19, %v13660_v3 }
 0x439   : > { %v7243_v49 = vmax.f32 %v7115_v48, 0.0  ;;  %v7117_v40 = vadd.f32 %v13662_v5, %v6977_v14  ;;  %v4984_v50 = vpop.f32.mrb[24].mxu1 }
 0x43a   : > { %v7244_v26 = vmax.f32 %v7116_v43, 0.0  ;;  %v7118_v56 = vadd.f32 %v13664_v12, %v6978_v41  ;;  %v6556_v46 = vpop.f32.mrb[24].mxu0  ;;  %v4986_v9 = vpop.f32.mrb[25].mxu1 }
 0x43b   : > { %v7499_v37 = vadd.f32 %v7371_v33, %v7243_v49  ;;  %v7245_v25 = vmax.f32 %v7117_v40, 0.0  ;;  %v8843_v60 = vadd.f32 %v6556_v46, %v4984_v50  ;;  %v6558_v18 = vpop.f32.mrb[25].mxu0  ;;  %v4988_v62 = vpop.f32.mrb[26].mxu1 }
 0x43c   : > { %v7500_v1 = vadd.f32 %v7372_v27, %v7244_v26  ;;  %v7246_v57 = vmax.f32 %v7118_v56, 0.0  ;;  %v8844_v53 = vadd.f32 %v6558_v18, %v4986_v9  ;;  %v6560_v8 = vpop.f32.mrb[26].mxu0  ;;  %v4990_v42 = vpop.f32.mrb[27].mxu1  ;;  %v7379_v27 = vld [vmem:[%s10225_s17 + $0xe0] sm:$0xff] }
 0x43d   : > { %7627 = vst [vmem:[%s13688_s29 + $0xa0] sm:$0xff] %v7499_v37  ;;  %v7501_v54 = vadd.f32 %v7373_v55, %v7245_v25  ;;  %v6979_v61 = vmul.f32 %v8843_v60, %v13658_v38  ;;  %v8845_v30 = vadd.f32 %v6560_v8, %v4988_v62  ;;  %v6562_v4 = vpop.f32.mrb[27].mxu0  ;;  %v7380_v55 = vld [vmem:[%s10225_s17 + $0xe8] sm:$0xff]  ;;  %v7381_v37 = vld [vmem:[%s10225_s17 + $0xf0] sm:$0xff] }
 0x43e   : > { %7628 = vst [vmem:[%s13688_s29 + $0xa8] sm:$0xff] %v7500_v1  ;;  %v7502_v2 = vadd.f32 %v7374_v7, %v7246_v57  ;;  %v6980_v63 = vmul.f32 %v8844_v53, %v13660_v3  ;;  %v8846_v6 = vadd.f32 %v6562_v4, %v4990_v42  ;;  %v7382_v1 = vld [vmem:[%s10225_s17 + $0xf8] sm:$0xff] }
 0x43f   : > { %7629 = vst [vmem:[%s13688_s29 + $0xb0] sm:$0xff] %v7501_v54  ;;  %v7119_v36 = vadd.f32 %v13662_v5, %v6979_v61  ;;  %v6981_v11 = vmul.f32 %v8845_v30, %v13658_v38 }
 0x440   : > { %7630 = vst [vmem:[%s13688_s29 + $0xb8] sm:$0xff] %v7502_v2  ;;  %v7120_v21 = vadd.f32 %v13664_v12, %v6980_v63  ;;  %v6982_v44 = vmul.f32 %v8846_v6, %v13660_v3 }
 0x441   : > { %v7247_v0 = vmax.f32 %v7119_v36, 0.0  ;;  %v7121_v47 = vadd.f32 %v13662_v5, %v6981_v11  ;;  %v4994_v28 = vpop.f32.mrb[28].mxu1 }
 0x442   : > { %v7248_v13 = vmax.f32 %v7120_v21, 0.0  ;;  %v7122_v39 = vadd.f32 %v13664_v12, %v6982_v44  ;;  %v6566_v51 = vpop.f32.mrb[28].mxu0  ;;  %v4996_v32 = vpop.f32.mrb[29].mxu1 }
 0x443   : > { %v7503_v15 = vadd.f32 %v7375_v58, %v7247_v0  ;;  %v7249_v29 = vmax.f32 %v7121_v47, 0.0  ;;  %v8847_v17 = vadd.f32 %v6566_v51, %v4994_v28  ;;  %v6568_v31 = vpop.f32.mrb[29].mxu0  ;;  %v4998_v20 = vpop.f32.mrb[30].mxu1 }
 0x444   : > { %v7504_v45 = vadd.f32 %v7376_v24, %v7248_v13  ;;  %v7250_v16 = vmax.f32 %v7122_v39, 0.0  ;;  %v8848_v34 = vadd.f32 %v6568_v31, %v4996_v32  ;;  %v6570_v35 = vpop.f32.mrb[30].mxu0  ;;  %v5000_v10 = vpop.f32.mrb[31].mxu1  ;;  %v7383_v24 = vld [vmem:[%s10225_s17 + $0x100] sm:$0xff] }
 0x445   : > { %7631 = vst [vmem:[%s13688_s29 + $0xc0] sm:$0xff] %v7503_v15  ;;  %v7505_v52 = vadd.f32 %v7377_v23, %v7249_v29  ;;  %v6983_v22 = vmul.f32 %v8847_v17, %v13658_v38  ;;  %v8849_v19 = vadd.f32 %v6570_v35, %v4998_v20  ;;  %v6572_v48 = vpop.f32.mrb[31].mxu0  ;;  %v7384_v23 = vld [vmem:[%s10225_s17 + $0x108] sm:$0xff]  ;;  %v7385_v15 = vld [vmem:[%s10225_s17 + $0x110] sm:$0xff] }
 0x446   : > { %7632 = vst [vmem:[%s13688_s29 + $0xc8] sm:$0xff] %v7504_v45  ;;  %v7506_v14 = vadd.f32 %v7378_v59, %v7250_v16  ;;  %v6984_v33 = vmul.f32 %v8848_v34, %v13660_v3  ;;  %v8850_v43 = vadd.f32 %v6572_v48, %v5000_v10  ;;  %v7386_v45 = vld [vmem:[%s10225_s17 + $0x118] sm:$0xff] }
 0x447   : > { %7633 = vst [vmem:[%s13688_s29 + $0xd0] sm:$0xff] %v7505_v52  ;;  %v7123_v41 = vadd.f32 %v13662_v5, %v6983_v22  ;;  %v6985_v49 = vmul.f32 %v8849_v19, %v13658_v38 }
 0x448   : > { %7634 = vst [vmem:[%s13688_s29 + $0xd8] sm:$0xff] %v7506_v14  ;;  %v7124_v40 = vadd.f32 %v13664_v12, %v6984_v33  ;;  %v6986_v50 = vmul.f32 %v8850_v43, %v13660_v3 }
 0x449   : > { %v7251_v26 = vmax.f32 %v7123_v41, 0.0  ;;  %v7125_v56 = vadd.f32 %v13662_v5, %v6985_v49  ;;  %v5004_v46 = vpop.f32.mrb[32].mxu1 }
 0x44a   : > { %v7252_v9 = vmax.f32 %v7124_v40, 0.0  ;;  %v7126_v25 = vadd.f32 %v13664_v12, %v6986_v50  ;;  %v6576_v7 = vpop.f32.mrb[32].mxu0  ;;  %v5006_v60 = vpop.f32.mrb[33].mxu1 }
 0x44b   : > { %v7507_v18 = vadd.f32 %v7379_v27, %v7251_v26  ;;  %v7253_v62 = vmax.f32 %v7125_v56, 0.0  ;;  %v8851_v57 = vadd.f32 %v6576_v7, %v5004_v46  ;;  %v6578_v53 = vpop.f32.mrb[33].mxu0  ;;  %v5008_v8 = vpop.f32.mrb[34].mxu1 }
 0x44c   : > { %v7508_v42 = vadd.f32 %v7380_v55, %v7252_v9  ;;  %v7254_v54 = vmax.f32 %v7126_v25, 0.0  ;;  %v8852_v61 = vadd.f32 %v6578_v53, %v5006_v60  ;;  %v6580_v30 = vpop.f32.mrb[34].mxu0  ;;  %v5010_v4 = vpop.f32.mrb[35].mxu1  ;;  %v7387_v55 = vld [vmem:[%s10225_s17 + $0x120] sm:$0xff] }
 0x44d   : > { %7635 = vst [vmem:[%s13688_s29 + $0xe0] sm:$0xff] %v7507_v18  ;;  %v7509_v2 = vadd.f32 %v7381_v37, %v7253_v62  ;;  %v6987_v63 = vmul.f32 %v8851_v57, %v13658_v38  ;;  %v8853_v6 = vadd.f32 %v6580_v30, %v5008_v8  ;;  %v6582_v36 = vpop.f32.mrb[35].mxu0  ;;  %v7388_v37 = vld [vmem:[%s10225_s17 + $0x128] sm:$0xff]  ;;  %v7389_v18 = vld [vmem:[%s10225_s17 + $0x130] sm:$0xff] }
 0x44e   : > { %7636 = vst [vmem:[%s13688_s29 + $0xe8] sm:$0xff] %v7508_v42  ;;  %v7510_v11 = vadd.f32 %v7382_v1, %v7254_v54  ;;  %v6988_v58 = vmul.f32 %v8852_v61, %v13660_v3  ;;  %v8854_v21 = vadd.f32 %v6582_v36, %v5010_v4  ;;  %v7390_v42 = vld [vmem:[%s10225_s17 + $0x138] sm:$0xff] }
 0x44f   : > { %7637 = vst [vmem:[%s13688_s29 + $0xf0] sm:$0xff] %v7509_v2  ;;  %v7127_v44 = vadd.f32 %v13662_v5, %v6987_v63  ;;  %v6989_v0 = vmul.f32 %v8853_v6, %v13658_v38 }
 0x450   : > { %7638 = vst [vmem:[%s13688_s29 + $0xf8] sm:$0xff] %v7510_v11  ;;  %v7128_v47 = vadd.f32 %v13664_v12, %v6988_v58  ;;  %v6990_v28 = vmul.f32 %v8854_v21, %v13660_v3 }
 0x451   : > { %v7255_v13 = vmax.f32 %v7127_v44, 0.0  ;;  %v7129_v39 = vadd.f32 %v13662_v5, %v6989_v0  ;;  %v5014_v51 = vpop.f32.mrb[36].mxu1 }
 0x452   : > { %v7256_v32 = vmax.f32 %v7128_v47, 0.0  ;;  %v7130_v29 = vadd.f32 %v13664_v12, %v6990_v28  ;;  %v6586_v59 = vpop.f32.mrb[36].mxu0  ;;  %v5016_v17 = vpop.f32.mrb[37].mxu1 }
 0x453   : > { %v7511_v31 = vadd.f32 %v7383_v24, %v7255_v13  ;;  %v7257_v20 = vmax.f32 %v7129_v39, 0.0  ;;  %v8855_v16 = vadd.f32 %v6586_v59, %v5014_v51  ;;  %v6588_v34 = vpop.f32.mrb[37].mxu0  ;;  %v5018_v35 = vpop.f32.mrb[38].mxu1 }
 0x454   : > { %v7512_v10 = vadd.f32 %v7384_v23, %v7256_v32  ;;  %v7258_v52 = vmax.f32 %v7130_v29, 0.0  ;;  %v8856_v22 = vadd.f32 %v6588_v34, %v5016_v17  ;;  %v6590_v19 = vpop.f32.mrb[38].mxu0  ;;  %v5020_v48 = vpop.f32.mrb[39].mxu1  ;;  %v7391_v23 = vld [vmem:[%s10225_s17 + $0x140] sm:$0xff] }
 0x455   : > { %7639 = vst [vmem:[%s13688_s29 + $0x100] sm:$0xff] %v7511_v31  ;;  %v7513_v14 = vadd.f32 %v7385_v15, %v7257_v20  ;;  %v6991_v33 = vmul.f32 %v8855_v16, %v13658_v38  ;;  %v8857_v43 = vadd.f32 %v6590_v19, %v5018_v35  ;;  %v6592_v41 = vpop.f32.mrb[39].mxu0  ;;  %v7392_v15 = vld [vmem:[%s10225_s17 + $0x148] sm:$0xff]  ;;  %v7393_v31 = vld [vmem:[%s10225_s17 + $0x150] sm:$0xff] }
 0x456   : > { %7640 = vst [vmem:[%s13688_s29 + $0x108] sm:$0xff] %v7512_v10  ;;  %v7514_v49 = vadd.f32 %v7386_v45, %v7258_v52  ;;  %v6992_v27 = vmul.f32 %v8856_v22, %v13660_v3  ;;  %v8858_v40 = vadd.f32 %v6592_v41, %v5020_v48  ;;  %v7394_v10 = vld [vmem:[%s10225_s17 + $0x158] sm:$0xff] }
 0x457   : > { %7641 = vst [vmem:[%s13688_s29 + $0x110] sm:$0xff] %v7513_v14  ;;  %v7131_v50 = vadd.f32 %v13662_v5, %v6991_v33  ;;  %v6993_v26 = vmul.f32 %v8857_v43, %v13658_v38 }
 0x458   : > { %7642 = vst [vmem:[%s13688_s29 + $0x118] sm:$0xff] %v7514_v49  ;;  %v7132_v56 = vadd.f32 %v13664_v12, %v6992_v27  ;;  %v6994_v46 = vmul.f32 %v8858_v40, %v13660_v3 }
 0x459   : > { %v7259_v9 = vmax.f32 %v7131_v50, 0.0  ;;  %v7133_v25 = vadd.f32 %v13662_v5, %v6993_v26  ;;  %v5024_v7 = vpop.f32.mrb[40].mxu1 }
 0x45a   : > { %v7260_v60 = vmax.f32 %v7132_v56, 0.0  ;;  %v7134_v62 = vadd.f32 %v13664_v12, %v6994_v46  ;;  %v6596_v1 = vpop.f32.mrb[40].mxu0  ;;  %v5026_v57 = vpop.f32.mrb[41].mxu1 }
 0x45b   : > { %v7515_v53 = vadd.f32 %v7387_v55, %v7259_v9  ;;  %v7261_v8 = vmax.f32 %v7133_v25, 0.0  ;;  %v8859_v54 = vadd.f32 %v6596_v1, %v5024_v7  ;;  %v6598_v61 = vpop.f32.mrb[41].mxu0  ;;  %v5028_v30 = vpop.f32.mrb[42].mxu1 }
 0x45c   : > { %v7516_v4 = vadd.f32 %v7388_v37, %v7260_v60  ;;  %v7262_v2 = vmax.f32 %v7134_v62, 0.0  ;;  %v8860_v63 = vadd.f32 %v6598_v61, %v5026_v57  ;;  %v6600_v6 = vpop.f32.mrb[42].mxu0  ;;  %v5030_v36 = vpop.f32.mrb[43].mxu1  ;;  %v7395_v37 = vld [vmem:[%s10225_s17 + $0x160] sm:$0xff] }
 0x45d   : > { %7643 = vst [vmem:[%s13688_s29 + $0x120] sm:$0xff] %v7515_v53  ;;  %v7517_v11 = vadd.f32 %v7389_v18, %v7261_v8  ;;  %v6995_v58 = vmul.f32 %v8859_v54, %v13658_v38  ;;  %v8861_v21 = vadd.f32 %v6600_v6, %v5028_v30  ;;  %v6602_v44 = vpop.f32.mrb[43].mxu0  ;;  %v7396_v18 = vld [vmem:[%s10225_s17 + $0x168] sm:$0xff]  ;;  %v7397_v53 = vld [vmem:[%s10225_s17 + $0x170] sm:$0xff] }
 0x45e   : > { %7644 = vst [vmem:[%s13688_s29 + $0x128] sm:$0xff] %v7516_v4  ;;  %v7518_v0 = vadd.f32 %v7390_v42, %v7262_v2  ;;  %v6996_v24 = vmul.f32 %v8860_v63, %v13660_v3  ;;  %v8862_v47 = vadd.f32 %v6602_v44, %v5030_v36  ;;  %v7398_v4 = vld [vmem:[%s10225_s17 + $0x178] sm:$0xff] }
 0x45f   : > { %7645 = vst [vmem:[%s13688_s29 + $0x130] sm:$0xff] %v7517_v11  ;;  %v7135_v28 = vadd.f32 %v13662_v5, %v6995_v58  ;;  %v6997_v13 = vmul.f32 %v8861_v21, %v13658_v38 }
 0x460   : > { %7646 = vst [vmem:[%s13688_s29 + $0x138] sm:$0xff] %v7518_v0  ;;  %v7136_v39 = vadd.f32 %v13664_v12, %v6996_v24  ;;  %v6998_v51 = vmul.f32 %v8862_v47, %v13660_v3 }
 0x461   : > { %v7263_v32 = vmax.f32 %v7135_v28, 0.0  ;;  %v7137_v29 = vadd.f32 %v13662_v5, %v6997_v13  ;;  %v5034_v59 = vpop.f32.mrb[44].mxu1 }
 0x462   : > { %v7264_v17 = vmax.f32 %v7136_v39, 0.0  ;;  %v7138_v20 = vadd.f32 %v13664_v12, %v6998_v51  ;;  %v6606_v45 = vpop.f32.mrb[44].mxu0  ;;  %v5036_v16 = vpop.f32.mrb[45].mxu1 }
 0x463   : > { %v7519_v34 = vadd.f32 %v7391_v23, %v7263_v32  ;;  %v7265_v35 = vmax.f32 %v7137_v29, 0.0  ;;  %v8863_v52 = vadd.f32 %v6606_v45, %v5034_v59  ;;  %v6608_v22 = vpop.f32.mrb[45].mxu0  ;;  %v5038_v19 = vpop.f32.mrb[46].mxu1 }
 0x464   : > { %v7520_v48 = vadd.f32 %v7392_v15, %v7264_v17  ;;  %v7266_v14 = vmax.f32 %v7138_v20, 0.0  ;;  %v8864_v33 = vadd.f32 %v6608_v22, %v5036_v16  ;;  %v6610_v43 = vpop.f32.mrb[46].mxu0  ;;  %v5040_v41 = vpop.f32.mrb[47].mxu1  ;;  %v7399_v15 = vld [vmem:[%s10225_s17 + $0x180] sm:$0xff] }
 0x465   : > { %7647 = vst [vmem:[%s13688_s29 + $0x140] sm:$0xff] %v7519_v34  ;;  %v7521_v49 = vadd.f32 %v7393_v31, %v7265_v35  ;;  %v6999_v27 = vmul.f32 %v8863_v52, %v13658_v38  ;;  %v8865_v40 = vadd.f32 %v6610_v43, %v5038_v19  ;;  %v6612_v50 = vpop.f32.mrb[47].mxu0  ;;  %v7400_v31 = vld [vmem:[%s10225_s17 + $0x188] sm:$0xff]  ;;  %v7401_v34 = vld [vmem:[%s10225_s17 + $0x190] sm:$0xff] }
 0x466   : > { %7648 = vst [vmem:[%s13688_s29 + $0x148] sm:$0xff] %v7520_v48  ;;  %v7522_v26 = vadd.f32 %v7394_v10, %v7266_v14  ;;  %v7000_v55 = vmul.f32 %v8864_v33, %v13660_v3  ;;  %v8866_v56 = vadd.f32 %v6612_v50, %v5040_v41  ;;  %v7402_v48 = vld [vmem:[%s10225_s17 + $0x198] sm:$0xff] }
 0x467   : > { %7649 = vst [vmem:[%s13688_s29 + $0x150] sm:$0xff] %v7521_v49  ;;  %v7139_v46 = vadd.f32 %v13662_v5, %v6999_v27  ;;  %v7001_v9 = vmul.f32 %v8865_v40, %v13658_v38 }
 0x468   : > { %7650 = vst [vmem:[%s13688_s29 + $0x158] sm:$0xff] %v7522_v26  ;;  %v7140_v25 = vadd.f32 %v13664_v12, %v7000_v55  ;;  %v7002_v7 = vmul.f32 %v8866_v56, %v13660_v3 }
 0x469   : > { %v7267_v60 = vmax.f32 %v7139_v46, 0.0  ;;  %v7141_v62 = vadd.f32 %v13662_v5, %v7001_v9  ;;  %v5044_v1 = vpop.f32.mrb[48].mxu1 }
 0x46a   : > { %v7268_v57 = vmax.f32 %v7140_v25, 0.0  ;;  %v7142_v8 = vadd.f32 %v13664_v12, %v7002_v7  ;;  %v6616_v42 = vpop.f32.mrb[48].mxu0  ;;  %v5046_v54 = vpop.f32.mrb[49].mxu1 }
 0x46b   : > { %v7523_v61 = vadd.f32 %v7395_v37, %v7267_v60  ;;  %v7269_v30 = vmax.f32 %v7141_v62, 0.0  ;;  %v8867_v2 = vadd.f32 %v6616_v42, %v5044_v1  ;;  %v6618_v63 = vpop.f32.mrb[49].mxu0  ;;  %v5048_v6 = vpop.f32.mrb[50].mxu1 }
 0x46c   : > { %v7524_v36 = vadd.f32 %v7396_v18, %v7268_v57  ;;  %v7270_v11 = vmax.f32 %v7142_v8, 0.0  ;;  %v8868_v58 = vadd.f32 %v6618_v63, %v5046_v54  ;;  %v6620_v21 = vpop.f32.mrb[50].mxu0  ;;  %v5050_v44 = vpop.f32.mrb[51].mxu1  ;;  %v7403_v18 = vld [vmem:[%s10225_s17 + $0x1a0] sm:$0xff] }
 0x46d   : > { %7651 = vst [vmem:[%s13688_s29 + $0x160] sm:$0xff] %v7523_v61  ;;  %v7525_v0 = vadd.f32 %v7397_v53, %v7269_v30  ;;  %v7003_v24 = vmul.f32 %v8867_v2, %v13658_v38  ;;  %v8869_v47 = vadd.f32 %v6620_v21, %v5048_v6  ;;  %v6622_v28 = vpop.f32.mrb[51].mxu0  ;;  %v7404_v53 = vld [vmem:[%s10225_s17 + $0x1a8] sm:$0xff]  ;;  %v7405_v61 = vld [vmem:[%s10225_s17 + $0x1b0] sm:$0xff] }
 0x46e   : > { %7652 = vst [vmem:[%s13688_s29 + $0x168] sm:$0xff] %v7524_v36  ;;  %v7526_v13 = vadd.f32 %v7398_v4, %v7270_v11  ;;  %v7004_v23 = vmul.f32 %v8868_v58, %v13660_v3  ;;  %v8870_v39 = vadd.f32 %v6622_v28, %v5050_v44  ;;  %v7406_v36 = vld [vmem:[%s10225_s17 + $0x1b8] sm:$0xff] }
 0x46f   : > { %7653 = vst [vmem:[%s13688_s29 + $0x170] sm:$0xff] %v7525_v0  ;;  %v7143_v51 = vadd.f32 %v13662_v5, %v7003_v24  ;;  %v7005_v32 = vmul.f32 %v8869_v47, %v13658_v38 }
 0x470   : > { %7654 = vst [vmem:[%s13688_s29 + $0x178] sm:$0xff] %v7526_v13  ;;  %v7144_v29 = vadd.f32 %v13664_v12, %v7004_v23  ;;  %v7006_v59 = vmul.f32 %v8870_v39, %v13660_v3 }
 0x471   : > { %v7271_v17 = vmax.f32 %v7143_v51, 0.0  ;;  %v7145_v20 = vadd.f32 %v13662_v5, %v7005_v32  ;;  %v5054_v45 = vpop.f32.mrb[52].mxu1 }
 0x472   : > { %v7272_v16 = vmax.f32 %v7144_v29, 0.0  ;;  %v7146_v35 = vadd.f32 %v13664_v12, %v7006_v59  ;;  %v6626_v10 = vpop.f32.mrb[52].mxu0  ;;  %v5056_v52 = vpop.f32.mrb[53].mxu1 }
 0x473   : > { %v7527_v22 = vadd.f32 %v7399_v15, %v7271_v17  ;;  %v7273_v19 = vmax.f32 %v7145_v20, 0.0  ;;  %v8871_v14 = vadd.f32 %v6626_v10, %v5054_v45  ;;  %v6628_v33 = vpop.f32.mrb[53].mxu0  ;;  %v5058_v43 = vpop.f32.mrb[54].mxu1 }
 0x474   : > { %v7528_v41 = vadd.f32 %v7400_v31, %v7272_v16  ;;  %v7274_v49 = vmax.f32 %v7146_v35, 0.0  ;;  %v8872_v27 = vadd.f32 %v6628_v33, %v5056_v52  ;;  %v6630_v40 = vpop.f32.mrb[54].mxu0  ;;  %v5060_v50 = vpop.f32.mrb[55].mxu1  ;;  %v7407_v31 = vld [vmem:[%s10225_s17 + $0x1c0] sm:$0xff] }
 0x475   : > { %7655 = vst [vmem:[%s13688_s29 + $0x180] sm:$0xff] %v7527_v22  ;;  %v7529_v26 = vadd.f32 %v7401_v34, %v7273_v19  ;;  %v7007_v55 = vmul.f32 %v8871_v14, %v13658_v38  ;;  %v8873_v56 = vadd.f32 %v6630_v40, %v5058_v43  ;;  %v6632_v46 = vpop.f32.mrb[55].mxu0  ;;  %v7408_v34 = vld [vmem:[%s10225_s17 + $0x1c8] sm:$0xff]  ;;  %v7409_v22 = vld [vmem:[%s10225_s17 + $0x1d0] sm:$0xff] }
 0x476   : > { %7656 = vst [vmem:[%s13688_s29 + $0x188] sm:$0xff] %v7528_v41  ;;  %v7530_v9 = vadd.f32 %v7402_v48, %v7274_v49  ;;  %v7008_v37 = vmul.f32 %v8872_v27, %v13660_v3  ;;  %v8874_v25 = vadd.f32 %v6632_v46, %v5060_v50  ;;  %v7410_v41 = vld [vmem:[%s10225_s17 + $0x1d8] sm:$0xff] }
 0x477   : > { %7657 = vst [vmem:[%s13688_s29 + $0x190] sm:$0xff] %v7529_v26  ;;  %v7147_v7 = vadd.f32 %v13662_v5, %v7007_v55  ;;  %v7009_v60 = vmul.f32 %v8873_v56, %v13658_v38 }
 0x478   : > { %7658 = vst [vmem:[%s13688_s29 + $0x198] sm:$0xff] %v7530_v9  ;;  %v7148_v62 = vadd.f32 %v13664_v12, %v7008_v37  ;;  %v7010_v1 = vmul.f32 %v8874_v25, %v13660_v3 }
 0x479   : > { %v7275_v57 = vmax.f32 %v7147_v7, 0.0  ;;  %v7149_v8 = vadd.f32 %v13662_v5, %v7009_v60  ;;  %v5064_v42 = vpop.f32.mrb[56].mxu1 }
 0x47a   : > { %v7276_v54 = vmax.f32 %v7148_v62, 0.0  ;;  %v7150_v30 = vadd.f32 %v13664_v12, %v7010_v1  ;;  %v6636_v4 = vpop.f32.mrb[56].mxu0  ;;  %v5066_v2 = vpop.f32.mrb[57].mxu1 }
 0x47b   : > { %v7531_v63 = vadd.f32 %v7403_v18, %v7275_v57  ;;  %v7277_v6 = vmax.f32 %v7149_v8, 0.0  ;;  %v8875_v11 = vadd.f32 %v6636_v4, %v5064_v42  ;;  %v6638_v58 = vpop.f32.mrb[57].mxu0  ;;  %v5068_v21 = vpop.f32.mrb[58].mxu1 }
 0x47c   : > { %v7532_v44 = vadd.f32 %v7404_v53, %v7276_v54  ;;  %v7278_v0 = vmax.f32 %v7150_v30, 0.0  ;;  %v8876_v24 = vadd.f32 %v6638_v58, %v5066_v2  ;;  %v6640_v47 = vpop.f32.mrb[58].mxu0  ;;  %v5070_v28 = vpop.f32.mrb[59].mxu1  ;;  %v7411_v53 = vld [vmem:[%s10225_s17 + $0x1e0] sm:$0xff] }
 0x47d   : > { %7659 = vst [vmem:[%s13688_s29 + $0x1a0] sm:$0xff] %v7531_v63  ;;  %v7533_v13 = vadd.f32 %v7405_v61, %v7277_v6  ;;  %v7011_v23 = vmul.f32 %v8875_v11, %v13658_v38  ;;  %v8877_v39 = vadd.f32 %v6640_v47, %v5068_v21  ;;  %v6642_v51 = vpop.f32.mrb[59].mxu0  ;;  %v7412_v61 = vld [vmem:[%s10225_s17 + $0x1e8] sm:$0xff]  ;;  %v7413_v63 = vld [vmem:[%s10225_s17 + $0x1f0] sm:$0xff] }
 0x47e   : > { %7660 = vst [vmem:[%s13688_s29 + $0x1a8] sm:$0xff] %v7532_v44  ;;  %v7534_v32 = vadd.f32 %v7406_v36, %v7278_v0  ;;  %v7012_v15 = vmul.f32 %v8876_v24, %v13660_v3  ;;  %v8878_v29 = vadd.f32 %v6642_v51, %v5070_v28  ;;  %v7414_v44 = vld [vmem:[%s10225_s17 + $0x1f8] sm:$0xff] }
 0x47f   : > { %7661 = vst [vmem:[%s13688_s29 + $0x1b0] sm:$0xff] %v7533_v13  ;;  %v7151_v59 = vadd.f32 %v13662_v5, %v7011_v23  ;;  %v7013_v17 = vmul.f32 %v8877_v39, %v13658_v38 }
 0x480   : > { %7662 = vst [vmem:[%s13688_s29 + $0x1b8] sm:$0xff] %v7534_v32  ;;  %v7152_v20 = vadd.f32 %v13664_v12, %v7012_v15  ;;  %v7014_v45 = vmul.f32 %v8878_v29, %v13660_v3 }
 0x481   : > { %v7279_v16 = vmax.f32 %v7151_v59, 0.0  ;;  %v7153_v35 = vadd.f32 %v13662_v5, %v7013_v17  ;;  %v5074_v10 = vpop.f32.mrb[60].mxu1 }
 0x482   : > { %v7280_v52 = vmax.f32 %v7152_v20, 0.0  ;;  %v7154_v19 = vadd.f32 %v13664_v12, %v7014_v45  ;;  %v6646_v48 = vpop.f32.mrb[60].mxu0  ;;  %v5076_v14 = vpop.f32.mrb[61].mxu1 }
 0x483   : > { %v7535_v33 = vadd.f32 %v7407_v31, %v7279_v16  ;;  %v7281_v43 = vmax.f32 %v7153_v35, 0.0  ;;  %v8879_v49 = vadd.f32 %v6646_v48, %v5074_v10  ;;  %v6648_v27 = vpop.f32.mrb[61].mxu0  ;;  %v5078_v40 = vpop.f32.mrb[62].mxu1 }
 0x484   : > { %v7536_v50 = vadd.f32 %v7408_v34, %v7280_v52  ;;  %v7282_v26 = vmax.f32 %v7154_v19, 0.0  ;;  %v8880_v55 = vadd.f32 %v6648_v27, %v5076_v14  ;;  %v6650_v56 = vpop.f32.mrb[62].mxu0  ;;  %v5080_v46 = vpop.f32.mrb[63].mxu1  ;;  %v7415_v34 = vld [vmem:[%s10225_s17 + $0x200] sm:$0xff] }
 0x485   : > { %7663 = vst [vmem:[%s13688_s29 + $0x1c0] sm:$0xff] %v7535_v33  ;;  %v7537_v9 = vadd.f32 %v7409_v22, %v7281_v43  ;;  %v7015_v37 = vmul.f32 %v8879_v49, %v13658_v38  ;;  %v8881_v25 = vadd.f32 %v6650_v56, %v5078_v40  ;;  %v6652_v7 = vpop.f32.mrb[63].mxu0  ;;  %v7416_v22 = vld [vmem:[%s10225_s17 + $0x208] sm:$0xff]  ;;  %v7417_v33 = vld [vmem:[%s10225_s17 + $0x210] sm:$0xff] }
 0x486   : > { %7664 = vst [vmem:[%s13688_s29 + $0x1c8] sm:$0xff] %v7536_v50  ;;  %v7538_v60 = vadd.f32 %v7410_v41, %v7282_v26  ;;  %v7016_v18 = vmul.f32 %v8880_v55, %v13660_v3  ;;  %v8882_v62 = vadd.f32 %v6652_v7, %v5080_v46  ;;  %v7418_v50 = vld [vmem:[%s10225_s17 + $0x218] sm:$0xff] }
 0x487   : > { %7665 = vst [vmem:[%s13688_s29 + $0x1d0] sm:$0xff] %v7537_v9  ;;  %v7155_v1 = vadd.f32 %v13662_v5, %v7015_v37  ;;  %v7017_v57 = vmul.f32 %v8881_v25, %v13658_v38 }
 0x488   : > { %7666 = vst [vmem:[%s13688_s29 + $0x1d8] sm:$0xff] %v7538_v60  ;;  %v7156_v8 = vadd.f32 %v13664_v12, %v7016_v18  ;;  %v7018_v42 = vmul.f32 %v8882_v62, %v13660_v3 }
 0x489   : > { %v7283_v54 = vmax.f32 %v7155_v1, 0.0  ;;  %v7157_v30 = vadd.f32 %v13662_v5, %v7017_v57  ;;  %v5084_v4 = vpop.f32.mrb[64].mxu1 }
 0x48a   : > { %v7284_v2 = vmax.f32 %v7156_v8, 0.0  ;;  %v7158_v6 = vadd.f32 %v13664_v12, %v7018_v42  ;;  %v6656_v36 = vpop.f32.mrb[64].mxu0  ;;  %v5086_v11 = vpop.f32.mrb[65].mxu1 }
 0x48b   : > { %v7539_v58 = vadd.f32 %v7411_v53, %v7283_v54  ;;  %v7285_v21 = vmax.f32 %v7157_v30, 0.0  ;;  %v8883_v0 = vadd.f32 %v6656_v36, %v5084_v4  ;;  %v6658_v24 = vpop.f32.mrb[65].mxu0  ;;  %v5088_v47 = vpop.f32.mrb[66].mxu1 }
 0x48c   : > { %v7540_v28 = vadd.f32 %v7412_v61, %v7284_v2  ;;  %v7286_v13 = vmax.f32 %v7158_v6, 0.0  ;;  %v8884_v23 = vadd.f32 %v6658_v24, %v5086_v11  ;;  %v6660_v39 = vpop.f32.mrb[66].mxu0  ;;  %v5090_v51 = vpop.f32.mrb[67].mxu1  ;;  %v7419_v61 = vld [vmem:[%s10225_s17 + $0x220] sm:$0xff] }
 0x48d   : > { %7667 = vst [vmem:[%s13688_s29 + $0x1e0] sm:$0xff] %v7539_v58  ;;  %v7541_v32 = vadd.f32 %v7413_v63, %v7285_v21  ;;  %v7019_v15 = vmul.f32 %v8883_v0, %v13658_v38  ;;  %v8885_v29 = vadd.f32 %v6660_v39, %v5088_v47  ;;  %v6662_v59 = vpop.f32.mrb[67].mxu0  ;;  %v7420_v63 = vld [vmem:[%s10225_s17 + $0x228] sm:$0xff]  ;;  %v7421_v58 = vld [vmem:[%s10225_s17 + $0x230] sm:$0xff] }
 0x48e   : > { %7668 = vst [vmem:[%s13688_s29 + $0x1e8] sm:$0xff] %v7540_v28  ;;  %v7542_v17 = vadd.f32 %v7414_v44, %v7286_v13  ;;  %v7020_v31 = vmul.f32 %v8884_v23, %v13660_v3  ;;  %v8886_v20 = vadd.f32 %v6662_v59, %v5090_v51  ;;  %v7422_v28 = vld [vmem:[%s10225_s17 + $0x238] sm:$0xff] }
 0x48f   : > { %7669 = vst [vmem:[%s13688_s29 + $0x1f0] sm:$0xff] %v7541_v32  ;;  %v7159_v45 = vadd.f32 %v13662_v5, %v7019_v15  ;;  %v7021_v16 = vmul.f32 %v8885_v29, %v13658_v38 }
 0x490   : > { %7670 = vst [vmem:[%s13688_s29 + $0x1f8] sm:$0xff] %v7542_v17  ;;  %v7160_v35 = vadd.f32 %v13664_v12, %v7020_v31  ;;  %v7022_v10 = vmul.f32 %v8886_v20, %v13660_v3 }
 0x491   : > { %v7287_v52 = vmax.f32 %v7159_v45, 0.0  ;;  %v7161_v19 = vadd.f32 %v13662_v5, %v7021_v16  ;;  %v5094_v48 = vpop.f32.mrb[68].mxu1 }
 0x492   : > { %v7288_v14 = vmax.f32 %v7160_v35, 0.0  ;;  %v7162_v43 = vadd.f32 %v13664_v12, %v7022_v10  ;;  %v6666_v41 = vpop.f32.mrb[68].mxu0  ;;  %v5096_v49 = vpop.f32.mrb[69].mxu1 }
 0x493   : > { %v7543_v27 = vadd.f32 %v7415_v34, %v7287_v52  ;;  %v7289_v40 = vmax.f32 %v7161_v19, 0.0  ;;  %v8887_v26 = vadd.f32 %v6666_v41, %v5094_v48  ;;  %v6668_v55 = vpop.f32.mrb[69].mxu0  ;;  %v5098_v56 = vpop.f32.mrb[70].mxu1 }
 0x494   : > { %v7544_v46 = vadd.f32 %v7416_v22, %v7288_v14  ;;  %v7290_v9 = vmax.f32 %v7162_v43, 0.0  ;;  %v8888_v37 = vadd.f32 %v6668_v55, %v5096_v49  ;;  %v6670_v25 = vpop.f32.mrb[70].mxu0  ;;  %v5100_v7 = vpop.f32.mrb[71].mxu1  ;;  %v7423_v22 = vld [vmem:[%s10225_s17 + $0x240] sm:$0xff] }
 0x495   : > { %7671 = vst [vmem:[%s13688_s29 + $0x200] sm:$0xff] %v7543_v27  ;;  %v7545_v60 = vadd.f32 %v7417_v33, %v7289_v40  ;;  %v7023_v18 = vmul.f32 %v8887_v26, %v13658_v38  ;;  %v8889_v62 = vadd.f32 %v6670_v25, %v5098_v56  ;;  %v6672_v1 = vpop.f32.mrb[71].mxu0  ;;  %v7424_v33 = vld [vmem:[%s10225_s17 + $0x248] sm:$0xff]  ;;  %v7425_v27 = vld [vmem:[%s10225_s17 + $0x250] sm:$0xff] }
 0x496   : > { %7672 = vst [vmem:[%s13688_s29 + $0x208] sm:$0xff] %v7544_v46  ;;  %v7546_v57 = vadd.f32 %v7418_v50, %v7290_v9  ;;  %v7024_v53 = vmul.f32 %v8888_v37, %v13660_v3  ;;  %v8890_v8 = vadd.f32 %v6672_v1, %v5100_v7  ;;  %v7426_v46 = vld [vmem:[%s10225_s17 + $0x258] sm:$0xff] }
 0x497   : > { %7673 = vst [vmem:[%s13688_s29 + $0x210] sm:$0xff] %v7545_v60  ;;  %v7163_v42 = vadd.f32 %v13662_v5, %v7023_v18  ;;  %v7025_v54 = vmul.f32 %v8889_v62, %v13658_v38 }
 0x498   : > { %7674 = vst [vmem:[%s13688_s29 + $0x218] sm:$0xff] %v7546_v57  ;;  %v7164_v30 = vadd.f32 %v13664_v12, %v7024_v53  ;;  %v7026_v4 = vmul.f32 %v8890_v8, %v13660_v3 }
 0x499   : > { %v7291_v2 = vmax.f32 %v7163_v42, 0.0  ;;  %v7165_v6 = vadd.f32 %v13662_v5, %v7025_v54  ;;  %v5104_v36 = vpop.f32.mrb[72].mxu1 }
 0x49a   : > { %v7292_v11 = vmax.f32 %v7164_v30, 0.0  ;;  %v7166_v21 = vadd.f32 %v13664_v12, %v7026_v4  ;;  %v6676_v44 = vpop.f32.mrb[72].mxu0  ;;  %v5106_v0 = vpop.f32.mrb[73].mxu1 }
 0x49b   : > { %v7547_v24 = vadd.f32 %v7419_v61, %v7291_v2  ;;  %v7293_v47 = vmax.f32 %v7165_v6, 0.0  ;;  %v8891_v13 = vadd.f32 %v6676_v44, %v5104_v36  ;;  %v6678_v23 = vpop.f32.mrb[73].mxu0  ;;  %v5108_v39 = vpop.f32.mrb[74].mxu1 }
 0x49c   : > { %v7548_v51 = vadd.f32 %v7420_v63, %v7292_v11  ;;  %v7294_v32 = vmax.f32 %v7166_v21, 0.0  ;;  %v8892_v15 = vadd.f32 %v6678_v23, %v5106_v0  ;;  %v6680_v29 = vpop.f32.mrb[74].mxu0  ;;  %v5110_v59 = vpop.f32.mrb[75].mxu1  ;;  %v7427_v63 = vld [vmem:[%s10225_s17 + $0x260] sm:$0xff] }
 0x49d   : > { %7675 = vst [vmem:[%s13688_s29 + $0x220] sm:$0xff] %v7547_v24  ;;  %v7549_v17 = vadd.f32 %v7421_v58, %v7293_v47  ;;  %v7027_v31 = vmul.f32 %v8891_v13, %v13658_v38  ;;  %v8893_v20 = vadd.f32 %v6680_v29, %v5108_v39  ;;  %v6682_v45 = vpop.f32.mrb[75].mxu0  ;;  %v7428_v58 = vld [vmem:[%s10225_s17 + $0x268] sm:$0xff]  ;;  %v7429_v24 = vld [vmem:[%s10225_s17 + $0x270] sm:$0xff] }
 0x49e   : > { %7676 = vst [vmem:[%s13688_s29 + $0x228] sm:$0xff] %v7548_v51  ;;  %v7550_v16 = vadd.f32 %v7422_v28, %v7294_v32  ;;  %v7028_v34 = vmul.f32 %v8892_v15, %v13660_v3  ;;  %v8894_v35 = vadd.f32 %v6682_v45, %v5110_v59  ;;  %v7430_v51 = vld [vmem:[%s10225_s17 + $0x278] sm:$0xff] }
 0x49f   : > { %7677 = vst [vmem:[%s13688_s29 + $0x230] sm:$0xff] %v7549_v17  ;;  %v7167_v10 = vadd.f32 %v13662_v5, %v7027_v31  ;;  %v7029_v52 = vmul.f32 %v8893_v20, %v13658_v38 }
 0x4a0   : > { %7678 = vst [vmem:[%s13688_s29 + $0x238] sm:$0xff] %v7550_v16  ;;  %v7168_v19 = vadd.f32 %v13664_v12, %v7028_v34  ;;  %v7030_v48 = vmul.f32 %v8894_v35, %v13660_v3 }
 0x4a1   : > { %v7295_v14 = vmax.f32 %v7167_v10, 0.0  ;;  %v7169_v43 = vadd.f32 %v13662_v5, %v7029_v52  ;;  %v5114_v41 = vpop.f32.mrb[76].mxu1 }
 0x4a2   : > { %v7296_v49 = vmax.f32 %v7168_v19, 0.0  ;;  %v7170_v40 = vadd.f32 %v13664_v12, %v7030_v48  ;;  %v6686_v50 = vpop.f32.mrb[76].mxu0  ;;  %v5116_v26 = vpop.f32.mrb[77].mxu1 }
 0x4a3   : > { %v7551_v55 = vadd.f32 %v7423_v22, %v7295_v14  ;;  %v7297_v56 = vmax.f32 %v7169_v43, 0.0  ;;  %v8895_v9 = vadd.f32 %v6686_v50, %v5114_v41  ;;  %v6688_v37 = vpop.f32.mrb[77].mxu0  ;;  %v5118_v25 = vpop.f32.mrb[78].mxu1 }
 0x4a4   : > { %v7552_v7 = vadd.f32 %v7424_v33, %v7296_v49  ;;  %v7298_v60 = vmax.f32 %v7170_v40, 0.0  ;;  %v8896_v18 = vadd.f32 %v6688_v37, %v5116_v26  ;;  %v6690_v62 = vpop.f32.mrb[78].mxu0  ;;  %v5120_v1 = vpop.f32.mrb[79].mxu1  ;;  %v7431_v33 = vld [vmem:[%s10225_s17 + $0x280] sm:$0xff] }
 0x4a5   : > { %7679 = vst [vmem:[%s13688_s29 + $0x240] sm:$0xff] %v7551_v55  ;;  %v7553_v57 = vadd.f32 %v7425_v27, %v7297_v56  ;;  %v7031_v53 = vmul.f32 %v8895_v9, %v13658_v38  ;;  %v8897_v8 = vadd.f32 %v6690_v62, %v5118_v25  ;;  %v6692_v42 = vpop.f32.mrb[79].mxu0  ;;  %v7432_v27 = vld [vmem:[%s10225_s17 + $0x288] sm:$0xff]  ;;  %v7433_v55 = vld [vmem:[%s10225_s17 + $0x290] sm:$0xff] }
 0x4a6   : > { %7680 = vst [vmem:[%s13688_s29 + $0x248] sm:$0xff] %v7552_v7  ;;  %v7554_v54 = vadd.f32 %v7426_v46, %v7298_v60  ;;  %v7032_v61 = vmul.f32 %v8896_v18, %v13660_v3  ;;  %v8898_v30 = vadd.f32 %v6692_v42, %v5120_v1  ;;  %v7434_v7 = vld [vmem:[%s10225_s17 + $0x298] sm:$0xff] }
 0x4a7   : > { %7681 = vst [vmem:[%s13688_s29 + $0x250] sm:$0xff] %v7553_v57  ;;  %v7171_v4 = vadd.f32 %v13662_v5, %v7031_v53  ;;  %v7033_v2 = vmul.f32 %v8897_v8, %v13658_v38 }
 0x4a8   : > { %7682 = vst [vmem:[%s13688_s29 + $0x258] sm:$0xff] %v7554_v54  ;;  %v7172_v6 = vadd.f32 %v13664_v12, %v7032_v61  ;;  %v7034_v36 = vmul.f32 %v8898_v30, %v13660_v3 }
 0x4a9   : > { %v7299_v11 = vmax.f32 %v7171_v4, 0.0  ;;  %v7173_v21 = vadd.f32 %v13662_v5, %v7033_v2  ;;  %v5124_v44 = vpop.f32.mrb[80].mxu1 }
 0x4aa   : > { %v7300_v0 = vmax.f32 %v7172_v6, 0.0  ;;  %v7174_v47 = vadd.f32 %v13664_v12, %v7034_v36  ;;  %v6696_v28 = vpop.f32.mrb[80].mxu0  ;;  %v5126_v13 = vpop.f32.mrb[81].mxu1 }
 0x4ab   : > { %v7555_v23 = vadd.f32 %v7427_v63, %v7299_v11  ;;  %v7301_v39 = vmax.f32 %v7173_v21, 0.0  ;;  %v8899_v32 = vadd.f32 %v6696_v28, %v5124_v44  ;;  %v6698_v15 = vpop.f32.mrb[81].mxu0  ;;  %v5128_v29 = vpop.f32.mrb[82].mxu1 }
 0x4ac   : > { %v7556_v59 = vadd.f32 %v7428_v58, %v7300_v0  ;;  %v7302_v17 = vmax.f32 %v7174_v47, 0.0  ;;  %v8900_v31 = vadd.f32 %v6698_v15, %v5126_v13  ;;  %v6700_v20 = vpop.f32.mrb[82].mxu0  ;;  %v5130_v45 = vpop.f32.mrb[83].mxu1  ;;  %v7435_v58 = vld [vmem:[%s10225_s17 + $0x2a0] sm:$0xff] }
 0x4ad   : > { %7683 = vst [vmem:[%s13688_s29 + $0x260] sm:$0xff] %v7555_v23  ;;  %v7557_v16 = vadd.f32 %v7429_v24, %v7301_v39  ;;  %v7035_v34 = vmul.f32 %v8899_v32, %v13658_v38  ;;  %v8901_v35 = vadd.f32 %v6700_v20, %v5128_v29  ;;  %v6702_v10 = vpop.f32.mrb[83].mxu0  ;;  %v7436_v24 = vld [vmem:[%s10225_s17 + $0x2a8] sm:$0xff]  ;;  %v7437_v23 = vld [vmem:[%s10225_s17 + $0x2b0] sm:$0xff] }
 0x4ae   : > { %7684 = vst [vmem:[%s13688_s29 + $0x268] sm:$0xff] %v7556_v59  ;;  %v7558_v52 = vadd.f32 %v7430_v51, %v7302_v17  ;;  %v7036_v22 = vmul.f32 %v8900_v31, %v13660_v3  ;;  %v8902_v19 = vadd.f32 %v6702_v10, %v5130_v45  ;;  %v7438_v59 = vld [vmem:[%s10225_s17 + $0x2b8] sm:$0xff] }
 0x4af   : > { %7685 = vst [vmem:[%s13688_s29 + $0x270] sm:$0xff] %v7557_v16  ;;  %v7175_v48 = vadd.f32 %v13662_v5, %v7035_v34  ;;  %v7037_v14 = vmul.f32 %v8901_v35, %v13658_v38 }
 0x4b0   : > { %7686 = vst [vmem:[%s13688_s29 + $0x278] sm:$0xff] %v7558_v52  ;;  %v7176_v43 = vadd.f32 %v13664_v12, %v7036_v22  ;;  %v7038_v41 = vmul.f32 %v8902_v19, %v13660_v3 }
 0x4b1   : > { %v7303_v49 = vmax.f32 %v7175_v48, 0.0  ;;  %v7177_v40 = vadd.f32 %v13662_v5, %v7037_v14  ;;  %v5134_v50 = vpop.f32.mrb[84].mxu1 }
 0x4b2   : > { %v7304_v26 = vmax.f32 %v7176_v43, 0.0  ;;  %v7178_v56 = vadd.f32 %v13664_v12, %v7038_v41  ;;  %v6706_v46 = vpop.f32.mrb[84].mxu0  ;;  %v5136_v9 = vpop.f32.mrb[85].mxu1 }
 0x4b3   : > { %v7559_v37 = vadd.f32 %v7431_v33, %v7303_v49  ;;  %v7305_v25 = vmax.f32 %v7177_v40, 0.0  ;;  %v8903_v60 = vadd.f32 %v6706_v46, %v5134_v50  ;;  %v6708_v18 = vpop.f32.mrb[85].mxu0  ;;  %v5138_v62 = vpop.f32.mrb[86].mxu1 }
 0x4b4   : > { %v7560_v1 = vadd.f32 %v7432_v27, %v7304_v26  ;;  %v7306_v57 = vmax.f32 %v7178_v56, 0.0  ;;  %v8904_v53 = vadd.f32 %v6708_v18, %v5136_v9  ;;  %v6710_v8 = vpop.f32.mrb[86].mxu0  ;;  %v5140_v42 = vpop.f32.mrb[87].mxu1  ;;  %v7439_v27 = vld [vmem:[%s10225_s17 + $0x2c0] sm:$0xff] }
 0x4b5   : > { %7687 = vst [vmem:[%s13688_s29 + $0x280] sm:$0xff] %v7559_v37  ;;  %v7561_v54 = vadd.f32 %v7433_v55, %v7305_v25  ;;  %v7039_v61 = vmul.f32 %v8903_v60, %v13658_v38  ;;  %v8905_v30 = vadd.f32 %v6710_v8, %v5138_v62  ;;  %v6712_v4 = vpop.f32.mrb[87].mxu0  ;;  %v7440_v55 = vld [vmem:[%s10225_s17 + $0x2c8] sm:$0xff]  ;;  %v7441_v37 = vld [vmem:[%s10225_s17 + $0x2d0] sm:$0xff] }
 0x4b6   : > { %7688 = vst [vmem:[%s13688_s29 + $0x288] sm:$0xff] %v7560_v1  ;;  %v7562_v2 = vadd.f32 %v7434_v7, %v7306_v57  ;;  %v7040_v63 = vmul.f32 %v8904_v53, %v13660_v3  ;;  %v8906_v6 = vadd.f32 %v6712_v4, %v5140_v42  ;;  %v7442_v1 = vld [vmem:[%s10225_s17 + $0x2d8] sm:$0xff] }
 0x4b7   : > { %7689 = vst [vmem:[%s13688_s29 + $0x290] sm:$0xff] %v7561_v54  ;;  %v7179_v36 = vadd.f32 %v13662_v5, %v7039_v61  ;;  %v7041_v11 = vmul.f32 %v8905_v30, %v13658_v38 }
 0x4b8   : > { %7690 = vst [vmem:[%s13688_s29 + $0x298] sm:$0xff] %v7562_v2  ;;  %v7180_v21 = vadd.f32 %v13664_v12, %v7040_v63  ;;  %v7042_v44 = vmul.f32 %v8906_v6, %v13660_v3 }
 0x4b9   : > { %v7307_v0 = vmax.f32 %v7179_v36, 0.0  ;;  %v7181_v47 = vadd.f32 %v13662_v5, %v7041_v11  ;;  %v5144_v28 = vpop.f32.mrb[88].mxu1 }
 0x4ba   : > { %v7308_v13 = vmax.f32 %v7180_v21, 0.0  ;;  %v7182_v39 = vadd.f32 %v13664_v12, %v7042_v44  ;;  %v6716_v51 = vpop.f32.mrb[88].mxu0  ;;  %v5146_v32 = vpop.f32.mrb[89].mxu1 }
 0x4bb   : > { %v7563_v15 = vadd.f32 %v7435_v58, %v7307_v0  ;;  %v7309_v29 = vmax.f32 %v7181_v47, 0.0  ;;  %v8907_v17 = vadd.f32 %v6716_v51, %v5144_v28  ;;  %v6718_v31 = vpop.f32.mrb[89].mxu0  ;;  %v5148_v20 = vpop.f32.mrb[90].mxu1 }
 0x4bc   : > { %v7564_v45 = vadd.f32 %v7436_v24, %v7308_v13  ;;  %v7310_v16 = vmax.f32 %v7182_v39, 0.0  ;;  %v8908_v34 = vadd.f32 %v6718_v31, %v5146_v32  ;;  %v6720_v35 = vpop.f32.mrb[90].mxu0  ;;  %v5150_v10 = vpop.f32.mrb[91].mxu1  ;;  %v7443_v24 = vld [vmem:[%s10225_s17 + $0x2e0] sm:$0xff] }
 0x4bd   : > { %7691 = vst [vmem:[%s13688_s29 + $0x2a0] sm:$0xff] %v7563_v15  ;;  %v7565_v52 = vadd.f32 %v7437_v23, %v7309_v29  ;;  %v7043_v22 = vmul.f32 %v8907_v17, %v13658_v38  ;;  %v8909_v19 = vadd.f32 %v6720_v35, %v5148_v20  ;;  %v6722_v48 = vpop.f32.mrb[91].mxu0  ;;  %v7444_v23 = vld [vmem:[%s10225_s17 + $0x2e8] sm:$0xff]  ;;  %v7445_v15 = vld [vmem:[%s10225_s17 + $0x2f0] sm:$0xff] }
 0x4be   : > { %7692 = vst [vmem:[%s13688_s29 + $0x2a8] sm:$0xff] %v7564_v45  ;;  %v7566_v14 = vadd.f32 %v7438_v59, %v7310_v16  ;;  %v7044_v33 = vmul.f32 %v8908_v34, %v13660_v3  ;;  %v8910_v43 = vadd.f32 %v6722_v48, %v5150_v10  ;;  %v7446_v45 = vld [vmem:[%s10225_s17 + $0x2f8] sm:$0xff] }
 0x4bf   : > { %7693 = vst [vmem:[%s13688_s29 + $0x2b0] sm:$0xff] %v7565_v52  ;;  %v7183_v41 = vadd.f32 %v13662_v5, %v7043_v22  ;;  %v7045_v49 = vmul.f32 %v8909_v19, %v13658_v38 }
 0x4c0   : > { %7694 = vst [vmem:[%s13688_s29 + $0x2b8] sm:$0xff] %v7566_v14  ;;  %v7184_v40 = vadd.f32 %v13664_v12, %v7044_v33  ;;  %v7046_v50 = vmul.f32 %v8910_v43, %v13660_v3 }
 0x4c1   : > { %v7311_v26 = vmax.f32 %v7183_v41, 0.0  ;;  %v7185_v56 = vadd.f32 %v13662_v5, %v7045_v49  ;;  %v5154_v46 = vpop.f32.mrb[92].mxu1 }
 0x4c2   : > { %v7312_v9 = vmax.f32 %v7184_v40, 0.0  ;;  %v7186_v25 = vadd.f32 %v13664_v12, %v7046_v50  ;;  %v6726_v7 = vpop.f32.mrb[92].mxu0  ;;  %v5156_v60 = vpop.f32.mrb[93].mxu1 }
 0x4c3   : > { %v7567_v18 = vadd.f32 %v7439_v27, %v7311_v26  ;;  %v7313_v62 = vmax.f32 %v7185_v56, 0.0  ;;  %v8911_v57 = vadd.f32 %v6726_v7, %v5154_v46  ;;  %v6728_v53 = vpop.f32.mrb[93].mxu0  ;;  %v5158_v8 = vpop.f32.mrb[94].mxu1 }
 0x4c4   : > { %v7568_v42 = vadd.f32 %v7440_v55, %v7312_v9  ;;  %v7314_v54 = vmax.f32 %v7186_v25, 0.0  ;;  %v8912_v61 = vadd.f32 %v6728_v53, %v5156_v60  ;;  %v6730_v30 = vpop.f32.mrb[94].mxu0  ;;  %v5160_v4 = vpop.f32.mrb[95].mxu1  ;;  %v7447_v55 = vld [vmem:[%s10225_s17 + $0x300] sm:$0xff] }
 0x4c5   : > { %7695 = vst [vmem:[%s13688_s29 + $0x2c0] sm:$0xff] %v7567_v18  ;;  %v7569_v2 = vadd.f32 %v7441_v37, %v7313_v62  ;;  %v7047_v63 = vmul.f32 %v8911_v57, %v13658_v38  ;;  %v8913_v6 = vadd.f32 %v6730_v30, %v5158_v8  ;;  %v6732_v36 = vpop.f32.mrb[95].mxu0  ;;  %v7448_v37 = vld [vmem:[%s10225_s17 + $0x308] sm:$0xff]  ;;  %v7449_v18 = vld [vmem:[%s10225_s17 + $0x310] sm:$0xff] }
 0x4c6   : > { %7696 = vst [vmem:[%s13688_s29 + $0x2c8] sm:$0xff] %v7568_v42  ;;  %v7570_v11 = vadd.f32 %v7442_v1, %v7314_v54  ;;  %v7048_v58 = vmul.f32 %v8912_v61, %v13660_v3  ;;  %v8914_v21 = vadd.f32 %v6732_v36, %v5160_v4  ;;  %v7450_v42 = vld [vmem:[%s10225_s17 + $0x318] sm:$0xff] }
 0x4c7   : > { %7697 = vst [vmem:[%s13688_s29 + $0x2d0] sm:$0xff] %v7569_v2  ;;  %v7187_v44 = vadd.f32 %v13662_v5, %v7047_v63  ;;  %v7049_v0 = vmul.f32 %v8913_v6, %v13658_v38 }
 0x4c8   : > { %7698 = vst [vmem:[%s13688_s29 + $0x2d8] sm:$0xff] %v7570_v11  ;;  %v7188_v47 = vadd.f32 %v13664_v12, %v7048_v58  ;;  %v7050_v28 = vmul.f32 %v8914_v21, %v13660_v3 }
 0x4c9   : > { %v7315_v13 = vmax.f32 %v7187_v44, 0.0  ;;  %v7189_v39 = vadd.f32 %v13662_v5, %v7049_v0  ;;  %v5164_v51 = vpop.f32.mrb[96].mxu1 }
 0x4ca   : > { %v7316_v32 = vmax.f32 %v7188_v47, 0.0  ;;  %v7190_v29 = vadd.f32 %v13664_v12, %v7050_v28  ;;  %v6736_v59 = vpop.f32.mrb[96].mxu0  ;;  %v5166_v17 = vpop.f32.mrb[97].mxu1 }
 0x4cb   : > { %v7571_v31 = vadd.f32 %v7443_v24, %v7315_v13  ;;  %v7317_v20 = vmax.f32 %v7189_v39, 0.0  ;;  %v8915_v16 = vadd.f32 %v6736_v59, %v5164_v51  ;;  %v6738_v34 = vpop.f32.mrb[97].mxu0  ;;  %v5168_v35 = vpop.f32.mrb[98].mxu1 }
 0x4cc   : > { %v7572_v10 = vadd.f32 %v7444_v23, %v7316_v32  ;;  %v7318_v52 = vmax.f32 %v7190_v29, 0.0  ;;  %v8916_v22 = vadd.f32 %v6738_v34, %v5166_v17  ;;  %v6740_v19 = vpop.f32.mrb[98].mxu0  ;;  %v5170_v48 = vpop.f32.mrb[99].mxu1  ;;  %v7451_v23 = vld [vmem:[%s10225_s17 + $0x320] sm:$0xff] }
 0x4cd   : > { %7699 = vst [vmem:[%s13688_s29 + $0x2e0] sm:$0xff] %v7571_v31  ;;  %v7573_v14 = vadd.f32 %v7445_v15, %v7317_v20  ;;  %v7051_v33 = vmul.f32 %v8915_v16, %v13658_v38  ;;  %v8917_v43 = vadd.f32 %v6740_v19, %v5168_v35  ;;  %v6742_v41 = vpop.f32.mrb[99].mxu0  ;;  %v7452_v15 = vld [vmem:[%s10225_s17 + $0x328] sm:$0xff]  ;;  %v7453_v31 = vld [vmem:[%s10225_s17 + $0x330] sm:$0xff] }
 0x4ce   : > { %7700 = vst [vmem:[%s13688_s29 + $0x2e8] sm:$0xff] %v7572_v10  ;;  %v7574_v49 = vadd.f32 %v7446_v45, %v7318_v52  ;;  %v7052_v27 = vmul.f32 %v8916_v22, %v13660_v3  ;;  %v8918_v40 = vadd.f32 %v6742_v41, %v5170_v48  ;;  %v7454_v10 = vld [vmem:[%s10225_s17 + $0x338] sm:$0xff] }
 0x4cf   : > { %7701 = vst [vmem:[%s13688_s29 + $0x2f0] sm:$0xff] %v7573_v14  ;;  %v7191_v50 = vadd.f32 %v13662_v5, %v7051_v33  ;;  %v7053_v26 = vmul.f32 %v8917_v43, %v13658_v38 }
 0x4d0   : > { %7702 = vst [vmem:[%s13688_s29 + $0x2f8] sm:$0xff] %v7574_v49  ;;  %v7192_v56 = vadd.f32 %v13664_v12, %v7052_v27  ;;  %v7054_v46 = vmul.f32 %v8918_v40, %v13660_v3 }
 0x4d1   : > { %v7319_v9 = vmax.f32 %v7191_v50, 0.0  ;;  %v7193_v25 = vadd.f32 %v13662_v5, %v7053_v26  ;;  %v5174_v7 = vpop.f32.mrb[100].mxu1 }
 0x4d2   : > { %v7320_v60 = vmax.f32 %v7192_v56, 0.0  ;;  %v7194_v62 = vadd.f32 %v13664_v12, %v7054_v46  ;;  %v6746_v1 = vpop.f32.mrb[100].mxu0  ;;  %v5176_v57 = vpop.f32.mrb[101].mxu1 }
 0x4d3   : > { %v7575_v53 = vadd.f32 %v7447_v55, %v7319_v9  ;;  %v7321_v8 = vmax.f32 %v7193_v25, 0.0  ;;  %v8919_v54 = vadd.f32 %v6746_v1, %v5174_v7  ;;  %v6748_v61 = vpop.f32.mrb[101].mxu0  ;;  %v5178_v30 = vpop.f32.mrb[102].mxu1 }
 0x4d4   : > { %v7576_v4 = vadd.f32 %v7448_v37, %v7320_v60  ;;  %v7322_v2 = vmax.f32 %v7194_v62, 0.0  ;;  %v8920_v63 = vadd.f32 %v6748_v61, %v5176_v57  ;;  %v6750_v6 = vpop.f32.mrb[102].mxu0  ;;  %v5180_v36 = vpop.f32.mrb[103].mxu1  ;;  %v7455_v37 = vld [vmem:[%s10225_s17 + $0x340] sm:$0xff] }
 0x4d5   : > { %7703 = vst [vmem:[%s13688_s29 + $0x300] sm:$0xff] %v7575_v53  ;;  %v7577_v11 = vadd.f32 %v7449_v18, %v7321_v8  ;;  %v7055_v58 = vmul.f32 %v8919_v54, %v13658_v38  ;;  %v8921_v21 = vadd.f32 %v6750_v6, %v5178_v30  ;;  %v6752_v44 = vpop.f32.mrb[103].mxu0  ;;  %v7456_v18 = vld [vmem:[%s10225_s17 + $0x348] sm:$0xff]  ;;  %v7457_v53 = vld [vmem:[%s10225_s17 + $0x350] sm:$0xff] }
 0x4d6   : > { %7704 = vst [vmem:[%s13688_s29 + $0x308] sm:$0xff] %v7576_v4  ;;  %v7578_v0 = vadd.f32 %v7450_v42, %v7322_v2  ;;  %v7056_v24 = vmul.f32 %v8920_v63, %v13660_v3  ;;  %v8922_v47 = vadd.f32 %v6752_v44, %v5180_v36  ;;  %v7458_v4 = vld [vmem:[%s10225_s17 + $0x358] sm:$0xff] }
 0x4d7   : > { %7705 = vst [vmem:[%s13688_s29 + $0x310] sm:$0xff] %v7577_v11  ;;  %v7195_v28 = vadd.f32 %v13662_v5, %v7055_v58  ;;  %v7057_v13 = vmul.f32 %v8921_v21, %v13658_v38 }
 0x4d8   : > { %7706 = vst [vmem:[%s13688_s29 + $0x318] sm:$0xff] %v7578_v0  ;;  %v7196_v39 = vadd.f32 %v13664_v12, %v7056_v24  ;;  %v7058_v51 = vmul.f32 %v8922_v47, %v13660_v3 }
 0x4d9   : > { %v7323_v32 = vmax.f32 %v7195_v28, 0.0  ;;  %v7197_v29 = vadd.f32 %v13662_v5, %v7057_v13  ;;  %v5184_v59 = vpop.f32.mrb[104].mxu1 }
 0x4da   : > { %v7324_v17 = vmax.f32 %v7196_v39, 0.0  ;;  %v7198_v20 = vadd.f32 %v13664_v12, %v7058_v51  ;;  %v6756_v45 = vpop.f32.mrb[104].mxu0  ;;  %v5186_v16 = vpop.f32.mrb[105].mxu1 }
 0x4db   : > { %v7579_v34 = vadd.f32 %v7451_v23, %v7323_v32  ;;  %v7325_v35 = vmax.f32 %v7197_v29, 0.0  ;;  %v8923_v52 = vadd.f32 %v6756_v45, %v5184_v59  ;;  %v6758_v22 = vpop.f32.mrb[105].mxu0  ;;  %v5188_v19 = vpop.f32.mrb[106].mxu1 }
 0x4dc   : > { %v7580_v48 = vadd.f32 %v7452_v15, %v7324_v17  ;;  %v7326_v14 = vmax.f32 %v7198_v20, 0.0  ;;  %v8924_v33 = vadd.f32 %v6758_v22, %v5186_v16  ;;  %v6760_v43 = vpop.f32.mrb[106].mxu0  ;;  %v5190_v41 = vpop.f32.mrb[107].mxu1  ;;  %v7459_v15 = vld [vmem:[%s10225_s17 + $0x360] sm:$0xff] }
 0x4dd   : > { %7707 = vst [vmem:[%s13688_s29 + $0x320] sm:$0xff] %v7579_v34  ;;  %v7581_v49 = vadd.f32 %v7453_v31, %v7325_v35  ;;  %v7059_v27 = vmul.f32 %v8923_v52, %v13658_v38  ;;  %v8925_v40 = vadd.f32 %v6760_v43, %v5188_v19  ;;  %v6762_v50 = vpop.f32.mrb[107].mxu0  ;;  %v7460_v31 = vld [vmem:[%s10225_s17 + $0x368] sm:$0xff]  ;;  %v7461_v34 = vld [vmem:[%s10225_s17 + $0x370] sm:$0xff] }
 0x4de   : > { %7708 = vst [vmem:[%s13688_s29 + $0x328] sm:$0xff] %v7580_v48  ;;  %v7582_v26 = vadd.f32 %v7454_v10, %v7326_v14  ;;  %v7060_v55 = vmul.f32 %v8924_v33, %v13660_v3  ;;  %v8926_v56 = vadd.f32 %v6762_v50, %v5190_v41  ;;  %v7462_v48 = vld [vmem:[%s10225_s17 + $0x378] sm:$0xff] }
 0x4df   : > { %7709 = vst [vmem:[%s13688_s29 + $0x330] sm:$0xff] %v7581_v49  ;;  %v7199_v46 = vadd.f32 %v13662_v5, %v7059_v27  ;;  %v7061_v9 = vmul.f32 %v8925_v40, %v13658_v38 }
 0x4e0   : > { %7710 = vst [vmem:[%s13688_s29 + $0x338] sm:$0xff] %v7582_v26  ;;  %v7200_v25 = vadd.f32 %v13664_v12, %v7060_v55  ;;  %v7062_v7 = vmul.f32 %v8926_v56, %v13660_v3 }
 0x4e1   : > { %v7327_v60 = vmax.f32 %v7199_v46, 0.0  ;;  %v7201_v62 = vadd.f32 %v13662_v5, %v7061_v9  ;;  %v5194_v1 = vpop.f32.mrb[108].mxu1 }
 0x4e2   : > { %v7328_v57 = vmax.f32 %v7200_v25, 0.0  ;;  %v7202_v8 = vadd.f32 %v13664_v12, %v7062_v7  ;;  %v6766_v42 = vpop.f32.mrb[108].mxu0  ;;  %v5196_v54 = vpop.f32.mrb[109].mxu1 }
 0x4e3   : > { %v7583_v61 = vadd.f32 %v7455_v37, %v7327_v60  ;;  %v7329_v30 = vmax.f32 %v7201_v62, 0.0  ;;  %v8927_v2 = vadd.f32 %v6766_v42, %v5194_v1  ;;  %v6768_v63 = vpop.f32.mrb[109].mxu0  ;;  %v5198_v6 = vpop.f32.mrb[110].mxu1 }
 0x4e4   : > { %v7584_v36 = vadd.f32 %v7456_v18, %v7328_v57  ;;  %v7330_v11 = vmax.f32 %v7202_v8, 0.0  ;;  %v8928_v58 = vadd.f32 %v6768_v63, %v5196_v54  ;;  %v6770_v21 = vpop.f32.mrb[110].mxu0  ;;  %v5200_v44 = vpop.f32.mrb[111].mxu1  ;;  %v7463_v18 = vld [vmem:[%s10225_s17 + $0x380] sm:$0xff] }
 0x4e5   : > { %7711 = vst [vmem:[%s13688_s29 + $0x340] sm:$0xff] %v7583_v61  ;;  %v7585_v0 = vadd.f32 %v7457_v53, %v7329_v30  ;;  %v7063_v24 = vmul.f32 %v8927_v2, %v13658_v38  ;;  %v8929_v47 = vadd.f32 %v6770_v21, %v5198_v6  ;;  %v6772_v28 = vpop.f32.mrb[111].mxu0  ;;  %v7464_v53 = vld [vmem:[%s10225_s17 + $0x388] sm:$0xff]  ;;  %v7465_v61 = vld [vmem:[%s10225_s17 + $0x390] sm:$0xff] }
 0x4e6   : > { %7712 = vst [vmem:[%s13688_s29 + $0x348] sm:$0xff] %v7584_v36  ;;  %v7586_v13 = vadd.f32 %v7458_v4, %v7330_v11  ;;  %v7064_v23 = vmul.f32 %v8928_v58, %v13660_v3  ;;  %v8930_v39 = vadd.f32 %v6772_v28, %v5200_v44  ;;  %v7466_v36 = vld [vmem:[%s10225_s17 + $0x398] sm:$0xff] }
 0x4e7   : > { %7713 = vst [vmem:[%s13688_s29 + $0x350] sm:$0xff] %v7585_v0  ;;  %v7203_v51 = vadd.f32 %v13662_v5, %v7063_v24  ;;  %v7065_v32 = vmul.f32 %v8929_v47, %v13658_v38 }
 0x4e8   : > { %7714 = vst [vmem:[%s13688_s29 + $0x358] sm:$0xff] %v7586_v13  ;;  %v7204_v29 = vadd.f32 %v13664_v12, %v7064_v23  ;;  %v7066_v59 = vmul.f32 %v8930_v39, %v13660_v3 }
 0x4e9   : > { %v7331_v17 = vmax.f32 %v7203_v51, 0.0  ;;  %v7205_v20 = vadd.f32 %v13662_v5, %v7065_v32  ;;  %v5204_v45 = vpop.f32.mrb[112].mxu1 }
 0x4ea   : > { %v7332_v16 = vmax.f32 %v7204_v29, 0.0  ;;  %v7206_v35 = vadd.f32 %v13664_v12, %v7066_v59  ;;  %v6776_v10 = vpop.f32.mrb[112].mxu0  ;;  %v5206_v52 = vpop.f32.mrb[113].mxu1 }
 0x4eb   : > { %v7587_v22 = vadd.f32 %v7459_v15, %v7331_v17  ;;  %v7333_v19 = vmax.f32 %v7205_v20, 0.0  ;;  %v8931_v14 = vadd.f32 %v6776_v10, %v5204_v45  ;;  %v6778_v33 = vpop.f32.mrb[113].mxu0  ;;  %v5208_v43 = vpop.f32.mrb[114].mxu1 }
 0x4ec   : > { %v7588_v41 = vadd.f32 %v7460_v31, %v7332_v16  ;;  %v7334_v49 = vmax.f32 %v7206_v35, 0.0  ;;  %v8932_v27 = vadd.f32 %v6778_v33, %v5206_v52  ;;  %v6780_v40 = vpop.f32.mrb[114].mxu0  ;;  %v5210_v50 = vpop.f32.mrb[115].mxu1  ;;  %v7467_v31 = vld [vmem:[%s10225_s17 + $0x3a0] sm:$0xff] }
 0x4ed   : > { %7715 = vst [vmem:[%s13688_s29 + $0x360] sm:$0xff] %v7587_v22  ;;  %v7589_v26 = vadd.f32 %v7461_v34, %v7333_v19  ;;  %v7067_v55 = vmul.f32 %v8931_v14, %v13658_v38  ;;  %v8933_v56 = vadd.f32 %v6780_v40, %v5208_v43  ;;  %v6782_v46 = vpop.f32.mrb[115].mxu0  ;;  %v7468_v34 = vld [vmem:[%s10225_s17 + $0x3a8] sm:$0xff]  ;;  %v7469_v22 = vld [vmem:[%s10225_s17 + $0x3b0] sm:$0xff] }
 0x4ee   : > { %7716 = vst [vmem:[%s13688_s29 + $0x368] sm:$0xff] %v7588_v41  ;;  %v7590_v9 = vadd.f32 %v7462_v48, %v7334_v49  ;;  %v7068_v37 = vmul.f32 %v8932_v27, %v13660_v3  ;;  %v8934_v25 = vadd.f32 %v6782_v46, %v5210_v50  ;;  %v7470_v41 = vld [vmem:[%s10225_s17 + $0x3b8] sm:$0xff] }
 0x4ef   : > { %7717 = vst [vmem:[%s13688_s29 + $0x370] sm:$0xff] %v7589_v26  ;;  %v7207_v7 = vadd.f32 %v13662_v5, %v7067_v55  ;;  %v7069_v60 = vmul.f32 %v8933_v56, %v13658_v38 }
 0x4f0   : > { %7718 = vst [vmem:[%s13688_s29 + $0x378] sm:$0xff] %v7590_v9  ;;  %v7208_v62 = vadd.f32 %v13664_v12, %v7068_v37  ;;  %v7070_v1 = vmul.f32 %v8934_v25, %v13660_v3 }
 0x4f1   : > { %v7335_v57 = vmax.f32 %v7207_v7, 0.0  ;;  %v7209_v8 = vadd.f32 %v13662_v5, %v7069_v60  ;;  %v5214_v42 = vpop.f32.mrb[116].mxu1 }
 0x4f2   : > { %v7336_v54 = vmax.f32 %v7208_v62, 0.0  ;;  %v7210_v30 = vadd.f32 %v13664_v12, %v7070_v1  ;;  %v6786_v4 = vpop.f32.mrb[116].mxu0  ;;  %v5216_v2 = vpop.f32.mrb[117].mxu1 }
 0x4f3   : > { %v7591_v63 = vadd.f32 %v7463_v18, %v7335_v57  ;;  %v7337_v6 = vmax.f32 %v7209_v8, 0.0  ;;  %v8935_v11 = vadd.f32 %v6786_v4, %v5214_v42  ;;  %v6788_v58 = vpop.f32.mrb[117].mxu0  ;;  %v5218_v21 = vpop.f32.mrb[118].mxu1 }
 0x4f4   : > { %v7592_v44 = vadd.f32 %v7464_v53, %v7336_v54  ;;  %v7338_v0 = vmax.f32 %v7210_v30, 0.0  ;;  %v8936_v24 = vadd.f32 %v6788_v58, %v5216_v2  ;;  %v6790_v47 = vpop.f32.mrb[118].mxu0  ;;  %v5220_v28 = vpop.f32.mrb[119].mxu1  ;;  %v7471_v53 = vld [vmem:[%s10225_s17 + $0x3c0] sm:$0xff] }
 0x4f5   : > { %7719 = vst [vmem:[%s13688_s29 + $0x380] sm:$0xff] %v7591_v63  ;;  %v7593_v13 = vadd.f32 %v7465_v61, %v7337_v6  ;;  %v7071_v23 = vmul.f32 %v8935_v11, %v13658_v38  ;;  %v8937_v39 = vadd.f32 %v6790_v47, %v5218_v21  ;;  %v6792_v51 = vpop.f32.mrb[119].mxu0  ;;  %v7472_v61 = vld [vmem:[%s10225_s17 + $0x3c8] sm:$0xff]  ;;  %v7473_v63 = vld [vmem:[%s10225_s17 + $0x3d0] sm:$0xff] }
 0x4f6   : > { %7720 = vst [vmem:[%s13688_s29 + $0x388] sm:$0xff] %v7592_v44  ;;  %v7594_v32 = vadd.f32 %v7466_v36, %v7338_v0  ;;  %v7072_v15 = vmul.f32 %v8936_v24, %v13660_v3  ;;  %v8938_v29 = vadd.f32 %v6792_v51, %v5220_v28  ;;  %v7474_v44 = vld [vmem:[%s10225_s17 + $0x3d8] sm:$0xff] }
 0x4f7   : > { %7721 = vst [vmem:[%s13688_s29 + $0x390] sm:$0xff] %v7593_v13  ;;  %v7211_v59 = vadd.f32 %v13662_v5, %v7071_v23  ;;  %v7073_v17 = vmul.f32 %v8937_v39, %v13658_v38 }
 0x4f8   : > { %7722 = vst [vmem:[%s13688_s29 + $0x398] sm:$0xff] %v7594_v32  ;;  %v7212_v20 = vadd.f32 %v13664_v12, %v7072_v15  ;;  %v7074_v45 = vmul.f32 %v8938_v29, %v13660_v3 }
 0x4f9   : > { %v7339_v16 = vmax.f32 %v7211_v59, 0.0  ;;  %v7213_v35 = vadd.f32 %v13662_v5, %v7073_v17  ;;  %v5224_v10 = vpop.f32.mrb[120].mxu1 }
 0x4fa   : > { %v7340_v52 = vmax.f32 %v7212_v20, 0.0  ;;  %v7214_v19 = vadd.f32 %v13664_v12, %v7074_v45  ;;  %v6796_v48 = vpop.f32.mrb[120].mxu0  ;;  %v5226_v14 = vpop.f32.mrb[121].mxu1 }
 0x4fb   : > { %v7595_v33 = vadd.f32 %v7467_v31, %v7339_v16  ;;  %v7341_v43 = vmax.f32 %v7213_v35, 0.0  ;;  %v8939_v49 = vadd.f32 %v6796_v48, %v5224_v10  ;;  %v6798_v27 = vpop.f32.mrb[121].mxu0  ;;  %v5228_v40 = vpop.f32.mrb[122].mxu1 }
 0x4fc   : > { %v7596_v50 = vadd.f32 %v7468_v34, %v7340_v52  ;;  %v7342_v26 = vmax.f32 %v7214_v19, 0.0  ;;  %v8940_v55 = vadd.f32 %v6798_v27, %v5226_v14  ;;  %v6800_v56 = vpop.f32.mrb[122].mxu0  ;;  %v5230_v46 = vpop.f32.mrb[123].mxu1  ;;  %v7475_v34 = vld [vmem:[%s10225_s17 + $0x3e0] sm:$0xff]  ;;  %v7477_v14 = vld [vmem:[%s10225_s17 + $0x3f0] sm:$0xff] }
 0x4fd   : > { %7723 = vst [vmem:[%s13688_s29 + $0x3a0] sm:$0xff] %v7595_v33  ;;  %v7597_v9 = vadd.f32 %v7469_v22, %v7341_v43  ;;  %v7075_v37 = vmul.f32 %v8939_v49, %v13658_v38  ;;  %v8941_v25 = vadd.f32 %v6800_v56, %v5228_v40  ;;  %v6802_v7 = vpop.f32.mrb[123].mxu0  ;;  %v7476_v22 = vld [vmem:[%s10225_s17 + $0x3e8] sm:$0xff] }
 0x4fe   : > { %7724 = vst [vmem:[%s13688_s29 + $0x3a8] sm:$0xff] %v7596_v50  ;;  %v7598_v60 = vadd.f32 %v7470_v41, %v7342_v26  ;;  %v7076_v18 = vmul.f32 %v8940_v55, %v13660_v3  ;;  %v8942_v62 = vadd.f32 %v6802_v7, %v5230_v46  ;;  %v7478_v41 = vld [vmem:[%s10225_s17 + $0x3f8] sm:$0xff] }
 0x4ff   : > { %7725 = vst [vmem:[%s13688_s29 + $0x3b0] sm:$0xff] %v7597_v9  ;;  %v7215_v1 = vadd.f32 %v13662_v5, %v7075_v37  ;;  %v7077_v57 = vmul.f32 %v8941_v25, %v13658_v38 }
 0x500   : > { %7726 = vst [vmem:[%s13688_s29 + $0x3b8] sm:$0xff] %v7598_v60  ;;  %v7216_v8 = vadd.f32 %v13664_v12, %v7076_v18  ;;  %v7078_v42 = vmul.f32 %v8942_v62, %v13660_v3 }
 0x501   : > { %v7343_v54 = vmax.f32 %v7215_v1, 0.0  ;;  %v7217_v30 = vadd.f32 %v13662_v5, %v7077_v57  ;;  %v5234_v4 = vpop.f32.mrb[124].mxu1 }
 0x502   : > { %v7344_v2 = vmax.f32 %v7216_v8, 0.0  ;;  %v7218_v6 = vadd.f32 %v13664_v12, %v7078_v42  ;;  %v6806_v36 = vpop.f32.mrb[124].mxu0  ;;  %v5236_v11 = vpop.f32.mrb[125].mxu1 }
 0x503   : > { %v7599_v58 = vadd.f32 %v7471_v53, %v7343_v54  ;;  %v7345_v21 = vmax.f32 %v7217_v30, 0.0  ;;  %v8943_v0 = vadd.f32 %v6806_v36, %v5234_v4  ;;  %v6808_v24 = vpop.f32.mrb[125].mxu0  ;;  %v5238_v47 = vpop.f32.mrb[126].mxu1 }
 0x504   : > { %v7600_v28 = vadd.f32 %v7472_v61, %v7344_v2  ;;  %v7346_v13 = vmax.f32 %v7218_v6, 0.0  ;;  %v8944_v23 = vadd.f32 %v6808_v24, %v5236_v11  ;;  %v6810_v39 = vpop.f32.mrb[126].mxu0  ;;  %v5240_v51 = vpop.f32.mrb[127].mxu1 }
 0x505   : > { %7727 = vst [vmem:[%s13688_s29 + $0x3c0] sm:$0xff] %v7599_v58  ;;  %v7601_v32 = vadd.f32 %v7473_v63, %v7345_v21  ;;  %v7079_v15 = vmul.f32 %v8943_v0, %v13658_v38  ;;  %v8945_v29 = vadd.f32 %v6810_v39, %v5238_v47  ;;  %v6812_v59 = vpop.f32.mrb[127].mxu0 }
 0x506   : > { %7728 = vst [vmem:[%s13688_s29 + $0x3c8] sm:$0xff] %v7600_v28  ;;  %v7602_v17 = vadd.f32 %v7474_v44, %v7346_v13  ;;  %v7080_v31 = vmul.f32 %v8944_v23, %v13660_v3  ;;  %v8946_v20 = vadd.f32 %v6812_v59, %v5240_v51 }
 0x507   : > { %7729 = vst [vmem:[%s13688_s29 + $0x3d0] sm:$0xff] %v7601_v32  ;;  %v7219_v45 = vadd.f32 %v13662_v5, %v7079_v15  ;;  %v7081_v16 = vmul.f32 %v8945_v29, %v13658_v38 }
 0x508   : > { %7730 = vst [vmem:[%s13688_s29 + $0x3d8] sm:$0xff] %v7602_v17  ;;  %v7220_v35 = vadd.f32 %v13664_v12, %v7080_v31  ;;  %v7082_v10 = vmul.f32 %v8946_v20, %v13660_v3 }
 0x509   : > { %v7347_v52 = vmax.f32 %v7219_v45, 0.0  ;;  %v7221_v19 = vadd.f32 %v13662_v5, %v7081_v16 }
 0x50a   : > { %v7348_v48 = vmax.f32 %v7220_v35, 0.0  ;;  %v7222_v33 = vadd.f32 %v13664_v12, %v7082_v10 }
 0x50b   : > { %v7603_v38 = vadd.f32 %v7475_v34, %v7347_v52  ;;  %v7349_v43 = vmax.f32 %v7221_v19, 0.0 }
 0x50c   : > { %v7604_v49 = vadd.f32 %v7476_v22, %v7348_v48  ;;  %v7350_v3 = vmax.f32 %v7222_v33, 0.0 }
 0x50d   : > { %7731 = vst [vmem:[%s13688_s29 + $0x3e0] sm:$0xff] %v7603_v38  ;;  %v7605_v27 = vadd.f32 %v7477_v14, %v7349_v43 }
 0x50e   : > { %7732 = vst [vmem:[%s13688_s29 + $0x3e8] sm:$0xff] %v7604_v49  ;;  %v7606_v5 = vadd.f32 %v7478_v41, %v7350_v3 }
 0x50f   : > { %7733 = vst [vmem:[%s13688_s29 + $0x3f0] sm:$0xff] %v7605_v27 }
 0x510   : > { %7734 = vst [vmem:[%s13688_s29 + $0x3f8] sm:$0xff] %v7606_v5 }
 0x511   : > { %9918 = shalt.err (!%p9915_p3)
}
 0x512   : > { %s9919_s6 = scalar_lea.hbm %s14218_s12, 16384  ;;  %s9923_s15 = scalar_lea.hbm %s14272_s5, 32768 }
 0x513   : > { %p9920_p11 = scmp.ne.s32.totalorder %s14218_s12, %s9919_s6  ;;  %p9924_p10 = scmp.lt.u32.totalorder %s14218_s12, %s14272_s5 }
 0x514   : > { %p9925_p13 = scmp.lt.u32.totalorder %s9923_s15, %s9919_s6  ;;  %p9927_p7 = scmp.lt.u32.totalorder %s9919_s6, %s14218_s12 }
 0x515   : > { %p9921_p9 = pnand %p9920_p11, %p15687_p12 }
 0x516   : > { %p9926_p5 = por %p9925_p13, %p9924_p10 }
 0x517   : > { %p9922_p8 = pneg %p9921_p9 }
 0x518   : > { %p9928_p2 = por %p9927_p7, %p9926_p5 }
 0x51a   : > { %p9929_p6 = pnand %p9928_p2, %p9922_p8 }
 0x51c   : > { %9932 = shalt.err (!%p9929_p6)
}
 0x51d   : > { %s9991_s14 = smov 256   ;;  %s9992_s29 = smov 16  }
 0x51e   : > { %9467 = dma.vmem_to_hbm [thread:$0]  (%p15687_p12), %s14220_s10, 16384, %s14218_s12, %s7736_s13, %s9991_s14, %s9991_s14, %s9992_s29  }
 0x51f PF: > { %s7764_s16 = sand.u32 1, %s9967_s18   ;;  %p15688_p0 = scmp.ne.s32.totalorder %s14727_s9, 0 }
 0x520   : > { %p15689_p4 = scmp.ge.s32.totalorder %s9979_s21, 2  ;;  %s7765_s0 = scalar_lea.sflag [#allocation5], %s7764_s16 }
 0x522   : > { %p9481_p1 = pnand %p15689_p4, %p15688_p0 }
 0x524   : > { %9962 = dma.done.wait (!%p9481_p1), %s7765_s0, 16384  }
 0x525   : > { %9964 = vsyncadd (!%p9481_p1), %s7765_s0, 4294950912  ;;  %p19_p3 = scmp.ge.s32.totalorder %s10044_s22, 4   ;;  %s15690_s18 = smov %s9971_s19 }
 0x526   : > { %s15691_s19 = smov %s9975_s20  ;;  %s15692_s20 = smov %s10053_s25 }
 0x527   : > { %s15693_s21 = smov %s10044_s22  ;;  %21 = sbr.rel (!%p19_p3) target bundleno = 9 (0x9), region = 102 }
 0x52e   :  { %7770 = vsyncpa [#allocation4], 1 }
 0x52f   :  { %7772 = vsyncpa [#allocation4 + $0x1], 1 }
 0x530   :  { %7773 = vsyncpa [#allocation7], 1 }
 0x531   :  { %7774 = vsyncpa [#allocation5], 1 }
 0x532   :  { %7776 = vsyncpa [#allocation5 + $0x1], 1 }

</bundles_post_ra>
